<compile_context>
chip_gen: v7x
topology: tpu7x:2x2x1
jax: 0.10.0
libtpu: 0.0.40
codegen_flags: <defaults>
</compile_context>

<pallas_src>
import functools
import math

import jax
import jax.numpy as jnp
from jax import lax
from jax.experimental import pallas as pl
from jax.experimental.pallas import tpu as pltpu

N_HEADS = 8          # ProbAttention(8, input_dim, hidden_dim)
LANE = 128
BIG_DEMAND = 1e9     # demand assigned to padded (non-existent) nodes -> always masked
NEG_MASK = -1e30     # finite "-inf": exp underflows to exactly 0, but never produces NaN rows


# ----------------------------------------------------------------------------------
# Single kernel: in-kernel context projections + the whole greedy decode loop
# ----------------------------------------------------------------------------------
def _decode_kernel(ctxT_ref, w_allT_ref, dem_ref, inp0_ref, pool0_ref, cap0_ref,
                   wxq_ref, wpool_ref, wcq_ref, ehT_ref,
                   p_out_ref, act_ref, logp_ref,
                   k1t_scr, vt_scr, k2t_scr,
                   *, n_steps, n_real, cap_value, dim, heads):
    f32 = jnp.float32
    B, Np = dem_ref.shape
    D, H = dim, heads
    neg = f32(NEG_MASK)
    norm1 = f32(1.0 / math.sqrt(D / H))     # Attention1: 1/sqrt(head_dim)
    norm2 = f32(1.0 / math.sqrt(D))         # ProbAttention: 1/sqrt(hidden_dim)
    lane = lax.broadcasted_iota(jnp.int32, (B, Np), 1)

    # ---- one-time in-kernel context projections, node axis lane-dense (B, D, Np) ----
    #   [K1^T | V^T | K2^T]  with Attention1.fc already folded into K2^T
    w_allT = w_allT_ref[...]                                       # (3D, D)
    for b in range(B):                                             # static unroll, runs once
        pj = jnp.dot(w_allT, ctxT_ref[b], preferred_element_type=f32)   # (3D, Np)
        k1t_scr[b] = pj[:D]
        vt_scr[b] = pj[D:2 * D]
        k2t_scr[b] = pj[2 * D:3 * D]

    ehT = ehT_ref[...]                                             # (H, D) head-selector one-hot
    wxq = wxq_ref[...]
    wpool = wpool_ref[...]
    wcq = wcq_ref[...]
    dem = dem_ref[...]

    # ---- prologue: mirrors the Decoder1.forward init + the i==0 update_mask(index=0) call ----
    cap0 = cap0_ref[...]
    over0 = (dem > cap0).astype(f32)
    mask0 = jnp.where(lane == 0, 0.0, jnp.clip(over0, 0.0, 1.0))
    carry0 = (inp0_ref[...], pool0_ref[...], cap0, mask0, jnp.zeros((B, Np), f32))

    def step_body(step, carry):
        inp, pool_cur, cap, mask, mask1 = carry
        k1t = k1t_scr[...]
        vt = vt_scr[...]
        k2t = k2t_scr[...]

        # decoder_input = fc([_input, cap]); pool = fc1(pool); decoder_input += pool
        # Attention1.w folded offline -> this directly yields q = decoder_input @ att_w.
        sp = jnp.dot(pool_cur, wpool, preferred_element_type=f32)  # (B, 2D) = [fc1(pool)@att_w | fc1(pool)]
        pool_new = sp[:, D:]
        q = jnp.dot(inp, wxq, preferred_element_type=f32) + sp[:, :D] + cap * wcq     # (B, D)

        # ---- Attention1: 8 heads, node axis in lanes -> lane-dense softmax ----
        qh = q[:, None, :] * ehT[None, :, :]                                          # (B, H, D)
        compat = norm1 * jnp.einsum('bhd,bdn->bhn', qh, k1t,
                                    preferred_element_type=f32)                       # (B, H, Np)
        compat = jnp.where(mask[:, None, :] != 0.0, neg, compat)
        scores = jax.nn.softmax(compat, axis=-1)
        mhaH = jnp.einsum('bhn,bdn->bhd', scores, vt,
                          preferred_element_type=f32) * ehT[None, :, :]               # (B, H, D)

        # ---- ProbAttention scoring on the MXU (Attention1.fc folded into K2^T):
        #      sum_h (mhaH_h @ K2^T) == mha @ K2^T, keeps free dims on both einsum operands ----
        compat2 = norm2 * jnp.sum(
            jnp.einsum('bhd,bdn->bhn', mhaH, k2t, preferred_element_type=f32), axis=1)  # (B, Np)
        u = jnp.where(mask != 0.0, neg, jnp.tanh(compat2) * 10.0)
        p = jax.nn.softmax(u, axis=-1)
        p_out_ref[step] = p

        # ---- greedy action (first argmax) + NaN-safe masked log-prob ----
        mx = jnp.max(p, axis=-1, keepdims=True)                                       # (B, 1)
        idx = jnp.min(jnp.where(p >= mx, lane.astype(f32), f32(Np)),
                      axis=-1, keepdims=True).astype(jnp.int32)                       # (B, 1)
        onehot = (lane == idx).astype(f32)
        served = jnp.sum(mask1, axis=-1, keepdims=True)                               # depot lane always 0
        is_done = served >= f32(n_real - 1)
        log_p = jnp.where(is_done, 0.0, jnp.log(mx))
        act_ref[step] = idx
        logp_ref[step] = log_p

        # ---- update_state ----
        # TODO(synk): update_state / update_mask are not defined in the provided module; standard
        # CVRP bookkeeping (depot refill, visited / over-capacity masking, depot re-entry rule) is
        # implemented here and mirrored exactly by the host-side reference below.
        sel_dem = jnp.sum(onehot * dem, axis=-1, keepdims=True)
        at_depot = idx == 0
        new_cap = jnp.where(at_depot, f32(cap_value), cap - sel_dem)

        # ---- update_mask ----
        mask1_n = jnp.maximum(mask1, onehot)
        mask1_n = jnp.where(lane == 0, 0.0, mask1_n)                                  # depot re-enterable
        over = (dem > new_cap).astype(f32)                                            # padded nodes stay masked
        mask_n = jnp.clip(mask1_n + over, 0.0, 1.0)
        all_served = jnp.sum(mask1_n, axis=-1, keepdims=True) >= f32(n_real - 1)
        depot_block = jnp.logical_and(
            at_depot, jnp.logical_and(step > 0, jnp.logical_not(all_served)))
        mask_n = jnp.where(lane == 0, jnp.where(depot_block, 1.0, 0.0), mask_n)

        # ---- next decoder input: one-hot gather from the resident ctx^T ----
        inp_new = jnp.sum(onehot[:, None, :] * ctxT_ref[...], axis=-1)                # (B, D)
        return inp_new, pool_new, new_cap, mask_n, mask1_n

    lax.fori_loop(0, n_steps, step_body, carry0, unroll=True)


@functools.partial(jax.jit, static_argnames=("cap_value", "n_steps"))
def greedy_decode(params, encoder_inputs, pool, demand, cap_value, n_steps):
    """Decoder1.forward(greedy=True, _action=False). Returns (actions, log_p, per-step probs)."""
    B, N, D = encoder_inputs.shape
    H = N_HEADS
    Np = ((N + LANE - 1) // LANE) * LANE
    f32 = jnp.float32

    ctx = encoder_inputs.astype(f32)
    ctx_pad = jnp.pad(ctx, ((0, 0), (0, Np - N), (0, 0)))
    ctxT = jnp.transpose(ctx_pad, (0, 2, 1))                                          # (B, D, Np)
    dem_pad = jnp.pad(demand.astype(f32), ((0, 0), (0, Np - N)), constant_values=BIG_DEMAND)

    # ---- static weight folds (once, outside the kernel) ----
    #   Attention1.w folded into the decoder-state projections; Attention1.fc folded into K2.
    w_all = jnp.concatenate([params['att_k'], params['att_v'],
                             params['prob_k'] @ params['att_fc'].T], axis=1)          # (D, 3D)
    w_allT = w_all.T                                                                  # (3D, D)
    wxq = params['fc_wx'] @ params['att_w']                                           # (D, D)
    wpool = jnp.concatenate([params['fc1_w'] @ params['att_w'], params['fc1_w']], axis=1)  # (D, 2D)
    wcq = params['fc_wc'] @ params['att_w']                                           # (1, D)
    hd = D // H
    ehT = (jnp.arange(H)[:, None] == (jnp.arange(D)[None, :] // hd)).astype(f32)      # (H, D)
    inp0 = ctx[:, 0, :]
    cap0 = jnp.full((B, 1), cap_value, f32)

    kernel = functools.partial(_decode_kernel, n_steps=n_steps, n_real=N,
                               cap_value=float(cap_value), dim=D, heads=H)

    # Single invocation (grid=(1,)): the whole decode loop runs in-kernel, so there is no per-step
    # grid/pipeline overhead and all loop-invariant tensors stay resident in VMEM.
    p_all, act_raw, logp_raw = pl.pallas_call(
        kernel,
        out_shape=(jax.ShapeDtypeStruct((n_steps, B, Np), f32),
                   jax.ShapeDtypeStruct((n_steps, B, 1), jnp.int32),
                   jax.ShapeDtypeStruct((n_steps, B, 1), f32)),
        grid_spec=pltpu.PrefetchScalarGridSpec(
            num_scalar_prefetch=0,
            grid=(1,),
            in_specs=[
                pl.BlockSpec((B, D, Np), lambda i: (0, 0, 0)),      # ctx^T
                pl.BlockSpec((3 * D, D), lambda i: (0, 0)),         # fused ctx-projection weight^T
                pl.BlockSpec((B, Np), lambda i: (0, 0)),            # demands (padded = BIG_DEMAND)
                pl.BlockSpec((B, D), lambda i: (0, 0)),             # _input @ step 0
                pl.BlockSpec((B, D), lambda i: (0, 0)),             # pool @ step 0
                pl.BlockSpec((B, 1), lambda i: (0, 0)),             # capacity @ step 0
                pl.BlockSpec((D, D), lambda i: (0, 0)),             # wxq
                pl.BlockSpec((D, 2 * D), lambda i: (0, 0)),         # wpool
                pl.BlockSpec((1, D), lambda i: (0, 0)),             # wcq
                pl.BlockSpec((H, D), lambda i: (0, 0)),             # head selector
            ],
            out_specs=(
                pl.BlockSpec((n_steps, B, Np), lambda i: (0, 0, 0)),   # per-step probs (lane-dense)
                pl.BlockSpec((n_steps, B, 1), lambda i: (0, 0, 0)),    # greedy actions
                pl.BlockSpec((n_steps, B, 1), lambda i: (0, 0, 0)),    # per-step masked log-probs
            ),
            scratch_shapes=[
                pltpu.VMEM((B, D, Np), f32),   # K1^T
                pltpu.VMEM((B, D, Np), f32),   # V^T
                pltpu.VMEM((B, D, Np), f32),   # K2^T (Attention1.fc folded)
            ]),
        compiler_params=pltpu.CompilerParams(dimension_semantics=("arbitrary",)),
    )(ctxT, w_allT, dem_pad, inp0, pool.astype(f32), cap0, wxq, wpool, wcq, ehT)

    actions = jnp.transpose(act_raw[:, :, 0])           # (B, n_steps)
    log_p = jnp.sum(logp_raw[:, :, 0], axis=0)          # (B,)
    return actions, log_p, p_all[:, :, :N]


# ----------------------------------------------------------------------------------
# Pure-JAX reference (correctness checking only)
# ----------------------------------------------------------------------------------
def prob_ref(params, dec_input, ctx, mask):
    B, N, D = ctx.shape
    H, hd = N_HEADS, ctx.shape[-1] // N_HEADS
    q = (dec_input @ params['att_w']).reshape(B, H, hd)
    K1 = (ctx @ params['att_k']).reshape(B, N, H, hd)
    V1 = (ctx @ params['att_v']).reshape(B, N, H, hd)
    compat = (1.0 / math.sqrt(D / H)) * jnp.einsum('bhd,bnhd->bhn', q, K1)
    compat = jnp.where(mask[:, None, :] != 0, -jnp.inf, compat)
    sc = jax.nn.softmax(compat, axis=-1)
    out = jnp.einsum('bhn,bnhd->bhd', sc, V1).reshape(B, D)
    x = out @ params['att_fc']
    K2 = ctx @ params['prob_k']
    c2 = (1.0 / math.sqrt(D)) * jnp.einsum('bd,bnd->bn', x, K2)
    u = jnp.where(mask != 0, -jnp.inf, jnp.tanh(c2) * 10.0)
    return jax.nn.softmax(u, axis=-1)


def update_state_ref(demands, dyn_cap, index, capacity_val):
    sel = jnp.take_along_axis(demands, index, axis=1)
    new_cap = dyn_cap - sel
    return jnp.where(index == 0, jnp.float32(capacity_val), new_cap)


def update_mask_ref(demands, dyn_cap, index, mask1, step):
    B, N = demands.shape
    visited = jax.nn.one_hot(index[:, 0], N, dtype=mask1.dtype)
    mask1 = jnp.maximum(mask1, visited)
    mask1 = mask1.at[:, 0].set(0.0)
    over = (demands > dyn_cap).astype(mask1.dtype)
    mask = jnp.clip(mask1 + over, 0.0, 1.0)
    all_served = jnp.sum(mask1[:, 1:], axis=1) >= (N - 1)
    at_depot = index[:, 0] == 0
    depot_block = at_depot & (step > 0) & (~all_served)
    mask = mask.at[:, 0].set(jnp.where(depot_block, 1.0, 0.0))
    return mask, mask1


# ----------------------------------------------------------------------------------
# Parameter init (orthogonal, matching INIT=True) and demo / check
# ----------------------------------------------------------------------------------
def make_orthogonal(key, rows, cols):
    n = max(rows, cols)
    a = jax.random.normal(key, (n, n), jnp.float32)
    q, r = jnp.linalg.qr(a)
    q = q * jnp.sign(jnp.diagonal(r))[None, :]
    return q[:rows, :cols]


def init_params(key, D):
    ks = jax.random.split(key, 7)
    fc_full = make_orthogonal(ks[0], D + 1, D)   # Decoder1.fc: Linear(hidden+1, hidden), transposed
    return dict(
        fc_wx=fc_full[:D, :], fc_wc=fc_full[D:, :],
        fc1_w=make_orthogonal(ks[1], D, D),       # Decoder1.fc1
        att_w=make_orthogonal(ks[2], D, D),       # Attention1.w (cat=1)
        att_k=make_orthogonal(ks[3], D, D),       # Attention1.k
        att_v=make_orthogonal(ks[4], D, D),       # Attention1.v
        att_fc=make_orthogonal(ks[5], D, D),      # Attention1.fc
        prob_k=make_orthogonal(ks[6], D, D),      # ProbAttention.k
    )


if __name__ == "__main__":
    B, N, D = 8, 21, 32       # n_nodes = 21 (module global); B multiple of 8 fills sublanes
    n_steps = 6
    cap_val = 1.0

    root = jax.random.PRNGKey(0)
    k_p, k_enc, k_pool, k_dem = jax.random.split(root, 4)
    params = init_params(k_p, D)
    enc = jax.random.normal(k_enc, (B, N, D), jnp.float32) * 0.3
    pool = jax.random.normal(k_pool, (B, D), jnp.float32) * 0.3
    demand = jax.random.uniform(k_dem, (B, N), jnp.float32, 0.05, 0.35).at[:, 0].set(0.0)

    # TODO(synk): the original loop `break`s once every customer is served; here a fixed n_steps is
    # run and log-probs of post-done steps are gated to zero (identical returned log_p).
    actions, log_p, p_steps = greedy_decode(params, enc, pool, demand, cap_val, n_steps)
    jax.block_until_ready((actions, log_p, p_steps))

    # ---- pure-JAX reference, replaying the kernel's greedy actions step by step ----
    mask1 = jnp.zeros((B, N), jnp.float32)
    dyn_cap = jnp.full((B, 1), cap_val, jnp.float32)
    pool_r = pool
    _input = enc[:, 0, :]
    mask, mask1 = update_mask_ref(demand, dyn_cap, jnp.zeros((B, 1), jnp.int32), mask1, 0)
    logp_sum_ref = jnp.zeros((B,), jnp.float32)
    batch_ix = jnp.arange(B)
    for i in range(n_steps):
        pool_r = pool_r @ params['fc1_w']
        dec = _input @ params['fc_wx'] + dyn_cap * params['fc_wc'] + pool_r
        p_ref = prob_ref(params, dec, enc, mask)
        assert jnp.allclose(p_steps[i], p_ref, atol=5e-3), f"prob mismatch at step {i}"
        a = actions[:, i]
        p_sel = p_ref[batch_ix, a]
        assert bool(jnp.all(p_sel >= jnp.max(p_ref, axis=1) - 1e-3)), f"non-greedy action at step {i}"
        is_done = (jnp.sum(mask1[:, 1:], axis=1) >= (N - 1)).astype(jnp.float32)
        logp_sum_ref = logp_sum_ref + jnp.log(p_sel) * (1.0 - is_done)
        dyn_cap = update_state_ref(demand, dyn_cap, a[:, None], cap_val)
        mask, mask1 = update_mask_ref(demand, dyn_cap, a[:, None], mask1, i)
        _input = enc[batch_ix, a]

    assert jnp.allclose(log_p, logp_sum_ref, atol=5e-2), "log-prob mismatch"
    print("KERNEL_OK")
</pallas_src>

<mosaic_0001>
module attributes {stable_mosaic.version = 11 : i64} {
  func.func @_decode_kernel(%arg0: i32, %arg1: memref<8x32x128xf32, #tpu.memory_space<vmem>>, %arg2: memref<96x32xf32, #tpu.memory_space<vmem>>, %arg3: memref<8x128xf32, #tpu.memory_space<vmem>>, %arg4: memref<8x32xf32, #tpu.memory_space<vmem>>, %arg5: memref<8x32xf32, #tpu.memory_space<vmem>>, %arg6: memref<8x1xf32, #tpu.memory_space<vmem>>, %arg7: memref<32x32xf32, #tpu.memory_space<vmem>>, %arg8: memref<32x64xf32, #tpu.memory_space<vmem>>, %arg9: memref<1x32xf32, #tpu.memory_space<vmem>>, %arg10: memref<8x32xf32, #tpu.memory_space<vmem>>, %arg11: memref<6x8x128xf32, #tpu.memory_space<vmem>>, %arg12: memref<6x8x1xi32, #tpu.memory_space<vmem>>, %arg13: memref<6x8x1xf32, #tpu.memory_space<vmem>>, %arg14: memref<8x32x128xf32, #tpu.memory_space<vmem>>, %arg15: memref<8x32x128xf32, #tpu.memory_space<vmem>>, %arg16: memref<8x32x128xf32, #tpu.memory_space<vmem>>) attributes {dimension_semantics = [#tpu.dimension_semantics<arbitrary>], iteration_bounds = array<i64: 1>, scalar_prefetch = 0 : i64, scratch_operands = 3 : i64, tpu.core_type = #tpu.core_type<tc>, window_params = [{pipeline_mode = #tpu.pipeline_mode<synchronous>, transform_indices = @transform_0, window_bounds = array<i64: 8, 32, 128>}, {pipeline_mode = #tpu.pipeline_mode<synchronous>, transform_indices = @transform_1, window_bounds = array<i64: 96, 32>}, {pipeline_mode = #tpu.pipeline_mode<synchronous>, transform_indices = @transform_2, window_bounds = array<i64: 8, 128>}, {pipeline_mode = #tpu.pipeline_mode<synchronous>, transform_indices = @transform_3, window_bounds = array<i64: 8, 32>}, {pipeline_mode = #tpu.pipeline_mode<synchronous>, transform_indices = @transform_4, window_bounds = array<i64: 8, 32>}, {pipeline_mode = #tpu.pipeline_mode<synchronous>, transform_indices = @transform_5, window_bounds = array<i64: 8, 1>}, {pipeline_mode = #tpu.pipeline_mode<synchronous>, transform_indices = @transform_6, window_bounds = array<i64: 32, 32>}, {pipeline_mode = #tpu.pipeline_mode<synchronous>, transform_indices = @transform_7, window_bounds = array<i64: 32, 64>}, {pipeline_mode = #tpu.pipeline_mode<synchronous>, transform_indices = @transform_8, window_bounds = array<i64: 1, 32>}, {pipeline_mode = #tpu.pipeline_mode<synchronous>, transform_indices = @transform_9, window_bounds = array<i64: 8, 32>}, {pipeline_mode = #tpu.pipeline_mode<synchronous>, transform_indices = @transform_10, window_bounds = array<i64: 6, 8, 128>}, {pipeline_mode = #tpu.pipeline_mode<synchronous>, transform_indices = @transform_11, window_bounds = array<i64: 6, 8, 1>}, {pipeline_mode = #tpu.pipeline_mode<synchronous>, transform_indices = @transform_12, window_bounds = array<i64: 6, 8, 1>}]} {
    %0 = tpu.iota {dimensions = array<i32: 1>} : vector<8x128xi32>
    %c0 = arith.constant 0 : index
    %c0_0 = arith.constant 0 : index
    %1 = vector.load %arg2[%c0, %c0_0] : memref<96x32xf32, #tpu.memory_space<vmem>>, vector<96x32xf32>
    %c0_1 = arith.constant 0 : index
    %c0_2 = arith.constant 0 : index
    %c0_3 = arith.constant 0 : index
    %2 = vector.load %arg1[%c0_1, %c0_2, %c0_3] : memref<8x32x128xf32, #tpu.memory_space<vmem>>, vector<1x32x128xf32>
    %3 = vector.shape_cast %2 : vector<1x32x128xf32> to vector<32x128xf32>
    %cst = arith.constant dense<0.000000e+00> : vector<96x128xf32>
    %4 = tpu.matmul %1, %3, %cst {dimension_numbers = #tpu.dot_dimension_numbers<[1], [0], [0], [1], [0, 0, 1, 1], [], []>} : vector<96x32xf32>, vector<32x128xf32>, vector<96x128xf32> -> vector<96x128xf32>
    %5 = vector.extract_strided_slice %4 {offsets = [0, 0], sizes = [32, 128], strides = [1, 1]} : vector<96x128xf32> to vector<32x128xf32>
    %c0_4 = arith.constant 0 : index
    %c0_5 = arith.constant 0 : index
    %c0_6 = arith.constant 0 : index
    %6 = vector.load %arg14[%c0_4, %c0_5, %c0_6] : memref<8x32x128xf32, #tpu.memory_space<vmem>>, vector<1x32x128xf32>
    %7 = vector.shape_cast %6 : vector<1x32x128xf32> to vector<32x128xf32>
    %8 = vector.shape_cast %5 : vector<32x128xf32> to vector<1x32x128xf32>
    tpu.vector_store %arg14[%c0_4, %c0_5, %c0_6], %8 {strides = array<i32>} : memref<8x32x128xf32, #tpu.memory_space<vmem>>, vector<1x32x128xf32>,
    %9 = vector.extract_strided_slice %4 {offsets = [32, 0], sizes = [32, 128], strides = [1, 1]} : vector<96x128xf32> to vector<32x128xf32>
    %c0_7 = arith.constant 0 : index
    %c0_8 = arith.constant 0 : index
    %c0_9 = arith.constant 0 : index
    %10 = vector.load %arg15[%c0_7, %c0_8, %c0_9] : memref<8x32x128xf32, #tpu.memory_space<vmem>>, vector<1x32x128xf32>
    %11 = vector.shape_cast %10 : vector<1x32x128xf32> to vector<32x128xf32>
    %12 = vector.shape_cast %9 : vector<32x128xf32> to vector<1x32x128xf32>
    tpu.vector_store %arg15[%c0_7, %c0_8, %c0_9], %12 {strides = array<i32>} : memref<8x32x128xf32, #tpu.memory_space<vmem>>, vector<1x32x128xf32>,
    %13 = vector.extract_strided_slice %4 {offsets = [64, 0], sizes = [32, 128], strides = [1, 1]} : vector<96x128xf32> to vector<32x128xf32>
    %c0_10 = arith.constant 0 : index
    %c0_11 = arith.constant 0 : index
    %c0_12 = arith.constant 0 : index
    %14 = vector.load %arg16[%c0_10, %c0_11, %c0_12] : memref<8x32x128xf32, #tpu.memory_space<vmem>>, vector<1x32x128xf32>
    %15 = vector.shape_cast %14 : vector<1x32x128xf32> to vector<32x128xf32>
    %16 = vector.shape_cast %13 : vector<32x128xf32> to vector<1x32x128xf32>
    tpu.vector_store %arg16[%c0_10, %c0_11, %c0_12], %16 {strides = array<i32>} : memref<8x32x128xf32, #tpu.memory_space<vmem>>, vector<1x32x128xf32>,
    %c1 = arith.constant 1 : index
    %c0_13 = arith.constant 0 : index
    %c0_14 = arith.constant 0 : index
    %17 = vector.load %arg1[%c1, %c0_13, %c0_14] : memref<8x32x128xf32, #tpu.memory_space<vmem>>, vector<1x32x128xf32>
    %18 = vector.shape_cast %17 : vector<1x32x128xf32> to vector<32x128xf32>
    %cst_15 = arith.constant dense<0.000000e+00> : vector<96x128xf32>
    %19 = tpu.matmul %1, %18, %cst_15 {dimension_numbers = #tpu.dot_dimension_numbers<[1], [0], [0], [1], [0, 0, 1, 1], [], []>} : vector<96x32xf32>, vector<32x128xf32>, vector<96x128xf32> -> vector<96x128xf32>
    %20 = vector.extract_strided_slice %19 {offsets = [0, 0], sizes = [32, 128], strides = [1, 1]} : vector<96x128xf32> to vector<32x128xf32>
    %c1_16 = arith.constant 1 : index
    %c0_17 = arith.constant 0 : index
    %c0_18 = arith.constant 0 : index
    %21 = vector.load %arg14[%c1_16, %c0_17, %c0_18] : memref<8x32x128xf32, #tpu.memory_space<vmem>>, vector<1x32x128xf32>
    %22 = vector.shape_cast %21 : vector<1x32x128xf32> to vector<32x128xf32>
    %23 = vector.shape_cast %20 : vector<32x128xf32> to vector<1x32x128xf32>
    tpu.vector_store %arg14[%c1_16, %c0_17, %c0_18], %23 {strides = array<i32>} : memref<8x32x128xf32, #tpu.memory_space<vmem>>, vector<1x32x128xf32>,
    %24 = vector.extract_strided_slice %19 {offsets = [32, 0], sizes = [32, 128], strides = [1, 1]} : vector<96x128xf32> to vector<32x128xf32>
    %c1_19 = arith.constant 1 : index
    %c0_20 = arith.constant 0 : index
    %c0_21 = arith.constant 0 : index
    %25 = vector.load %arg15[%c1_19, %c0_20, %c0_21] : memref<8x32x128xf32, #tpu.memory_space<vmem>>, vector<1x32x128xf32>
    %26 = vector.shape_cast %25 : vector<1x32x128xf32> to vector<32x128xf32>
    %27 = vector.shape_cast %24 : vector<32x128xf32> to vector<1x32x128xf32>
    tpu.vector_store %arg15[%c1_19, %c0_20, %c0_21], %27 {strides = array<i32>} : memref<8x32x128xf32, #tpu.memory_space<vmem>>, vector<1x32x128xf32>,
    %28 = vector.extract_strided_slice %19 {offsets = [64, 0], sizes = [32, 128], strides = [1, 1]} : vector<96x128xf32> to vector<32x128xf32>
    %c1_22 = arith.constant 1 : index
    %c0_23 = arith.constant 0 : index
    %c0_24 = arith.constant 0 : index
    %29 = vector.load %arg16[%c1_22, %c0_23, %c0_24] : memref<8x32x128xf32, #tpu.memory_space<vmem>>, vector<1x32x128xf32>
    %30 = vector.shape_cast %29 : vector<1x32x128xf32> to vector<32x128xf32>
    %31 = vector.shape_cast %28 : vector<32x128xf32> to vector<1x32x128xf32>
    tpu.vector_store %arg16[%c1_22, %c0_23, %c0_24], %31 {strides = array<i32>} : memref<8x32x128xf32, #tpu.memory_space<vmem>>, vector<1x32x128xf32>,
    %c2 = arith.constant 2 : index
    %c0_25 = arith.constant 0 : index
    %c0_26 = arith.constant 0 : index
    %32 = vector.load %arg1[%c2, %c0_25, %c0_26] : memref<8x32x128xf32, #tpu.memory_space<vmem>>, vector<1x32x128xf32>
    %33 = vector.shape_cast %32 : vector<1x32x128xf32> to vector<32x128xf32>
    %cst_27 = arith.constant dense<0.000000e+00> : vector<96x128xf32>
    %34 = tpu.matmul %1, %33, %cst_27 {dimension_numbers = #tpu.dot_dimension_numbers<[1], [0], [0], [1], [0, 0, 1, 1], [], []>} : vector<96x32xf32>, vector<32x128xf32>, vector<96x128xf32> -> vector<96x128xf32>
    %35 = vector.extract_strided_slice %34 {offsets = [0, 0], sizes = [32, 128], strides = [1, 1]} : vector<96x128xf32> to vector<32x128xf32>
    %c2_28 = arith.constant 2 : index
    %c0_29 = arith.constant 0 : index
    %c0_30 = arith.constant 0 : index
    %36 = vector.load %arg14[%c2_28, %c0_29, %c0_30] : memref<8x32x128xf32, #tpu.memory_space<vmem>>, vector<1x32x128xf32>
    %37 = vector.shape_cast %36 : vector<1x32x128xf32> to vector<32x128xf32>
    %38 = vector.shape_cast %35 : vector<32x128xf32> to vector<1x32x128xf32>
    tpu.vector_store %arg14[%c2_28, %c0_29, %c0_30], %38 {strides = array<i32>} : memref<8x32x128xf32, #tpu.memory_space<vmem>>, vector<1x32x128xf32>,
    %39 = vector.extract_strided_slice %34 {offsets = [32, 0], sizes = [32, 128], strides = [1, 1]} : vector<96x128xf32> to vector<32x128xf32>
    %c2_31 = arith.constant 2 : index
    %c0_32 = arith.constant 0 : index
    %c0_33 = arith.constant 0 : index
    %40 = vector.load %arg15[%c2_31, %c0_32, %c0_33] : memref<8x32x128xf32, #tpu.memory_space<vmem>>, vector<1x32x128xf32>
    %41 = vector.shape_cast %40 : vector<1x32x128xf32> to vector<32x128xf32>
    %42 = vector.shape_cast %39 : vector<32x128xf32> to vector<1x32x128xf32>
    tpu.vector_store %arg15[%c2_31, %c0_32, %c0_33], %42 {strides = array<i32>} : memref<8x32x128xf32, #tpu.memory_space<vmem>>, vector<1x32x128xf32>,
    %43 = vector.extract_strided_slice %34 {offsets = [64, 0], sizes = [32, 128], strides = [1, 1]} : vector<96x128xf32> to vector<32x128xf32>
    %c2_34 = arith.constant 2 : index
    %c0_35 = arith.constant 0 : index
    %c0_36 = arith.constant 0 : index
    %44 = vector.load %arg16[%c2_34, %c0_35, %c0_36] : memref<8x32x128xf32, #tpu.memory_space<vmem>>, vector<1x32x128xf32>
    %45 = vector.shape_cast %44 : vector<1x32x128xf32> to vector<32x128xf32>
    %46 = vector.shape_cast %43 : vector<32x128xf32> to vector<1x32x128xf32>
    tpu.vector_store %arg16[%c2_34, %c0_35, %c0_36], %46 {strides = array<i32>} : memref<8x32x128xf32, #tpu.memory_space<vmem>>, vector<1x32x128xf32>,
    %c3 = arith.constant 3 : index
    %c0_37 = arith.constant 0 : index
    %c0_38 = arith.constant 0 : index
    %47 = vector.load %arg1[%c3, %c0_37, %c0_38] : memref<8x32x128xf32, #tpu.memory_space<vmem>>, vector<1x32x128xf32>
    %48 = vector.shape_cast %47 : vector<1x32x128xf32> to vector<32x128xf32>
    %cst_39 = arith.constant dense<0.000000e+00> : vector<96x128xf32>
    %49 = tpu.matmul %1, %48, %cst_39 {dimension_numbers = #tpu.dot_dimension_numbers<[1], [0], [0], [1], [0, 0, 1, 1], [], []>} : vector<96x32xf32>, vector<32x128xf32>, vector<96x128xf32> -> vector<96x128xf32>
    %50 = vector.extract_strided_slice %49 {offsets = [0, 0], sizes = [32, 128], strides = [1, 1]} : vector<96x128xf32> to vector<32x128xf32>
    %c3_40 = arith.constant 3 : index
    %c0_41 = arith.constant 0 : index
    %c0_42 = arith.constant 0 : index
    %51 = vector.load %arg14[%c3_40, %c0_41, %c0_42] : memref<8x32x128xf32, #tpu.memory_space<vmem>>, vector<1x32x128xf32>
    %52 = vector.shape_cast %51 : vector<1x32x128xf32> to vector<32x128xf32>
    %53 = vector.shape_cast %50 : vector<32x128xf32> to vector<1x32x128xf32>
    tpu.vector_store %arg14[%c3_40, %c0_41, %c0_42], %53 {strides = array<i32>} : memref<8x32x128xf32, #tpu.memory_space<vmem>>, vector<1x32x128xf32>,
    %54 = vector.extract_strided_slice %49 {offsets = [32, 0], sizes = [32, 128], strides = [1, 1]} : vector<96x128xf32> to vector<32x128xf32>
    %c3_43 = arith.constant 3 : index
    %c0_44 = arith.constant 0 : index
    %c0_45 = arith.constant 0 : index
    %55 = vector.load %arg15[%c3_43, %c0_44, %c0_45] : memref<8x32x128xf32, #tpu.memory_space<vmem>>, vector<1x32x128xf32>
    %56 = vector.shape_cast %55 : vector<1x32x128xf32> to vector<32x128xf32>
    %57 = vector.shape_cast %54 : vector<32x128xf32> to vector<1x32x128xf32>
    tpu.vector_store %arg15[%c3_43, %c0_44, %c0_45], %57 {strides = array<i32>} : memref<8x32x128xf32, #tpu.memory_space<vmem>>, vector<1x32x128xf32>,
    %58 = vector.extract_strided_slice %49 {offsets = [64, 0], sizes = [32, 128], strides = [1, 1]} : vector<96x128xf32> to vector<32x128xf32>
    %c3_46 = arith.constant 3 : index
    %c0_47 = arith.constant 0 : index
    %c0_48 = arith.constant 0 : index
    %59 = vector.load %arg16[%c3_46, %c0_47, %c0_48] : memref<8x32x128xf32, #tpu.memory_space<vmem>>, vector<1x32x128xf32>
    %60 = vector.shape_cast %59 : vector<1x32x128xf32> to vector<32x128xf32>
    %61 = vector.shape_cast %58 : vector<32x128xf32> to vector<1x32x128xf32>
    tpu.vector_store %arg16[%c3_46, %c0_47, %c0_48], %61 {strides = array<i32>} : memref<8x32x128xf32, #tpu.memory_space<vmem>>, vector<1x32x128xf32>,
    %c4 = arith.constant 4 : index
    %c0_49 = arith.constant 0 : index
    %c0_50 = arith.constant 0 : index
    %62 = vector.load %arg1[%c4, %c0_49, %c0_50] : memref<8x32x128xf32, #tpu.memory_space<vmem>>, vector<1x32x128xf32>
    %63 = vector.shape_cast %62 : vector<1x32x128xf32> to vector<32x128xf32>
    %cst_51 = arith.constant dense<0.000000e+00> : vector<96x128xf32>
    %64 = tpu.matmul %1, %63, %cst_51 {dimension_numbers = #tpu.dot_dimension_numbers<[1], [0], [0], [1], [0, 0, 1, 1], [], []>} : vector<96x32xf32>, vector<32x128xf32>, vector<96x128xf32> -> vector<96x128xf32>
    %65 = vector.extract_strided_slice %64 {offsets = [0, 0], sizes = [32, 128], strides = [1, 1]} : vector<96x128xf32> to vector<32x128xf32>
    %c4_52 = arith.constant 4 : index
    %c0_53 = arith.constant 0 : index
    %c0_54 = arith.constant 0 : index
    %66 = vector.load %arg14[%c4_52, %c0_53, %c0_54] : memref<8x32x128xf32, #tpu.memory_space<vmem>>, vector<1x32x128xf32>
    %67 = vector.shape_cast %66 : vector<1x32x128xf32> to vector<32x128xf32>
    %68 = vector.shape_cast %65 : vector<32x128xf32> to vector<1x32x128xf32>
    tpu.vector_store %arg14[%c4_52, %c0_53, %c0_54], %68 {strides = array<i32>} : memref<8x32x128xf32, #tpu.memory_space<vmem>>, vector<1x32x128xf32>,
    %69 = vector.extract_strided_slice %64 {offsets = [32, 0], sizes = [32, 128], strides = [1, 1]} : vector<96x128xf32> to vector<32x128xf32>
    %c4_55 = arith.constant 4 : index
    %c0_56 = arith.constant 0 : index
    %c0_57 = arith.constant 0 : index
    %70 = vector.load %arg15[%c4_55, %c0_56, %c0_57] : memref<8x32x128xf32, #tpu.memory_space<vmem>>, vector<1x32x128xf32>
    %71 = vector.shape_cast %70 : vector<1x32x128xf32> to vector<32x128xf32>
    %72 = vector.shape_cast %69 : vector<32x128xf32> to vector<1x32x128xf32>
    tpu.vector_store %arg15[%c4_55, %c0_56, %c0_57], %72 {strides = array<i32>} : memref<8x32x128xf32, #tpu.memory_space<vmem>>, vector<1x32x128xf32>,
    %73 = vector.extract_strided_slice %64 {offsets = [64, 0], sizes = [32, 128], strides = [1, 1]} : vector<96x128xf32> to vector<32x128xf32>
    %c4_58 = arith.constant 4 : index
    %c0_59 = arith.constant 0 : index
    %c0_60 = arith.constant 0 : index
    %74 = vector.load %arg16[%c4_58, %c0_59, %c0_60] : memref<8x32x128xf32, #tpu.memory_space<vmem>>, vector<1x32x128xf32>
    %75 = vector.shape_cast %74 : vector<1x32x128xf32> to vector<32x128xf32>
    %76 = vector.shape_cast %73 : vector<32x128xf32> to vector<1x32x128xf32>
    tpu.vector_store %arg16[%c4_58, %c0_59, %c0_60], %76 {strides = array<i32>} : memref<8x32x128xf32, #tpu.memory_space<vmem>>, vector<1x32x128xf32>,
    %c5 = arith.constant 5 : index
    %c0_61 = arith.constant 0 : index
    %c0_62 = arith.constant 0 : index
    %77 = vector.load %arg1[%c5, %c0_61, %c0_62] : memref<8x32x128xf32, #tpu.memory_space<vmem>>, vector<1x32x128xf32>
    %78 = vector.shape_cast %77 : vector<1x32x128xf32> to vector<32x128xf32>
    %cst_63 = arith.constant dense<0.000000e+00> : vector<96x128xf32>
    %79 = tpu.matmul %1, %78, %cst_63 {dimension_numbers = #tpu.dot_dimension_numbers<[1], [0], [0], [1], [0, 0, 1, 1], [], []>} : vector<96x32xf32>, vector<32x128xf32>, vector<96x128xf32> -> vector<96x128xf32>
    %80 = vector.extract_strided_slice %79 {offsets = [0, 0], sizes = [32, 128], strides = [1, 1]} : vector<96x128xf32> to vector<32x128xf32>
    %c5_64 = arith.constant 5 : index
    %c0_65 = arith.constant 0 : index
    %c0_66 = arith.constant 0 : index
    %81 = vector.load %arg14[%c5_64, %c0_65, %c0_66] : memref<8x32x128xf32, #tpu.memory_space<vmem>>, vector<1x32x128xf32>
    %82 = vector.shape_cast %81 : vector<1x32x128xf32> to vector<32x128xf32>
    %83 = vector.shape_cast %80 : vector<32x128xf32> to vector<1x32x128xf32>
    tpu.vector_store %arg14[%c5_64, %c0_65, %c0_66], %83 {strides = array<i32>} : memref<8x32x128xf32, #tpu.memory_space<vmem>>, vector<1x32x128xf32>,
    %84 = vector.extract_strided_slice %79 {offsets = [32, 0], sizes = [32, 128], strides = [1, 1]} : vector<96x128xf32> to vector<32x128xf32>
    %c5_67 = arith.constant 5 : index
    %c0_68 = arith.constant 0 : index
    %c0_69 = arith.constant 0 : index
    %85 = vector.load %arg15[%c5_67, %c0_68, %c0_69] : memref<8x32x128xf32, #tpu.memory_space<vmem>>, vector<1x32x128xf32>
    %86 = vector.shape_cast %85 : vector<1x32x128xf32> to vector<32x128xf32>
    %87 = vector.shape_cast %84 : vector<32x128xf32> to vector<1x32x128xf32>
    tpu.vector_store %arg15[%c5_67, %c0_68, %c0_69], %87 {strides = array<i32>} : memref<8x32x128xf32, #tpu.memory_space<vmem>>, vector<1x32x128xf32>,
    %88 = vector.extract_strided_slice %79 {offsets = [64, 0], sizes = [32, 128], strides = [1, 1]} : vector<96x128xf32> to vector<32x128xf32>
    %c5_70 = arith.constant 5 : index
    %c0_71 = arith.constant 0 : index
    %c0_72 = arith.constant 0 : index
    %89 = vector.load %arg16[%c5_70, %c0_71, %c0_72] : memref<8x32x128xf32, #tpu.memory_space<vmem>>, vector<1x32x128xf32>
    %90 = vector.shape_cast %89 : vector<1x32x128xf32> to vector<32x128xf32>
    %91 = vector.shape_cast %88 : vector<32x128xf32> to vector<1x32x128xf32>
    tpu.vector_store %arg16[%c5_70, %c0_71, %c0_72], %91 {strides = array<i32>} : memref<8x32x128xf32, #tpu.memory_space<vmem>>, vector<1x32x128xf32>,
    %c6 = arith.constant 6 : index
    %c0_73 = arith.constant 0 : index
    %c0_74 = arith.constant 0 : index
    %92 = vector.load %arg1[%c6, %c0_73, %c0_74] : memref<8x32x128xf32, #tpu.memory_space<vmem>>, vector<1x32x128xf32>
    %93 = vector.shape_cast %92 : vector<1x32x128xf32> to vector<32x128xf32>
    %cst_75 = arith.constant dense<0.000000e+00> : vector<96x128xf32>
    %94 = tpu.matmul %1, %93, %cst_75 {dimension_numbers = #tpu.dot_dimension_numbers<[1], [0], [0], [1], [0, 0, 1, 1], [], []>} : vector<96x32xf32>, vector<32x128xf32>, vector<96x128xf32> -> vector<96x128xf32>
    %95 = vector.extract_strided_slice %94 {offsets = [0, 0], sizes = [32, 128], strides = [1, 1]} : vector<96x128xf32> to vector<32x128xf32>
    %c6_76 = arith.constant 6 : index
    %c0_77 = arith.constant 0 : index
    %c0_78 = arith.constant 0 : index
    %96 = vector.load %arg14[%c6_76, %c0_77, %c0_78] : memref<8x32x128xf32, #tpu.memory_space<vmem>>, vector<1x32x128xf32>
    %97 = vector.shape_cast %96 : vector<1x32x128xf32> to vector<32x128xf32>
    %98 = vector.shape_cast %95 : vector<32x128xf32> to vector<1x32x128xf32>
    tpu.vector_store %arg14[%c6_76, %c0_77, %c0_78], %98 {strides = array<i32>} : memref<8x32x128xf32, #tpu.memory_space<vmem>>, vector<1x32x128xf32>,
    %99 = vector.extract_strided_slice %94 {offsets = [32, 0], sizes = [32, 128], strides = [1, 1]} : vector<96x128xf32> to vector<32x128xf32>
    %c6_79 = arith.constant 6 : index
    %c0_80 = arith.constant 0 : index
    %c0_81 = arith.constant 0 : index
    %100 = vector.load %arg15[%c6_79, %c0_80, %c0_81] : memref<8x32x128xf32, #tpu.memory_space<vmem>>, vector<1x32x128xf32>
    %101 = vector.shape_cast %100 : vector<1x32x128xf32> to vector<32x128xf32>
    %102 = vector.shape_cast %99 : vector<32x128xf32> to vector<1x32x128xf32>
    tpu.vector_store %arg15[%c6_79, %c0_80, %c0_81], %102 {strides = array<i32>} : memref<8x32x128xf32, #tpu.memory_space<vmem>>, vector<1x32x128xf32>,
    %103 = vector.extract_strided_slice %94 {offsets = [64, 0], sizes = [32, 128], strides = [1, 1]} : vector<96x128xf32> to vector<32x128xf32>
    %c6_82 = arith.constant 6 : index
    %c0_83 = arith.constant 0 : index
    %c0_84 = arith.constant 0 : index
    %104 = vector.load %arg16[%c6_82, %c0_83, %c0_84] : memref<8x32x128xf32, #tpu.memory_space<vmem>>, vector<1x32x128xf32>
    %105 = vector.shape_cast %104 : vector<1x32x128xf32> to vector<32x128xf32>
    %106 = vector.shape_cast %103 : vector<32x128xf32> to vector<1x32x128xf32>
    tpu.vector_store %arg16[%c6_82, %c0_83, %c0_84], %106 {strides = array<i32>} : memref<8x32x128xf32, #tpu.memory_space<vmem>>, vector<1x32x128xf32>,
    %c7 = arith.constant 7 : index
    %c0_85 = arith.constant 0 : index
    %c0_86 = arith.constant 0 : index
    %107 = vector.load %arg1[%c7, %c0_85, %c0_86] : memref<8x32x128xf32, #tpu.memory_space<vmem>>, vector<1x32x128xf32>
    %108 = vector.shape_cast %107 : vector<1x32x128xf32> to vector<32x128xf32>
    %cst_87 = arith.constant dense<0.000000e+00> : vector<96x128xf32>
    %109 = tpu.matmul %1, %108, %cst_87 {dimension_numbers = #tpu.dot_dimension_numbers<[1], [0], [0], [1], [0, 0, 1, 1], [], []>} : vector<96x32xf32>, vector<32x128xf32>, vector<96x128xf32> -> vector<96x128xf32>
    %110 = vector.extract_strided_slice %109 {offsets = [0, 0], sizes = [32, 128], strides = [1, 1]} : vector<96x128xf32> to vector<32x128xf32>
    %c7_88 = arith.constant 7 : index
    %c0_89 = arith.constant 0 : index
    %c0_90 = arith.constant 0 : index
    %111 = vector.load %arg14[%c7_88, %c0_89, %c0_90] : memref<8x32x128xf32, #tpu.memory_space<vmem>>, vector<1x32x128xf32>
    %112 = vector.shape_cast %111 : vector<1x32x128xf32> to vector<32x128xf32>
    %113 = vector.shape_cast %110 : vector<32x128xf32> to vector<1x32x128xf32>
    tpu.vector_store %arg14[%c7_88, %c0_89, %c0_90], %113 {strides = array<i32>} : memref<8x32x128xf32, #tpu.memory_space<vmem>>, vector<1x32x128xf32>,
    %114 = vector.extract_strided_slice %109 {offsets = [32, 0], sizes = [32, 128], strides = [1, 1]} : vector<96x128xf32> to vector<32x128xf32>
    %c7_91 = arith.constant 7 : index
    %c0_92 = arith.constant 0 : index
    %c0_93 = arith.constant 0 : index
    %115 = vector.load %arg15[%c7_91, %c0_92, %c0_93] : memref<8x32x128xf32, #tpu.memory_space<vmem>>, vector<1x32x128xf32>
    %116 = vector.shape_cast %115 : vector<1x32x128xf32> to vector<32x128xf32>
    %117 = vector.shape_cast %114 : vector<32x128xf32> to vector<1x32x128xf32>
    tpu.vector_store %arg15[%c7_91, %c0_92, %c0_93], %117 {strides = array<i32>} : memref<8x32x128xf32, #tpu.memory_space<vmem>>, vector<1x32x128xf32>,
    %118 = vector.extract_strided_slice %109 {offsets = [64, 0], sizes = [32, 128], strides = [1, 1]} : vector<96x128xf32> to vector<32x128xf32>
    %c7_94 = arith.constant 7 : index
    %c0_95 = arith.constant 0 : index
    %c0_96 = arith.constant 0 : index
    %119 = vector.load %arg16[%c7_94, %c0_95, %c0_96] : memref<8x32x128xf32, #tpu.memory_space<vmem>>, vector<1x32x128xf32>
    %120 = vector.shape_cast %119 : vector<1x32x128xf32> to vector<32x128xf32>
    %121 = vector.shape_cast %118 : vector<32x128xf32> to vector<1x32x128xf32>
    tpu.vector_store %arg16[%c7_94, %c0_95, %c0_96], %121 {strides = array<i32>} : memref<8x32x128xf32, #tpu.memory_space<vmem>>, vector<1x32x128xf32>,
    %c0_97 = arith.constant 0 : index
    %c0_98 = arith.constant 0 : index
    %122 = vector.load %arg10[%c0_97, %c0_98] : memref<8x32xf32, #tpu.memory_space<vmem>>, vector<8x32xf32>
    %c0_99 = arith.constant 0 : index
    %c0_100 = arith.constant 0 : index
    %123 = vector.load %arg7[%c0_99, %c0_100] : memref<32x32xf32, #tpu.memory_space<vmem>>, vector<32x32xf32>
    %c0_101 = arith.constant 0 : index
    %c0_102 = arith.constant 0 : index
    %124 = vector.load %arg8[%c0_101, %c0_102] : memref<32x64xf32, #tpu.memory_space<vmem>>, vector<32x64xf32>
    %c0_103 = arith.constant 0 : index
    %c0_104 = arith.constant 0 : index
    %125 = vector.load %arg9[%c0_103, %c0_104] : memref<1x32xf32, #tpu.memory_space<vmem>>, vector<1x32xf32>
    %c0_105 = arith.constant 0 : index
    %c0_106 = arith.constant 0 : index
    %126 = vector.load %arg3[%c0_105, %c0_106] : memref<8x128xf32, #tpu.memory_space<vmem>>, vector<8x128xf32>
    %c0_107 = arith.constant 0 : index
    %c0_108 = arith.constant 0 : index
    %127 = vector.load %arg6[%c0_107, %c0_108] : memref<8x1xf32, #tpu.memory_space<vmem>>, vector<8x1xf32>
    %128 = vector.broadcast %127 : vector<8x1xf32> to vector<8x128xf32>
    %129 = arith.cmpf ogt, %126, %128 : vector<8x128xf32>
    %130 = arith.extui %129 : vector<8x128xi1> to vector<8x128xi32>
    %131 = arith.sitofp %130 : vector<8x128xi32> to vector<8x128xf32>
    %c0_i32 = arith.constant 0 : i32
    %132 = vector.broadcast %c0_i32 : i32 to vector<8x128xi32>
    %133 = arith.cmpi eq, %0, %132 : vector<8x128xi32>
    %cst_109 = arith.constant 0.000000e+00 : f32
    %cst_110 = arith.constant 1.000000e+00 : f32
    %134 = vector.broadcast %cst_109 : f32 to vector<8x128xf32>
    %135 = arith.maximumf %134, %131 : vector<8x128xf32>
    %136 = vector.broadcast %cst_110 : f32 to vector<8x128xf32>
    %137 = arith.minimumf %136, %135 : vector<8x128xf32>
    %cst_111 = arith.constant 0.000000e+00 : f32
    %138 = vector.broadcast %cst_111 : f32 to vector<8x128xf32>
    %139 = arith.select %133, %138, %137 : vector<8x128xi1>, vector<8x128xf32>
    %c0_112 = arith.constant 0 : index
    %c0_113 = arith.constant 0 : index
    %140 = vector.load %arg4[%c0_112, %c0_113] : memref<8x32xf32, #tpu.memory_space<vmem>>, vector<8x32xf32>
    %c0_114 = arith.constant 0 : index
    %c0_115 = arith.constant 0 : index
    %141 = vector.load %arg5[%c0_114, %c0_115] : memref<8x32xf32, #tpu.memory_space<vmem>>, vector<8x32xf32>
    %cst_116 = arith.constant 0.000000e+00 : f32
    %142 = vector.broadcast %cst_116 : f32 to vector<8x128xf32>
    %cst_117 = arith.constant 5.000000e-01 : f32
    %cst_118 = arith.constant -1.000000e+30 : f32
    %cst_119 = arith.constant 0.176776692 : f32
    %c0_i32_120 = arith.constant 0 : i32
    %c0_121 = arith.constant 0 : index
    %c0_122 = arith.constant 0 : index
    %c0_123 = arith.constant 0 : index
    %143 = vector.load %arg14[%c0_121, %c0_122, %c0_123] : memref<8x32x128xf32, #tpu.memory_space<vmem>>, vector<8x32x128xf32>
    %c0_124 = arith.constant 0 : index
    %c0_125 = arith.constant 0 : index
    %c0_126 = arith.constant 0 : index
    %144 = vector.load %arg15[%c0_124, %c0_125, %c0_126] : memref<8x32x128xf32, #tpu.memory_space<vmem>>, vector<8x32x128xf32>
    %c0_127 = arith.constant 0 : index
    %c0_128 = arith.constant 0 : index
    %c0_129 = arith.constant 0 : index
    %145 = vector.load %arg16[%c0_127, %c0_128, %c0_129] : memref<8x32x128xf32, #tpu.memory_space<vmem>>, vector<8x32x128xf32>
    %cst_130 = arith.constant dense<0.000000e+00> : vector<8x64xf32>
    %146 = tpu.matmul %141, %124, %cst_130 {dimension_numbers = #tpu.dot_dimension_numbers<[1], [0], [0], [1], [0, 0, 1, 1], [], []>} : vector<8x32xf32>, vector<32x64xf32>, vector<8x64xf32> -> vector<8x64xf32>
    %147 = vector.extract_strided_slice %146 {offsets = [0, 32], sizes = [8, 32], strides = [1, 1]} : vector<8x64xf32> to vector<8x32xf32>
    %cst_131 = arith.constant dense<0.000000e+00> : vector<8x32xf32>
    %148 = tpu.matmul %140, %123, %cst_131 {dimension_numbers = #tpu.dot_dimension_numbers<[1], [0], [0], [1], [0, 0, 1, 1], [], []>} : vector<8x32xf32>, vector<32x32xf32>, vector<8x32xf32> -> vector<8x32xf32>
    %149 = vector.extract_strided_slice %146 {offsets = [0, 0], sizes = [8, 32], strides = [1, 1]} : vector<8x64xf32> to vector<8x32xf32>
    %150 = arith.addf %148, %149 : vector<8x32xf32>
    %151 = vector.broadcast %127 : vector<8x1xf32> to vector<8x32xf32>
    %152 = vector.broadcast %125 : vector<1x32xf32> to vector<8x32xf32>
    %153 = arith.mulf %151, %152 : vector<8x32xf32>
    %154 = arith.addf %150, %153 : vector<8x32xf32>
    %155 = vector.shape_cast %154 : vector<8x32xf32> to vector<8x1x32xf32>
    %156 = vector.shape_cast %122 : vector<8x32xf32> to vector<1x8x32xf32>
    %157 = vector.broadcast %155 : vector<8x1x32xf32> to vector<8x8x32xf32>
    %158 = vector.broadcast %156 : vector<1x8x32xf32> to vector<8x8x32xf32>
    %159 = arith.mulf %157, %158 : vector<8x8x32xf32>
    "tpu.trace_start"() <{level = 10 : i32, message = "bhd,bdn->bhn"}> : () -> ()
    %cst_132 = arith.constant dense<0.000000e+00> : vector<8x8x128xf32>
    %160 = tpu.matmul %159, %143, %cst_132 {dimension_numbers = #tpu.dot_dimension_numbers<[2], [1], [1], [2], [0, 0, 0, 1, 1, 2], [0], [0]>} : vector<8x8x32xf32>, vector<8x32x128xf32>, vector<8x8x128xf32> -> vector<8x8x128xf32>
    "tpu.trace_stop"() : () -> ()
    %161 = vector.broadcast %cst_117 : f32 to vector<8x8x128xf32>
    %162 = arith.mulf %161, %160 : vector<8x8x128xf32>
    %163 = vector.shape_cast %139 : vector<8x128xf32> to vector<8x1x128xf32>
    %cst_133 = arith.constant 0.000000e+00 : f32
    %164 = vector.broadcast %cst_133 : f32 to vector<8x1x128xf32>
    %165 = arith.cmpf one, %163, %164 : vector<8x1x128xf32>
    %166 = vector.shape_cast %165 : vector<8x1x128xi1> to vector<8x1x128xi1>
    %167 = vector.broadcast %166 : vector<8x1x128xi1> to vector<8x8x128xi1>
    %168 = vector.broadcast %cst_118 : f32 to vector<8x8x128xf32>
    %169 = arith.select %167, %168, %162 : vector<8x8x128xi1>, vector<8x8x128xf32>
    %cst_134 = arith.constant dense<0xFF800000> : vector<8x8xf32>
    %170 = vector.multi_reduction <maximumf>, %169, %cst_134 [2] : vector<8x8x128xf32> to vector<8x8xf32>
    %cst_135 = arith.constant 0xFF800000 : f32
    %171 = vector.broadcast %cst_135 : f32 to vector<8x8xf32>
    %172 = arith.maximumf %171, %170 : vector<8x8xf32>
    %173 = vector.shape_cast %172 : vector<8x8xf32> to vector<8x8x1xf32>
    %174 = vector.broadcast %173 : vector<8x8x1xf32> to vector<8x8x128xf32>
    %175 = arith.subf %169, %174 : vector<8x8x128xf32>
    %176 = math.exp %175 : vector<8x8x128xf32>
    %cst_136 = arith.constant dense<0.000000e+00> : vector<8x8xf32>
    %177 = vector.multi_reduction <add>, %176, %cst_136 [2] : vector<8x8x128xf32> to vector<8x8xf32>
    %178 = vector.shape_cast %177 : vector<8x8xf32> to vector<8x8x1xf32>
    %179 = vector.broadcast %178 : vector<8x8x1xf32> to vector<8x8x128xf32>
    %180 = arith.divf %176, %179 : vector<8x8x128xf32>
    "tpu.trace_start"() <{level = 10 : i32, message = "bhn,bdn->bhd"}> : () -> ()
    %cst_137 = arith.constant dense<0.000000e+00> : vector<8x8x32xf32>
    %181 = tpu.matmul %180, %144, %cst_137 {dimension_numbers = #tpu.dot_dimension_numbers<[2], [2], [1], [1], [0, 0, 0, 1, 1, 1], [0], [0]>} : vector<8x8x128xf32>, vector<8x32x128xf32>, vector<8x8x32xf32> -> vector<8x8x32xf32>
    "tpu.trace_stop"() : () -> ()
    %182 = vector.shape_cast %122 : vector<8x32xf32> to vector<1x8x32xf32>
    %183 = vector.broadcast %182 : vector<1x8x32xf32> to vector<8x8x32xf32>
    %184 = arith.mulf %181, %183 : vector<8x8x32xf32>
    "tpu.trace_start"() <{level = 10 : i32, message = "bhd,bdn->bhn"}> : () -> ()
    %cst_138 = arith.constant dense<0.000000e+00> : vector<8x8x128xf32>
    %185 = tpu.matmul %184, %145, %cst_138 {dimension_numbers = #tpu.dot_dimension_numbers<[2], [1], [1], [2], [0, 0, 0, 1, 1, 2], [0], [0]>} : vector<8x8x32xf32>, vector<8x32x128xf32>, vector<8x8x128xf32> -> vector<8x8x128xf32>
    "tpu.trace_stop"() : () -> ()
    %cst_139 = arith.constant dense<0.000000e+00> : vector<8x128xf32>
    %186 = vector.multi_reduction <add>, %185, %cst_139 [1] : vector<8x8x128xf32> to vector<8x128xf32>
    %187 = vector.broadcast %cst_119 : f32 to vector<8x128xf32>
    %188 = arith.mulf %187, %186 : vector<8x128xf32>
    %cst_140 = arith.constant 0.000000e+00 : f32
    %189 = vector.broadcast %cst_140 : f32 to vector<8x128xf32>
    %190 = arith.cmpf one, %139, %189 : vector<8x128xf32>
    %191 = math.tanh %188 : vector<8x128xf32>
    %cst_141 = arith.constant 1.000000e+01 : f32
    %192 = vector.broadcast %cst_141 : f32 to vector<8x128xf32>
    %193 = arith.mulf %191, %192 : vector<8x128xf32>
    %194 = vector.broadcast %cst_118 : f32 to vector<8x128xf32>
    %195 = arith.select %190, %194, %193 : vector<8x128xi1>, vector<8x128xf32>
    %cst_142 = arith.constant dense<0xFF800000> : vector<8xf32>
    %196 = vector.multi_reduction <maximumf>, %195, %cst_142 [1] : vector<8x128xf32> to vector<8xf32>
    %cst_143 = arith.constant 0xFF800000 : f32
    %197 = vector.broadcast %cst_143 : f32 to vector<8xf32>
    %198 = arith.maximumf %197, %196 : vector<8xf32>
    %199 = vector.shape_cast %198 : vector<8xf32> to vector<8x1xf32>
    %200 = vector.broadcast %199 : vector<8x1xf32> to vector<8x128xf32>
    %201 = arith.subf %195, %200 : vector<8x128xf32>
    %202 = math.exp %201 : vector<8x128xf32>
    %cst_144 = arith.constant dense<0.000000e+00> : vector<8xf32>
    %203 = vector.multi_reduction <add>, %202, %cst_144 [1] : vector<8x128xf32> to vector<8xf32>
    %204 = vector.shape_cast %203 : vector<8xf32> to vector<8x1xf32>
    %205 = vector.broadcast %204 : vector<8x1xf32> to vector<8x128xf32>
    %206 = arith.divf %202, %205 : vector<8x128xf32>
    %207 = arith.index_cast %c0_i32_120 : i32 to index
    %c0_145 = arith.constant 0 : index
    %c0_146 = arith.constant 0 : index
    %208 = vector.load %arg11[%207, %c0_145, %c0_146] : memref<6x8x128xf32, #tpu.memory_space<vmem>>, vector<1x8x128xf32>
    %209 = vector.shape_cast %208 : vector<1x8x128xf32> to vector<8x128xf32>
    %210 = vector.shape_cast %206 : vector<8x128xf32> to vector<1x8x128xf32>
    tpu.vector_store %arg11[%207, %c0_145, %c0_146], %210 {strides = array<i32>} : memref<6x8x128xf32, #tpu.memory_space<vmem>>, vector<1x8x128xf32>,
    %cst_147 = arith.constant dense<0xFF800000> : vector<8xf32>
    %211 = vector.multi_reduction <maximumf>, %206, %cst_147 [1] : vector<8x128xf32> to vector<8xf32>
    %212 = vector.shape_cast %211 : vector<8xf32> to vector<8x1xf32>
    %213 = vector.broadcast %212 : vector<8x1xf32> to vector<8x128xf32>
    %214 = arith.cmpf oge, %206, %213 : vector<8x128xf32>
    %215 = arith.sitofp %0 : vector<8x128xi32> to vector<8x128xf32>
    %cst_148 = arith.constant 1.280000e+02 : f32
    %216 = vector.broadcast %cst_148 : f32 to vector<8x128xf32>
    %217 = arith.select %214, %215, %216 : vector<8x128xi1>, vector<8x128xf32>
    %cst_149 = arith.constant dense<0x7F800000> : vector<8xf32>
    %218 = vector.multi_reduction <minimumf>, %217, %cst_149 [1] : vector<8x128xf32> to vector<8xf32>
    %219 = vector.shape_cast %218 : vector<8xf32> to vector<8x1xf32>
    %220 = arith.fptosi %219 : vector<8x1xf32> to vector<8x1xi32>
    %221 = vector.broadcast %220 : vector<8x1xi32> to vector<8x128xi32>
    %222 = arith.cmpi eq, %0, %221 : vector<8x128xi32>
    %223 = arith.extui %222 : vector<8x128xi1> to vector<8x128xi32>
    %224 = arith.sitofp %223 : vector<8x128xi32> to vector<8x128xf32>
    %cst_150 = arith.constant dense<0.000000e+00> : vector<8xf32>
    %225 = vector.multi_reduction <add>, %142, %cst_150 [1] : vector<8x128xf32> to vector<8xf32>
    %226 = vector.shape_cast %225 : vector<8xf32> to vector<8x1xf32>
    %cst_151 = arith.constant 2.000000e+01 : f32
    %227 = vector.broadcast %cst_151 : f32 to vector<8x1xf32>
    %228 = arith.cmpf oge, %226, %227 : vector<8x1xf32>
    %229 = math.log %212 : vector<8x1xf32>
    %cst_152 = arith.constant 0.000000e+00 : f32
    %230 = vector.broadcast %cst_152 : f32 to vector<8x1xf32>
    %231 = arith.select %228, %230, %229 : vector<8x1xi1>, vector<8x1xf32>
    %232 = arith.index_cast %c0_i32_120 : i32 to index
    %c0_153 = arith.constant 0 : index
    %c0_154 = arith.constant 0 : index
    %233 = vector.load %arg12[%232, %c0_153, %c0_154] : memref<6x8x1xi32, #tpu.memory_space<vmem>>, vector<1x8x1xi32>
    %234 = vector.shape_cast %233 : vector<1x8x1xi32> to vector<8x1xi32>
    %235 = vector.shape_cast %220 : vector<8x1xi32> to vector<1x8x1xi32>
    tpu.vector_store %arg12[%232, %c0_153, %c0_154], %235 {strides = array<i32>} : memref<6x8x1xi32, #tpu.memory_space<vmem>>, vector<1x8x1xi32>,
    %236 = arith.index_cast %c0_i32_120 : i32 to index
    %c0_155 = arith.constant 0 : index
    %c0_156 = arith.constant 0 : index
    %237 = vector.load %arg13[%236, %c0_155, %c0_156] : memref<6x8x1xf32, #tpu.memory_space<vmem>>, vector<1x8x1xf32>
    %238 = vector.shape_cast %237 : vector<1x8x1xf32> to vector<8x1xf32>
    %239 = vector.shape_cast %231 : vector<8x1xf32> to vector<1x8x1xf32>
    tpu.vector_store %arg13[%236, %c0_155, %c0_156], %239 {strides = array<i32>} : memref<6x8x1xf32, #tpu.memory_space<vmem>>, vector<1x8x1xf32>,
    %240 = arith.mulf %224, %126 : vector<8x128xf32>
    %cst_157 = arith.constant dense<0.000000e+00> : vector<8xf32>
    %241 = vector.multi_reduction <add>, %240, %cst_157 [1] : vector<8x128xf32> to vector<8xf32>
    %242 = vector.shape_cast %241 : vector<8xf32> to vector<8x1xf32>
    %c0_i32_158 = arith.constant 0 : i32
    %243 = vector.broadcast %c0_i32_158 : i32 to vector<8x1xi32>
    %244 = arith.cmpi eq, %220, %243 : vector<8x1xi32>
    %245 = arith.subf %127, %242 : vector<8x1xf32>
    %cst_159 = arith.constant 1.000000e+00 : f32
    %246 = vector.broadcast %cst_159 : f32 to vector<8x1xf32>
    %247 = arith.select %244, %246, %245 : vector<8x1xi1>, vector<8x1xf32>
    %248 = arith.maximumf %142, %224 : vector<8x128xf32>
    %c0_i32_160 = arith.constant 0 : i32
    %249 = vector.broadcast %c0_i32_160 : i32 to vector<8x128xi32>
    %250 = arith.cmpi eq, %0, %249 : vector<8x128xi32>
    %cst_161 = arith.constant 0.000000e+00 : f32
    %251 = vector.broadcast %cst_161 : f32 to vector<8x128xf32>
    %252 = arith.select %250, %251, %248 : vector<8x128xi1>, vector<8x128xf32>
    %253 = vector.broadcast %247 : vector<8x1xf32> to vector<8x128xf32>
    %254 = arith.cmpf ogt, %126, %253 : vector<8x128xf32>
    %255 = arith.extui %254 : vector<8x128xi1> to vector<8x128xi32>
    %256 = arith.sitofp %255 : vector<8x128xi32> to vector<8x128xf32>
    %257 = arith.addf %252, %256 : vector<8x128xf32>
    %cst_162 = arith.constant 0.000000e+00 : f32
    %cst_163 = arith.constant 1.000000e+00 : f32
    %258 = vector.broadcast %cst_162 : f32 to vector<8x128xf32>
    %259 = arith.maximumf %258, %257 : vector<8x128xf32>
    %260 = vector.broadcast %cst_163 : f32 to vector<8x128xf32>
    %261 = arith.minimumf %260, %259 : vector<8x128xf32>
    %cst_164 = arith.constant dense<0.000000e+00> : vector<8xf32>
    %262 = vector.multi_reduction <add>, %252, %cst_164 [1] : vector<8x128xf32> to vector<8xf32>
    %263 = vector.shape_cast %262 : vector<8xf32> to vector<8x1xf32>
    %cst_165 = arith.constant 2.000000e+01 : f32
    %264 = vector.broadcast %cst_165 : f32 to vector<8x1xf32>
    %265 = arith.cmpf oge, %263, %264 : vector<8x1xf32>
    %c0_i32_166 = arith.constant 0 : i32
    %266 = arith.cmpi sgt, %c0_i32_120, %c0_i32_166 : i32
    %cst_167 = arith.constant dense<true> : vector<8x1xi1>
    %267 = arith.xori %265, %cst_167 : vector<8x1xi1>
    %268 = vector.broadcast %266 : i1 to vector<8x1xi1>
    %269 = arith.andi %268, %267 : vector<8x1xi1>
    %270 = arith.andi %244, %269 : vector<8x1xi1>
    %c0_i32_168 = arith.constant 0 : i32
    %271 = vector.broadcast %c0_i32_168 : i32 to vector<8x128xi32>
    %272 = arith.cmpi eq, %0, %271 : vector<8x128xi32>
    %cst_169 = arith.constant 1.000000e+00 : f32
    %cst_170 = arith.constant 0.000000e+00 : f32
    %273 = vector.broadcast %cst_169 : f32 to vector<8x1xf32>
    %274 = vector.broadcast %cst_170 : f32 to vector<8x1xf32>
    %275 = arith.select %270, %273, %274 : vector<8x1xi1>, vector<8x1xf32>
    %276 = vector.shape_cast %275 : vector<8x1xf32> to vector<8x1xf32>
    %277 = vector.broadcast %276 : vector<8x1xf32> to vector<8x128xf32>
    %278 = arith.select %272, %277, %261 : vector<8x128xi1>, vector<8x128xf32>
    %279 = vector.shape_cast %224 : vector<8x128xf32> to vector<8x1x128xf32>
    %c0_171 = arith.constant 0 : index
    %c0_172 = arith.constant 0 : index
    %c0_173 = arith.constant 0 : index
    %280 = vector.load %arg1[%c0_171, %c0_172, %c0_173] : memref<8x32x128xf32, #tpu.memory_space<vmem>>, vector<8x32x128xf32>
    %281 = vector.broadcast %279 : vector<8x1x128xf32> to vector<8x32x128xf32>
    %282 = arith.mulf %281, %280 : vector<8x32x128xf32>
    %cst_174 = arith.constant dense<0.000000e+00> : vector<8x32xf32>
    %283 = vector.multi_reduction <add>, %282, %cst_174 [2] : vector<8x32x128xf32> to vector<8x32xf32>
    %c1_i32 = arith.constant 1 : i32
    %c0_175 = arith.constant 0 : index
    %c0_176 = arith.constant 0 : index
    %c0_177 = arith.constant 0 : index
    %284 = vector.load %arg14[%c0_175, %c0_176, %c0_177] : memref<8x32x128xf32, #tpu.memory_space<vmem>>, vector<8x32x128xf32>
    %c0_178 = arith.constant 0 : index
    %c0_179 = arith.constant 0 : index
    %c0_180 = arith.constant 0 : index
    %285 = vector.load %arg15[%c0_178, %c0_179, %c0_180] : memref<8x32x128xf32, #tpu.memory_space<vmem>>, vector<8x32x128xf32>
    %c0_181 = arith.constant 0 : index
    %c0_182 = arith.constant 0 : index
    %c0_183 = arith.constant 0 : index
    %286 = vector.load %arg16[%c0_181, %c0_182, %c0_183] : memref<8x32x128xf32, #tpu.memory_space<vmem>>, vector<8x32x128xf32>
    %cst_184 = arith.constant dense<0.000000e+00> : vector<8x64xf32>
    %287 = tpu.matmul %147, %124, %cst_184 {dimension_numbers = #tpu.dot_dimension_numbers<[1], [0], [0], [1], [0, 0, 1, 1], [], []>} : vector<8x32xf32>, vector<32x64xf32>, vector<8x64xf32> -> vector<8x64xf32>
    %288 = vector.extract_strided_slice %287 {offsets = [0, 32], sizes = [8, 32], strides = [1, 1]} : vector<8x64xf32> to vector<8x32xf32>
    %cst_185 = arith.constant dense<0.000000e+00> : vector<8x32xf32>
    %289 = tpu.matmul %283, %123, %cst_185 {dimension_numbers = #tpu.dot_dimension_numbers<[1], [0], [0], [1], [0, 0, 1, 1], [], []>} : vector<8x32xf32>, vector<32x32xf32>, vector<8x32xf32> -> vector<8x32xf32>
    %290 = vector.extract_strided_slice %287 {offsets = [0, 0], sizes = [8, 32], strides = [1, 1]} : vector<8x64xf32> to vector<8x32xf32>
    %291 = arith.addf %289, %290 : vector<8x32xf32>
    %292 = vector.broadcast %247 : vector<8x1xf32> to vector<8x32xf32>
    %293 = vector.broadcast %125 : vector<1x32xf32> to vector<8x32xf32>
    %294 = arith.mulf %292, %293 : vector<8x32xf32>
    %295 = arith.addf %291, %294 : vector<8x32xf32>
    %296 = vector.shape_cast %295 : vector<8x32xf32> to vector<8x1x32xf32>
    %297 = vector.shape_cast %122 : vector<8x32xf32> to vector<1x8x32xf32>
    %298 = vector.broadcast %296 : vector<8x1x32xf32> to vector<8x8x32xf32>
    %299 = vector.broadcast %297 : vector<1x8x32xf32> to vector<8x8x32xf32>
    %300 = arith.mulf %298, %299 : vector<8x8x32xf32>
    "tpu.trace_start"() <{level = 10 : i32, message = "bhd,bdn->bhn"}> : () -> ()
    %cst_186 = arith.constant dense<0.000000e+00> : vector<8x8x128xf32>
    %301 = tpu.matmul %300, %284, %cst_186 {dimension_numbers = #tpu.dot_dimension_numbers<[2], [1], [1], [2], [0, 0, 0, 1, 1, 2], [0], [0]>} : vector<8x8x32xf32>, vector<8x32x128xf32>, vector<8x8x128xf32> -> vector<8x8x128xf32>
    "tpu.trace_stop"() : () -> ()
    %302 = vector.broadcast %cst_117 : f32 to vector<8x8x128xf32>
    %303 = arith.mulf %302, %301 : vector<8x8x128xf32>
    %304 = vector.shape_cast %278 : vector<8x128xf32> to vector<8x1x128xf32>
    %cst_187 = arith.constant 0.000000e+00 : f32
    %305 = vector.broadcast %cst_187 : f32 to vector<8x1x128xf32>
    %306 = arith.cmpf one, %304, %305 : vector<8x1x128xf32>
    %307 = vector.shape_cast %306 : vector<8x1x128xi1> to vector<8x1x128xi1>
    %308 = vector.broadcast %307 : vector<8x1x128xi1> to vector<8x8x128xi1>
    %309 = vector.broadcast %cst_118 : f32 to vector<8x8x128xf32>
    %310 = arith.select %308, %309, %303 : vector<8x8x128xi1>, vector<8x8x128xf32>
    %cst_188 = arith.constant dense<0xFF800000> : vector<8x8xf32>
    %311 = vector.multi_reduction <maximumf>, %310, %cst_188 [2] : vector<8x8x128xf32> to vector<8x8xf32>
    %cst_189 = arith.constant 0xFF800000 : f32
    %312 = vector.broadcast %cst_189 : f32 to vector<8x8xf32>
    %313 = arith.maximumf %312, %311 : vector<8x8xf32>
    %314 = vector.shape_cast %313 : vector<8x8xf32> to vector<8x8x1xf32>
    %315 = vector.broadcast %314 : vector<8x8x1xf32> to vector<8x8x128xf32>
    %316 = arith.subf %310, %315 : vector<8x8x128xf32>
    %317 = math.exp %316 : vector<8x8x128xf32>
    %cst_190 = arith.constant dense<0.000000e+00> : vector<8x8xf32>
    %318 = vector.multi_reduction <add>, %317, %cst_190 [2] : vector<8x8x128xf32> to vector<8x8xf32>
    %319 = vector.shape_cast %318 : vector<8x8xf32> to vector<8x8x1xf32>
    %320 = vector.broadcast %319 : vector<8x8x1xf32> to vector<8x8x128xf32>
    %321 = arith.divf %317, %320 : vector<8x8x128xf32>
    "tpu.trace_start"() <{level = 10 : i32, message = "bhn,bdn->bhd"}> : () -> ()
    %cst_191 = arith.constant dense<0.000000e+00> : vector<8x8x32xf32>
    %322 = tpu.matmul %321, %285, %cst_191 {dimension_numbers = #tpu.dot_dimension_numbers<[2], [2], [1], [1], [0, 0, 0, 1, 1, 1], [0], [0]>} : vector<8x8x128xf32>, vector<8x32x128xf32>, vector<8x8x32xf32> -> vector<8x8x32xf32>
    "tpu.trace_stop"() : () -> ()
    %323 = vector.shape_cast %122 : vector<8x32xf32> to vector<1x8x32xf32>
    %324 = vector.broadcast %323 : vector<1x8x32xf32> to vector<8x8x32xf32>
    %325 = arith.mulf %322, %324 : vector<8x8x32xf32>
    "tpu.trace_start"() <{level = 10 : i32, message = "bhd,bdn->bhn"}> : () -> ()
    %cst_192 = arith.constant dense<0.000000e+00> : vector<8x8x128xf32>
    %326 = tpu.matmul %325, %286, %cst_192 {dimension_numbers = #tpu.dot_dimension_numbers<[2], [1], [1], [2], [0, 0, 0, 1, 1, 2], [0], [0]>} : vector<8x8x32xf32>, vector<8x32x128xf32>, vector<8x8x128xf32> -> vector<8x8x128xf32>
    "tpu.trace_stop"() : () -> ()
    %cst_193 = arith.constant dense<0.000000e+00> : vector<8x128xf32>
    %327 = vector.multi_reduction <add>, %326, %cst_193 [1] : vector<8x8x128xf32> to vector<8x128xf32>
    %328 = vector.broadcast %cst_119 : f32 to vector<8x128xf32>
    %329 = arith.mulf %328, %327 : vector<8x128xf32>
    %cst_194 = arith.constant 0.000000e+00 : f32
    %330 = vector.broadcast %cst_194 : f32 to vector<8x128xf32>
    %331 = arith.cmpf one, %278, %330 : vector<8x128xf32>
    %332 = math.tanh %329 : vector<8x128xf32>
    %cst_195 = arith.constant 1.000000e+01 : f32
    %333 = vector.broadcast %cst_195 : f32 to vector<8x128xf32>
    %334 = arith.mulf %332, %333 : vector<8x128xf32>
    %335 = vector.broadcast %cst_118 : f32 to vector<8x128xf32>
    %336 = arith.select %331, %335, %334 : vector<8x128xi1>, vector<8x128xf32>
    %cst_196 = arith.constant dense<0xFF800000> : vector<8xf32>
    %337 = vector.multi_reduction <maximumf>, %336, %cst_196 [1] : vector<8x128xf32> to vector<8xf32>
    %cst_197 = arith.constant 0xFF800000 : f32
    %338 = vector.broadcast %cst_197 : f32 to vector<8xf32>
    %339 = arith.maximumf %338, %337 : vector<8xf32>
    %340 = vector.shape_cast %339 : vector<8xf32> to vector<8x1xf32>
    %341 = vector.broadcast %340 : vector<8x1xf32> to vector<8x128xf32>
    %342 = arith.subf %336, %341 : vector<8x128xf32>
    %343 = math.exp %342 : vector<8x128xf32>
    %cst_198 = arith.constant dense<0.000000e+00> : vector<8xf32>
    %344 = vector.multi_reduction <add>, %343, %cst_198 [1] : vector<8x128xf32> to vector<8xf32>
    %345 = vector.shape_cast %344 : vector<8xf32> to vector<8x1xf32>
    %346 = vector.broadcast %345 : vector<8x1xf32> to vector<8x128xf32>
    %347 = arith.divf %343, %346 : vector<8x128xf32>
    %348 = arith.index_cast %c1_i32 : i32 to index
    %c0_199 = arith.constant 0 : index
    %c0_200 = arith.constant 0 : index
    %349 = vector.load %arg11[%348, %c0_199, %c0_200] : memref<6x8x128xf32, #tpu.memory_space<vmem>>, vector<1x8x128xf32>
    %350 = vector.shape_cast %349 : vector<1x8x128xf32> to vector<8x128xf32>
    %351 = vector.shape_cast %347 : vector<8x128xf32> to vector<1x8x128xf32>
    tpu.vector_store %arg11[%348, %c0_199, %c0_200], %351 {strides = array<i32>} : memref<6x8x128xf32, #tpu.memory_space<vmem>>, vector<1x8x128xf32>,
    %cst_201 = arith.constant dense<0xFF800000> : vector<8xf32>
    %352 = vector.multi_reduction <maximumf>, %347, %cst_201 [1] : vector<8x128xf32> to vector<8xf32>
    %353 = vector.shape_cast %352 : vector<8xf32> to vector<8x1xf32>
    %354 = vector.broadcast %353 : vector<8x1xf32> to vector<8x128xf32>
    %355 = arith.cmpf oge, %347, %354 : vector<8x128xf32>
    %356 = arith.sitofp %0 : vector<8x128xi32> to vector<8x128xf32>
    %cst_202 = arith.constant 1.280000e+02 : f32
    %357 = vector.broadcast %cst_202 : f32 to vector<8x128xf32>
    %358 = arith.select %355, %356, %357 : vector<8x128xi1>, vector<8x128xf32>
    %cst_203 = arith.constant dense<0x7F800000> : vector<8xf32>
    %359 = vector.multi_reduction <minimumf>, %358, %cst_203 [1] : vector<8x128xf32> to vector<8xf32>
    %360 = vector.shape_cast %359 : vector<8xf32> to vector<8x1xf32>
    %361 = arith.fptosi %360 : vector<8x1xf32> to vector<8x1xi32>
    %362 = vector.broadcast %361 : vector<8x1xi32> to vector<8x128xi32>
    %363 = arith.cmpi eq, %0, %362 : vector<8x128xi32>
    %364 = arith.extui %363 : vector<8x128xi1> to vector<8x128xi32>
    %365 = arith.sitofp %364 : vector<8x128xi32> to vector<8x128xf32>
    %cst_204 = arith.constant dense<0.000000e+00> : vector<8xf32>
    %366 = vector.multi_reduction <add>, %252, %cst_204 [1] : vector<8x128xf32> to vector<8xf32>
    %367 = vector.shape_cast %366 : vector<8xf32> to vector<8x1xf32>
    %cst_205 = arith.constant 2.000000e+01 : f32
    %368 = vector.broadcast %cst_205 : f32 to vector<8x1xf32>
    %369 = arith.cmpf oge, %367, %368 : vector<8x1xf32>
    %370 = math.log %353 : vector<8x1xf32>
    %cst_206 = arith.constant 0.000000e+00 : f32
    %371 = vector.broadcast %cst_206 : f32 to vector<8x1xf32>
    %372 = arith.select %369, %371, %370 : vector<8x1xi1>, vector<8x1xf32>
    %373 = arith.index_cast %c1_i32 : i32 to index
    %c0_207 = arith.constant 0 : index
    %c0_208 = arith.constant 0 : index
    %374 = vector.load %arg12[%373, %c0_207, %c0_208] : memref<6x8x1xi32, #tpu.memory_space<vmem>>, vector<1x8x1xi32>
    %375 = vector.shape_cast %374 : vector<1x8x1xi32> to vector<8x1xi32>
    %376 = vector.shape_cast %361 : vector<8x1xi32> to vector<1x8x1xi32>
    tpu.vector_store %arg12[%373, %c0_207, %c0_208], %376 {strides = array<i32>} : memref<6x8x1xi32, #tpu.memory_space<vmem>>, vector<1x8x1xi32>,
    %377 = arith.index_cast %c1_i32 : i32 to index
    %c0_209 = arith.constant 0 : index
    %c0_210 = arith.constant 0 : index
    %378 = vector.load %arg13[%377, %c0_209, %c0_210] : memref<6x8x1xf32, #tpu.memory_space<vmem>>, vector<1x8x1xf32>
    %379 = vector.shape_cast %378 : vector<1x8x1xf32> to vector<8x1xf32>
    %380 = vector.shape_cast %372 : vector<8x1xf32> to vector<1x8x1xf32>
    tpu.vector_store %arg13[%377, %c0_209, %c0_210], %380 {strides = array<i32>} : memref<6x8x1xf32, #tpu.memory_space<vmem>>, vector<1x8x1xf32>,
    %381 = arith.mulf %365, %126 : vector<8x128xf32>
    %cst_211 = arith.constant dense<0.000000e+00> : vector<8xf32>
    %382 = vector.multi_reduction <add>, %381, %cst_211 [1] : vector<8x128xf32> to vector<8xf32>
    %383 = vector.shape_cast %382 : vector<8xf32> to vector<8x1xf32>
    %c0_i32_212 = arith.constant 0 : i32
    %384 = vector.broadcast %c0_i32_212 : i32 to vector<8x1xi32>
    %385 = arith.cmpi eq, %361, %384 : vector<8x1xi32>
    %386 = arith.subf %247, %383 : vector<8x1xf32>
    %cst_213 = arith.constant 1.000000e+00 : f32
    %387 = vector.broadcast %cst_213 : f32 to vector<8x1xf32>
    %388 = arith.select %385, %387, %386 : vector<8x1xi1>, vector<8x1xf32>
    %389 = arith.maximumf %252, %365 : vector<8x128xf32>
    %c0_i32_214 = arith.constant 0 : i32
    %390 = vector.broadcast %c0_i32_214 : i32 to vector<8x128xi32>
    %391 = arith.cmpi eq, %0, %390 : vector<8x128xi32>
    %cst_215 = arith.constant 0.000000e+00 : f32
    %392 = vector.broadcast %cst_215 : f32 to vector<8x128xf32>
    %393 = arith.select %391, %392, %389 : vector<8x128xi1>, vector<8x128xf32>
    %394 = vector.broadcast %388 : vector<8x1xf32> to vector<8x128xf32>
    %395 = arith.cmpf ogt, %126, %394 : vector<8x128xf32>
    %396 = arith.extui %395 : vector<8x128xi1> to vector<8x128xi32>
    %397 = arith.sitofp %396 : vector<8x128xi32> to vector<8x128xf32>
    %398 = arith.addf %393, %397 : vector<8x128xf32>
    %cst_216 = arith.constant 0.000000e+00 : f32
    %cst_217 = arith.constant 1.000000e+00 : f32
    %399 = vector.broadcast %cst_216 : f32 to vector<8x128xf32>
    %400 = arith.maximumf %399, %398 : vector<8x128xf32>
    %401 = vector.broadcast %cst_217 : f32 to vector<8x128xf32>
    %402 = arith.minimumf %401, %400 : vector<8x128xf32>
    %cst_218 = arith.constant dense<0.000000e+00> : vector<8xf32>
    %403 = vector.multi_reduction <add>, %393, %cst_218 [1] : vector<8x128xf32> to vector<8xf32>
    %404 = vector.shape_cast %403 : vector<8xf32> to vector<8x1xf32>
    %cst_219 = arith.constant 2.000000e+01 : f32
    %405 = vector.broadcast %cst_219 : f32 to vector<8x1xf32>
    %406 = arith.cmpf oge, %404, %405 : vector<8x1xf32>
    %c0_i32_220 = arith.constant 0 : i32
    %407 = arith.cmpi sgt, %c1_i32, %c0_i32_220 : i32
    %cst_221 = arith.constant dense<true> : vector<8x1xi1>
    %408 = arith.xori %406, %cst_221 : vector<8x1xi1>
    %409 = vector.broadcast %407 : i1 to vector<8x1xi1>
    %410 = arith.andi %409, %408 : vector<8x1xi1>
    %411 = arith.andi %385, %410 : vector<8x1xi1>
    %c0_i32_222 = arith.constant 0 : i32
    %412 = vector.broadcast %c0_i32_222 : i32 to vector<8x128xi32>
    %413 = arith.cmpi eq, %0, %412 : vector<8x128xi32>
    %cst_223 = arith.constant 1.000000e+00 : f32
    %cst_224 = arith.constant 0.000000e+00 : f32
    %414 = vector.broadcast %cst_223 : f32 to vector<8x1xf32>
    %415 = vector.broadcast %cst_224 : f32 to vector<8x1xf32>
    %416 = arith.select %411, %414, %415 : vector<8x1xi1>, vector<8x1xf32>
    %417 = vector.shape_cast %416 : vector<8x1xf32> to vector<8x1xf32>
    %418 = vector.broadcast %417 : vector<8x1xf32> to vector<8x128xf32>
    %419 = arith.select %413, %418, %402 : vector<8x128xi1>, vector<8x128xf32>
    %420 = vector.shape_cast %365 : vector<8x128xf32> to vector<8x1x128xf32>
    %c0_225 = arith.constant 0 : index
    %c0_226 = arith.constant 0 : index
    %c0_227 = arith.constant 0 : index
    %421 = vector.load %arg1[%c0_225, %c0_226, %c0_227] : memref<8x32x128xf32, #tpu.memory_space<vmem>>, vector<8x32x128xf32>
    %422 = vector.broadcast %420 : vector<8x1x128xf32> to vector<8x32x128xf32>
    %423 = arith.mulf %422, %421 : vector<8x32x128xf32>
    %cst_228 = arith.constant dense<0.000000e+00> : vector<8x32xf32>
    %424 = vector.multi_reduction <add>, %423, %cst_228 [2] : vector<8x32x128xf32> to vector<8x32xf32>
    %c2_i32 = arith.constant 2 : i32
    %c0_229 = arith.constant 0 : index
    %c0_230 = arith.constant 0 : index
    %c0_231 = arith.constant 0 : index
    %425 = vector.load %arg14[%c0_229, %c0_230, %c0_231] : memref<8x32x128xf32, #tpu.memory_space<vmem>>, vector<8x32x128xf32>
    %c0_232 = arith.constant 0 : index
    %c0_233 = arith.constant 0 : index
    %c0_234 = arith.constant 0 : index
    %426 = vector.load %arg15[%c0_232, %c0_233, %c0_234] : memref<8x32x128xf32, #tpu.memory_space<vmem>>, vector<8x32x128xf32>
    %c0_235 = arith.constant 0 : index
    %c0_236 = arith.constant 0 : index
    %c0_237 = arith.constant 0 : index
    %427 = vector.load %arg16[%c0_235, %c0_236, %c0_237] : memref<8x32x128xf32, #tpu.memory_space<vmem>>, vector<8x32x128xf32>
    %cst_238 = arith.constant dense<0.000000e+00> : vector<8x64xf32>
    %428 = tpu.matmul %288, %124, %cst_238 {dimension_numbers = #tpu.dot_dimension_numbers<[1], [0], [0], [1], [0, 0, 1, 1], [], []>} : vector<8x32xf32>, vector<32x64xf32>, vector<8x64xf32> -> vector<8x64xf32>
    %429 = vector.extract_strided_slice %428 {offsets = [0, 32], sizes = [8, 32], strides = [1, 1]} : vector<8x64xf32> to vector<8x32xf32>
    %cst_239 = arith.constant dense<0.000000e+00> : vector<8x32xf32>
    %430 = tpu.matmul %424, %123, %cst_239 {dimension_numbers = #tpu.dot_dimension_numbers<[1], [0], [0], [1], [0, 0, 1, 1], [], []>} : vector<8x32xf32>, vector<32x32xf32>, vector<8x32xf32> -> vector<8x32xf32>
    %431 = vector.extract_strided_slice %428 {offsets = [0, 0], sizes = [8, 32], strides = [1, 1]} : vector<8x64xf32> to vector<8x32xf32>
    %432 = arith.addf %430, %431 : vector<8x32xf32>
    %433 = vector.broadcast %388 : vector<8x1xf32> to vector<8x32xf32>
    %434 = vector.broadcast %125 : vector<1x32xf32> to vector<8x32xf32>
    %435 = arith.mulf %433, %434 : vector<8x32xf32>
    %436 = arith.addf %432, %435 : vector<8x32xf32>
    %437 = vector.shape_cast %436 : vector<8x32xf32> to vector<8x1x32xf32>
    %438 = vector.shape_cast %122 : vector<8x32xf32> to vector<1x8x32xf32>
    %439 = vector.broadcast %437 : vector<8x1x32xf32> to vector<8x8x32xf32>
    %440 = vector.broadcast %438 : vector<1x8x32xf32> to vector<8x8x32xf32>
    %441 = arith.mulf %439, %440 : vector<8x8x32xf32>
    "tpu.trace_start"() <{level = 10 : i32, message = "bhd,bdn->bhn"}> : () -> ()
    %cst_240 = arith.constant dense<0.000000e+00> : vector<8x8x128xf32>
    %442 = tpu.matmul %441, %425, %cst_240 {dimension_numbers = #tpu.dot_dimension_numbers<[2], [1], [1], [2], [0, 0, 0, 1, 1, 2], [0], [0]>} : vector<8x8x32xf32>, vector<8x32x128xf32>, vector<8x8x128xf32> -> vector<8x8x128xf32>
    "tpu.trace_stop"() : () -> ()
    %443 = vector.broadcast %cst_117 : f32 to vector<8x8x128xf32>
    %444 = arith.mulf %443, %442 : vector<8x8x128xf32>
    %445 = vector.shape_cast %419 : vector<8x128xf32> to vector<8x1x128xf32>
    %cst_241 = arith.constant 0.000000e+00 : f32
    %446 = vector.broadcast %cst_241 : f32 to vector<8x1x128xf32>
    %447 = arith.cmpf one, %445, %446 : vector<8x1x128xf32>
    %448 = vector.shape_cast %447 : vector<8x1x128xi1> to vector<8x1x128xi1>
    %449 = vector.broadcast %448 : vector<8x1x128xi1> to vector<8x8x128xi1>
    %450 = vector.broadcast %cst_118 : f32 to vector<8x8x128xf32>
    %451 = arith.select %449, %450, %444 : vector<8x8x128xi1>, vector<8x8x128xf32>
    %cst_242 = arith.constant dense<0xFF800000> : vector<8x8xf32>
    %452 = vector.multi_reduction <maximumf>, %451, %cst_242 [2] : vector<8x8x128xf32> to vector<8x8xf32>
    %cst_243 = arith.constant 0xFF800000 : f32
    %453 = vector.broadcast %cst_243 : f32 to vector<8x8xf32>
    %454 = arith.maximumf %453, %452 : vector<8x8xf32>
    %455 = vector.shape_cast %454 : vector<8x8xf32> to vector<8x8x1xf32>
    %456 = vector.broadcast %455 : vector<8x8x1xf32> to vector<8x8x128xf32>
    %457 = arith.subf %451, %456 : vector<8x8x128xf32>
    %458 = math.exp %457 : vector<8x8x128xf32>
    %cst_244 = arith.constant dense<0.000000e+00> : vector<8x8xf32>
    %459 = vector.multi_reduction <add>, %458, %cst_244 [2] : vector<8x8x128xf32> to vector<8x8xf32>
    %460 = vector.shape_cast %459 : vector<8x8xf32> to vector<8x8x1xf32>
    %461 = vector.broadcast %460 : vector<8x8x1xf32> to vector<8x8x128xf32>
    %462 = arith.divf %458, %461 : vector<8x8x128xf32>
    "tpu.trace_start"() <{level = 10 : i32, message = "bhn,bdn->bhd"}> : () -> ()
    %cst_245 = arith.constant dense<0.000000e+00> : vector<8x8x32xf32>
    %463 = tpu.matmul %462, %426, %cst_245 {dimension_numbers = #tpu.dot_dimension_numbers<[2], [2], [1], [1], [0, 0, 0, 1, 1, 1], [0], [0]>} : vector<8x8x128xf32>, vector<8x32x128xf32>, vector<8x8x32xf32> -> vector<8x8x32xf32>
    "tpu.trace_stop"() : () -> ()
    %464 = vector.shape_cast %122 : vector<8x32xf32> to vector<1x8x32xf32>
    %465 = vector.broadcast %464 : vector<1x8x32xf32> to vector<8x8x32xf32>
    %466 = arith.mulf %463, %465 : vector<8x8x32xf32>
    "tpu.trace_start"() <{level = 10 : i32, message = "bhd,bdn->bhn"}> : () -> ()
    %cst_246 = arith.constant dense<0.000000e+00> : vector<8x8x128xf32>
    %467 = tpu.matmul %466, %427, %cst_246 {dimension_numbers = #tpu.dot_dimension_numbers<[2], [1], [1], [2], [0, 0, 0, 1, 1, 2], [0], [0]>} : vector<8x8x32xf32>, vector<8x32x128xf32>, vector<8x8x128xf32> -> vector<8x8x128xf32>
    "tpu.trace_stop"() : () -> ()
    %cst_247 = arith.constant dense<0.000000e+00> : vector<8x128xf32>
    %468 = vector.multi_reduction <add>, %467, %cst_247 [1] : vector<8x8x128xf32> to vector<8x128xf32>
    %469 = vector.broadcast %cst_119 : f32 to vector<8x128xf32>
    %470 = arith.mulf %469, %468 : vector<8x128xf32>
    %cst_248 = arith.constant 0.000000e+00 : f32
    %471 = vector.broadcast %cst_248 : f32 to vector<8x128xf32>
    %472 = arith.cmpf one, %419, %471 : vector<8x128xf32>
    %473 = math.tanh %470 : vector<8x128xf32>
    %cst_249 = arith.constant 1.000000e+01 : f32
    %474 = vector.broadcast %cst_249 : f32 to vector<8x128xf32>
    %475 = arith.mulf %473, %474 : vector<8x128xf32>
    %476 = vector.broadcast %cst_118 : f32 to vector<8x128xf32>
    %477 = arith.select %472, %476, %475 : vector<8x128xi1>, vector<8x128xf32>
    %cst_250 = arith.constant dense<0xFF800000> : vector<8xf32>
    %478 = vector.multi_reduction <maximumf>, %477, %cst_250 [1] : vector<8x128xf32> to vector<8xf32>
    %cst_251 = arith.constant 0xFF800000 : f32
    %479 = vector.broadcast %cst_251 : f32 to vector<8xf32>
    %480 = arith.maximumf %479, %478 : vector<8xf32>
    %481 = vector.shape_cast %480 : vector<8xf32> to vector<8x1xf32>
    %482 = vector.broadcast %481 : vector<8x1xf32> to vector<8x128xf32>
    %483 = arith.subf %477, %482 : vector<8x128xf32>
    %484 = math.exp %483 : vector<8x128xf32>
    %cst_252 = arith.constant dense<0.000000e+00> : vector<8xf32>
    %485 = vector.multi_reduction <add>, %484, %cst_252 [1] : vector<8x128xf32> to vector<8xf32>
    %486 = vector.shape_cast %485 : vector<8xf32> to vector<8x1xf32>
    %487 = vector.broadcast %486 : vector<8x1xf32> to vector<8x128xf32>
    %488 = arith.divf %484, %487 : vector<8x128xf32>
    %489 = arith.index_cast %c2_i32 : i32 to index
    %c0_253 = arith.constant 0 : index
    %c0_254 = arith.constant 0 : index
    %490 = vector.load %arg11[%489, %c0_253, %c0_254] : memref<6x8x128xf32, #tpu.memory_space<vmem>>, vector<1x8x128xf32>
    %491 = vector.shape_cast %490 : vector<1x8x128xf32> to vector<8x128xf32>
    %492 = vector.shape_cast %488 : vector<8x128xf32> to vector<1x8x128xf32>
    tpu.vector_store %arg11[%489, %c0_253, %c0_254], %492 {strides = array<i32>} : memref<6x8x128xf32, #tpu.memory_space<vmem>>, vector<1x8x128xf32>,
    %cst_255 = arith.constant dense<0xFF800000> : vector<8xf32>
    %493 = vector.multi_reduction <maximumf>, %488, %cst_255 [1] : vector<8x128xf32> to vector<8xf32>
    %494 = vector.shape_cast %493 : vector<8xf32> to vector<8x1xf32>
    %495 = vector.broadcast %494 : vector<8x1xf32> to vector<8x128xf32>
    %496 = arith.cmpf oge, %488, %495 : vector<8x128xf32>
    %497 = arith.sitofp %0 : vector<8x128xi32> to vector<8x128xf32>
    %cst_256 = arith.constant 1.280000e+02 : f32
    %498 = vector.broadcast %cst_256 : f32 to vector<8x128xf32>
    %499 = arith.select %496, %497, %498 : vector<8x128xi1>, vector<8x128xf32>
    %cst_257 = arith.constant dense<0x7F800000> : vector<8xf32>
    %500 = vector.multi_reduction <minimumf>, %499, %cst_257 [1] : vector<8x128xf32> to vector<8xf32>
    %501 = vector.shape_cast %500 : vector<8xf32> to vector<8x1xf32>
    %502 = arith.fptosi %501 : vector<8x1xf32> to vector<8x1xi32>
    %503 = vector.broadcast %502 : vector<8x1xi32> to vector<8x128xi32>
    %504 = arith.cmpi eq, %0, %503 : vector<8x128xi32>
    %505 = arith.extui %504 : vector<8x128xi1> to vector<8x128xi32>
    %506 = arith.sitofp %505 : vector<8x128xi32> to vector<8x128xf32>
    %cst_258 = arith.constant dense<0.000000e+00> : vector<8xf32>
    %507 = vector.multi_reduction <add>, %393, %cst_258 [1] : vector<8x128xf32> to vector<8xf32>
    %508 = vector.shape_cast %507 : vector<8xf32> to vector<8x1xf32>
    %cst_259 = arith.constant 2.000000e+01 : f32
    %509 = vector.broadcast %cst_259 : f32 to vector<8x1xf32>
    %510 = arith.cmpf oge, %508, %509 : vector<8x1xf32>
    %511 = math.log %494 : vector<8x1xf32>
    %cst_260 = arith.constant 0.000000e+00 : f32
    %512 = vector.broadcast %cst_260 : f32 to vector<8x1xf32>
    %513 = arith.select %510, %512, %511 : vector<8x1xi1>, vector<8x1xf32>
    %514 = arith.index_cast %c2_i32 : i32 to index
    %c0_261 = arith.constant 0 : index
    %c0_262 = arith.constant 0 : index
    %515 = vector.load %arg12[%514, %c0_261, %c0_262] : memref<6x8x1xi32, #tpu.memory_space<vmem>>, vector<1x8x1xi32>
    %516 = vector.shape_cast %515 : vector<1x8x1xi32> to vector<8x1xi32>
    %517 = vector.shape_cast %502 : vector<8x1xi32> to vector<1x8x1xi32>
    tpu.vector_store %arg12[%514, %c0_261, %c0_262], %517 {strides = array<i32>} : memref<6x8x1xi32, #tpu.memory_space<vmem>>, vector<1x8x1xi32>,
    %518 = arith.index_cast %c2_i32 : i32 to index
    %c0_263 = arith.constant 0 : index
    %c0_264 = arith.constant 0 : index
    %519 = vector.load %arg13[%518, %c0_263, %c0_264] : memref<6x8x1xf32, #tpu.memory_space<vmem>>, vector<1x8x1xf32>
    %520 = vector.shape_cast %519 : vector<1x8x1xf32> to vector<8x1xf32>
    %521 = vector.shape_cast %513 : vector<8x1xf32> to vector<1x8x1xf32>
    tpu.vector_store %arg13[%518, %c0_263, %c0_264], %521 {strides = array<i32>} : memref<6x8x1xf32, #tpu.memory_space<vmem>>, vector<1x8x1xf32>,
    %522 = arith.mulf %506, %126 : vector<8x128xf32>
    %cst_265 = arith.constant dense<0.000000e+00> : vector<8xf32>
    %523 = vector.multi_reduction <add>, %522, %cst_265 [1] : vector<8x128xf32> to vector<8xf32>
    %524 = vector.shape_cast %523 : vector<8xf32> to vector<8x1xf32>
    %c0_i32_266 = arith.constant 0 : i32
    %525 = vector.broadcast %c0_i32_266 : i32 to vector<8x1xi32>
    %526 = arith.cmpi eq, %502, %525 : vector<8x1xi32>
    %527 = arith.subf %388, %524 : vector<8x1xf32>
    %cst_267 = arith.constant 1.000000e+00 : f32
    %528 = vector.broadcast %cst_267 : f32 to vector<8x1xf32>
    %529 = arith.select %526, %528, %527 : vector<8x1xi1>, vector<8x1xf32>
    %530 = arith.maximumf %393, %506 : vector<8x128xf32>
    %c0_i32_268 = arith.constant 0 : i32
    %531 = vector.broadcast %c0_i32_268 : i32 to vector<8x128xi32>
    %532 = arith.cmpi eq, %0, %531 : vector<8x128xi32>
    %cst_269 = arith.constant 0.000000e+00 : f32
    %533 = vector.broadcast %cst_269 : f32 to vector<8x128xf32>
    %534 = arith.select %532, %533, %530 : vector<8x128xi1>, vector<8x128xf32>
    %535 = vector.broadcast %529 : vector<8x1xf32> to vector<8x128xf32>
    %536 = arith.cmpf ogt, %126, %535 : vector<8x128xf32>
    %537 = arith.extui %536 : vector<8x128xi1> to vector<8x128xi32>
    %538 = arith.sitofp %537 : vector<8x128xi32> to vector<8x128xf32>
    %539 = arith.addf %534, %538 : vector<8x128xf32>
    %cst_270 = arith.constant 0.000000e+00 : f32
    %cst_271 = arith.constant 1.000000e+00 : f32
    %540 = vector.broadcast %cst_270 : f32 to vector<8x128xf32>
    %541 = arith.maximumf %540, %539 : vector<8x128xf32>
    %542 = vector.broadcast %cst_271 : f32 to vector<8x128xf32>
    %543 = arith.minimumf %542, %541 : vector<8x128xf32>
    %cst_272 = arith.constant dense<0.000000e+00> : vector<8xf32>
    %544 = vector.multi_reduction <add>, %534, %cst_272 [1] : vector<8x128xf32> to vector<8xf32>
    %545 = vector.shape_cast %544 : vector<8xf32> to vector<8x1xf32>
    %cst_273 = arith.constant 2.000000e+01 : f32
    %546 = vector.broadcast %cst_273 : f32 to vector<8x1xf32>
    %547 = arith.cmpf oge, %545, %546 : vector<8x1xf32>
    %c0_i32_274 = arith.constant 0 : i32
    %548 = arith.cmpi sgt, %c2_i32, %c0_i32_274 : i32
    %cst_275 = arith.constant dense<true> : vector<8x1xi1>
    %549 = arith.xori %547, %cst_275 : vector<8x1xi1>
    %550 = vector.broadcast %548 : i1 to vector<8x1xi1>
    %551 = arith.andi %550, %549 : vector<8x1xi1>
    %552 = arith.andi %526, %551 : vector<8x1xi1>
    %c0_i32_276 = arith.constant 0 : i32
    %553 = vector.broadcast %c0_i32_276 : i32 to vector<8x128xi32>
    %554 = arith.cmpi eq, %0, %553 : vector<8x128xi32>
    %cst_277 = arith.constant 1.000000e+00 : f32
    %cst_278 = arith.constant 0.000000e+00 : f32
    %555 = vector.broadcast %cst_277 : f32 to vector<8x1xf32>
    %556 = vector.broadcast %cst_278 : f32 to vector<8x1xf32>
    %557 = arith.select %552, %555, %556 : vector<8x1xi1>, vector<8x1xf32>
    %558 = vector.shape_cast %557 : vector<8x1xf32> to vector<8x1xf32>
    %559 = vector.broadcast %558 : vector<8x1xf32> to vector<8x128xf32>
    %560 = arith.select %554, %559, %543 : vector<8x128xi1>, vector<8x128xf32>
    %561 = vector.shape_cast %506 : vector<8x128xf32> to vector<8x1x128xf32>
    %c0_279 = arith.constant 0 : index
    %c0_280 = arith.constant 0 : index
    %c0_281 = arith.constant 0 : index
    %562 = vector.load %arg1[%c0_279, %c0_280, %c0_281] : memref<8x32x128xf32, #tpu.memory_space<vmem>>, vector<8x32x128xf32>
    %563 = vector.broadcast %561 : vector<8x1x128xf32> to vector<8x32x128xf32>
    %564 = arith.mulf %563, %562 : vector<8x32x128xf32>
    %cst_282 = arith.constant dense<0.000000e+00> : vector<8x32xf32>
    %565 = vector.multi_reduction <add>, %564, %cst_282 [2] : vector<8x32x128xf32> to vector<8x32xf32>
    %c3_i32 = arith.constant 3 : i32
    %c0_283 = arith.constant 0 : index
    %c0_284 = arith.constant 0 : index
    %c0_285 = arith.constant 0 : index
    %566 = vector.load %arg14[%c0_283, %c0_284, %c0_285] : memref<8x32x128xf32, #tpu.memory_space<vmem>>, vector<8x32x128xf32>
    %c0_286 = arith.constant 0 : index
    %c0_287 = arith.constant 0 : index
    %c0_288 = arith.constant 0 : index
    %567 = vector.load %arg15[%c0_286, %c0_287, %c0_288] : memref<8x32x128xf32, #tpu.memory_space<vmem>>, vector<8x32x128xf32>
    %c0_289 = arith.constant 0 : index
    %c0_290 = arith.constant 0 : index
    %c0_291 = arith.constant 0 : index
    %568 = vector.load %arg16[%c0_289, %c0_290, %c0_291] : memref<8x32x128xf32, #tpu.memory_space<vmem>>, vector<8x32x128xf32>
    %cst_292 = arith.constant dense<0.000000e+00> : vector<8x64xf32>
    %569 = tpu.matmul %429, %124, %cst_292 {dimension_numbers = #tpu.dot_dimension_numbers<[1], [0], [0], [1], [0, 0, 1, 1], [], []>} : vector<8x32xf32>, vector<32x64xf32>, vector<8x64xf32> -> vector<8x64xf32>
    %570 = vector.extract_strided_slice %569 {offsets = [0, 32], sizes = [8, 32], strides = [1, 1]} : vector<8x64xf32> to vector<8x32xf32>
    %cst_293 = arith.constant dense<0.000000e+00> : vector<8x32xf32>
    %571 = tpu.matmul %565, %123, %cst_293 {dimension_numbers = #tpu.dot_dimension_numbers<[1], [0], [0], [1], [0, 0, 1, 1], [], []>} : vector<8x32xf32>, vector<32x32xf32>, vector<8x32xf32> -> vector<8x32xf32>
    %572 = vector.extract_strided_slice %569 {offsets = [0, 0], sizes = [8, 32], strides = [1, 1]} : vector<8x64xf32> to vector<8x32xf32>
    %573 = arith.addf %571, %572 : vector<8x32xf32>
    %574 = vector.broadcast %529 : vector<8x1xf32> to vector<8x32xf32>
    %575 = vector.broadcast %125 : vector<1x32xf32> to vector<8x32xf32>
    %576 = arith.mulf %574, %575 : vector<8x32xf32>
    %577 = arith.addf %573, %576 : vector<8x32xf32>
    %578 = vector.shape_cast %577 : vector<8x32xf32> to vector<8x1x32xf32>
    %579 = vector.shape_cast %122 : vector<8x32xf32> to vector<1x8x32xf32>
    %580 = vector.broadcast %578 : vector<8x1x32xf32> to vector<8x8x32xf32>
    %581 = vector.broadcast %579 : vector<1x8x32xf32> to vector<8x8x32xf32>
    %582 = arith.mulf %580, %581 : vector<8x8x32xf32>
    "tpu.trace_start"() <{level = 10 : i32, message = "bhd,bdn->bhn"}> : () -> ()
    %cst_294 = arith.constant dense<0.000000e+00> : vector<8x8x128xf32>
    %583 = tpu.matmul %582, %566, %cst_294 {dimension_numbers = #tpu.dot_dimension_numbers<[2], [1], [1], [2], [0, 0, 0, 1, 1, 2], [0], [0]>} : vector<8x8x32xf32>, vector<8x32x128xf32>, vector<8x8x128xf32> -> vector<8x8x128xf32>
    "tpu.trace_stop"() : () -> ()
    %584 = vector.broadcast %cst_117 : f32 to vector<8x8x128xf32>
    %585 = arith.mulf %584, %583 : vector<8x8x128xf32>
    %586 = vector.shape_cast %560 : vector<8x128xf32> to vector<8x1x128xf32>
    %cst_295 = arith.constant 0.000000e+00 : f32
    %587 = vector.broadcast %cst_295 : f32 to vector<8x1x128xf32>
    %588 = arith.cmpf one, %586, %587 : vector<8x1x128xf32>
    %589 = vector.shape_cast %588 : vector<8x1x128xi1> to vector<8x1x128xi1>
    %590 = vector.broadcast %589 : vector<8x1x128xi1> to vector<8x8x128xi1>
    %591 = vector.broadcast %cst_118 : f32 to vector<8x8x128xf32>
    %592 = arith.select %590, %591, %585 : vector<8x8x128xi1>, vector<8x8x128xf32>
    %cst_296 = arith.constant dense<0xFF800000> : vector<8x8xf32>
    %593 = vector.multi_reduction <maximumf>, %592, %cst_296 [2] : vector<8x8x128xf32> to vector<8x8xf32>
    %cst_297 = arith.constant 0xFF800000 : f32
    %594 = vector.broadcast %cst_297 : f32 to vector<8x8xf32>
    %595 = arith.maximumf %594, %593 : vector<8x8xf32>
    %596 = vector.shape_cast %595 : vector<8x8xf32> to vector<8x8x1xf32>
    %597 = vector.broadcast %596 : vector<8x8x1xf32> to vector<8x8x128xf32>
    %598 = arith.subf %592, %597 : vector<8x8x128xf32>
    %599 = math.exp %598 : vector<8x8x128xf32>
    %cst_298 = arith.constant dense<0.000000e+00> : vector<8x8xf32>
    %600 = vector.multi_reduction <add>, %599, %cst_298 [2] : vector<8x8x128xf32> to vector<8x8xf32>
    %601 = vector.shape_cast %600 : vector<8x8xf32> to vector<8x8x1xf32>
    %602 = vector.broadcast %601 : vector<8x8x1xf32> to vector<8x8x128xf32>
    %603 = arith.divf %599, %602 : vector<8x8x128xf32>
    "tpu.trace_start"() <{level = 10 : i32, message = "bhn,bdn->bhd"}> : () -> ()
    %cst_299 = arith.constant dense<0.000000e+00> : vector<8x8x32xf32>
    %604 = tpu.matmul %603, %567, %cst_299 {dimension_numbers = #tpu.dot_dimension_numbers<[2], [2], [1], [1], [0, 0, 0, 1, 1, 1], [0], [0]>} : vector<8x8x128xf32>, vector<8x32x128xf32>, vector<8x8x32xf32> -> vector<8x8x32xf32>
    "tpu.trace_stop"() : () -> ()
    %605 = vector.shape_cast %122 : vector<8x32xf32> to vector<1x8x32xf32>
    %606 = vector.broadcast %605 : vector<1x8x32xf32> to vector<8x8x32xf32>
    %607 = arith.mulf %604, %606 : vector<8x8x32xf32>
    "tpu.trace_start"() <{level = 10 : i32, message = "bhd,bdn->bhn"}> : () -> ()
    %cst_300 = arith.constant dense<0.000000e+00> : vector<8x8x128xf32>
    %608 = tpu.matmul %607, %568, %cst_300 {dimension_numbers = #tpu.dot_dimension_numbers<[2], [1], [1], [2], [0, 0, 0, 1, 1, 2], [0], [0]>} : vector<8x8x32xf32>, vector<8x32x128xf32>, vector<8x8x128xf32> -> vector<8x8x128xf32>
    "tpu.trace_stop"() : () -> ()
    %cst_301 = arith.constant dense<0.000000e+00> : vector<8x128xf32>
    %609 = vector.multi_reduction <add>, %608, %cst_301 [1] : vector<8x8x128xf32> to vector<8x128xf32>
    %610 = vector.broadcast %cst_119 : f32 to vector<8x128xf32>
    %611 = arith.mulf %610, %609 : vector<8x128xf32>
    %cst_302 = arith.constant 0.000000e+00 : f32
    %612 = vector.broadcast %cst_302 : f32 to vector<8x128xf32>
    %613 = arith.cmpf one, %560, %612 : vector<8x128xf32>
    %614 = math.tanh %611 : vector<8x128xf32>
    %cst_303 = arith.constant 1.000000e+01 : f32
    %615 = vector.broadcast %cst_303 : f32 to vector<8x128xf32>
    %616 = arith.mulf %614, %615 : vector<8x128xf32>
    %617 = vector.broadcast %cst_118 : f32 to vector<8x128xf32>
    %618 = arith.select %613, %617, %616 : vector<8x128xi1>, vector<8x128xf32>
    %cst_304 = arith.constant dense<0xFF800000> : vector<8xf32>
    %619 = vector.multi_reduction <maximumf>, %618, %cst_304 [1] : vector<8x128xf32> to vector<8xf32>
    %cst_305 = arith.constant 0xFF800000 : f32
    %620 = vector.broadcast %cst_305 : f32 to vector<8xf32>
    %621 = arith.maximumf %620, %619 : vector<8xf32>
    %622 = vector.shape_cast %621 : vector<8xf32> to vector<8x1xf32>
    %623 = vector.broadcast %622 : vector<8x1xf32> to vector<8x128xf32>
    %624 = arith.subf %618, %623 : vector<8x128xf32>
    %625 = math.exp %624 : vector<8x128xf32>
    %cst_306 = arith.constant dense<0.000000e+00> : vector<8xf32>
    %626 = vector.multi_reduction <add>, %625, %cst_306 [1] : vector<8x128xf32> to vector<8xf32>
    %627 = vector.shape_cast %626 : vector<8xf32> to vector<8x1xf32>
    %628 = vector.broadcast %627 : vector<8x1xf32> to vector<8x128xf32>
    %629 = arith.divf %625, %628 : vector<8x128xf32>
    %630 = arith.index_cast %c3_i32 : i32 to index
    %c0_307 = arith.constant 0 : index
    %c0_308 = arith.constant 0 : index
    %631 = vector.load %arg11[%630, %c0_307, %c0_308] : memref<6x8x128xf32, #tpu.memory_space<vmem>>, vector<1x8x128xf32>
    %632 = vector.shape_cast %631 : vector<1x8x128xf32> to vector<8x128xf32>
    %633 = vector.shape_cast %629 : vector<8x128xf32> to vector<1x8x128xf32>
    tpu.vector_store %arg11[%630, %c0_307, %c0_308], %633 {strides = array<i32>} : memref<6x8x128xf32, #tpu.memory_space<vmem>>, vector<1x8x128xf32>,
    %cst_309 = arith.constant dense<0xFF800000> : vector<8xf32>
    %634 = vector.multi_reduction <maximumf>, %629, %cst_309 [1] : vector<8x128xf32> to vector<8xf32>
    %635 = vector.shape_cast %634 : vector<8xf32> to vector<8x1xf32>
    %636 = vector.broadcast %635 : vector<8x1xf32> to vector<8x128xf32>
    %637 = arith.cmpf oge, %629, %636 : vector<8x128xf32>
    %638 = arith.sitofp %0 : vector<8x128xi32> to vector<8x128xf32>
    %cst_310 = arith.constant 1.280000e+02 : f32
    %639 = vector.broadcast %cst_310 : f32 to vector<8x128xf32>
    %640 = arith.select %637, %638, %639 : vector<8x128xi1>, vector<8x128xf32>
    %cst_311 = arith.constant dense<0x7F800000> : vector<8xf32>
    %641 = vector.multi_reduction <minimumf>, %640, %cst_311 [1] : vector<8x128xf32> to vector<8xf32>
    %642 = vector.shape_cast %641 : vector<8xf32> to vector<8x1xf32>
    %643 = arith.fptosi %642 : vector<8x1xf32> to vector<8x1xi32>
    %644 = vector.broadcast %643 : vector<8x1xi32> to vector<8x128xi32>
    %645 = arith.cmpi eq, %0, %644 : vector<8x128xi32>
    %646 = arith.extui %645 : vector<8x128xi1> to vector<8x128xi32>
    %647 = arith.sitofp %646 : vector<8x128xi32> to vector<8x128xf32>
    %cst_312 = arith.constant dense<0.000000e+00> : vector<8xf32>
    %648 = vector.multi_reduction <add>, %534, %cst_312 [1] : vector<8x128xf32> to vector<8xf32>
    %649 = vector.shape_cast %648 : vector<8xf32> to vector<8x1xf32>
    %cst_313 = arith.constant 2.000000e+01 : f32
    %650 = vector.broadcast %cst_313 : f32 to vector<8x1xf32>
    %651 = arith.cmpf oge, %649, %650 : vector<8x1xf32>
    %652 = math.log %635 : vector<8x1xf32>
    %cst_314 = arith.constant 0.000000e+00 : f32
    %653 = vector.broadcast %cst_314 : f32 to vector<8x1xf32>
    %654 = arith.select %651, %653, %652 : vector<8x1xi1>, vector<8x1xf32>
    %655 = arith.index_cast %c3_i32 : i32 to index
    %c0_315 = arith.constant 0 : index
    %c0_316 = arith.constant 0 : index
    %656 = vector.load %arg12[%655, %c0_315, %c0_316] : memref<6x8x1xi32, #tpu.memory_space<vmem>>, vector<1x8x1xi32>
    %657 = vector.shape_cast %656 : vector<1x8x1xi32> to vector<8x1xi32>
    %658 = vector.shape_cast %643 : vector<8x1xi32> to vector<1x8x1xi32>
    tpu.vector_store %arg12[%655, %c0_315, %c0_316], %658 {strides = array<i32>} : memref<6x8x1xi32, #tpu.memory_space<vmem>>, vector<1x8x1xi32>,
    %659 = arith.index_cast %c3_i32 : i32 to index
    %c0_317 = arith.constant 0 : index
    %c0_318 = arith.constant 0 : index
    %660 = vector.load %arg13[%659, %c0_317, %c0_318] : memref<6x8x1xf32, #tpu.memory_space<vmem>>, vector<1x8x1xf32>
    %661 = vector.shape_cast %660 : vector<1x8x1xf32> to vector<8x1xf32>
    %662 = vector.shape_cast %654 : vector<8x1xf32> to vector<1x8x1xf32>
    tpu.vector_store %arg13[%659, %c0_317, %c0_318], %662 {strides = array<i32>} : memref<6x8x1xf32, #tpu.memory_space<vmem>>, vector<1x8x1xf32>,
    %663 = arith.mulf %647, %126 : vector<8x128xf32>
    %cst_319 = arith.constant dense<0.000000e+00> : vector<8xf32>
    %664 = vector.multi_reduction <add>, %663, %cst_319 [1] : vector<8x128xf32> to vector<8xf32>
    %665 = vector.shape_cast %664 : vector<8xf32> to vector<8x1xf32>
    %c0_i32_320 = arith.constant 0 : i32
    %666 = vector.broadcast %c0_i32_320 : i32 to vector<8x1xi32>
    %667 = arith.cmpi eq, %643, %666 : vector<8x1xi32>
    %668 = arith.subf %529, %665 : vector<8x1xf32>
    %cst_321 = arith.constant 1.000000e+00 : f32
    %669 = vector.broadcast %cst_321 : f32 to vector<8x1xf32>
    %670 = arith.select %667, %669, %668 : vector<8x1xi1>, vector<8x1xf32>
    %671 = arith.maximumf %534, %647 : vector<8x128xf32>
    %c0_i32_322 = arith.constant 0 : i32
    %672 = vector.broadcast %c0_i32_322 : i32 to vector<8x128xi32>
    %673 = arith.cmpi eq, %0, %672 : vector<8x128xi32>
    %cst_323 = arith.constant 0.000000e+00 : f32
    %674 = vector.broadcast %cst_323 : f32 to vector<8x128xf32>
    %675 = arith.select %673, %674, %671 : vector<8x128xi1>, vector<8x128xf32>
    %676 = vector.broadcast %670 : vector<8x1xf32> to vector<8x128xf32>
    %677 = arith.cmpf ogt, %126, %676 : vector<8x128xf32>
    %678 = arith.extui %677 : vector<8x128xi1> to vector<8x128xi32>
    %679 = arith.sitofp %678 : vector<8x128xi32> to vector<8x128xf32>
    %680 = arith.addf %675, %679 : vector<8x128xf32>
    %cst_324 = arith.constant 0.000000e+00 : f32
    %cst_325 = arith.constant 1.000000e+00 : f32
    %681 = vector.broadcast %cst_324 : f32 to vector<8x128xf32>
    %682 = arith.maximumf %681, %680 : vector<8x128xf32>
    %683 = vector.broadcast %cst_325 : f32 to vector<8x128xf32>
    %684 = arith.minimumf %683, %682 : vector<8x128xf32>
    %cst_326 = arith.constant dense<0.000000e+00> : vector<8xf32>
    %685 = vector.multi_reduction <add>, %675, %cst_326 [1] : vector<8x128xf32> to vector<8xf32>
    %686 = vector.shape_cast %685 : vector<8xf32> to vector<8x1xf32>
    %cst_327 = arith.constant 2.000000e+01 : f32
    %687 = vector.broadcast %cst_327 : f32 to vector<8x1xf32>
    %688 = arith.cmpf oge, %686, %687 : vector<8x1xf32>
    %c0_i32_328 = arith.constant 0 : i32
    %689 = arith.cmpi sgt, %c3_i32, %c0_i32_328 : i32
    %cst_329 = arith.constant dense<true> : vector<8x1xi1>
    %690 = arith.xori %688, %cst_329 : vector<8x1xi1>
    %691 = vector.broadcast %689 : i1 to vector<8x1xi1>
    %692 = arith.andi %691, %690 : vector<8x1xi1>
    %693 = arith.andi %667, %692 : vector<8x1xi1>
    %c0_i32_330 = arith.constant 0 : i32
    %694 = vector.broadcast %c0_i32_330 : i32 to vector<8x128xi32>
    %695 = arith.cmpi eq, %0, %694 : vector<8x128xi32>
    %cst_331 = arith.constant 1.000000e+00 : f32
    %cst_332 = arith.constant 0.000000e+00 : f32
    %696 = vector.broadcast %cst_331 : f32 to vector<8x1xf32>
    %697 = vector.broadcast %cst_332 : f32 to vector<8x1xf32>
    %698 = arith.select %693, %696, %697 : vector<8x1xi1>, vector<8x1xf32>
    %699 = vector.shape_cast %698 : vector<8x1xf32> to vector<8x1xf32>
    %700 = vector.broadcast %699 : vector<8x1xf32> to vector<8x128xf32>
    %701 = arith.select %695, %700, %684 : vector<8x128xi1>, vector<8x128xf32>
    %702 = vector.shape_cast %647 : vector<8x128xf32> to vector<8x1x128xf32>
    %c0_333 = arith.constant 0 : index
    %c0_334 = arith.constant 0 : index
    %c0_335 = arith.constant 0 : index
    %703 = vector.load %arg1[%c0_333, %c0_334, %c0_335] : memref<8x32x128xf32, #tpu.memory_space<vmem>>, vector<8x32x128xf32>
    %704 = vector.broadcast %702 : vector<8x1x128xf32> to vector<8x32x128xf32>
    %705 = arith.mulf %704, %703 : vector<8x32x128xf32>
    %cst_336 = arith.constant dense<0.000000e+00> : vector<8x32xf32>
    %706 = vector.multi_reduction <add>, %705, %cst_336 [2] : vector<8x32x128xf32> to vector<8x32xf32>
    %c4_i32 = arith.constant 4 : i32
    %c0_337 = arith.constant 0 : index
    %c0_338 = arith.constant 0 : index
    %c0_339 = arith.constant 0 : index
    %707 = vector.load %arg14[%c0_337, %c0_338, %c0_339] : memref<8x32x128xf32, #tpu.memory_space<vmem>>, vector<8x32x128xf32>
    %c0_340 = arith.constant 0 : index
    %c0_341 = arith.constant 0 : index
    %c0_342 = arith.constant 0 : index
    %708 = vector.load %arg15[%c0_340, %c0_341, %c0_342] : memref<8x32x128xf32, #tpu.memory_space<vmem>>, vector<8x32x128xf32>
    %c0_343 = arith.constant 0 : index
    %c0_344 = arith.constant 0 : index
    %c0_345 = arith.constant 0 : index
    %709 = vector.load %arg16[%c0_343, %c0_344, %c0_345] : memref<8x32x128xf32, #tpu.memory_space<vmem>>, vector<8x32x128xf32>
    %cst_346 = arith.constant dense<0.000000e+00> : vector<8x64xf32>
    %710 = tpu.matmul %570, %124, %cst_346 {dimension_numbers = #tpu.dot_dimension_numbers<[1], [0], [0], [1], [0, 0, 1, 1], [], []>} : vector<8x32xf32>, vector<32x64xf32>, vector<8x64xf32> -> vector<8x64xf32>
    %711 = vector.extract_strided_slice %710 {offsets = [0, 32], sizes = [8, 32], strides = [1, 1]} : vector<8x64xf32> to vector<8x32xf32>
    %cst_347 = arith.constant dense<0.000000e+00> : vector<8x32xf32>
    %712 = tpu.matmul %706, %123, %cst_347 {dimension_numbers = #tpu.dot_dimension_numbers<[1], [0], [0], [1], [0, 0, 1, 1], [], []>} : vector<8x32xf32>, vector<32x32xf32>, vector<8x32xf32> -> vector<8x32xf32>
    %713 = vector.extract_strided_slice %710 {offsets = [0, 0], sizes = [8, 32], strides = [1, 1]} : vector<8x64xf32> to vector<8x32xf32>
    %714 = arith.addf %712, %713 : vector<8x32xf32>
    %715 = vector.broadcast %670 : vector<8x1xf32> to vector<8x32xf32>
    %716 = vector.broadcast %125 : vector<1x32xf32> to vector<8x32xf32>
    %717 = arith.mulf %715, %716 : vector<8x32xf32>
    %718 = arith.addf %714, %717 : vector<8x32xf32>
    %719 = vector.shape_cast %718 : vector<8x32xf32> to vector<8x1x32xf32>
    %720 = vector.shape_cast %122 : vector<8x32xf32> to vector<1x8x32xf32>
    %721 = vector.broadcast %719 : vector<8x1x32xf32> to vector<8x8x32xf32>
    %722 = vector.broadcast %720 : vector<1x8x32xf32> to vector<8x8x32xf32>
    %723 = arith.mulf %721, %722 : vector<8x8x32xf32>
    "tpu.trace_start"() <{level = 10 : i32, message = "bhd,bdn->bhn"}> : () -> ()
    %cst_348 = arith.constant dense<0.000000e+00> : vector<8x8x128xf32>
    %724 = tpu.matmul %723, %707, %cst_348 {dimension_numbers = #tpu.dot_dimension_numbers<[2], [1], [1], [2], [0, 0, 0, 1, 1, 2], [0], [0]>} : vector<8x8x32xf32>, vector<8x32x128xf32>, vector<8x8x128xf32> -> vector<8x8x128xf32>
    "tpu.trace_stop"() : () -> ()
    %725 = vector.broadcast %cst_117 : f32 to vector<8x8x128xf32>
    %726 = arith.mulf %725, %724 : vector<8x8x128xf32>
    %727 = vector.shape_cast %701 : vector<8x128xf32> to vector<8x1x128xf32>
    %cst_349 = arith.constant 0.000000e+00 : f32
    %728 = vector.broadcast %cst_349 : f32 to vector<8x1x128xf32>
    %729 = arith.cmpf one, %727, %728 : vector<8x1x128xf32>
    %730 = vector.shape_cast %729 : vector<8x1x128xi1> to vector<8x1x128xi1>
    %731 = vector.broadcast %730 : vector<8x1x128xi1> to vector<8x8x128xi1>
    %732 = vector.broadcast %cst_118 : f32 to vector<8x8x128xf32>
    %733 = arith.select %731, %732, %726 : vector<8x8x128xi1>, vector<8x8x128xf32>
    %cst_350 = arith.constant dense<0xFF800000> : vector<8x8xf32>
    %734 = vector.multi_reduction <maximumf>, %733, %cst_350 [2] : vector<8x8x128xf32> to vector<8x8xf32>
    %cst_351 = arith.constant 0xFF800000 : f32
    %735 = vector.broadcast %cst_351 : f32 to vector<8x8xf32>
    %736 = arith.maximumf %735, %734 : vector<8x8xf32>
    %737 = vector.shape_cast %736 : vector<8x8xf32> to vector<8x8x1xf32>
    %738 = vector.broadcast %737 : vector<8x8x1xf32> to vector<8x8x128xf32>
    %739 = arith.subf %733, %738 : vector<8x8x128xf32>
    %740 = math.exp %739 : vector<8x8x128xf32>
    %cst_352 = arith.constant dense<0.000000e+00> : vector<8x8xf32>
    %741 = vector.multi_reduction <add>, %740, %cst_352 [2] : vector<8x8x128xf32> to vector<8x8xf32>
    %742 = vector.shape_cast %741 : vector<8x8xf32> to vector<8x8x1xf32>
    %743 = vector.broadcast %742 : vector<8x8x1xf32> to vector<8x8x128xf32>
    %744 = arith.divf %740, %743 : vector<8x8x128xf32>
    "tpu.trace_start"() <{level = 10 : i32, message = "bhn,bdn->bhd"}> : () -> ()
    %cst_353 = arith.constant dense<0.000000e+00> : vector<8x8x32xf32>
    %745 = tpu.matmul %744, %708, %cst_353 {dimension_numbers = #tpu.dot_dimension_numbers<[2], [2], [1], [1], [0, 0, 0, 1, 1, 1], [0], [0]>} : vector<8x8x128xf32>, vector<8x32x128xf32>, vector<8x8x32xf32> -> vector<8x8x32xf32>
    "tpu.trace_stop"() : () -> ()
    %746 = vector.shape_cast %122 : vector<8x32xf32> to vector<1x8x32xf32>
    %747 = vector.broadcast %746 : vector<1x8x32xf32> to vector<8x8x32xf32>
    %748 = arith.mulf %745, %747 : vector<8x8x32xf32>
    "tpu.trace_start"() <{level = 10 : i32, message = "bhd,bdn->bhn"}> : () -> ()
    %cst_354 = arith.constant dense<0.000000e+00> : vector<8x8x128xf32>
    %749 = tpu.matmul %748, %709, %cst_354 {dimension_numbers = #tpu.dot_dimension_numbers<[2], [1], [1], [2], [0, 0, 0, 1, 1, 2], [0], [0]>} : vector<8x8x32xf32>, vector<8x32x128xf32>, vector<8x8x128xf32> -> vector<8x8x128xf32>
    "tpu.trace_stop"() : () -> ()
    %cst_355 = arith.constant dense<0.000000e+00> : vector<8x128xf32>
    %750 = vector.multi_reduction <add>, %749, %cst_355 [1] : vector<8x8x128xf32> to vector<8x128xf32>
    %751 = vector.broadcast %cst_119 : f32 to vector<8x128xf32>
    %752 = arith.mulf %751, %750 : vector<8x128xf32>
    %cst_356 = arith.constant 0.000000e+00 : f32
    %753 = vector.broadcast %cst_356 : f32 to vector<8x128xf32>
    %754 = arith.cmpf one, %701, %753 : vector<8x128xf32>
    %755 = math.tanh %752 : vector<8x128xf32>
    %cst_357 = arith.constant 1.000000e+01 : f32
    %756 = vector.broadcast %cst_357 : f32 to vector<8x128xf32>
    %757 = arith.mulf %755, %756 : vector<8x128xf32>
    %758 = vector.broadcast %cst_118 : f32 to vector<8x128xf32>
    %759 = arith.select %754, %758, %757 : vector<8x128xi1>, vector<8x128xf32>
    %cst_358 = arith.constant dense<0xFF800000> : vector<8xf32>
    %760 = vector.multi_reduction <maximumf>, %759, %cst_358 [1] : vector<8x128xf32> to vector<8xf32>
    %cst_359 = arith.constant 0xFF800000 : f32
    %761 = vector.broadcast %cst_359 : f32 to vector<8xf32>
    %762 = arith.maximumf %761, %760 : vector<8xf32>
    %763 = vector.shape_cast %762 : vector<8xf32> to vector<8x1xf32>
    %764 = vector.broadcast %763 : vector<8x1xf32> to vector<8x128xf32>
    %765 = arith.subf %759, %764 : vector<8x128xf32>
    %766 = math.exp %765 : vector<8x128xf32>
    %cst_360 = arith.constant dense<0.000000e+00> : vector<8xf32>
    %767 = vector.multi_reduction <add>, %766, %cst_360 [1] : vector<8x128xf32> to vector<8xf32>
    %768 = vector.shape_cast %767 : vector<8xf32> to vector<8x1xf32>
    %769 = vector.broadcast %768 : vector<8x1xf32> to vector<8x128xf32>
    %770 = arith.divf %766, %769 : vector<8x128xf32>
    %771 = arith.index_cast %c4_i32 : i32 to index
    %c0_361 = arith.constant 0 : index
    %c0_362 = arith.constant 0 : index
    %772 = vector.load %arg11[%771, %c0_361, %c0_362] : memref<6x8x128xf32, #tpu.memory_space<vmem>>, vector<1x8x128xf32>
    %773 = vector.shape_cast %772 : vector<1x8x128xf32> to vector<8x128xf32>
    %774 = vector.shape_cast %770 : vector<8x128xf32> to vector<1x8x128xf32>
    tpu.vector_store %arg11[%771, %c0_361, %c0_362], %774 {strides = array<i32>} : memref<6x8x128xf32, #tpu.memory_space<vmem>>, vector<1x8x128xf32>,
    %cst_363 = arith.constant dense<0xFF800000> : vector<8xf32>
    %775 = vector.multi_reduction <maximumf>, %770, %cst_363 [1] : vector<8x128xf32> to vector<8xf32>
    %776 = vector.shape_cast %775 : vector<8xf32> to vector<8x1xf32>
    %777 = vector.broadcast %776 : vector<8x1xf32> to vector<8x128xf32>
    %778 = arith.cmpf oge, %770, %777 : vector<8x128xf32>
    %779 = arith.sitofp %0 : vector<8x128xi32> to vector<8x128xf32>
    %cst_364 = arith.constant 1.280000e+02 : f32
    %780 = vector.broadcast %cst_364 : f32 to vector<8x128xf32>
    %781 = arith.select %778, %779, %780 : vector<8x128xi1>, vector<8x128xf32>
    %cst_365 = arith.constant dense<0x7F800000> : vector<8xf32>
    %782 = vector.multi_reduction <minimumf>, %781, %cst_365 [1] : vector<8x128xf32> to vector<8xf32>
    %783 = vector.shape_cast %782 : vector<8xf32> to vector<8x1xf32>
    %784 = arith.fptosi %783 : vector<8x1xf32> to vector<8x1xi32>
    %785 = vector.broadcast %784 : vector<8x1xi32> to vector<8x128xi32>
    %786 = arith.cmpi eq, %0, %785 : vector<8x128xi32>
    %787 = arith.extui %786 : vector<8x128xi1> to vector<8x128xi32>
    %788 = arith.sitofp %787 : vector<8x128xi32> to vector<8x128xf32>
    %cst_366 = arith.constant dense<0.000000e+00> : vector<8xf32>
    %789 = vector.multi_reduction <add>, %675, %cst_366 [1] : vector<8x128xf32> to vector<8xf32>
    %790 = vector.shape_cast %789 : vector<8xf32> to vector<8x1xf32>
    %cst_367 = arith.constant 2.000000e+01 : f32
    %791 = vector.broadcast %cst_367 : f32 to vector<8x1xf32>
    %792 = arith.cmpf oge, %790, %791 : vector<8x1xf32>
    %793 = math.log %776 : vector<8x1xf32>
    %cst_368 = arith.constant 0.000000e+00 : f32
    %794 = vector.broadcast %cst_368 : f32 to vector<8x1xf32>
    %795 = arith.select %792, %794, %793 : vector<8x1xi1>, vector<8x1xf32>
    %796 = arith.index_cast %c4_i32 : i32 to index
    %c0_369 = arith.constant 0 : index
    %c0_370 = arith.constant 0 : index
    %797 = vector.load %arg12[%796, %c0_369, %c0_370] : memref<6x8x1xi32, #tpu.memory_space<vmem>>, vector<1x8x1xi32>
    %798 = vector.shape_cast %797 : vector<1x8x1xi32> to vector<8x1xi32>
    %799 = vector.shape_cast %784 : vector<8x1xi32> to vector<1x8x1xi32>
    tpu.vector_store %arg12[%796, %c0_369, %c0_370], %799 {strides = array<i32>} : memref<6x8x1xi32, #tpu.memory_space<vmem>>, vector<1x8x1xi32>,
    %800 = arith.index_cast %c4_i32 : i32 to index
    %c0_371 = arith.constant 0 : index
    %c0_372 = arith.constant 0 : index
    %801 = vector.load %arg13[%800, %c0_371, %c0_372] : memref<6x8x1xf32, #tpu.memory_space<vmem>>, vector<1x8x1xf32>
    %802 = vector.shape_cast %801 : vector<1x8x1xf32> to vector<8x1xf32>
    %803 = vector.shape_cast %795 : vector<8x1xf32> to vector<1x8x1xf32>
    tpu.vector_store %arg13[%800, %c0_371, %c0_372], %803 {strides = array<i32>} : memref<6x8x1xf32, #tpu.memory_space<vmem>>, vector<1x8x1xf32>,
    %804 = arith.mulf %788, %126 : vector<8x128xf32>
    %cst_373 = arith.constant dense<0.000000e+00> : vector<8xf32>
    %805 = vector.multi_reduction <add>, %804, %cst_373 [1] : vector<8x128xf32> to vector<8xf32>
    %806 = vector.shape_cast %805 : vector<8xf32> to vector<8x1xf32>
    %c0_i32_374 = arith.constant 0 : i32
    %807 = vector.broadcast %c0_i32_374 : i32 to vector<8x1xi32>
    %808 = arith.cmpi eq, %784, %807 : vector<8x1xi32>
    %809 = arith.subf %670, %806 : vector<8x1xf32>
    %cst_375 = arith.constant 1.000000e+00 : f32
    %810 = vector.broadcast %cst_375 : f32 to vector<8x1xf32>
    %811 = arith.select %808, %810, %809 : vector<8x1xi1>, vector<8x1xf32>
    %812 = arith.maximumf %675, %788 : vector<8x128xf32>
    %c0_i32_376 = arith.constant 0 : i32
    %813 = vector.broadcast %c0_i32_376 : i32 to vector<8x128xi32>
    %814 = arith.cmpi eq, %0, %813 : vector<8x128xi32>
    %cst_377 = arith.constant 0.000000e+00 : f32
    %815 = vector.broadcast %cst_377 : f32 to vector<8x128xf32>
    %816 = arith.select %814, %815, %812 : vector<8x128xi1>, vector<8x128xf32>
    %817 = vector.broadcast %811 : vector<8x1xf32> to vector<8x128xf32>
    %818 = arith.cmpf ogt, %126, %817 : vector<8x128xf32>
    %819 = arith.extui %818 : vector<8x128xi1> to vector<8x128xi32>
    %820 = arith.sitofp %819 : vector<8x128xi32> to vector<8x128xf32>
    %821 = arith.addf %816, %820 : vector<8x128xf32>
    %cst_378 = arith.constant 0.000000e+00 : f32
    %cst_379 = arith.constant 1.000000e+00 : f32
    %822 = vector.broadcast %cst_378 : f32 to vector<8x128xf32>
    %823 = arith.maximumf %822, %821 : vector<8x128xf32>
    %824 = vector.broadcast %cst_379 : f32 to vector<8x128xf32>
    %825 = arith.minimumf %824, %823 : vector<8x128xf32>
    %cst_380 = arith.constant dense<0.000000e+00> : vector<8xf32>
    %826 = vector.multi_reduction <add>, %816, %cst_380 [1] : vector<8x128xf32> to vector<8xf32>
    %827 = vector.shape_cast %826 : vector<8xf32> to vector<8x1xf32>
    %cst_381 = arith.constant 2.000000e+01 : f32
    %828 = vector.broadcast %cst_381 : f32 to vector<8x1xf32>
    %829 = arith.cmpf oge, %827, %828 : vector<8x1xf32>
    %c0_i32_382 = arith.constant 0 : i32
    %830 = arith.cmpi sgt, %c4_i32, %c0_i32_382 : i32
    %cst_383 = arith.constant dense<true> : vector<8x1xi1>
    %831 = arith.xori %829, %cst_383 : vector<8x1xi1>
    %832 = vector.broadcast %830 : i1 to vector<8x1xi1>
    %833 = arith.andi %832, %831 : vector<8x1xi1>
    %834 = arith.andi %808, %833 : vector<8x1xi1>
    %c0_i32_384 = arith.constant 0 : i32
    %835 = vector.broadcast %c0_i32_384 : i32 to vector<8x128xi32>
    %836 = arith.cmpi eq, %0, %835 : vector<8x128xi32>
    %cst_385 = arith.constant 1.000000e+00 : f32
    %cst_386 = arith.constant 0.000000e+00 : f32
    %837 = vector.broadcast %cst_385 : f32 to vector<8x1xf32>
    %838 = vector.broadcast %cst_386 : f32 to vector<8x1xf32>
    %839 = arith.select %834, %837, %838 : vector<8x1xi1>, vector<8x1xf32>
    %840 = vector.shape_cast %839 : vector<8x1xf32> to vector<8x1xf32>
    %841 = vector.broadcast %840 : vector<8x1xf32> to vector<8x128xf32>
    %842 = arith.select %836, %841, %825 : vector<8x128xi1>, vector<8x128xf32>
    %843 = vector.shape_cast %788 : vector<8x128xf32> to vector<8x1x128xf32>
    %c0_387 = arith.constant 0 : index
    %c0_388 = arith.constant 0 : index
    %c0_389 = arith.constant 0 : index
    %844 = vector.load %arg1[%c0_387, %c0_388, %c0_389] : memref<8x32x128xf32, #tpu.memory_space<vmem>>, vector<8x32x128xf32>
    %845 = vector.broadcast %843 : vector<8x1x128xf32> to vector<8x32x128xf32>
    %846 = arith.mulf %845, %844 : vector<8x32x128xf32>
    %cst_390 = arith.constant dense<0.000000e+00> : vector<8x32xf32>
    %847 = vector.multi_reduction <add>, %846, %cst_390 [2] : vector<8x32x128xf32> to vector<8x32xf32>
    %c5_i32 = arith.constant 5 : i32
    %c0_391 = arith.constant 0 : index
    %c0_392 = arith.constant 0 : index
    %c0_393 = arith.constant 0 : index
    %848 = vector.load %arg14[%c0_391, %c0_392, %c0_393] : memref<8x32x128xf32, #tpu.memory_space<vmem>>, vector<8x32x128xf32>
    %c0_394 = arith.constant 0 : index
    %c0_395 = arith.constant 0 : index
    %c0_396 = arith.constant 0 : index
    %849 = vector.load %arg15[%c0_394, %c0_395, %c0_396] : memref<8x32x128xf32, #tpu.memory_space<vmem>>, vector<8x32x128xf32>
    %c0_397 = arith.constant 0 : index
    %c0_398 = arith.constant 0 : index
    %c0_399 = arith.constant 0 : index
    %850 = vector.load %arg16[%c0_397, %c0_398, %c0_399] : memref<8x32x128xf32, #tpu.memory_space<vmem>>, vector<8x32x128xf32>
    %cst_400 = arith.constant dense<0.000000e+00> : vector<8x64xf32>
    %851 = tpu.matmul %711, %124, %cst_400 {dimension_numbers = #tpu.dot_dimension_numbers<[1], [0], [0], [1], [0, 0, 1, 1], [], []>} : vector<8x32xf32>, vector<32x64xf32>, vector<8x64xf32> -> vector<8x64xf32>
    %852 = vector.extract_strided_slice %851 {offsets = [0, 32], sizes = [8, 32], strides = [1, 1]} : vector<8x64xf32> to vector<8x32xf32>
    %cst_401 = arith.constant dense<0.000000e+00> : vector<8x32xf32>
    %853 = tpu.matmul %847, %123, %cst_401 {dimension_numbers = #tpu.dot_dimension_numbers<[1], [0], [0], [1], [0, 0, 1, 1], [], []>} : vector<8x32xf32>, vector<32x32xf32>, vector<8x32xf32> -> vector<8x32xf32>
    %854 = vector.extract_strided_slice %851 {offsets = [0, 0], sizes = [8, 32], strides = [1, 1]} : vector<8x64xf32> to vector<8x32xf32>
    %855 = arith.addf %853, %854 : vector<8x32xf32>
    %856 = vector.broadcast %811 : vector<8x1xf32> to vector<8x32xf32>
    %857 = vector.broadcast %125 : vector<1x32xf32> to vector<8x32xf32>
    %858 = arith.mulf %856, %857 : vector<8x32xf32>
    %859 = arith.addf %855, %858 : vector<8x32xf32>
    %860 = vector.shape_cast %859 : vector<8x32xf32> to vector<8x1x32xf32>
    %861 = vector.shape_cast %122 : vector<8x32xf32> to vector<1x8x32xf32>
    %862 = vector.broadcast %860 : vector<8x1x32xf32> to vector<8x8x32xf32>
    %863 = vector.broadcast %861 : vector<1x8x32xf32> to vector<8x8x32xf32>
    %864 = arith.mulf %862, %863 : vector<8x8x32xf32>
    "tpu.trace_start"() <{level = 10 : i32, message = "bhd,bdn->bhn"}> : () -> ()
    %cst_402 = arith.constant dense<0.000000e+00> : vector<8x8x128xf32>
    %865 = tpu.matmul %864, %848, %cst_402 {dimension_numbers = #tpu.dot_dimension_numbers<[2], [1], [1], [2], [0, 0, 0, 1, 1, 2], [0], [0]>} : vector<8x8x32xf32>, vector<8x32x128xf32>, vector<8x8x128xf32> -> vector<8x8x128xf32>
    "tpu.trace_stop"() : () -> ()
    %866 = vector.broadcast %cst_117 : f32 to vector<8x8x128xf32>
    %867 = arith.mulf %866, %865 : vector<8x8x128xf32>
    %868 = vector.shape_cast %842 : vector<8x128xf32> to vector<8x1x128xf32>
    %cst_403 = arith.constant 0.000000e+00 : f32
    %869 = vector.broadcast %cst_403 : f32 to vector<8x1x128xf32>
    %870 = arith.cmpf one, %868, %869 : vector<8x1x128xf32>
    %871 = vector.shape_cast %870 : vector<8x1x128xi1> to vector<8x1x128xi1>
    %872 = vector.broadcast %871 : vector<8x1x128xi1> to vector<8x8x128xi1>
    %873 = vector.broadcast %cst_118 : f32 to vector<8x8x128xf32>
    %874 = arith.select %872, %873, %867 : vector<8x8x128xi1>, vector<8x8x128xf32>
    %cst_404 = arith.constant dense<0xFF800000> : vector<8x8xf32>
    %875 = vector.multi_reduction <maximumf>, %874, %cst_404 [2] : vector<8x8x128xf32> to vector<8x8xf32>
    %cst_405 = arith.constant 0xFF800000 : f32
    %876 = vector.broadcast %cst_405 : f32 to vector<8x8xf32>
    %877 = arith.maximumf %876, %875 : vector<8x8xf32>
    %878 = vector.shape_cast %877 : vector<8x8xf32> to vector<8x8x1xf32>
    %879 = vector.broadcast %878 : vector<8x8x1xf32> to vector<8x8x128xf32>
    %880 = arith.subf %874, %879 : vector<8x8x128xf32>
    %881 = math.exp %880 : vector<8x8x128xf32>
    %cst_406 = arith.constant dense<0.000000e+00> : vector<8x8xf32>
    %882 = vector.multi_reduction <add>, %881, %cst_406 [2] : vector<8x8x128xf32> to vector<8x8xf32>
    %883 = vector.shape_cast %882 : vector<8x8xf32> to vector<8x8x1xf32>
    %884 = vector.broadcast %883 : vector<8x8x1xf32> to vector<8x8x128xf32>
    %885 = arith.divf %881, %884 : vector<8x8x128xf32>
    "tpu.trace_start"() <{level = 10 : i32, message = "bhn,bdn->bhd"}> : () -> ()
    %cst_407 = arith.constant dense<0.000000e+00> : vector<8x8x32xf32>
    %886 = tpu.matmul %885, %849, %cst_407 {dimension_numbers = #tpu.dot_dimension_numbers<[2], [2], [1], [1], [0, 0, 0, 1, 1, 1], [0], [0]>} : vector<8x8x128xf32>, vector<8x32x128xf32>, vector<8x8x32xf32> -> vector<8x8x32xf32>
    "tpu.trace_stop"() : () -> ()
    %887 = vector.shape_cast %122 : vector<8x32xf32> to vector<1x8x32xf32>
    %888 = vector.broadcast %887 : vector<1x8x32xf32> to vector<8x8x32xf32>
    %889 = arith.mulf %886, %888 : vector<8x8x32xf32>
    "tpu.trace_start"() <{level = 10 : i32, message = "bhd,bdn->bhn"}> : () -> ()
    %cst_408 = arith.constant dense<0.000000e+00> : vector<8x8x128xf32>
    %890 = tpu.matmul %889, %850, %cst_408 {dimension_numbers = #tpu.dot_dimension_numbers<[2], [1], [1], [2], [0, 0, 0, 1, 1, 2], [0], [0]>} : vector<8x8x32xf32>, vector<8x32x128xf32>, vector<8x8x128xf32> -> vector<8x8x128xf32>
    "tpu.trace_stop"() : () -> ()
    %cst_409 = arith.constant dense<0.000000e+00> : vector<8x128xf32>
    %891 = vector.multi_reduction <add>, %890, %cst_409 [1] : vector<8x8x128xf32> to vector<8x128xf32>
    %892 = vector.broadcast %cst_119 : f32 to vector<8x128xf32>
    %893 = arith.mulf %892, %891 : vector<8x128xf32>
    %cst_410 = arith.constant 0.000000e+00 : f32
    %894 = vector.broadcast %cst_410 : f32 to vector<8x128xf32>
    %895 = arith.cmpf one, %842, %894 : vector<8x128xf32>
    %896 = math.tanh %893 : vector<8x128xf32>
    %cst_411 = arith.constant 1.000000e+01 : f32
    %897 = vector.broadcast %cst_411 : f32 to vector<8x128xf32>
    %898 = arith.mulf %896, %897 : vector<8x128xf32>
    %899 = vector.broadcast %cst_118 : f32 to vector<8x128xf32>
    %900 = arith.select %895, %899, %898 : vector<8x128xi1>, vector<8x128xf32>
    %cst_412 = arith.constant dense<0xFF800000> : vector<8xf32>
    %901 = vector.multi_reduction <maximumf>, %900, %cst_412 [1] : vector<8x128xf32> to vector<8xf32>
    %cst_413 = arith.constant 0xFF800000 : f32
    %902 = vector.broadcast %cst_413 : f32 to vector<8xf32>
    %903 = arith.maximumf %902, %901 : vector<8xf32>
    %904 = vector.shape_cast %903 : vector<8xf32> to vector<8x1xf32>
    %905 = vector.broadcast %904 : vector<8x1xf32> to vector<8x128xf32>
    %906 = arith.subf %900, %905 : vector<8x128xf32>
    %907 = math.exp %906 : vector<8x128xf32>
    %cst_414 = arith.constant dense<0.000000e+00> : vector<8xf32>
    %908 = vector.multi_reduction <add>, %907, %cst_414 [1] : vector<8x128xf32> to vector<8xf32>
    %909 = vector.shape_cast %908 : vector<8xf32> to vector<8x1xf32>
    %910 = vector.broadcast %909 : vector<8x1xf32> to vector<8x128xf32>
    %911 = arith.divf %907, %910 : vector<8x128xf32>
    %912 = arith.index_cast %c5_i32 : i32 to index
    %c0_415 = arith.constant 0 : index
    %c0_416 = arith.constant 0 : index
    %913 = vector.load %arg11[%912, %c0_415, %c0_416] : memref<6x8x128xf32, #tpu.memory_space<vmem>>, vector<1x8x128xf32>
    %914 = vector.shape_cast %913 : vector<1x8x128xf32> to vector<8x128xf32>
    %915 = vector.shape_cast %911 : vector<8x128xf32> to vector<1x8x128xf32>
    tpu.vector_store %arg11[%912, %c0_415, %c0_416], %915 {strides = array<i32>} : memref<6x8x128xf32, #tpu.memory_space<vmem>>, vector<1x8x128xf32>,
    %cst_417 = arith.constant dense<0xFF800000> : vector<8xf32>
    %916 = vector.multi_reduction <maximumf>, %911, %cst_417 [1] : vector<8x128xf32> to vector<8xf32>
    %917 = vector.shape_cast %916 : vector<8xf32> to vector<8x1xf32>
    %918 = vector.broadcast %917 : vector<8x1xf32> to vector<8x128xf32>
    %919 = arith.cmpf oge, %911, %918 : vector<8x128xf32>
    %920 = arith.sitofp %0 : vector<8x128xi32> to vector<8x128xf32>
    %cst_418 = arith.constant 1.280000e+02 : f32
    %921 = vector.broadcast %cst_418 : f32 to vector<8x128xf32>
    %922 = arith.select %919, %920, %921 : vector<8x128xi1>, vector<8x128xf32>
    %cst_419 = arith.constant dense<0x7F800000> : vector<8xf32>
    %923 = vector.multi_reduction <minimumf>, %922, %cst_419 [1] : vector<8x128xf32> to vector<8xf32>
    %924 = vector.shape_cast %923 : vector<8xf32> to vector<8x1xf32>
    %925 = arith.fptosi %924 : vector<8x1xf32> to vector<8x1xi32>
    %926 = vector.broadcast %925 : vector<8x1xi32> to vector<8x128xi32>
    %927 = arith.cmpi eq, %0, %926 : vector<8x128xi32>
    %928 = arith.extui %927 : vector<8x128xi1> to vector<8x128xi32>
    %929 = arith.sitofp %928 : vector<8x128xi32> to vector<8x128xf32>
    %cst_420 = arith.constant dense<0.000000e+00> : vector<8xf32>
    %930 = vector.multi_reduction <add>, %816, %cst_420 [1] : vector<8x128xf32> to vector<8xf32>
    %931 = vector.shape_cast %930 : vector<8xf32> to vector<8x1xf32>
    %cst_421 = arith.constant 2.000000e+01 : f32
    %932 = vector.broadcast %cst_421 : f32 to vector<8x1xf32>
    %933 = arith.cmpf oge, %931, %932 : vector<8x1xf32>
    %934 = math.log %917 : vector<8x1xf32>
    %cst_422 = arith.constant 0.000000e+00 : f32
    %935 = vector.broadcast %cst_422 : f32 to vector<8x1xf32>
    %936 = arith.select %933, %935, %934 : vector<8x1xi1>, vector<8x1xf32>
    %937 = arith.index_cast %c5_i32 : i32 to index
    %c0_423 = arith.constant 0 : index
    %c0_424 = arith.constant 0 : index
    %938 = vector.load %arg12[%937, %c0_423, %c0_424] : memref<6x8x1xi32, #tpu.memory_space<vmem>>, vector<1x8x1xi32>
    %939 = vector.shape_cast %938 : vector<1x8x1xi32> to vector<8x1xi32>
    %940 = vector.shape_cast %925 : vector<8x1xi32> to vector<1x8x1xi32>
    tpu.vector_store %arg12[%937, %c0_423, %c0_424], %940 {strides = array<i32>} : memref<6x8x1xi32, #tpu.memory_space<vmem>>, vector<1x8x1xi32>,
    %941 = arith.index_cast %c5_i32 : i32 to index
    %c0_425 = arith.constant 0 : index
    %c0_426 = arith.constant 0 : index
    %942 = vector.load %arg13[%941, %c0_425, %c0_426] : memref<6x8x1xf32, #tpu.memory_space<vmem>>, vector<1x8x1xf32>
    %943 = vector.shape_cast %942 : vector<1x8x1xf32> to vector<8x1xf32>
    %944 = vector.shape_cast %936 : vector<8x1xf32> to vector<1x8x1xf32>
    tpu.vector_store %arg13[%941, %c0_425, %c0_426], %944 {strides = array<i32>} : memref<6x8x1xf32, #tpu.memory_space<vmem>>, vector<1x8x1xf32>,
    %945 = arith.mulf %929, %126 : vector<8x128xf32>
    %cst_427 = arith.constant dense<0.000000e+00> : vector<8xf32>
    %946 = vector.multi_reduction <add>, %945, %cst_427 [1] : vector<8x128xf32> to vector<8xf32>
    %947 = vector.shape_cast %946 : vector<8xf32> to vector<8x1xf32>
    %c0_i32_428 = arith.constant 0 : i32
    %948 = vector.broadcast %c0_i32_428 : i32 to vector<8x1xi32>
    %949 = arith.cmpi eq, %925, %948 : vector<8x1xi32>
    %950 = arith.subf %811, %947 : vector<8x1xf32>
    %cst_429 = arith.constant 1.000000e+00 : f32
    %951 = vector.broadcast %cst_429 : f32 to vector<8x1xf32>
    %952 = arith.select %949, %951, %950 : vector<8x1xi1>, vector<8x1xf32>
    %953 = arith.maximumf %816, %929 : vector<8x128xf32>
    %c0_i32_430 = arith.constant 0 : i32
    %954 = vector.broadcast %c0_i32_430 : i32 to vector<8x128xi32>
    %955 = arith.cmpi eq, %0, %954 : vector<8x128xi32>
    %cst_431 = arith.constant 0.000000e+00 : f32
    %956 = vector.broadcast %cst_431 : f32 to vector<8x128xf32>
    %957 = arith.select %955, %956, %953 : vector<8x128xi1>, vector<8x128xf32>
    %958 = vector.broadcast %952 : vector<8x1xf32> to vector<8x128xf32>
    %959 = arith.cmpf ogt, %126, %958 : vector<8x128xf32>
    %960 = arith.extui %959 : vector<8x128xi1> to vector<8x128xi32>
    %961 = arith.sitofp %960 : vector<8x128xi32> to vector<8x128xf32>
    %962 = arith.addf %957, %961 : vector<8x128xf32>
    %cst_432 = arith.constant 0.000000e+00 : f32
    %cst_433 = arith.constant 1.000000e+00 : f32
    %963 = vector.broadcast %cst_432 : f32 to vector<8x128xf32>
    %964 = arith.maximumf %963, %962 : vector<8x128xf32>
    %965 = vector.broadcast %cst_433 : f32 to vector<8x128xf32>
    %966 = arith.minimumf %965, %964 : vector<8x128xf32>
    %cst_434 = arith.constant dense<0.000000e+00> : vector<8xf32>
    %967 = vector.multi_reduction <add>, %957, %cst_434 [1] : vector<8x128xf32> to vector<8xf32>
    %968 = vector.shape_cast %967 : vector<8xf32> to vector<8x1xf32>
    %cst_435 = arith.constant 2.000000e+01 : f32
    %969 = vector.broadcast %cst_435 : f32 to vector<8x1xf32>
    %970 = arith.cmpf oge, %968, %969 : vector<8x1xf32>
    %c0_i32_436 = arith.constant 0 : i32
    %971 = arith.cmpi sgt, %c5_i32, %c0_i32_436 : i32
    %cst_437 = arith.constant dense<true> : vector<8x1xi1>
    %972 = arith.xori %970, %cst_437 : vector<8x1xi1>
    %973 = vector.broadcast %971 : i1 to vector<8x1xi1>
    %974 = arith.andi %973, %972 : vector<8x1xi1>
    %975 = arith.andi %949, %974 : vector<8x1xi1>
    %c0_i32_438 = arith.constant 0 : i32
    %976 = vector.broadcast %c0_i32_438 : i32 to vector<8x128xi32>
    %977 = arith.cmpi eq, %0, %976 : vector<8x128xi32>
    %cst_439 = arith.constant 1.000000e+00 : f32
    %cst_440 = arith.constant 0.000000e+00 : f32
    %978 = vector.broadcast %cst_439 : f32 to vector<8x1xf32>
    %979 = vector.broadcast %cst_440 : f32 to vector<8x1xf32>
    %980 = arith.select %975, %978, %979 : vector<8x1xi1>, vector<8x1xf32>
    %981 = vector.shape_cast %980 : vector<8x1xf32> to vector<8x1xf32>
    %982 = vector.broadcast %981 : vector<8x1xf32> to vector<8x128xf32>
    %983 = arith.select %977, %982, %966 : vector<8x128xi1>, vector<8x128xf32>
    %984 = vector.shape_cast %929 : vector<8x128xf32> to vector<8x1x128xf32>
    %c0_441 = arith.constant 0 : index
    %c0_442 = arith.constant 0 : index
    %c0_443 = arith.constant 0 : index
    %985 = vector.load %arg1[%c0_441, %c0_442, %c0_443] : memref<8x32x128xf32, #tpu.memory_space<vmem>>, vector<8x32x128xf32>
    %986 = vector.broadcast %984 : vector<8x1x128xf32> to vector<8x32x128xf32>
    %987 = arith.mulf %986, %985 : vector<8x32x128xf32>
    %cst_444 = arith.constant dense<0.000000e+00> : vector<8x32xf32>
    %988 = vector.multi_reduction <add>, %987, %cst_444 [2] : vector<8x32x128xf32> to vector<8x32xf32>
    %c6_i32 = arith.constant 6 : i32
    return
  }
  func.func @transform_0(%arg0: i32) -> (i32, i32, i32) {
    %c0_i32 = arith.constant 0 : i32
    %c0_i32_0 = arith.constant 0 : i32
    %c0_i32_1 = arith.constant 0 : i32
    %c0_i32_2 = arith.constant 0 : i32
    return %c0_i32, %c0_i32_0, %c0_i32_1 : i32, i32, i32
  }
  func.func @transform_1(%arg0: i32) -> (i32, i32) {
    %c0_i32 = arith.constant 0 : i32
    %c0_i32_0 = arith.constant 0 : i32
    %c0_i32_1 = arith.constant 0 : i32
    return %c0_i32, %c0_i32_0 : i32, i32
  }
  func.func @transform_2(%arg0: i32) -> (i32, i32) {
    %c0_i32 = arith.constant 0 : i32
    %c0_i32_0 = arith.constant 0 : i32
    %c0_i32_1 = arith.constant 0 : i32
    return %c0_i32, %c0_i32_0 : i32, i32
  }
  func.func @transform_3(%arg0: i32) -> (i32, i32) {
    %c0_i32 = arith.constant 0 : i32
    %c0_i32_0 = arith.constant 0 : i32
    %c0_i32_1 = arith.constant 0 : i32
    return %c0_i32, %c0_i32_0 : i32, i32
  }
  func.func @transform_4(%arg0: i32) -> (i32, i32) {
    %c0_i32 = arith.constant 0 : i32
    %c0_i32_0 = arith.constant 0 : i32
    %c0_i32_1 = arith.constant 0 : i32
    return %c0_i32, %c0_i32_0 : i32, i32
  }
  func.func @transform_5(%arg0: i32) -> (i32, i32) {
    %c0_i32 = arith.constant 0 : i32
    %c0_i32_0 = arith.constant 0 : i32
    %c0_i32_1 = arith.constant 0 : i32
    return %c0_i32, %c0_i32_0 : i32, i32
  }
  func.func @transform_6(%arg0: i32) -> (i32, i32) {
    %c0_i32 = arith.constant 0 : i32
    %c0_i32_0 = arith.constant 0 : i32
    %c0_i32_1 = arith.constant 0 : i32
    return %c0_i32, %c0_i32_0 : i32, i32
  }
  func.func @transform_7(%arg0: i32) -> (i32, i32) {
    %c0_i32 = arith.constant 0 : i32
    %c0_i32_0 = arith.constant 0 : i32
    %c0_i32_1 = arith.constant 0 : i32
    return %c0_i32, %c0_i32_0 : i32, i32
  }
  func.func @transform_8(%arg0: i32) -> (i32, i32) {
    %c0_i32 = arith.constant 0 : i32
    %c0_i32_0 = arith.constant 0 : i32
    %c0_i32_1 = arith.constant 0 : i32
    return %c0_i32, %c0_i32_0 : i32, i32
  }
  func.func @transform_9(%arg0: i32) -> (i32, i32) {
    %c0_i32 = arith.constant 0 : i32
    %c0_i32_0 = arith.constant 0 : i32
    %c0_i32_1 = arith.constant 0 : i32
    return %c0_i32, %c0_i32_0 : i32, i32
  }
  func.func @transform_10(%arg0: i32) -> (i32, i32, i32) {
    %c0_i32 = arith.constant 0 : i32
    %c0_i32_0 = arith.constant 0 : i32
    %c0_i32_1 = arith.constant 0 : i32
    %c0_i32_2 = arith.constant 0 : i32
    return %c0_i32, %c0_i32_0, %c0_i32_1 : i32, i32, i32
  }
  func.func @transform_11(%arg0: i32) -> (i32, i32, i32) {
    %c0_i32 = arith.constant 0 : i32
    %c0_i32_0 = arith.constant 0 : i32
    %c0_i32_1 = arith.constant 0 : i32
    %c0_i32_2 = arith.constant 0 : i32
    return %c0_i32, %c0_i32_0, %c0_i32_1 : i32, i32, i32
  }
  func.func @transform_12(%arg0: i32) -> (i32, i32, i32) {
    %c0_i32 = arith.constant 0 : i32
    %c0_i32_0 = arith.constant 0 : i32
    %c0_i32_1 = arith.constant 0 : i32
    %c0_i32_2 = arith.constant 0 : i32
    return %c0_i32, %c0_i32_0, %c0_i32_1 : i32, i32, i32
  }
}

</mosaic_0001>

<bundles_post_ra>
// kernel: greedy_decode.1
= control target key start
LH: loop header
LB: loop body
LE: loop exit
PB: predicated region body
PF: predicated region fallthrough
CT: control target
= control target key end

     0   :  { %vm57_vm0 = vcmask 261120   ;;  %v25770_v12 = vmov 0   ;;  %s25757_s0 = inlined_call_operand.vmem [shape: f32[8,32,128], index: 0, kind: input, shape index: {}]   ;;  %s25758_s1 = inlined_call_operand.vmem [shape: f32[96,32], index: 1, kind: input, shape index: {}]   ;;  %s25759_s2 = inlined_call_operand.vmem [shape: f32[8,128], index: 2, kind: input, shape index: {}]   ;;  %s25760_s3 = inlined_call_operand.vmem [shape: f32[8,32], index: 3, kind: input, shape index: {}]   ;;  %s25761_s4 = inlined_call_operand.vmem [shape: f32[8,32], index: 4, kind: input, shape index: {}]   ;;  %s25762_s5 = inlined_call_operand.vmem [shape: f32[8,1], index: 5, kind: input, shape index: {}]   ;;  %s25763_s6 = inlined_call_operand.vmem [shape: f32[32,32], index: 6, kind: input, shape index: {}]   ;;  %s25764_s7 = inlined_call_operand.vmem [shape: f32[32,64], index: 7, kind: input, shape index: {}]   ;;  %s25765_s8 = inlined_call_operand.vmem [shape: f32[1,32], index: 8, kind: input, shape index: {}]   ;;  %s25766_s9 = inlined_call_operand.vmem [shape: f32[8,32], index: 9, kind: input, shape index: {}]   ;;  %s25767_s10 = inlined_call_operand.hbm [shape: f32[6,8,128], index: 10, kind: output, shape index: {0}]   ;;  %s25768_s11 = inlined_call_operand.vmem [shape: s32[6,8,1], index: 11, kind: output, shape index: {1}]   ;;  %s25769_s12 = inlined_call_operand.vmem [shape: f32[6,8,1], index: 12, kind: output, shape index: {2}]  }
   0x1   :  { %v53_v0 = vld [vmem:[%s25757_s0] sm:$0xff]  ;;  %v54_v1 = vld [vmem:[%s25757_s0 + $0x8] sm:$0xff]  ;;  %v55_v5 = vld [vmem:[%s25757_s0 + $0x10] sm:$0xff]  ;;  %21987 = vset.pattern.permute.xlu0 %v25770_v12  ;;  %21988 = vset.pattern.permute.xlu1 %v25770_v12 }
   0x2   :  { %v17891_v2 = vld [vmem:[%s25757_s0 + $0x20] sm:$0xff]  ;;  %v20965_v3 = vpack.c.bf16 %v54_v1, %v53_v0  ;;  %v17892_v4 = vld [vmem:[%s25757_s0 + $0x28] sm:$0xff]  ;;  %v56_v6 = vld [vmem:[%s25757_s0 + $0x18] sm:$0xff] }
   0x3   :  { %v20973_v7 = vpack.c.bf16 %v17892_v4, %v17891_v2  ;;  %v20969_v8 = vpack.c.bf16 %v56_v6, %v55_v5  ;;  %v17893_v9 = vld [vmem:[%s25757_s0 + $0x30] sm:$0xff]  ;;  %v17894_v10 = vld [vmem:[%s25757_s0 + $0x38] sm:$0xff]  ;;  %v22455_v11 = vld [vmem:[%s25758_s1] sm:$0xff] }
   0x4   :  { %20966 = vmatprep.subr.bf16.mxu0 %v20965_v3  ;;  %v20977_v13 = vpack.c.bf16 %v17894_v10, %v17893_v9  ;;  %19049 = vmatprep.mubr.msk.f32.mxu0 %vm57_vm0, %v22455_v11  ;;  %v17907_v14 = vld [vmem:[%s25757_s0 + $0x40] sm:$0xff]  ;;  %v17908_v15 = vld [vmem:[%s25757_s0 + $0x48] sm:$0xff]  ;;  %v17909_v20 = vld [vmem:[%s25757_s0 + $0x50] sm:$0xff] }
   0x5   :  { %20974 = vmatprep.subr.bf16.mxu1 %v20973_v7  ;;  %20968 = vmatpush3.bf16.msra.mxu0 %v20965_v3  ;;  %v17923_v16 = vld [vmem:[%s25757_s0 + $0x60] sm:$0xff]  ;;  %v17924_v17 = vld [vmem:[%s25757_s0 + $0x68] sm:$0xff]  ;;  %v20981_v18 = vpack.c.bf16 %v17908_v15, %v17907_v14  ;;  %v17910_v21 = vld [vmem:[%s25757_s0 + $0x58] sm:$0xff] }
   0x6   :  { %20976 = vmatpush3.bf16.msra.mxu1 %v20973_v7  ;;  %20970 = vmatprep.subr.bf16.mxu0 %v20969_v8  ;;  %v20989_v19 = vpack.c.bf16 %v17924_v17, %v17923_v16  ;;  %v22484_v22 = vld [vmem:[%s25758_s1 + $0x8] sm:$0xff]  ;;  %v17925_v23 = vld [vmem:[%s25757_s0 + $0x70] sm:$0xff]  ;;  %v17926_v24 = vld [vmem:[%s25757_s0 + $0x78] sm:$0xff]  ;;  %v20985_v26 = vpack.c.bf16 %v17910_v21, %v17909_v20 }
   0x7   :  { %20978 = vmatprep.subr.bf16.mxu1 %v20977_v13  ;;  %19075 = vmatprep.mubr.msk.f32.mxu1 %vm57_vm0, %v22455_v11  ;;  %v22495_v25 = vld [vmem:[%s25758_s1 + $0x10] sm:$0xff]  ;;  %v20993_v27 = vpack.c.bf16 %v17926_v24, %v17925_v23  ;;  %v17939_v28 = vld [vmem:[%s25757_s0 + $0x80] sm:$0xff]  ;;  %v17940_v29 = vld [vmem:[%s25757_s0 + $0x88] sm:$0xff] }
   0x8   :  { %v22510_v30 = vld [vmem:[%s25758_s1 + $0x18] sm:$0xff]  ;;  %v17955_v31 = vld [vmem:[%s25757_s0 + $0xa0] sm:$0xff]  ;;  %v17956_v32 = vld [vmem:[%s25757_s0 + $0xa8] sm:$0xff]  ;;  %v20997_v34 = vpack.c.bf16 %v17940_v29, %v17939_v28 }
   0x9   :  { %20972 = vmatpush3.bf16.msra.mxu0 %v20969_v8  ;;  %v22523_v33 = vld [vmem:[%s25758_s1 + $0x20] sm:$0xff]  ;;  %v21005_v35 = vpack.c.bf16 %v17956_v32, %v17955_v31  ;;  %v22536_v36 = vld [vmem:[%s25758_s1 + $0x28] sm:$0xff]  ;;  %v22543_v37 = vld [vmem:[%s25758_s1 + $0x30] sm:$0xff] }
   0xa   :  { %20980 = vmatpush3.bf16.msra.mxu1 %v20977_v13  ;;  %20982 = vmatprep.subr.bf16.mxu0 %v20981_v18  ;;  %v1257_v38 = vld [vmem:[%s25762_s5] sm:$0xff] }
   0xb   :  { %20990 = vmatprep.subr.bf16.mxu1 %v20989_v19 }
   0xc   :  { %19050 = vmatmul.mubr.msk.f32.vlgmr.msra.gmra.mrb[0].mxu0 %vm57_vm0, %v22484_v22 }
   0xd   :  { %19076 = vmatmul.mubr.msk.f32.vlgmr.msra.gmra.mrb[0].mxu1 %vm57_vm0, %v22484_v22  ;;  %20984 = vmatpush3.bf16.msra.mxu0 %v20981_v18 }
   0xe   :  { %20992 = vmatpush3.bf16.msra.mxu1 %v20989_v19  ;;  %19052 = vmatprep.mubr.msk.f32.mxu0 %vm57_vm0, %v22495_v25 }
   0xf   :  { %19078 = vmatprep.mubr.msk.f32.mxu1 %vm57_vm0, %v22495_v25  ;;  %20986 = vmatprep.subr.bf16.mxu0 %v20985_v26 }
  0x10   :  { %19053 = vmatmul.mubr.msk.f32.gmra.mrb[2].mxu0 %vm57_vm0, %v22510_v30  ;;  %20994 = vmatprep.subr.bf16.mxu1 %v20993_v27 }
  0x11   :  { %19079 = vmatmul.mubr.msk.f32.gmra.mrb[2].mxu1 %vm57_vm0, %v22510_v30  ;;  %19055 = vmatprep.mubr.msk.f32.mxu0 %vm57_vm0, %v22523_v33 }
  0x12   :  { %19081 = vmatprep.mubr.msk.f32.mxu1 %vm57_vm0, %v22523_v33  ;;  %20988 = vmatpush3.bf16.msra.mxu0 %v20985_v26 }
  0x13   :  { %20996 = vmatpush3.bf16.msra.mxu1 %v20993_v27  ;;  %20998 = vmatprep.subr.bf16.mxu0 %v20997_v34 }
  0x14   :  { %18 = vsyncpa [#allocation6], 0  ;;  %19056 = vmatmul.mubr.msk.f32.gmra.mrb[4].mxu0 %vm57_vm0, %v22536_v36  ;;  %21006 = vmatprep.subr.bf16.mxu1 %v21005_v35  ;;  %v22557_v39 = vld [vmem:[%s25758_s1 + $0x38] sm:$0xff]  ;;  %v22564_v40 = vld [vmem:[%s25758_s1 + $0x40] sm:$0xff]  ;;  %v25772_v62 = vmov 0.0|0.0   ;;  %vm22355_vm1 = vmmov 0  }
  0x15   :  { %19082 = vmatmul.mubr.msk.f32.gmra.mrb[4].mxu1 %vm57_vm0, %v22536_v36  ;;  %19058 = vmatprep.mubr.msk.f32.mxu0 %vm57_vm0, %v22543_v37  ;;  %v22575_v41 = vld [vmem:[%s25758_s1 + $0x48] sm:$0xff]  ;;  %v22582_v42 = vld [vmem:[%s25758_s1 + $0x50] sm:$0xff]  ;;  %v22593_v43 = vld [vmem:[%s25758_s1 + $0x58] sm:$0xff]  ;;  %v22357_v12 = vmov 1966171168   ;;  %s22358_s21 = smov 96  }
  0x16   :  { %19084 = vmatprep.mubr.msk.f32.mxu1 %vm57_vm0, %v22543_v37  ;;  %1260 = vperm.xlu0 %21987, %v1257_v38   ;;  %v17941_v44 = vld [vmem:[%s25757_s0 + $0x90] sm:$0xff]  ;;  %v17942_v45 = vld [vmem:[%s25757_s0 + $0x98] sm:$0xff]  ;;  %v17971_v50 = vld [vmem:[%s25757_s0 + $0xc0] sm:$0xff]  ;;  %s22360_s22 = smov [#allocation5]  }
  0x17   :  { %v17957_v46 = vld [vmem:[%s25757_s0 + $0xb0] sm:$0xff]  ;;  %v17958_v47 = vld [vmem:[%s25757_s0 + $0xb8] sm:$0xff]  ;;  %v21001_v48 = vpack.c.bf16 %v17942_v45, %v17941_v44  ;;  %v17972_v51 = vld [vmem:[%s25757_s0 + $0xc8] sm:$0xff]  ;;  %s17860_s23 = sshll.u32 %s22360_s22, 4  ;;  %s17861_s23 = int_to_ptr.vmem [resolvable:$true] %s17860_s23 }
  0x18   :  { %19059 = vmatmul.mubr.msk.f32.gmra.mrb[6].mxu0 %vm57_vm0, %v22557_v39  ;;  %v21009_v49 = vpack.c.bf16 %v17958_v47, %v17957_v46  ;;  %v17987_v52 = vld [vmem:[%s25757_s0 + $0xe0] sm:$0xff]  ;;  %v17988_v53 = vld [vmem:[%s25757_s0 + $0xe8] sm:$0xff]  ;;  %v21013_v54 = vpack.c.bf16 %v17972_v51, %v17971_v50  ;;  %v17973_v56 = vld [vmem:[%s25757_s0 + $0xd0] sm:$0xff]  ;;  %p22334_p1 = scmp.lt.s32.totalorder %s17861_s23, %s17861_s23 }
  0x19   :  { %19085 = vmatmul.mubr.msk.f32.gmra.mrb[6].mxu1 %vm57_vm0, %v22557_v39  ;;  %19061 = vmatprep.mubr.msk.f32.mxu0 %vm57_vm0, %v22564_v40  ;;  %v21021_v55 = vpack.c.bf16 %v17988_v53, %v17987_v52  ;;  %v17974_v57 = vld [vmem:[%s25757_s0 + $0xd8] sm:$0xff]  ;;  %v17989_v58 = vld [vmem:[%s25757_s0 + $0xf0] sm:$0xff]  ;;  %v1251_v63 = vld [vmem:[%s25764_s7] sm:$0xff] }
  0x1a   :  { %19087 = vmatprep.mubr.msk.f32.mxu1 %vm57_vm0, %v22564_v40  ;;  %v17990_v59 = vld [vmem:[%s25757_s0 + $0xf8] sm:$0xff]  ;;  %v21017_v60 = vpack.c.bf16 %v17974_v57, %v17973_v56  ;;  %v1252_v0 = vld [vmem:[%s25764_s7 + $0x8] sm:$0xff]  ;;  %v1247_v1 = vld [vmem:[%s25763_s6] sm:$0xff] }
  0x1b   :  { %v21025_v61 = vpack.c.bf16 %v17990_v59, %v17989_v58  ;;  %v1248_v2 = vld [vmem:[%s25763_s6 + $0x8] sm:$0xff]  ;;  %v22749_v3 = vpack.c.bf16 %v1252_v0, %v1251_v63  ;;  %v1253_v5 = vld [vmem:[%s25764_s7 + $0x10] sm:$0xff]  ;;  %v1254_v6 = vld [vmem:[%s25764_s7 + $0x18] sm:$0xff] }
  0x1c   :  { %19062 = vmatmul.mubr.msk.f32.gmra.mrb[8].mxu0 %vm57_vm0, %v22575_v41  ;;  %v22753_v4 = vpack.c.bf16 %v1248_v2, %v1247_v1  ;;  %v1249_v7 = vld [vmem:[%s25763_s6 + $0x10] sm:$0xff]  ;;  %v1250_v8 = vld [vmem:[%s25763_s6 + $0x18] sm:$0xff]  ;;  %v22775_v9 = vpack.c.bf16 %v1254_v6, %v1253_v5  ;;  %v1271_v13 = vld [vmem:[%s25761_s4] sm:$0xff] }
  0x1d   :  { %19088 = vmatmul.mubr.msk.f32.gmra.mrb[8].mxu1 %vm57_vm0, %v22575_v41  ;;  %19064 = vmatprep.mubr.msk.f32.mxu0 %vm57_vm0, %v22582_v42  ;;  %25911 = vst [vmem:[#allocation8_spill] sm:$0xff] %v22749_v3  ;;  %v22780_v10 = vpack.c.bf16 %v1250_v8, %v1249_v7  ;;  %v1270_v14 = vld [vmem:[%s25760_s3] sm:$0xff] }
  0x1e   :  { %19090 = vmatprep.mubr.msk.f32.mxu1 %vm57_vm0, %v22582_v42  ;;  %25912 = vst [vmem:[#allocation9_spill] sm:$0xff] %v22753_v4  ;;  %25913 = vst [vmem:[#allocation10_spill] sm:$0xff] %v22775_v9 }
  0x1f   :  { %25914 = vst [vmem:[#allocation11_spill] sm:$0xff] %v22780_v10 }
  0x20   :  { %19065 = vmatmul.mubr.msk.f32.gmra.mrb[10].mxu0 %vm57_vm0, %v22593_v43 }
  0x21   :  { %19091 = vmatmul.mubr.msk.f32.gmra.mrb[10].mxu1 %vm57_vm0, %v22593_v43  ;;  %19101 = vmatprep.mubr.msk.f32.mxu0 %vm57_vm0, %v22455_v11 }
  0x22   :  { %19127 = vmatprep.mubr.msk.f32.mxu1 %vm57_vm0, %v22455_v11 }
  0x24   :  { %19102 = vmatmul.mubr.msk.f32.vlgmr.msra.gmra.mrb[12].mxu0 %vm57_vm0, %v22484_v22 }
  0x25   :  { %19128 = vmatmul.mubr.msk.f32.vlgmr.msra.gmra.mrb[12].mxu1 %vm57_vm0, %v22484_v22  ;;  %21000 = vmatpush3.bf16.msra.mxu0 %v20997_v34 }
  0x26   :  { %21008 = vmatpush3.bf16.msra.mxu1 %v21005_v35  ;;  %19104 = vmatprep.mubr.msk.f32.mxu0 %vm57_vm0, %v22495_v25 }
  0x27   :  { %19130 = vmatprep.mubr.msk.f32.mxu1 %vm57_vm0, %v22495_v25  ;;  %21002 = vmatprep.subr.bf16.mxu0 %v21001_v48 }
  0x28   :  { %19105 = vmatmul.mubr.msk.f32.gmra.mrb[14].mxu0 %vm57_vm0, %v22510_v30  ;;  %21010 = vmatprep.subr.bf16.mxu1 %v21009_v49 }
  0x29   :  { %19131 = vmatmul.mubr.msk.f32.gmra.mrb[14].mxu1 %vm57_vm0, %v22510_v30  ;;  %19107 = vmatprep.mubr.msk.f32.mxu0 %vm57_vm0, %v22523_v33 }
  0x2a   :  { %19133 = vmatprep.mubr.msk.f32.mxu1 %vm57_vm0, %v22523_v33  ;;  %21004 = vmatpush3.bf16.msra.mxu0 %v21001_v48 }
  0x2b   :  { %21012 = vmatpush3.bf16.msra.mxu1 %v21009_v49  ;;  %21014 = vmatprep.subr.bf16.mxu0 %v21013_v54 }
  0x2c   :  { %19108 = vmatmul.mubr.msk.f32.gmra.mrb[16].mxu0 %vm57_vm0, %v22536_v36  ;;  %21022 = vmatprep.subr.bf16.mxu1 %v21021_v55 }
  0x2d   :  { %19134 = vmatmul.mubr.msk.f32.gmra.mrb[16].mxu1 %vm57_vm0, %v22536_v36  ;;  %19110 = vmatprep.mubr.msk.f32.mxu0 %vm57_vm0, %v22543_v37 }
  0x2e   :  { %19136 = vmatprep.mubr.msk.f32.mxu1 %vm57_vm0, %v22543_v37 }
  0x30   :  { %19111 = vmatmul.mubr.msk.f32.gmra.mrb[18].mxu0 %vm57_vm0, %v22557_v39 }
  0x31   :  { %19137 = vmatmul.mubr.msk.f32.gmra.mrb[18].mxu1 %vm57_vm0, %v22557_v39  ;;  %19113 = vmatprep.mubr.msk.f32.mxu0 %vm57_vm0, %v22564_v40 }
  0x32   :  { %19139 = vmatprep.mubr.msk.f32.mxu1 %vm57_vm0, %v22564_v40 }
  0x34   :  { %19114 = vmatmul.mubr.msk.f32.gmra.mrb[20].mxu0 %vm57_vm0, %v22575_v41 }
  0x35   :  { %19140 = vmatmul.mubr.msk.f32.gmra.mrb[20].mxu1 %vm57_vm0, %v22575_v41  ;;  %19116 = vmatprep.mubr.msk.f32.mxu0 %vm57_vm0, %v22582_v42 }
  0x36   :  { %19142 = vmatprep.mubr.msk.f32.mxu1 %vm57_vm0, %v22582_v42 }
  0x38   :  { %19117 = vmatmul.mubr.msk.f32.gmra.mrb[22].mxu0 %vm57_vm0, %v22593_v43 }
  0x39   :  { %19143 = vmatmul.mubr.msk.f32.gmra.mrb[22].mxu1 %vm57_vm0, %v22593_v43  ;;  %19153 = vmatprep.mubr.msk.f32.mxu0 %vm57_vm0, %v22455_v11 }
  0x3a   :  { %19179 = vmatprep.mubr.msk.f32.mxu1 %vm57_vm0, %v22455_v11 }
  0x3c   :  { %19154 = vmatmul.mubr.msk.f32.vlgmr.msra.gmra.mrb[24].mxu0 %vm57_vm0, %v22484_v22 }
  0x3d   :  { %19180 = vmatmul.mubr.msk.f32.vlgmr.msra.gmra.mrb[24].mxu1 %vm57_vm0, %v22484_v22  ;;  %21016 = vmatpush3.bf16.msra.mxu0 %v21013_v54 }
  0x3e   :  { %21024 = vmatpush3.bf16.msra.mxu1 %v21021_v55  ;;  %19156 = vmatprep.mubr.msk.f32.mxu0 %vm57_vm0, %v22495_v25 }
  0x3f   :  { %19182 = vmatprep.mubr.msk.f32.mxu1 %vm57_vm0, %v22495_v25  ;;  %21018 = vmatprep.subr.bf16.mxu0 %v21017_v60 }
  0x40   :  { %19157 = vmatmul.mubr.msk.f32.gmra.mrb[26].mxu0 %vm57_vm0, %v22510_v30  ;;  %21026 = vmatprep.subr.bf16.mxu1 %v21025_v61 }
  0x41   :  { %19183 = vmatmul.mubr.msk.f32.gmra.mrb[26].mxu1 %vm57_vm0, %v22510_v30  ;;  %19159 = vmatprep.mubr.msk.f32.mxu0 %vm57_vm0, %v22523_v33 }
  0x42   :  { %19185 = vmatprep.mubr.msk.f32.mxu1 %vm57_vm0, %v22523_v33  ;;  %21020 = vmatpush3.bf16.msra.mxu0 %v21017_v60 }
  0x43   :  { %21028 = vmatpush3.bf16.msra.mxu1 %v21025_v61  ;;  %21029 = vmatprep.subr.bf16.mxu0 %v25772_v62 }
  0x44   :  { %19160 = vmatmul.mubr.msk.f32.gmra.mrb[28].mxu0 %vm57_vm0, %v22536_v36  ;;  %21035 = vmatprep.subr.bf16.mxu1 %v25772_v62 }
  0x45   :  { %19186 = vmatmul.mubr.msk.f32.gmra.mrb[28].mxu1 %vm57_vm0, %v22536_v36  ;;  %19162 = vmatprep.mubr.msk.f32.mxu0 %vm57_vm0, %v22543_v37 }
  0x46   :  { %19188 = vmatprep.mubr.msk.f32.mxu1 %vm57_vm0, %v22543_v37 }
  0x48   :  { %19163 = vmatmul.mubr.msk.f32.gmra.mrb[30].mxu0 %vm57_vm0, %v22557_v39 }
  0x49   :  { %19189 = vmatmul.mubr.msk.f32.gmra.mrb[30].mxu1 %vm57_vm0, %v22557_v39  ;;  %19165 = vmatprep.mubr.msk.f32.mxu0 %vm57_vm0, %v22564_v40 }
  0x4a   :  { %19191 = vmatprep.mubr.msk.f32.mxu1 %vm57_vm0, %v22564_v40 }
  0x4c   :  { %19166 = vmatmul.mubr.msk.f32.gmra.mrb[32].mxu0 %vm57_vm0, %v22575_v41 }
  0x4d   :  { %19192 = vmatmul.mubr.msk.f32.gmra.mrb[32].mxu1 %vm57_vm0, %v22575_v41  ;;  %19168 = vmatprep.mubr.msk.f32.mxu0 %vm57_vm0, %v22582_v42 }
  0x4e   :  { %19194 = vmatprep.mubr.msk.f32.mxu1 %vm57_vm0, %v22582_v42 }
  0x50   :  { %19169 = vmatmul.mubr.msk.f32.gmra.mrb[34].mxu0 %vm57_vm0, %v22593_v43 }
  0x51   :  { %19195 = vmatmul.mubr.msk.f32.gmra.mrb[34].mxu1 %vm57_vm0, %v22593_v43  ;;  %19205 = vmatprep.mubr.msk.f32.mxu0 %vm57_vm0, %v22455_v11 }
  0x52   :  { %19231 = vmatprep.mubr.msk.f32.mxu1 %vm57_vm0, %v22455_v11  ;;  %v25774_v11 = vmov 0.0  }
  0x54   :  { %19206 = vmatmul.mubr.msk.f32.vlgmr.msra.gmra.mrb[36].mxu0 %vm57_vm0, %v22484_v22 }
  0x55   :  { %19232 = vmatmul.mubr.msk.f32.vlgmr.msra.gmra.mrb[36].mxu1 %vm57_vm0, %v22484_v22  ;;  %21031 = vmatpush3.bf16.msra.mxu0 %v22749_v3 }
  0x56   :  { %21037 = vmatpush3.bf16.msra.mxu1 %v22753_v4  ;;  %19208 = vmatprep.mubr.msk.f32.mxu0 %vm57_vm0, %v22495_v25 }
  0x57   :  { %19234 = vmatprep.mubr.msk.f32.mxu1 %vm57_vm0, %v22495_v25  ;;  %21032 = vmatprep.subr.bf16.mxu0 %v25772_v62 }
  0x58   :  { %19209 = vmatmul.mubr.msk.f32.gmra.mrb[38].mxu0 %vm57_vm0, %v22510_v30  ;;  %21038 = vmatprep.subr.bf16.mxu1 %v25772_v62 }
  0x59   :  { %19235 = vmatmul.mubr.msk.f32.gmra.mrb[38].mxu1 %vm57_vm0, %v22510_v30  ;;  %19211 = vmatprep.mubr.msk.f32.mxu0 %vm57_vm0, %v22523_v33 }
  0x5a   :  { %19237 = vmatprep.mubr.msk.f32.mxu1 %vm57_vm0, %v22523_v33  ;;  %21034 = vmatpush3.bf16.msra.mxu0 %v22775_v9 }
  0x5b   :  { %21040 = vmatpush3.bf16.msra.mxu1 %v22780_v10  ;;  %21041 = vmatprep.subr.bf16.mxu0 %v25772_v62  ;;  %v25963_v10 = vmov 0.0  }
  0x5c   :  { %19212 = vmatmul.mubr.msk.f32.gmra.mrb[40].mxu0 %vm57_vm0, %v22536_v36  ;;  %21047 = vmatprep.subr.bf16.mxu1 %v25772_v62 }
  0x5d   :  { %19238 = vmatmul.mubr.msk.f32.gmra.mrb[40].mxu1 %vm57_vm0, %v22536_v36  ;;  %19214 = vmatprep.mubr.msk.f32.mxu0 %vm57_vm0, %v22543_v37 }
  0x5e   :  { %19240 = vmatprep.mubr.msk.f32.mxu1 %vm57_vm0, %v22543_v37 }
  0x60   :  { %19215 = vmatmul.mubr.msk.f32.gmra.mrb[42].mxu0 %vm57_vm0, %v22557_v39 }
  0x61   :  { %19241 = vmatmul.mubr.msk.f32.gmra.mrb[42].mxu1 %vm57_vm0, %v22557_v39  ;;  %19217 = vmatprep.mubr.msk.f32.mxu0 %vm57_vm0, %v22564_v40 }
  0x62   :  { %19243 = vmatprep.mubr.msk.f32.mxu1 %vm57_vm0, %v22564_v40 }
  0x64   :  { %19218 = vmatmul.mubr.msk.f32.gmra.mrb[44].mxu0 %vm57_vm0, %v22575_v41 }
  0x65   :  { %19244 = vmatmul.mubr.msk.f32.gmra.mrb[44].mxu1 %vm57_vm0, %v22575_v41  ;;  %19220 = vmatprep.mubr.msk.f32.mxu0 %vm57_vm0, %v22582_v42 }
  0x66   :  { %19246 = vmatprep.mubr.msk.f32.mxu1 %vm57_vm0, %v22582_v42 }
  0x68   :  { %19221 = vmatmul.mubr.msk.f32.gmra.mrb[46].mxu0 %vm57_vm0, %v22593_v43 }
  0x69   :  { %19247 = vmatmul.mubr.msk.f32.gmra.mrb[46].mxu1 %vm57_vm0, %v22593_v43  ;;  %19257 = vmatprep.mubr.msk.f32.mxu0 %vm22355_vm1, %v25774_v11 }
  0x6a   :  { %19268 = vmatprep.mubr.msk.f32.mxu1 %vm22355_vm1, %v25774_v11 }
  0x6c   :  { %19258 = vmatmul.mubr.msk.f32.vlgmr.msra.gmra.mrb[48].mxu0 %vm57_vm0, %v1271_v13 }
  0x6d   :  { %19269 = vmatmul.mubr.msk.f32.vlgmr.msra.gmra.mrb[48].mxu1 %vm57_vm0, %v1270_v14  ;;  %19279 = vmatprep.mubr.msk.f32.mxu0 %vm22355_vm1, %v25774_v11 }
  0x6e   :  { %19290 = vmatprep.mubr.msk.f32.mxu1 %vm22355_vm1, %v25774_v11 }
  0xdf   :  { %v19051_v15 = vpop.f32.mrb[0].mxu0 }
  0xe0   :  { %v19077_v16 = vpop.f32.mrb[0].mxu1  ;;  %v160_v17 = vpop.f32.mrb[1].mxu0 }
  0xe1   :  { %v22839_v18 = vpack.c.bf16 %v19051_v15, %v160_v17  ;;  %v302_v19 = vpop.f32.mrb[1].mxu1 }
  0xe2   :  { %v22841_v20 = vpack.c.bf16 %v19077_v16, %v302_v19 }
  0xe3   :  { %25915 = vst [vmem:[#allocation12_spill] sm:$0xff] %v22839_v18  ;;  %v19054_v21 = vpop.f32.mrb[2].mxu0  ;;  %21043 = vmatpush3.bf16.msra.mxu0 %v22839_v18 }
  0xe4   :  { %25916 = vst [vmem:[#allocation13_spill] sm:$0xff] %v22841_v20  ;;  %v19080_v22 = vpop.f32.mrb[2].mxu1  ;;  %21049 = vmatpush3.bf16.msra.mxu1 %v22841_v20  ;;  %v170_v23 = vpop.f32.mrb[3].mxu0  ;;  %21044 = vmatprep.subr.bf16.mxu0 %v25772_v62 }
  0xe5   :  { %v22846_v24 = vpack.c.bf16 %v19054_v21, %v170_v23  ;;  %v312_v25 = vpop.f32.mrb[3].mxu1  ;;  %21050 = vmatprep.subr.bf16.mxu1 %v25772_v62 }
  0xe6   :  { %v22849_v26 = vpack.c.bf16 %v19080_v22, %v312_v25 }
  0xe7   :  { %25917 = vst [vmem:[#allocation14_spill] sm:$0xff] %v22846_v24  ;;  %v19057_v27 = vpop.f32.mrb[4].mxu0  ;;  %21046 = vmatpush3.bf16.msra.mxu0 %v22846_v24 }
  0xe8   :  { %25918 = vst [vmem:[#allocation15_spill] sm:$0xff] %v22849_v26  ;;  %v19083_v28 = vpop.f32.mrb[4].mxu1  ;;  %21052 = vmatpush3.bf16.msra.mxu1 %v22849_v26  ;;  %v180_v29 = vpop.f32.mrb[5].mxu0  ;;  %21053 = vmatprep.subr.bf16.mxu0 %v25772_v62 }
  0xe9   :  { %v22854_v30 = vpack.c.bf16 %v19057_v27, %v180_v29  ;;  %v322_v31 = vpop.f32.mrb[5].mxu1  ;;  %21059 = vmatprep.subr.bf16.mxu1 %v25772_v62 }
  0xea   :  { %v22857_v32 = vpack.c.bf16 %v19083_v28, %v322_v31 }
  0xeb   :  { %25919 = vst [vmem:[#allocation16_spill] sm:$0xff] %v22854_v30  ;;  %v19060_v33 = vpop.f32.mrb[6].mxu0 }
  0xec   :  { %25920 = vst [vmem:[#allocation17_spill] sm:$0xff] %v22857_v32  ;;  %v19086_v34 = vpop.f32.mrb[6].mxu1  ;;  %v190_v35 = vpop.f32.mrb[7].mxu0 }
  0xed   :  { %v22859_v36 = vpack.c.bf16 %v19060_v33, %v190_v35  ;;  %v332_v37 = vpop.f32.mrb[7].mxu1 }
  0xee   :  { %v22861_v38 = vpack.c.bf16 %v19086_v34, %v332_v37 }
  0xef   :  { %25921 = vst [vmem:[#allocation18_spill] sm:$0xff] %v22859_v36  ;;  %v19063_v39 = vpop.f32.mrb[8].mxu0 }
  0xf0   :  { %25922 = vst [vmem:[#allocation19_spill] sm:$0xff] %v22861_v38  ;;  %v19089_v40 = vpop.f32.mrb[8].mxu1  ;;  %v200_v41 = vpop.f32.mrb[9].mxu0 }
  0xf1   :  { %v22863_v42 = vpack.c.bf16 %v19063_v39, %v200_v41  ;;  %v342_v43 = vpop.f32.mrb[9].mxu1 }
  0xf2   :  { %v22865_v44 = vpack.c.bf16 %v19089_v40, %v342_v43 }
  0xf3   :  { %25923 = vst [vmem:[#allocation20_spill] sm:$0xff] %v22863_v42  ;;  %v19066_v45 = vpop.f32.mrb[10].mxu0 }
  0xf4   :  { %25924 = vst [vmem:[#allocation21_spill] sm:$0xff] %v22865_v44  ;;  %v19092_v46 = vpop.f32.mrb[10].mxu1  ;;  %v210_v47 = vpop.f32.mrb[11].mxu0 }
  0xf5   :  { %v22867_v48 = vpack.c.bf16 %v19066_v45, %v210_v47  ;;  %v352_v49 = vpop.f32.mrb[11].mxu1 }
  0xf6   :  { %v22869_v50 = vpack.c.bf16 %v19092_v46, %v352_v49 }
  0xf7   :  { %25925 = vst [vmem:[#allocation22_spill] sm:$0xff] %v22867_v48  ;;  %v19103_v51 = vpop.f32.mrb[12].mxu0 }
  0xf8   :  { %25926 = vst [vmem:[#allocation23_spill] sm:$0xff] %v22869_v50  ;;  %v19129_v52 = vpop.f32.mrb[12].mxu1  ;;  %v447_v53 = vpop.f32.mrb[13].mxu0 }
  0xf9   :  { %v22871_v54 = vpack.c.bf16 %v19103_v51, %v447_v53  ;;  %v592_v55 = vpop.f32.mrb[13].mxu1 }
  0xfa   :  { %v22873_v56 = vpack.c.bf16 %v19129_v52, %v592_v55 }
  0xfb   :  { %v19106_v57 = vpop.f32.mrb[14].mxu0 }
  0xfc   :  { %v19132_v58 = vpop.f32.mrb[14].mxu1  ;;  %v457_v59 = vpop.f32.mrb[15].mxu0 }
  0xfd   :  { %v22875_v60 = vpack.c.bf16 %v19106_v57, %v457_v59  ;;  %v602_v61 = vpop.f32.mrb[15].mxu1 }
  0xfe   :  { %v22877_v63 = vpack.c.bf16 %v19132_v58, %v602_v61 }
  0xff   :  { %25927 = vst [vmem:[#allocation24_spill] sm:$0xff] %v22875_v60  ;;  %v19109_v0 = vpop.f32.mrb[16].mxu0 }
 0x100   :  { %25928 = vst [vmem:[#allocation25_spill] sm:$0xff] %v22877_v63  ;;  %v19135_v1 = vpop.f32.mrb[16].mxu1  ;;  %v467_v2 = vpop.f32.mrb[17].mxu0 }
 0x101   :  { %v22879_v5 = vpack.c.bf16 %v19109_v0, %v467_v2  ;;  %v612_v6 = vpop.f32.mrb[17].mxu1 }
 0x102   :  { %v22881_v7 = vpack.c.bf16 %v19135_v1, %v612_v6 }
 0x103   :  { %25929 = vst [vmem:[#allocation26_spill] sm:$0xff] %v22879_v5  ;;  %v19112_v8 = vpop.f32.mrb[18].mxu0 }
 0x104   :  { %25930 = vst [vmem:[#allocation27_spill] sm:$0xff] %v22881_v7  ;;  %v19138_v13 = vpop.f32.mrb[18].mxu1  ;;  %v477_v14 = vpop.f32.mrb[19].mxu0 }
 0x105   :  { %v22883_v15 = vpack.c.bf16 %v19112_v8, %v477_v14  ;;  %v622_v16 = vpop.f32.mrb[19].mxu1 }
 0x106   :  { %v22885_v17 = vpack.c.bf16 %v19138_v13, %v622_v16 }
 0x107   :  { %25931 = vst [vmem:[#allocation28_spill] sm:$0xff] %v22883_v15  ;;  %v19115_v19 = vpop.f32.mrb[20].mxu0 }
 0x108   :  { %25932 = vst [vmem:[#allocation29_spill] sm:$0xff] %v22885_v17  ;;  %v19141_v21 = vpop.f32.mrb[20].mxu1  ;;  %v487_v22 = vpop.f32.mrb[21].mxu0 }
 0x109   :  { %v22887_v23 = vpack.c.bf16 %v19115_v19, %v487_v22  ;;  %v632_v25 = vpop.f32.mrb[21].mxu1 }
 0x10a   :  { %v22889_v27 = vpack.c.bf16 %v19141_v21, %v632_v25 }
 0x10b   :  { %25933 = vst [vmem:[#allocation30_spill] sm:$0xff] %v22887_v23  ;;  %v19118_v28 = vpop.f32.mrb[22].mxu0 }
 0x10c   :  { %25934 = vst [vmem:[#allocation31_spill] sm:$0xff] %v22889_v27  ;;  %v19144_v29 = vpop.f32.mrb[22].mxu1  ;;  %v497_v31 = vpop.f32.mrb[23].mxu0 }
 0x10d   :  { %v22891_v33 = vpack.c.bf16 %v19118_v28, %v497_v31  ;;  %v642_v34 = vpop.f32.mrb[23].mxu1 }
 0x10e   :  { %v22893_v35 = vpack.c.bf16 %v19144_v29, %v642_v34 }
 0x10f   :  { %25935 = vst [vmem:[#allocation32_spill] sm:$0xff] %v22891_v33  ;;  %v19155_v37 = vpop.f32.mrb[24].mxu0 }
 0x110   :  { %25936 = vst [vmem:[#allocation33_spill] sm:$0xff] %v22893_v35  ;;  %v19181_v39 = vpop.f32.mrb[24].mxu1  ;;  %v737_v40 = vpop.f32.mrb[25].mxu0 }
 0x111   :  { %v22895_v41 = vpack.c.bf16 %v19155_v37, %v737_v40  ;;  %v882_v43 = vpop.f32.mrb[25].mxu1 }
 0x112   :  { %v22897_v45 = vpack.c.bf16 %v19181_v39, %v882_v43 }
 0x113   :  { %25937 = vst [vmem:[#allocation34_spill] sm:$0xff] %v22895_v41  ;;  %v19158_v46 = vpop.f32.mrb[26].mxu0 }
 0x114   :  { %25938 = vst [vmem:[#allocation35_spill] sm:$0xff] %v22897_v45  ;;  %v19184_v47 = vpop.f32.mrb[26].mxu1  ;;  %v747_v49 = vpop.f32.mrb[27].mxu0 }
 0x115   :  { %v22899_v51 = vpack.c.bf16 %v19158_v46, %v747_v49  ;;  %v892_v52 = vpop.f32.mrb[27].mxu1 }
 0x116   :  { %v22901_v53 = vpack.c.bf16 %v19184_v47, %v892_v52 }
 0x117   :  { %25939 = vst [vmem:[#allocation36_spill] sm:$0xff] %v22899_v51  ;;  %v19161_v55 = vpop.f32.mrb[28].mxu0 }
 0x118   :  { %25940 = vst [vmem:[#allocation37_spill] sm:$0xff] %v22901_v53  ;;  %v19187_v57 = vpop.f32.mrb[28].mxu1  ;;  %v757_v58 = vpop.f32.mrb[29].mxu0 }
 0x119   :  { %v22903_v59 = vpack.c.bf16 %v19161_v55, %v757_v58  ;;  %v902_v61 = vpop.f32.mrb[29].mxu1 }
 0x11a   :  { %v22905_v0 = vpack.c.bf16 %v19187_v57, %v902_v61 }
 0x11b   :  { %25941 = vst [vmem:[#allocation38_spill] sm:$0xff] %v22903_v59  ;;  %v19164_v1 = vpop.f32.mrb[30].mxu0 }
 0x11c   :  { %25942 = vst [vmem:[#allocation39_spill] sm:$0xff] %v22905_v0  ;;  %v19190_v2 = vpop.f32.mrb[30].mxu1  ;;  %v767_v6 = vpop.f32.mrb[31].mxu0 }
 0x11d   :  { %v22907_v8 = vpack.c.bf16 %v19164_v1, %v767_v6  ;;  %v912_v13 = vpop.f32.mrb[31].mxu1 }
 0x11e   :  { %v22909_v14 = vpack.c.bf16 %v19190_v2, %v912_v13 }
 0x11f   :  { %25943 = vst [vmem:[#allocation40_spill] sm:$0xff] %v22907_v8  ;;  %v19167_v16 = vpop.f32.mrb[32].mxu0 }
 0x120   :  { %25944 = vst [vmem:[#allocation41_spill] sm:$0xff] %v22909_v14  ;;  %v19193_v19 = vpop.f32.mrb[32].mxu1  ;;  %v777_v21 = vpop.f32.mrb[33].mxu0 }
 0x121   :  { %v22911_v22 = vpack.c.bf16 %v19167_v16, %v777_v21  ;;  %v922_v25 = vpop.f32.mrb[33].mxu1 }
 0x122   :  { %v22913_v28 = vpack.c.bf16 %v19193_v19, %v922_v25 }
 0x123   :  { %25945 = vst [vmem:[#allocation42_spill] sm:$0xff] %v22911_v22  ;;  %v19170_v29 = vpop.f32.mrb[34].mxu0 }
 0x124   :  { %25946 = vst [vmem:[#allocation43_spill] sm:$0xff] %v22913_v28  ;;  %v19196_v31 = vpop.f32.mrb[34].mxu1  ;;  %v787_v34 = vpop.f32.mrb[35].mxu0 }
 0x125   :  { %v22915_v37 = vpack.c.bf16 %v19170_v29, %v787_v34  ;;  %v932_v39 = vpop.f32.mrb[35].mxu1 }
 0x126   :  { %v22917_v40 = vpack.c.bf16 %v19196_v31, %v932_v39 }
 0x127   :  { %25947 = vst [vmem:[#allocation44_spill] sm:$0xff] %v22915_v37  ;;  %v19207_v43 = vpop.f32.mrb[36].mxu0 }
 0x128   :  { %25948 = vst [vmem:[#allocation45_spill] sm:$0xff] %v22917_v40  ;;  %v19233_v46 = vpop.f32.mrb[36].mxu1  ;;  %v1027_v47 = vpop.f32.mrb[37].mxu0 }
 0x129   :  { %v22919_v49 = vpack.c.bf16 %v19207_v43, %v1027_v47  ;;  %v1172_v52 = vpop.f32.mrb[37].mxu1 }
 0x12a   :  { %v22921_v55 = vpack.c.bf16 %v19233_v46, %v1172_v52 }
 0x12b   :  { %25949 = vst [vmem:[#allocation46_spill] sm:$0xff] %v22919_v49  ;;  %v19210_v57 = vpop.f32.mrb[38].mxu0 }
 0x12c   :  { %25950 = vst [vmem:[#allocation47_spill] sm:$0xff] %v22921_v55  ;;  %v19236_v58 = vpop.f32.mrb[38].mxu1  ;;  %v1037_v61 = vpop.f32.mrb[39].mxu0 }
 0x12d   :  { %v22923_v1 = vpack.c.bf16 %v19210_v57, %v1037_v61  ;;  %v1182_v2 = vpop.f32.mrb[39].mxu1 }
 0x12e   :  { %v22925_v6 = vpack.c.bf16 %v19236_v58, %v1182_v2 }
 0x12f   :  { %25951 = vst [vmem:[#allocation48_spill] sm:$0xff] %v22923_v1  ;;  %v19213_v13 = vpop.f32.mrb[40].mxu0 }
 0x130   :  { %25952 = vst [vmem:[#allocation49_spill] sm:$0xff] %v22925_v6  ;;  %v19239_v16 = vpop.f32.mrb[40].mxu1  ;;  %v1047_v19 = vpop.f32.mrb[41].mxu0 }
 0x131   :  { %v22927_v21 = vpack.c.bf16 %v19213_v13, %v1047_v19  ;;  %v1192_v25 = vpop.f32.mrb[41].mxu1  ;;  %v1525_v13 = vunpack.c.l.s4 %v22357_v12  ;;  %v25784_v19 = vlaneseq }
 0x132   :  { %v22929_v29 = vpack.c.bf16 %v19239_v16, %v1192_v25  ;;  %v22939_v25 = vpop.permute.xlu0 %1260 }
 0x133   :  { %25953 = vst [vmem:[#allocation50_spill] sm:$0xff] %v22927_v21  ;;  %v19216_v31 = vpop.f32.mrb[42].mxu0 }
 0x134   :  { %25954 = vst [vmem:[#allocation51_spill] sm:$0xff] %v22929_v29  ;;  %v19242_v34 = vpop.f32.mrb[42].mxu1  ;;  %v1057_v39 = vpop.f32.mrb[43].mxu0 }
 0x135   :  { %v22931_v43 = vpack.c.bf16 %v19216_v31, %v1057_v39  ;;  %v1202_v46 = vpop.f32.mrb[43].mxu1 }
 0x136   :  { %v22933_v47 = vpack.c.bf16 %v19242_v34, %v1202_v46  ;;  %v18006_v34 = vld [vmem:[%s25765_s8] ss:$0 sm:$0xff] }
 0x137   :  { %25955 = vst [vmem:[#allocation52_spill] sm:$0xff] %v22931_v43  ;;  %v19219_v52 = vpop.f32.mrb[44].mxu0 }
 0x138   :  { %25956 = vst [vmem:[#allocation53_spill] sm:$0xff] %v22933_v47  ;;  %v19245_v57 = vpop.f32.mrb[44].mxu1  ;;  %v1067_v58 = vpop.f32.mrb[45].mxu0 }
 0x139   :  { %v22935_v61 = vpack.c.bf16 %v19219_v52, %v1067_v58  ;;  %v1212_v2 = vpop.f32.mrb[45].mxu1  ;;  %v1526_v52 = vunpack.c.0.s8 %v1525_v13  ;;  %v22947_v58 = vshrl.u32 %v25784_v19, 7 }
 0x13a   :  { %v22937_v62 = vpack.c.bf16 %v19245_v57, %v1212_v2  ;;  %v1520_v57 = vmul.f32 %v18006_v34, %v22939_v25  ;;  %v22966_v34 = vld [vmem:[%s25766_s9] sm:$0xff] }
 0x13b   :  { %25957 = vst [vmem:[#allocation54_spill] sm:$0xff] %v22935_v61  ;;  %v19222_v16 = vpop.f32.mrb[46].mxu0  ;;  %25960 = vst [vmem:[#allocation57_spill] sm:$0xff] %v22947_v58  ;;  %v22955_v20 = vsub.s32 %v1526_v52, %v22947_v58  ;;  %v22960_v19 = vsub.s32 0, %v22947_v58 }
 0x13c   :  { %25958 = vst [vmem:[#allocation55_spill] sm:$0xff] %v22937_v62  ;;  %v19248_v11 = vpop.f32.mrb[46].mxu1  ;;  %v1077_v31 = vpop.f32.mrb[47].mxu0 }
 0x13d   :  { %v22944_v39 = vpack.c.bf16 %v19222_v16, %v1077_v31  ;;  %v1222_v46 = vpop.f32.mrb[47].mxu1 }
 0x13e   :  { %v22949_v12 = vpack.c.bf16 %v19248_v11, %v1222_v46 }
 0x13f   :  { %25959 = vst [vmem:[#allocation56_spill] sm:$0xff] %v22944_v39  ;;  %v22952_v2 = vpop.f32.mrb[48].mxu0 }
 0x140   :  { %25961 = vst [vmem:[#allocation58_spill] sm:$0xff] %v22949_v12  ;;  %25962 = vst [vmem:[#allocation59_spill] sm:$0xff] %v22952_v2  ;;  %v1510_v26 = vpop.f32.mrb[48].mxu1  ;;  %v19259_v24 = vpop.f32.mrb[49].mxu0 }
 0x141   :  { %v1511_v18 = vadd.f32 %v1510_v26, %v22952_v2  ;;  %v19270_v16 = vpop.f32.mrb[49].mxu1 }
 0x143   :  { %v1521_v31 = vadd.f32 %v1520_v57, %v1511_v18 }
 0x145   :  { %v1530_v13 = vrot.slane %v1521_v31, %v22955_v20  ;;  %v1523_v52 = vcombine.high %v1521_v31, %v1521_v31 }
 0x147   :  { %v1538_v11 = vcombine.high %v1530_v13, %v1530_v13  ;;  %v1546_v46 = vrot.slane %v1530_v13, %v22955_v20  ;;  %v1537_v58 = vrot.slane %v1523_v52, %v22955_v20 }
 0x149   :  { %v1560_v24 = vrot.slane %v1538_v11, %v22955_v20  ;;  %v1575_v26 = vrot.slane %v1546_v46, %v22960_v19  ;;  %v1568_v57 = vcombine.high %v1546_v46, %v1546_v46  ;;  %v25964_v11 = vmov 0.0|0.0  }
 0x14a   :  { %v1539_v46 = vcombine.high %v1537_v58, %v1537_v58  ;;  %v1553_v52 = vrot.slane %v1537_v58, %v22955_v20 }
 0x14b   :  { %v1579_v18 = vrot.slane %v1560_v24, %v22960_v19  ;;  %v1612_v16 = vmul.f32 %v1575_v26, %v22966_v34  ;;  %v1570_v2 = vcombine.high %v1560_v24, %v1560_v24  ;;  %v1583_v31 = vrot.slane %v1568_v57, %v22960_v19 }
 0x14c   :  { %v1591_v58 = vrot.slane %v1553_v52, %v22960_v19 }
 0x14d   :  { %19280 = vmatmul.mubr.msk.f32.vlgmr.msra.gmra.mrb[50].mxu0 %vm57_vm0, %v1612_v16  ;;  %v1613_v13 = vmul.f32 %v1579_v18, %v22966_v34  ;;  %v1587_v24 = vrot.slane %v1570_v2, %v22960_v19  ;;  %v1614_v26 = vmul.f32 %v1583_v31, %v22966_v34  ;;  %v1567_v18 = vrot.slane %v1539_v46, %v22955_v20 }
 0x14e   :  { %21055 = vmatpush3.bf16.msra.mxu0 %v22871_v54  ;;  %19301 = vmatprep.mubr.msk.f32.mxu0 %vm22355_vm1, %v25963_v10  ;;  %v1569_v16 = vcombine.high %v1553_v52, %v1553_v52 }
 0x14f   :  { %19291 = vmatmul.mubr.msk.f32.vlgmr.msra.gmra.mrb[50].mxu1 %vm57_vm0, %v1613_v13  ;;  %21056 = vmatprep.subr.bf16.mxu0 %v25964_v11  ;;  %v1615_v57 = vmul.f32 %v1587_v24, %v22966_v34  ;;  %v1595_v2 = vrot.slane %v1567_v18, %v22960_v19  ;;  %v1616_v13 = vmul.f32 %v1591_v58, %v22966_v34 }
 0x150   :  { %21061 = vmatpush3.bf16.msra.mxu1 %v22873_v56  ;;  %19312 = vmatprep.mubr.msk.f32.mxu1 %vm22355_vm1, %v25963_v10  ;;  %v1571_v31 = vcombine.high %v1567_v18, %v1567_v18  ;;  %v1599_v24 = vrot.slane %v1569_v16, %v22960_v19  ;;  %v25965_v16 = vlaneseq }
 0x151   :  { %21062 = vmatprep.subr.bf16.mxu1 %v25964_v11  ;;  %v1617_v46 = vmul.f32 %v1595_v2, %v22966_v34 }
 0x152   :  { %21058 = vmatpush3.bf16.msra.mxu0 %v22875_v60  ;;  %v1603_v52 = vrot.slane %v1571_v31, %v22960_v19 }
 0x153   :  { %21065 = vmatprep.subr.bf16.mxu0 %v25964_v11 }
 0x154   :  { %21064 = vmatpush3.bf16.msra.mxu1 %v22877_v63  ;;  %v1619_v18 = vmul.f32 %v1603_v52, %v22966_v34 }
 0x155   :  { %19302 = vmatmul.mubr.msk.f32.vlgmr.msra.gmra.mrb[52].mxu0 %vm57_vm0, %v1614_v26  ;;  %21071 = vmatprep.subr.bf16.mxu1 %v25964_v11  ;;  %v1618_v26 = vmul.f32 %v1599_v24, %v22966_v34 }
 0x156   :  { %21067 = vmatpush3.bf16.msra.mxu0 %v22895_v41  ;;  %19323 = vmatprep.mubr.msk.f32.mxu0 %vm22355_vm1, %v25963_v10 }
 0x157   :  { %19313 = vmatmul.mubr.msk.f32.vlgmr.msra.gmra.mrb[52].mxu1 %vm57_vm0, %v1615_v57  ;;  %21068 = vmatprep.subr.bf16.mxu0 %v25964_v11  ;;  %v1256_v57 = vld [vmem:[%s25759_s2] sm:$0xff] }
 0x158   :  { %21073 = vmatpush3.bf16.msra.mxu1 %v22897_v45  ;;  %19334 = vmatprep.mubr.msk.f32.mxu1 %vm22355_vm1, %v25963_v10  ;;  %vm1263_vm2 = vcmp.gt.f32.partialorder %v1256_v57, %v22939_v25 }
 0x159   :  { %21074 = vmatprep.subr.bf16.mxu1 %v25964_v11  ;;  %v18003_v58 = vsel %vm1263_vm2, 1.0, %v25963_v10 }
 0x15a   :  { %21070 = vmatpush3.bf16.msra.mxu0 %v22899_v51  ;;  %v1267_v2 = vmax.f32 %v18003_v58, 0.0 }
 0x15b   :  { %21077 = vmatprep.subr.bf16.mxu0 %v25964_v11 }
 0x15c   :  { %21076 = vmatpush3.bf16.msra.mxu1 %v22901_v53  ;;  %v1268_v31 = vmin.f32 %v1267_v2, 1.0 }
 0x15d   :  { %19324 = vmatmul.mubr.msk.f32.vlgmr.msra.gmra.mrb[54].mxu0 %vm57_vm0, %v1616_v13  ;;  %21083 = vmatprep.subr.bf16.mxu1 %v25964_v11  ;;  %v23050_v13 = vand.u32 127, %v25965_v16 }
 0x15e   :  { %21079 = vmatpush3.bf16.msra.mxu0 %v22919_v49  ;;  %19345 = vmatprep.mubr.msk.f32.mxu0 %vm22355_vm1, %v25963_v10 }
 0x15f   :  { %19335 = vmatmul.mubr.msk.f32.vlgmr.msra.gmra.mrb[54].mxu1 %vm57_vm0, %v1617_v46  ;;  %21080 = vmatprep.subr.bf16.mxu0 %v25964_v11  ;;  %25966 = vst [vmem:[#allocation60_spill] sm:$0xff] %v23050_v13  ;;  %vm25857_vm3 = vcmp.eq.s32.totalorder %v23050_v13, 0 }
 0x160   :  { %21085 = vmatpush3.bf16.msra.mxu1 %v22921_v55  ;;  %19356 = vmatprep.mubr.msk.f32.mxu1 %vm22355_vm1, %v25963_v10  ;;  %v23055_v46 = vsel %vm25857_vm3, 0.0, %v1268_v31 }
 0x161   :  { %21086 = vmatprep.subr.bf16.mxu1 %v25964_v11  ;;  %v2220_v24 = vrot.slane %v23055_v46, %v22955_v20  ;;  %v2213_v58 = vcombine.high %v23055_v46, %v23055_v46 }
 0x162   :  { %21082 = vmatpush3.bf16.msra.mxu0 %v22923_v1 }
 0x163   :  { %21089 = vmatprep.subr.bf16.mxu0 %v25964_v11  ;;  %v2228_v52 = vcombine.high %v2220_v24, %v2220_v24 }
 0x164   :  { %21088 = vmatpush3.bf16.msra.mxu1 %v22925_v6 }
 0x165   :  { %19346 = vmatmul.mubr.msk.f32.vlgmr.msra.gmra.mrb[56].mxu0 %vm57_vm0, %v1618_v26  ;;  %21095 = vmatprep.subr.bf16.mxu1 %v25964_v11  ;;  %v2236_v26 = vrot.slane %v2220_v24, %v22955_v20  ;;  %v2250_v25 = vrot.slane %v2228_v52, %v22955_v20  ;;  %v2227_v24 = vrot.slane %v2213_v58, %v22955_v20 }
 0x166   :  { %19367 = vmatprep.mubr.msk.f32.mxu0 %vm22355_vm1, %v25963_v10 }
 0x167   :  { %19357 = vmatmul.mubr.msk.f32.vlgmr.msra.gmra.mrb[56].mxu1 %vm57_vm0, %v1619_v18  ;;  %vm2270_vm4 = vcmp.ne.f32.partialorder %v2236_v26, 0.0  ;;  %vm2271_vm5 = vcmp.ne.f32.partialorder %v2250_v25, 0.0  ;;  %v25967_v18 = vmov 0   ;;  %v2258_v2 = vcombine.high %v2236_v26, %v2236_v26 }
 0x168   :  { %19378 = vmatprep.mubr.msk.f32.mxu1 %vm22355_vm1, %v25963_v10  ;;  %v2278_v57 = vsel %vm2270_vm4, 1, %v25967_v18  ;;  %v2279_v16 = vsel %vm2271_vm5, 1, %v25967_v18 }
 0x169   :  { %v2289_v31 = vrot.slane %v2278_v57, %v22960_v19  ;;  %vm2272_vm6 = vcmp.ne.f32.partialorder %v2258_v2, 0.0  ;;  %v2243_v57 = vrot.slane %v2227_v24, %v22955_v20  ;;  %v2229_v2 = vcombine.high %v2227_v24, %v2227_v24 }
 0x16a   :  { %v2280_v26 = vsel %vm2272_vm6, 1, %v25967_v18 }
 0x16b   :  { %21091 = vmatpush3.bf16.xpose.msra.mxu0 %v22854_v30  ;;  %vm2318_vm7 = vcmp.eq.s32.totalorder %v2289_v31, 1  ;;  %vm2274_vm10 = vcmp.ne.f32.partialorder %v2243_v57, 0.0  ;;  %v2259_v24 = vcombine.high %v2243_v57, %v2243_v57 }
 0x16c   :  { %21092 = vmatprep.subr.bf16.mxu0 %v25964_v11 }
 0x16d   :  { %21097 = vmatpush3.bf16.xpose.msra.mxu1 %v22857_v32  ;;  %v2260_v32 = vcombine.high %v2250_v25, %v2250_v25  ;;  %vm2276_vm14 = vcmp.ne.f32.partialorder %v2259_v24, 0.0 }
 0x16e   :  { %21098 = vmatprep.subr.bf16.mxu1 %v25964_v11  ;;  %v2284_v57 = vsel %vm2276_vm14, 1, %v25967_v18  ;;  %vm3614_vm14 = vcmp.ne.f32.partialorder %v23055_v46, 0.0 }
 0x16f   :  { %vm2273_vm9 = vcmp.ne.f32.partialorder %v2260_v32, 0.0 }
 0x173   :  { %21094 = vmatpush3.bf16.xpose.msra.mxu0 %v22859_v36  ;;  %v2293_v36 = vrot.slane %v2279_v16, %v22960_v19 }
 0x174   :  { %21101 = vmatprep.subr.bf16.mxu0 %v25964_v11 }
 0x175   :  { %21100 = vmatpush3.bf16.xpose.msra.mxu1 %v22861_v38  ;;  %vm2319_vm8 = vcmp.eq.s32.totalorder %v2293_v36, 1 }
 0x176   :  { %21107 = vmatprep.subr.bf16.mxu1 %v25964_v11 }
 0x220   :  { %v1689_v38 = vpop.f32.mrb[50].mxu0 }
 0x221   :  { %v2204_v52 = vmul.f32 0.5, %v1689_v38  ;;  %v19281_v30 = vpop.f32.mrb[51].mxu0  ;;  %v2297_v38 = vrot.slane %v2280_v26, %v22960_v19 }
 0x222   :  { %v1762_v6 = vpop.f32.mrb[50].mxu1  ;;  %v2281_v30 = vsel %vm2273_vm9, 1, %v25967_v18  ;;  %vm3643_vm9 = vcmask 1043459  }
 0x223   :  { %v2205_v1 = vmul.f32 0.5, %v1762_v6  ;;  %v19292_v55 = vpop.f32.mrb[51].mxu1  ;;  %v23068_v49 = vsel %vm2318_vm7, -1e+30, %v2204_v52  ;;  %vm2320_vm11 = vcmp.eq.s32.totalorder %v2297_v38, 1  ;;  %v2301_v36 = vrot.slane %v2281_v30, %v22960_v19 }
 0x224   :  { %2334 = vmax.xlane.f32.xlu0 %v23068_v49  ;;  %v2257_v55 = vrot.slane %v2229_v2, %v22955_v20  ;;  %vm3639_vm7 = vcmask 1041409  }
 0x225   :  { %v2327_v25 = vsel %vm2319_vm8, -1e+30, %v2205_v1  ;;  %v2282_v1 = vsel %vm2274_vm10, 1, %v25967_v18  ;;  %vm2321_vm13 = vcmp.eq.s32.totalorder %v2301_v36, 1  ;;  %v2313_v36 = vrot.slane %v2284_v57, %v22960_v19 }
 0x226   :  { %2336 = vmax.xlane.f32.xlu1 %v2327_v25  ;;  %vm2275_vm12 = vcmp.ne.f32.partialorder %v2257_v55, 0.0  ;;  %v2305_v26 = vrot.slane %v2282_v1, %v22960_v19  ;;  %v2261_v38 = vcombine.high %v2257_v55, %v2257_v55  ;;  %vm3641_vm8 = vcmask 1042434  }
 0x227   :  { %v2283_v2 = vsel %vm2275_vm12, 1, %v25967_v18  ;;  %vm2324_vm5 = vcmp.eq.s32.totalorder %v2313_v36, 1  ;;  %vm3645_vm10 = vcmask 1044484   ;;  %vm3649_vm12 = vcmask 1046534  }
 0x228   :  { %v1835_v58 = vpop.f32.mrb[52].mxu0  ;;  %vm2322_vm15 = vcmp.eq.s32.totalorder %v2305_v26, 1  ;;  %vm2277_vm2 = vcmp.ne.f32.partialorder %v2261_v38, 0.0 }
 0x229   :  { %v2206_v6 = vmul.f32 0.5, %v1835_v58  ;;  %v19303_v16 = vpop.f32.mrb[53].mxu0  ;;  %v2285_v1 = vsel %vm2277_vm2, 1, %v25967_v18  ;;  %vm25881_vm2 = vcmask 7168  }
 0x22a   :  { %v1908_v31 = vpop.f32.mrb[52].mxu1 }
 0x22b   :  { %v2207_v32 = vmul.f32 0.5, %v1908_v31  ;;  %v19314_v52 = vpop.f32.mrb[53].mxu1  ;;  %v2328_v53 = vsel %vm2320_vm11, -1e+30, %v2206_v6  ;;  %v2309_v6 = vrot.slane %v2283_v2, %v22960_v19  ;;  %v2317_v2 = vrot.slane %v2285_v1, %v22960_v19 }
 0x22c   :  { %2338 = vmax.xlane.f32.xlu1 %v2328_v53  ;;  %vm3647_vm11 = vcmask 1045509  }
 0x22d   :  { %v2329_v51 = vsel %vm2321_vm13, -1e+30, %v2207_v32  ;;  %vm2323_vm4 = vcmp.eq.s32.totalorder %v2309_v6, 1  ;;  %vm2325_vm6 = vcmp.eq.s32.totalorder %v2317_v2, 1  ;;  %vm3651_vm13 = vcmask 1047559  }
 0x230   :  { %v1981_v58 = vpop.f32.mrb[54].mxu0  ;;  %2340 = vmax.xlane.f32.xlu1 %v2329_v51 }
 0x231   :  { %v2208_v16 = vmul.f32 0.5, %v1981_v58  ;;  %v19325_v30 = vpop.f32.mrb[55].mxu0 }
 0x232   :  { %v2054_v31 = vpop.f32.mrb[54].mxu1 }
 0x233   :  { %v2209_v52 = vmul.f32 0.5, %v2054_v31  ;;  %v19336_v45 = vpop.f32.mrb[55].mxu1  ;;  %v2330_v41 = vsel %vm2322_vm15, -1e+30, %v2208_v16 }
 0x234   :  { %2342 = vmax.xlane.f32.xlu1 %v2330_v41 }
 0x235   :  { %v2331_v32 = vsel %vm2323_vm4, -1e+30, %v2209_v52 }
 0x238   :  { %v2127_v55 = vpop.f32.mrb[56].mxu0  ;;  %2344 = vmax.xlane.f32.xlu1 %v2331_v32 }
 0x239   :  { %v2210_v24 = vmul.f32 0.5, %v2127_v55  ;;  %v19347_v58 = vpop.f32.mrb[57].mxu0 }
 0x23a   :  { %v2200_v26 = vpop.f32.mrb[56].mxu1 }
 0x23b   :  { %v2211_v45 = vmul.f32 0.5, %v2200_v26  ;;  %v19358_v16 = vpop.f32.mrb[57].mxu1  ;;  %v2332_v30 = vsel %vm2324_vm5, -1e+30, %v2210_v24  ;;  %vm25856_vm5 = vcmask 130112  }
 0x23c   :  { %2346 = vmax.xlane.f32.xlu1 %v2332_v30 }
 0x23d   :  { %v2333_v38 = vsel %vm2325_vm6, -1e+30, %v2211_v45  ;;  %vm25855_vm6 = vcmask 195712  }
 0x240   :  { %2348 = vmax.xlane.f32.xlu1 %v2333_v38 }
 0x2b1   :  { %v2335_v31 = vpop.xlane.xlu0 %2334 }
 0x2b2   :  { %v2350_v6 = vsub.f32 %v23068_v49, %v2335_v31 }
 0x2b3   :  { %v2337_v52 = vpop.xlane.xlu1 %2336 }
 0x2b4   :  { %v2358_v57 = vmul.f32 1.442695, %v2350_v6  ;;  %v2351_v18 = vsub.f32 %v2327_v25, %v2337_v52 }
 0x2b6   :  { %21989 = vpow2.f32 %v2358_v57  ;;  %v2360_v55 = vmul.f32 1.442695, %v2351_v18 }
 0x2b8   :  { %21991 = vpow2.f32 %v2360_v55 }
 0x2b9   :  { %v2339_v58 = vpop.xlane.xlu1 %2338 }
 0x2ba   :  { %v2352_v36 = vsub.f32 %v2328_v53, %v2339_v58 }
 0x2bc   :  { %v2362_v63 = vmul.f32 1.442695, %v2352_v36 }
 0x2bd   :  { %v2341_v1 = vpop.xlane.xlu1 %2340 }
 0x2be   :  { %21993 = vpow2.f32 %v2362_v63  ;;  %v2353_v26 = vsub.f32 %v2329_v51, %v2341_v1 }
 0x2c0   :  { %v21990_v24 = vpop.eup %21989  ;;  %v2364_v16 = vmul.f32 1.442695, %v2353_v26 }
 0x2c1   :  { %v2343_v2 = vpop.xlane.xlu1 %2342  ;;  %2374 = vadd.xlane.f32.xlu1 %v21990_v24 }
 0x2c2   :  { %21995 = vpow2.f32 %v2364_v16  ;;  %v2354_v45 = vsub.f32 %v2330_v41, %v2343_v2  ;;  %v21992_v60 = vpop.eup %21991 }
 0x2c4   :  { %v2366_v49 = vmul.f32 1.442695, %v2354_v45 }
 0x2c5   :  { %v2345_v31 = vpop.xlane.xlu1 %2344  ;;  %2376 = vadd.xlane.f32.xlu1 %v21992_v60 }
 0x2c6   :  { %21997 = vpow2.f32 %v2366_v49  ;;  %v2355_v25 = vsub.f32 %v2331_v32, %v2345_v31 }
 0x2c8   :  { %v21994_v18 = vpop.eup %21993  ;;  %v2368_v6 = vmul.f32 1.442695, %v2355_v25 }
 0x2c9   :  { %2378 = vadd.xlane.f32.xlu0 %v21994_v18  ;;  %v2347_v53 = vpop.xlane.xlu1 %2346 }
 0x2ca   :  { %21999 = vpow2.f32 %v2368_v6  ;;  %v2356_v52 = vsub.f32 %v2332_v30, %v2347_v53 }
 0x2cc   :  { %v21996_v63 = vpop.eup %21995  ;;  %v2370_v51 = vmul.f32 1.442695, %v2356_v52 }
 0x2cd   :  { %2380 = vadd.xlane.f32.xlu1 %v21996_v63  ;;  %v2349_v57 = vpop.xlane.xlu1 %2348 }
 0x2ce   :  { %22001 = vpow2.f32 %v2370_v51  ;;  %v2357_v55 = vsub.f32 %v2333_v38, %v2349_v57 }
 0x2d0   :  { %v21998_v58 = vpop.eup %21997  ;;  %v2372_v41 = vmul.f32 1.442695, %v2357_v55 }
 0x2d1   :  { %2382 = vadd.xlane.f32.xlu0 %v21998_v58 }
 0x2d2   :  { %22003 = vpow2.f32 %v2372_v41 }
 0x2d4   :  { %v22000_v36 = vpop.eup %21999 }
 0x2d5   :  { %2384 = vadd.xlane.f32.xlu1 %v22000_v36 }
 0x2d8   :  { %v23086_v1 = vpop.eup %22001 }
 0x2d9   :  { %2386 = vadd.xlane.f32.xlu0 %v23086_v1 }
 0x2dc   :  { %v23089_v32 = vpop.eup %22003 }
 0x2dd   :  { %2388 = vadd.xlane.f32.xlu1 %v23089_v32 }
 0x34e   :  { %v2375_v30 = vpop.xlane.xlu1 %2374 }
 0x34f   :  { %22005 = vrcp.f32 %v2375_v30 }
 0x352   :  { %v2377_v26 = vpop.xlane.xlu1 %2376 }
 0x353   :  { %22007 = vrcp.f32 %v2377_v26 }
 0x356   :  { %v2379_v38 = vpop.xlane.xlu0 %2378 }
 0x357   :  { %22009 = vrcp.f32 %v2379_v38 }
 0x359   :  { %v22006_v16 = vpop.eup %22005 }
 0x35a   :  { %v2391_v2 = vmul.f32 %v22006_v16, %v21990_v24  ;;  %v2381_v49 = vpop.xlane.xlu1 %2380 }
 0x35b   :  { %22011 = vrcp.f32 %v2381_v49 }
 0x35c   :  { %19368 = vmatmul.mubr.f32.vlgmr.msra.gmra.mrb[58].mxu0 %v2391_v2 }
 0x35d   :  { %v22008_v45 = vpop.eup %22007  ;;  %21103 = vmatpush3.bf16.xpose.msra.mxu0 %v22879_v5  ;;  %19389 = vmatprep.mubr.msk.f32.mxu0 %vm22355_vm1, %v25963_v10 }
 0x35e   :  { %v2393_v31 = vmul.f32 %v22008_v45, %v21992_v60  ;;  %21104 = vmatprep.subr.bf16.mxu0 %v25964_v11  ;;  %v2383_v25 = vpop.xlane.xlu0 %2382 }
 0x35f   :  { %22013 = vrcp.f32 %v2383_v25 }
 0x360   :  { %19379 = vmatmul.mubr.f32.vlgmr.msra.gmra.mrb[58].mxu1 %v2393_v31 }
 0x361   :  { %21109 = vmatpush3.bf16.xpose.msra.mxu1 %v22881_v7  ;;  %19400 = vmatprep.mubr.msk.f32.mxu1 %vm22355_vm1, %v25963_v10  ;;  %v22010_v24 = vpop.eup %22009 }
 0x362   :  { %21110 = vmatprep.subr.bf16.mxu1 %v25964_v11  ;;  %v2395_v60 = vmul.f32 %v22010_v24, %v21994_v18  ;;  %v2385_v53 = vpop.xlane.xlu1 %2384 }
 0x363   :  { %22015 = vrcp.f32 %v2385_v53 }
 0x365   :  { %21106 = vmatpush3.bf16.xpose.msra.mxu0 %v22883_v15  ;;  %v22012_v6 = vpop.eup %22011 }
 0x366   :  { %21113 = vmatprep.subr.bf16.mxu0 %v25964_v11  ;;  %v2397_v52 = vmul.f32 %v22012_v6, %v21996_v63  ;;  %v2387_v51 = vpop.xlane.xlu0 %2386 }
 0x367   :  { %22017 = vrcp.f32 %v2387_v51 }
 0x369   :  { %21112 = vmatpush3.bf16.xpose.msra.mxu1 %v22885_v17  ;;  %v22014_v18 = vpop.eup %22013 }
 0x36a   :  { %21119 = vmatprep.subr.bf16.mxu1 %v25964_v11  ;;  %v2399_v63 = vmul.f32 %v22014_v18, %v21998_v58  ;;  %v2389_v55 = vpop.xlane.xlu1 %2388 }
 0x36b   :  { %22019 = vrcp.f32 %v2389_v55 }
 0x36c   :  { %19390 = vmatmul.mubr.f32.vlgmr.msra.gmra.mrb[60].mxu0 %v2395_v60 }
 0x36d   :  { %21115 = vmatpush3.bf16.xpose.msra.mxu0 %v22903_v59  ;;  %19411 = vmatprep.mubr.msk.f32.mxu0 %vm22355_vm1, %v25963_v10  ;;  %v22016_v57 = vpop.eup %22015 }
 0x36e   :  { %21116 = vmatprep.subr.bf16.mxu0 %v25964_v11  ;;  %v2401_v41 = vmul.f32 %v22016_v57, %v22000_v36 }
 0x370   :  { %19401 = vmatmul.mubr.f32.vlgmr.msra.gmra.mrb[60].mxu1 %v2397_v52 }
 0x371   :  { %21121 = vmatpush3.bf16.xpose.msra.mxu1 %v22905_v0  ;;  %19422 = vmatprep.mubr.msk.f32.mxu1 %vm22355_vm1, %v25963_v10  ;;  %v22018_v58 = vpop.eup %22017 }
 0x372   :  { %21122 = vmatprep.subr.bf16.mxu1 %v25964_v11  ;;  %v2403_v36 = vmul.f32 %v22018_v58, %v23086_v1 }
 0x375   :  { %21118 = vmatpush3.bf16.xpose.msra.mxu0 %v22907_v8  ;;  %v22020_v30 = vpop.eup %22019 }
 0x376   :  { %21125 = vmatprep.subr.bf16.mxu0 %v25964_v11  ;;  %v2405_v26 = vmul.f32 %v22020_v30, %v23089_v32 }
 0x379   :  { %21124 = vmatpush3.bf16.xpose.msra.mxu1 %v22909_v14 }
 0x37a   :  { %21131 = vmatprep.subr.bf16.mxu1 %v25964_v11 }
 0x37c   :  { %19412 = vmatmul.mubr.f32.vlgmr.msra.gmra.mrb[62].mxu0 %v2399_v63 }
 0x37d   :  { %21127 = vmatpush3.bf16.xpose.msra.mxu0 %v22927_v21  ;;  %19433 = vmatprep.mubr.msk.f32.mxu0 %vm22355_vm1, %v25963_v10 }
 0x37e   :  { %21128 = vmatprep.subr.bf16.mxu0 %v25964_v11 }
 0x380   :  { %19423 = vmatmul.mubr.f32.vlgmr.msra.gmra.mrb[62].mxu1 %v2401_v41 }
 0x381   :  { %21133 = vmatpush3.bf16.xpose.msra.mxu1 %v22929_v29  ;;  %19444 = vmatprep.mubr.msk.f32.mxu1 %vm22355_vm1, %v25963_v10 }
 0x382   :  { %21134 = vmatprep.subr.bf16.mxu1 %v25964_v11 }
 0x385   :  { %21130 = vmatpush3.bf16.xpose.msra.mxu0 %v22931_v43 }
 0x386   :  { %21137 = vmatprep.subr.bf16.mxu0 %v25964_v11 }
 0x389   :  { %21136 = vmatpush3.bf16.xpose.msra.mxu1 %v22933_v47 }
 0x38a   :  { %21143 = vmatprep.subr.bf16.mxu1 %v25964_v11 }
 0x38c   :  { %19434 = vmatmul.mubr.f32.vlgmr.msra.gmra.mrb[64].mxu0 %v2403_v36 }
 0x38d   :  { %21139 = vmatpush3.bf16.msra.mxu0 %v22863_v42  ;;  %19455 = vmatprep.mubr.msk.f32.mxu0 %vm22355_vm1, %v25963_v10 }
 0x38e   :  { %21140 = vmatprep.subr.bf16.mxu0 %v25964_v11 }
 0x390   :  { %19445 = vmatmul.mubr.f32.vlgmr.msra.gmra.mrb[64].mxu1 %v2405_v26 }
 0x391   :  { %21142 = vmatpush3.bf16.msra.mxu0 %v22867_v48  ;;  %21145 = vmatpush3.bf16.msra.mxu1 %v22865_v44 }
 0x392   :  { %21146 = vmatprep.subr.bf16.mxu1 %v25964_v11  ;;  %21149 = vmatprep.subr.bf16.mxu0 %v25964_v11 }
 0x393   :  { %19466 = vmatprep.mubr.msk.f32.mxu1 %vm22355_vm1, %v25963_v10 }
 0x395   :  { %21148 = vmatpush3.bf16.msra.mxu1 %v22869_v50 }
 0x396   :  { %21155 = vmatprep.subr.bf16.mxu1 %v25964_v11 }
 0x42f   :  { %v2472_v1 = vpop.f32.mrb[58].mxu0 }
 0x430   :  { %v2966_v32 = vmul.f32 %v2472_v1, %v22966_v34  ;;  %v19369_v16 = vpop.f32.mrb[59].mxu0  ;;  %v25968_v1 = vld [vmem:[#allocation11_spill] sm:$0xff] }
 0x432   :  { %19456 = vmatmul.mubr.msk.f32.vlgmr.msra.gmra.mrb[66].mxu0 %vm57_vm0, %v2966_v32 }
 0x433   :  { %21151 = vmatpush3.bf16.msra.mxu0 %v22887_v23  ;;  %v2542_v38 = vpop.f32.mrb[58].mxu1  ;;  %19477 = vmatprep.mubr.msk.f32.mxu0 %vm22355_vm1, %v25963_v10 }
 0x434   :  { %v2967_v2 = vmul.f32 %v2542_v38, %v22966_v34  ;;  %v19380_v45 = vpop.f32.mrb[59].mxu1  ;;  %21152 = vmatprep.subr.bf16.mxu0 %v25964_v11 }
 0x436   :  { %19467 = vmatmul.mubr.msk.f32.vlgmr.msra.gmra.mrb[66].mxu1 %vm57_vm0, %v2967_v2 }
 0x437   :  { %21154 = vmatpush3.bf16.msra.mxu0 %v22891_v33  ;;  %21157 = vmatpush3.bf16.msra.mxu1 %v22889_v27 }
 0x438   :  { %21158 = vmatprep.subr.bf16.mxu1 %v25964_v11  ;;  %21161 = vmatprep.subr.bf16.mxu0 %v25964_v11 }
 0x439   :  { %19488 = vmatprep.mubr.msk.f32.mxu1 %vm22355_vm1, %v25963_v10 }
 0x43b   :  { %21160 = vmatpush3.bf16.msra.mxu1 %v22893_v35 }
 0x43c   :  { %21167 = vmatprep.subr.bf16.mxu1 %v25964_v11 }
 0x43f   :  { %v2612_v49 = vpop.f32.mrb[60].mxu0 }
 0x440   :  { %v2968_v31 = vmul.f32 %v2612_v49, %v22966_v34  ;;  %v19391_v24 = vpop.f32.mrb[61].mxu0 }
 0x442   :  { %19478 = vmatmul.mubr.msk.f32.vlgmr.msra.gmra.mrb[68].mxu0 %vm57_vm0, %v2968_v31 }
 0x443   :  { %21163 = vmatpush3.bf16.msra.mxu0 %v22911_v22  ;;  %v2682_v25 = vpop.f32.mrb[60].mxu1  ;;  %19499 = vmatprep.mubr.msk.f32.mxu0 %vm22355_vm1, %v25963_v10 }
 0x444   :  { %v2969_v60 = vmul.f32 %v2682_v25, %v22966_v34  ;;  %v19402_v6 = vpop.f32.mrb[61].mxu1  ;;  %21164 = vmatprep.subr.bf16.mxu0 %v25964_v11 }
 0x446   :  { %19489 = vmatmul.mubr.msk.f32.vlgmr.msra.gmra.mrb[68].mxu1 %vm57_vm0, %v2969_v60 }
 0x447   :  { %21166 = vmatpush3.bf16.msra.mxu0 %v22915_v37  ;;  %21169 = vmatpush3.bf16.msra.mxu1 %v22913_v28 }
 0x448   :  { %21170 = vmatprep.subr.bf16.mxu1 %v25964_v11  ;;  %21173 = vmatprep.subr.bf16.mxu0 %v25964_v11 }
 0x449   :  { %19510 = vmatprep.mubr.msk.f32.mxu1 %vm22355_vm1, %v25963_v10 }
 0x44b   :  { %21172 = vmatpush3.bf16.msra.mxu1 %v22917_v40 }
 0x44c   :  { %21179 = vmatprep.subr.bf16.mxu1 %v25964_v11 }
 0x44f   :  { %v2752_v53 = vpop.f32.mrb[62].mxu0 }
 0x450   :  { %v2970_v52 = vmul.f32 %v2752_v53, %v22966_v34  ;;  %v19413_v18 = vpop.f32.mrb[63].mxu0 }
 0x452   :  { %19500 = vmatmul.mubr.msk.f32.vlgmr.msra.gmra.mrb[70].mxu0 %vm57_vm0, %v2970_v52 }
 0x453   :  { %21175 = vmatpush3.bf16.msra.mxu0 %v22935_v61  ;;  %v2822_v51 = vpop.f32.mrb[62].mxu1  ;;  %19521 = vmatprep.mubr.msk.f32.mxu0 %vm22355_vm1, %v25963_v10 }
 0x454   :  { %v2971_v63 = vmul.f32 %v2822_v51, %v22966_v34  ;;  %v19424_v57 = vpop.f32.mrb[63].mxu1  ;;  %21176 = vmatprep.subr.bf16.mxu0 %v25964_v11 }
 0x456   :  { %19511 = vmatmul.mubr.msk.f32.vlgmr.msra.gmra.mrb[70].mxu1 %vm57_vm0, %v2971_v63 }
 0x457   :  { %21178 = vmatpush3.bf16.msra.mxu0 %v22944_v39  ;;  %21181 = vmatpush3.bf16.msra.mxu1 %v22937_v62 }
 0x458   :  { %21182 = vmatprep.subr.bf16.mxu1 %v25964_v11  ;;  %19532 = vmatprep.mubr.msk.f32.mxu1 %vm22355_vm1, %v25963_v10 }
 0x459   :  { %21185 = vmatprep.subr.bf16.mxu0 %v25964_v11 }
 0x45b   :  { %21184 = vmatpush3.bf16.msra.mxu1 %v22949_v12  ;;  %v4144_v12 = vadd.s32 4294967272, %v23050_v13 }
 0x45c   :  { %21191 = vmatprep.subr.bf16.mxu1 %v25964_v11 }
 0x45f   :  { %v2892_v55 = vpop.f32.mrb[64].mxu0 }
 0x460   :  { %v2972_v41 = vmul.f32 %v2892_v55, %v22966_v34  ;;  %v19435_v58 = vpop.f32.mrb[65].mxu0 }
 0x462   :  { %19522 = vmatmul.mubr.msk.f32.vlgmr.msra.gmra.mrb[72].mxu0 %vm57_vm0, %v2972_v41 }
 0x463   :  { %v2962_v36 = vpop.f32.mrb[64].mxu1  ;;  %21187 = vmatpush3.bf16.msra.mxu0 %v22749_v3  ;;  %19543 = vmatprep.mubr.msk.f32.mxu0 %vm22355_vm1, %v25963_v10 }
 0x464   :  { %v2973_v30 = vmul.f32 %v2962_v36, %v22966_v34  ;;  %v19446_v26 = vpop.f32.mrb[65].mxu1  ;;  %21188 = vmatprep.subr.bf16.mxu0 %v25964_v11 }
 0x466   :  { %19533 = vmatmul.mubr.msk.f32.vlgmr.msra.gmra.mrb[72].mxu1 %vm57_vm0, %v2973_v30 }
 0x467   :  { %21193 = vmatpush3.bf16.msra.mxu1 %v22753_v4  ;;  %21190 = vmatpush3.bf16.msra.mxu0 %v22775_v9  ;;  %v25972_v4 = vld [vmem:[#allocation57_spill] sm:$0xff] }
 0x468   :  { %21194 = vmatprep.subr.bf16.mxu1 %v25964_v11  ;;  %21197 = vmatprep.subr.bf16.mxu0 %v25964_v11  ;;  %v23373_v3 = vsub.s32 %v23050_v13, %v25972_v4  ;;  %v23386_v28 = vsub.s32 %v4144_v12, %v25972_v4 }
 0x469   :  { %19554 = vmatprep.mubr.msk.f32.mxu1 %vm22355_vm1, %v25963_v10 }
 0x46b   :  { %21196 = vmatpush3.bf16.msra.mxu1 %v25968_v1 }
 0x46c   :  { %21203 = vmatprep.subr.bf16.mxu1 %v25964_v11 }
 0x505   :  { %v3043_v34 = vpop.f32.mrb[66].mxu0 }
 0x506   :  { %v3558_v32 = vrot.slane %v3043_v34, 4  ;;  %v19457_v16 = vpop.f32.mrb[67].mxu0 }
 0x508   :  { %v3559_v38 = vadd.f32 %v3558_v32, %v3043_v34 }
 0x509   :  { %v3116_v2 = vpop.f32.mrb[66].mxu1 }
 0x50a   :  { %v3560_v45 = vrot.slane %v3559_v38, 2  ;;  %v3564_v49 = vrot.slane %v3116_v2, 4  ;;  %v19468_v31 = vpop.f32.mrb[67].mxu1 }
 0x50c   :  { %v3561_v24 = vadd.f32 %v3560_v45, %v3559_v38  ;;  %v3565_v25 = vadd.f32 %v3564_v49, %v3116_v2 }
 0x50e   :  { %v3562_v60 = vrot.slane %v3561_v24, 1  ;;  %v3566_v6 = vrot.slane %v3565_v25, 2 }
 0x510   :  { %v3563_v53 = vadd.f32 %v3562_v60, %v3561_v24  ;;  %v3567_v52 = vadd.f32 %v3566_v6, %v3565_v25 }
 0x512   :  { %v3606_v18 = vmul.f32 0.17677669, %v3563_v53  ;;  %v3568_v51 = vrot.slane %v3567_v52, 1 }
 0x514   :  { %v3569_v63 = vadd.f32 %v3568_v51, %v3567_v52  ;;  %22021 = vtanh.f32 %v3606_v18 }
 0x515   :  { %v3189_v57 = vpop.f32.mrb[68].mxu0 }
 0x516   :  { %v3607_v55 = vmul.f32 0.17677669, %v3569_v63  ;;  %v3570_v41 = vrot.slane %v3189_v57, 4  ;;  %v19479_v58 = vpop.f32.mrb[69].mxu0 }
 0x518   :  { %22023 = vtanh.f32 %v3607_v55  ;;  %v3571_v36 = vadd.f32 %v3570_v41, %v3189_v57 }
 0x519   :  { %v3262_v30 = vpop.f32.mrb[68].mxu1 }
 0x51a   :  { %v3572_v26 = vrot.slane %v3571_v36, 2  ;;  %v3576_v34 = vrot.slane %v3262_v30, 4  ;;  %v19490_v32 = vpop.f32.mrb[69].mxu1 }
 0x51c   :  { %v3573_v16 = vadd.f32 %v3572_v26, %v3571_v36  ;;  %v3577_v38 = vadd.f32 %v3576_v34, %v3262_v30 }
 0x51e   :  { %v3574_v2 = vrot.slane %v3573_v16, 1  ;;  %v3578_v45 = vrot.slane %v3577_v38, 2  ;;  %v22022_v49 = vpop.eup %22021 }
 0x51f   :  { %v3623_v53 = vmul.f32 10.0, %v22022_v49 }
 0x520   :  { %v3575_v31 = vadd.f32 %v3574_v2, %v3573_v16  ;;  %v3579_v24 = vadd.f32 %v3578_v45, %v3577_v38 }
 0x522   :  { %v22024_v25 = vpop.eup %22023  ;;  %v3608_v60 = vmul.f32 0.17677669, %v3575_v31  ;;  %v3580_v6 = vrot.slane %v3579_v24, 1 }
 0x523   :  { %v3624_v52 = vmul.f32 10.0, %v22024_v25 }
 0x524   :  { %22025 = vtanh.f32 %v3608_v60  ;;  %v3581_v18 = vadd.f32 %v3580_v6, %v3579_v24 }
 0x525   :  { %v3640_v51 = vsel %vm3639_vm7, %v3624_v52, %v3623_v53  ;;  %v3335_v63 = vpop.f32.mrb[70].mxu0 }
 0x526   :  { %v3609_v57 = vmul.f32 0.17677669, %v3581_v18  ;;  %v3582_v55 = vrot.slane %v3335_v63, 4  ;;  %v19501_v41 = vpop.f32.mrb[71].mxu0 }
 0x528   :  { %22027 = vtanh.f32 %v3609_v57  ;;  %v3583_v58 = vadd.f32 %v3582_v55, %v3335_v63 }
 0x529   :  { %v3408_v36 = vpop.f32.mrb[70].mxu1 }
 0x52a   :  { %v3584_v30 = vrot.slane %v3583_v58, 2  ;;  %v3588_v26 = vrot.slane %v3408_v36, 4  ;;  %v19512_v34 = vpop.f32.mrb[71].mxu1 }
 0x52c   :  { %v3585_v32 = vadd.f32 %v3584_v30, %v3583_v58  ;;  %v3589_v16 = vadd.f32 %v3588_v26, %v3408_v36 }
 0x52e   :  { %v22026_v38 = vpop.eup %22025  ;;  %v3586_v2 = vrot.slane %v3585_v32, 1  ;;  %v3590_v45 = vrot.slane %v3589_v16, 2 }
 0x52f   :  { %v3625_v49 = vmul.f32 10.0, %v22026_v38 }
 0x530   :  { %v3587_v31 = vadd.f32 %v3586_v2, %v3585_v32  ;;  %v3591_v24 = vadd.f32 %v3590_v45, %v3589_v16 }
 0x531   :  { %v3642_v25 = vsel %vm3641_vm8, %v3625_v49, %v3640_v51 }
 0x532   :  { %v22028_v60 = vpop.eup %22027  ;;  %v3610_v6 = vmul.f32 0.17677669, %v3587_v31  ;;  %v3592_v53 = vrot.slane %v3591_v24, 1 }
 0x533   :  { %v3626_v52 = vmul.f32 10.0, %v22028_v60 }
 0x534   :  { %22029 = vtanh.f32 %v3610_v6  ;;  %v3593_v18 = vadd.f32 %v3592_v53, %v3591_v24 }
 0x535   :  { %v3481_v63 = vpop.f32.mrb[72].mxu0  ;;  %v3644_v57 = vsel %vm3643_vm9, %v3626_v52, %v3642_v25 }
 0x536   :  { %v3611_v55 = vmul.f32 0.17677669, %v3593_v18  ;;  %v3594_v41 = vrot.slane %v3481_v63, 4  ;;  %v19523_v58 = vpop.f32.mrb[73].mxu0 }
 0x538   :  { %22031 = vtanh.f32 %v3611_v55  ;;  %v3595_v36 = vadd.f32 %v3594_v41, %v3481_v63 }
 0x539   :  { %v3554_v30 = vpop.f32.mrb[72].mxu1 }
 0x53a   :  { %v3596_v26 = vrot.slane %v3595_v36, 2  ;;  %v3600_v34 = vrot.slane %v3554_v30, 4  ;;  %v19534_v32 = vpop.f32.mrb[73].mxu1 }
 0x53c   :  { %v3597_v51 = vadd.f32 %v3596_v26, %v3595_v36  ;;  %v3601_v16 = vadd.f32 %v3600_v34, %v3554_v30 }
 0x53e   :  { %v22030_v38 = vpop.eup %22029  ;;  %v3598_v2 = vrot.slane %v3597_v51, 1  ;;  %v3602_v45 = vrot.slane %v3601_v16, 2 }
 0x53f   :  { %v3627_v49 = vmul.f32 10.0, %v22030_v38 }
 0x540   :  { %v3599_v31 = vadd.f32 %v3598_v2, %v3597_v51  ;;  %v3603_v24 = vadd.f32 %v3602_v45, %v3601_v16 }
 0x541   :  { %v3646_v25 = vsel %vm3645_vm10, %v3627_v49, %v3644_v57 }
 0x542   :  { %v22032_v60 = vpop.eup %22031  ;;  %v3612_v6 = vmul.f32 0.17677669, %v3599_v31  ;;  %v3604_v53 = vrot.slane %v3603_v24, 1  ;;  %v23215_v31 = vcvt.s32.f32 %v23050_v13 }
 0x543   :  { %v3628_v52 = vmul.f32 10.0, %v22032_v60 }
 0x544   :  { %22033 = vtanh.f32 %v3612_v6  ;;  %v3605_v18 = vadd.f32 %v3604_v53, %v3603_v24  ;;  %25969 = vst [vmem:[#allocation61_spill] sm:$0xff] %v23215_v31 }
 0x545   :  { %v3648_v63 = vsel %vm3647_vm11, %v3628_v52, %v3646_v25 }
 0x546   :  { %v3613_v55 = vmul.f32 0.17677669, %v3605_v18 }
 0x548   :  { %22035 = vtanh.f32 %v3613_v55  ;;  %v3756_v55 = vld [vmem:[%s25757_s0 + $0x8] sm:$0xff] }
 0x54e   :  { %v22034_v41 = vpop.eup %22033 }
 0x54f   :  { %v3629_v58 = vmul.f32 10.0, %v22034_v41  ;;  %v3755_v41 = vld [vmem:[%s25757_s0] sm:$0xff] }
 0x551   :  { %v3650_v36 = vsel %vm3649_vm12, %v3629_v58, %v3648_v63 }
 0x552   :  { %v22036_v30 = vpop.eup %22035 }
 0x553   :  { %v3630_v26 = vmul.f32 10.0, %v22036_v30 }
 0x555   :  { %v3652_v57 = vsel %vm3651_vm13, %v3630_v26, %v3650_v36 }
 0x556   :  { %v3654_v34 = vsel %vm3614_vm14, -1e+30, %v3652_v57  ;;  %vm25854_vm14 = vcmask 261312  }
 0x557   :  { %3655 = vmax.xlane.f32.xlu0 %v3654_v34 }
 0x5e4   :  { %v3656_v32 = vpop.xlane.xlu0 %3655 }
 0x5e5   :  { %v3657_v51 = vsub.f32 %v3654_v34, %v3656_v32  ;;  %v3757_v34 = vld [vmem:[%s25757_s0 + $0x10] sm:$0xff]  ;;  %v3760_v32 = vld [vmem:[%s25757_s0 + $0x28] sm:$0xff] }
 0x5e7   :  { %v3658_v16 = vmul.f32 1.442695, %v3657_v51 }
 0x5e9   :  { %22037 = vpow2.f32 %v3658_v16 }
 0x5f3   :  { %v22038_v38 = vpop.eup %22037 }
 0x5f4   :  { %3660 = vadd.xlane.f32.xlu1 %v22038_v38 }
 0x681   :  { %v3661_v2 = vpop.xlane.xlu1 %3660 }
 0x682   :  { %22039 = vrcp.f32 %v3661_v2  ;;  %v3758_v2 = vld [vmem:[%s25757_s0 + $0x18] sm:$0xff] }
 0x68c   :  { %v22040_v45 = vpop.eup %22039 }
 0x68d   :  { %v3663_v49 = vmul.f32 %v22040_v45, %v22038_v38  ;;  %v3761_v45 = vld [vmem:[%s25757_s0 + $0x30] sm:$0xff] }
 0x68f   :  { %3665 = vmax.xlane.f32.xlu0 %v3663_v49  ;;  %3664 = vst [vmem:[#allocation5] sm:$0xff] %v3663_v49 }
 0x71c   :  { %v23217_v46 = vpop.xlane.xlu0 %3665 }
 0x71d   :  { %25970 = vst [vmem:[#allocation62_spill] sm:$0xff] %v23217_v46  ;;  %vm3667_vm15 = vcmp.ge.f32.partialorder %v3663_v49, %v23217_v46  ;;  %v4130_v46 = vadd.s32 4294967288, %v23050_v13 }
 0x71e   :  { %v3669_v24 = vsel %vm3667_vm15, %v23215_v31, 128.0  ;;  %v4137_v31 = vadd.s32 4294967280, %v23050_v13 }
 0x71f   :  { %3670 = vmin.xlane.f32.xlu1 %v3669_v24  ;;  %v23377_v39 = vsub.s32 %v4130_v46, %v25972_v4 }
 0x720   :  { %v23380_v62 = vsub.s32 %v4137_v31, %v25972_v4 }
 0x7ac   :  { %v3671_v25 = vpop.xlane.xlu1 %3670 }
 0x7ad   :  { %v21965_v60 = vtrunc.f32 %v3671_v25 }
 0x7af   :  { %v23221_v6 = vcvt.f32.s32 %v21965_v60 }
 0x7b1   :  { %vm3673_vm4 = vcmp.eq.s32.totalorder %v23050_v13, %v23221_v6  ;;  %3683 = vst.msk [vmem:[%s25768_s11] sm:$0xff] %vm25881_vm2, %v23221_v6  ;;  %vm3688_vm15 = vcmp.eq.s32.totalorder %v23221_v6, 0 }
 0x7b2   :  { %v23231_v53 = vsel %vm3673_vm4, 1.0, %v25963_v10 }
 0x7b3   :  { %v3713_v52 = vrot.slane %v23231_v53, %v22955_v20  ;;  %v3706_v49 = vcombine.high %v23231_v53, %v23231_v53 }
 0x7b5   :  { %v3729_v18 = vrot.slane %v3713_v52, %v22955_v20  ;;  %v3721_v63 = vcombine.high %v3713_v52, %v3713_v52  ;;  %v3764_v52 = vld [vmem:[%s25757_s0 + $0x48] sm:$0xff] }
 0x7b7   :  { %v3790_v58 = vrot.slane %v3729_v18, %v22960_v19  ;;  %v3743_v36 = vrot.slane %v3721_v63, %v22955_v20  ;;  %v3751_v38 = vcombine.high %v3729_v18, %v3729_v18  ;;  %v3759_v18 = vld [vmem:[%s25757_s0 + $0x20] sm:$0xff] }
 0x7b9   :  { %v3828_v30 = vmul.f32 %v3790_v58, %v3756_v55  ;;  %v3827_v26 = vmul.f32 %v3790_v58, %v3755_v41  ;;  %v3794_v57 = vrot.slane %v3743_v36, %v22960_v19  ;;  %v3829_v51 = vmul.f32 %v3790_v58, %v3757_v34 }
 0x7ba   :  { %v3830_v24 = vmul.f32 %v3790_v58, %v3758_v2  ;;  %v3798_v60 = vrot.slane %v3751_v38, %v22960_v19  ;;  %v3720_v41 = vrot.slane %v3706_v49, %v22955_v20  ;;  %v3762_v58 = vld [vmem:[%s25757_s0 + $0x38] sm:$0xff]  ;;  %v3771_v49 = vld [vmem:[%s25757_s0 + $0x80] sm:$0xff] }
 0x7bb   :  { %3861 = vadd.xlane.f32.xlu1 %v3828_v30  ;;  %3859 = vadd.xlane.f32.xlu0 %v3827_v26  ;;  %v3832_v16 = vmul.f32 %v3794_v57, %v3760_v32  ;;  %v3833_v25 = vmul.f32 %v3794_v57, %v3761_v45  ;;  %v3831_v55 = vmul.f32 %v3794_v57, %v3759_v18  ;;  %v3763_v30 = vld [vmem:[%s25757_s0 + $0x40] sm:$0xff]  ;;  %v3773_v18 = vld [vmem:[%s25757_s0 + $0x90] sm:$0xff] }
 0x7bc   :  { %v3836_v63 = vmul.f32 %v3798_v60, %v3764_v52  ;;  %v3834_v26 = vmul.f32 %v3794_v57, %v3762_v58  ;;  %v3835_v34 = vmul.f32 %v3798_v60, %v3763_v30  ;;  %v3736_v32 = vrot.slane %v3720_v41, %v22955_v20  ;;  %v3772_v57 = vld [vmem:[%s25757_s0 + $0x88] sm:$0xff] }
 0x7bd   :  { %v3753_v52 = vcombine.high %v3743_v36, %v3743_v36  ;;  %v3722_v30 = vcombine.high %v3720_v41, %v3720_v41  ;;  %v3767_v36 = vld [vmem:[%s25757_s0 + $0x60] sm:$0xff]  ;;  %v3770_v41 = vld [vmem:[%s25757_s0 + $0x78] sm:$0xff] }
 0x7be   :  { %v3806_v45 = vrot.slane %v3736_v32, %v22960_v19 }
 0x7bf   :  { %3863 = vadd.xlane.f32.xlu0 %v3829_v51  ;;  %3869 = vadd.xlane.f32.xlu1 %v3832_v16  ;;  %v3766_v51 = vld [vmem:[%s25757_s0 + $0x58] sm:$0xff]  ;;  %v3765_v16 = vld [vmem:[%s25757_s0 + $0x50] sm:$0xff]  ;;  %v3802_v58 = vrot.slane %v3753_v52, %v22960_v19 }
 0x7c0   :  { %v3838_v38 = vmul.f32 %v3798_v60, %v3766_v51  ;;  %v3837_v2 = vmul.f32 %v3798_v60, %v3765_v16  ;;  %v3774_v60 = vld [vmem:[%s25757_s0 + $0x98] sm:$0xff]  ;;  %v3750_v16 = vrot.slane %v3722_v30, %v22955_v20  ;;  %v3780_v30 = vld [vmem:[%s25757_s0 + $0xc8] sm:$0xff] }
 0x7c1   :  { %v3839_v51 = vmul.f32 %v3802_v58, %v3767_v36 }
 0x7c3   :  { %3865 = vadd.xlane.f32.xlu0 %v3830_v24  ;;  %3871 = vadd.xlane.f32.xlu1 %v3833_v25  ;;  %v3844_v24 = vmul.f32 %v3806_v45, %v3772_v57  ;;  %v3843_v25 = vmul.f32 %v3806_v45, %v3771_v49  ;;  %v3810_v57 = vrot.slane %v3750_v16, %v22960_v19 }
 0x7c4   :  { %v3752_v49 = vcombine.high %v3736_v32, %v3736_v32  ;;  %v3779_v32 = vld [vmem:[%s25757_s0 + $0xc0] sm:$0xff] }
 0x7c7   :  { %3877 = vadd.xlane.f32.xlu1 %v3836_v63  ;;  %3867 = vadd.xlane.f32.xlu0 %v3831_v55  ;;  %v3845_v63 = vmul.f32 %v3806_v45, %v3773_v18  ;;  %v3846_v55 = vmul.f32 %v3806_v45, %v3774_v60  ;;  %v3842_v45 = vmul.f32 %v3802_v58, %v3770_v41  ;;  %v3782_v41 = vld [vmem:[%s25757_s0 + $0xd8] sm:$0xff] }
 0x7c8   :  { %v3814_v60 = vrot.slane %v3752_v49, %v22960_v19 }
 0x7ca   :  { %v3852_v36 = vmul.f32 %v3814_v60, %v3780_v30 }
 0x7cb   :  { %3873 = vadd.xlane.f32.xlu1 %v3834_v26  ;;  %3875 = vadd.xlane.f32.xlu0 %v3835_v34  ;;  %v3768_v26 = vld [vmem:[%s25757_s0 + $0x68] sm:$0xff] }
 0x7cc   :  { %v3840_v34 = vmul.f32 %v3802_v58, %v3768_v26  ;;  %v3778_v26 = vld [vmem:[%s25757_s0 + $0xb8] sm:$0xff] }
 0x7cf   :  { %3881 = vadd.xlane.f32.xlu1 %v3838_v38  ;;  %3879 = vadd.xlane.f32.xlu0 %v3837_v2  ;;  %v3769_v38 = vld [vmem:[%s25757_s0 + $0x70] sm:$0xff] }
 0x7d0   :  { %v3841_v2 = vmul.f32 %v3802_v58, %v3769_v38  ;;  %v3851_v58 = vmul.f32 %v3814_v60, %v3779_v32  ;;  %v3781_v38 = vld [vmem:[%s25757_s0 + $0xd0] sm:$0xff]  ;;  %v23349_v32 = vld [vmem:[%s25759_s2] sm:$0xff] }
 0x7d3   :  { %3893 = vadd.xlane.f32.xlu0 %v3844_v24  ;;  %3891 = vadd.xlane.f32.xlu1 %v3843_v25  ;;  %v3776_v24 = vld [vmem:[%s25757_s0 + $0xa8] sm:$0xff]  ;;  %v3775_v25 = vld [vmem:[%s25757_s0 + $0xa0] sm:$0xff] }
 0x7d4   :  { %v3848_v52 = vmul.f32 %v3810_v57, %v3776_v24  ;;  %v3847_v18 = vmul.f32 %v3810_v57, %v3775_v25  ;;  %v3784_v24 = vld [vmem:[%s25757_s0 + $0xe8] sm:$0xff] }
 0x7d7   :  { %3895 = vadd.xlane.f32.xlu0 %v3845_v63  ;;  %3897 = vadd.xlane.f32.xlu1 %v3846_v55  ;;  %v3777_v63 = vld [vmem:[%s25757_s0 + $0xb0] sm:$0xff] }
 0x7d8   :  { %v3849_v55 = vmul.f32 %v3810_v57, %v3777_v63 }
 0x7db   :  { %3885 = vadd.xlane.f32.xlu0 %v3840_v34  ;;  %3883 = vadd.xlane.f32.xlu1 %v3839_v51  ;;  %v3850_v34 = vmul.f32 %v3810_v57, %v3778_v26  ;;  %v3754_v51 = vcombine.high %v3750_v16, %v3750_v16  ;;  %v3783_v16 = vld [vmem:[%s25757_s0 + $0xe0] sm:$0xff] }
 0x7dd   :  { %v3818_v49 = vrot.slane %v3754_v51, %v22960_v19 }
 0x7df   :  { %3887 = vadd.xlane.f32.xlu0 %v3841_v2  ;;  %3889 = vadd.xlane.f32.xlu1 %v3842_v45  ;;  %v3853_v2 = vmul.f32 %v3814_v60, %v3781_v38  ;;  %v3854_v45 = vmul.f32 %v3814_v60, %v3782_v41  ;;  %v3856_v57 = vmul.f32 %v3818_v49, %v3784_v24 }
 0x7e0   :  { %v3855_v25 = vmul.f32 %v3818_v49, %v3783_v16 }
 0x7e3   :  { %3901 = vadd.xlane.f32.xlu0 %v3848_v52  ;;  %3899 = vadd.xlane.f32.xlu1 %v3847_v18  ;;  %v3785_v52 = vld [vmem:[%s25757_s0 + $0xf0] sm:$0xff]  ;;  %v3786_v18 = vld [vmem:[%s25757_s0 + $0xf8] sm:$0xff] }
 0x7e4   :  { %v3857_v60 = vmul.f32 %v3818_v49, %v3785_v52  ;;  %v3858_v63 = vmul.f32 %v3818_v49, %v3786_v18 }
 0x7e7   :  { %3903 = vadd.xlane.f32.xlu0 %v3849_v55  ;;  %3907 = vadd.xlane.f32.xlu1 %v3851_v58  ;;  %v3685_v55 = vmul.f32 %v23349_v32, %v23231_v53  ;;  %v25971_v58 = vld [vmem:[#allocation59_spill] sm:$0xff] }
 0x7eb   :  { %3909 = vadd.xlane.f32.xlu0 %v3852_v36  ;;  %3905 = vadd.xlane.f32.xlu1 %v3850_v34 }
 0x7ef   :  { %3911 = vadd.xlane.f32.xlu0 %v3853_v2  ;;  %3913 = vadd.xlane.f32.xlu1 %v3854_v45 }
 0x7f3   :  { %3917 = vadd.xlane.f32.xlu0 %v3856_v57  ;;  %3915 = vadd.xlane.f32.xlu1 %v3855_v25 }
 0x7f7   :  { %3919 = vadd.xlane.f32.xlu0 %v3857_v60  ;;  %3921 = vadd.xlane.f32.xlu1 %v3858_v63 }
 0x7fb   :  { %3686 = vadd.xlane.f32.xlu1 %v3685_v55 }
 0x80d   :  { %4020 = vrot.lane.b32.xlu0 %v25971_v58, %s22358_s21 }
 0x848   :  { %v3862_v30 = vpop.xlane.xlu1 %3861  ;;  %v3860_v26 = vpop.xlane.xlu0 %3859 }
 0x849   :  { %v4134_v33 = vrot.slane %v3862_v30, %v23377_v39  ;;  %v4129_v46 = vrot.slane %v3860_v26, %v23373_v3 }
 0x84c   :  { %v3864_v36 = vpop.xlane.xlu0 %3863  ;;  %v3870_v34 = vpop.xlane.xlu1 %3869 }
 0x84d   :  { %v4158_v22 = vrot.slane %v3870_v34, %v23377_v39  ;;  %v4141_v27 = vrot.slane %v3864_v36, %v23380_v62 }
 0x850   :  { %v23355_v51 = vpop.xlane.xlu0 %3865  ;;  %v3872_v38 = vpop.xlane.xlu1 %3871 }
 0x851   :  { %v4163_v12 = vrot.slane %v3872_v38, %v23380_v62 }
 0x854   :  { %v3878_v41 = vpop.xlane.xlu1 %3877  ;;  %v3868_v2 = vpop.xlane.xlu0 %3867 }
 0x855   :  { %v4154_v61 = vrot.slane %v3868_v2, %v23373_v3  ;;  %v4177_v2 = vrot.slane %v3878_v41, %v23377_v39 }
 0x857   :  { %v4159_v23 = vsel %vm25856_vm5, %v4158_v22, %v4154_v61  ;;  %v4136_v22 = vsel %vm25856_vm5, %v4134_v33, %v4129_v46  ;;  %v4148_v61 = vrot.slane %v23355_v51, %v23386_v28 }
 0x858   :  { %v3874_v45 = vpop.xlane.xlu1 %3873  ;;  %v3876_v49 = vpop.xlane.xlu0 %3875  ;;  %v4164_v38 = vsel %vm25855_vm6, %v4163_v12, %v4159_v23 }
 0x859   :  { %v4173_v35 = vrot.slane %v3876_v49, %v23373_v3  ;;  %v4168_v4 = vrot.slane %v3874_v45, %v23386_v28 }
 0x85b   :  { %v4178_v26 = vsel %vm25856_vm5, %v4177_v2, %v4173_v35 }
 0x85c   :  { %v3882_v24 = vpop.xlane.xlu1 %3881  ;;  %v3880_v16 = vpop.xlane.xlu0 %3879 }
 0x85d   :  { %v4182_v31 = vrot.slane %v3880_v16, %v23380_v62  ;;  %v4187_v36 = vrot.slane %v3882_v24, %v23386_v28  ;;  %v4143_v16 = vsel %vm25855_vm6, %v4141_v27, %v4136_v22 }
 0x85f   :  { %v4183_v45 = vsel %vm25855_vm6, %v4182_v31, %v4178_v26 }
 0x860   :  { %v23357_v57 = vpop.xlane.xlu0 %3893  ;;  %v23359_v25 = vpop.xlane.xlu1 %3891  ;;  %v4188_v23 = vsel %vm25854_vm14, %v4187_v36, %v4183_v45 }
 0x861   :  { %v4215_v35 = vrot.slane %v23357_v57, %v23377_v39  ;;  %v4211_v24 = vrot.slane %v23359_v25, %v23373_v3  ;;  %v4150_v57 = vsel %vm25854_vm14, %v4148_v61, %v4143_v16 }
 0x864   :  { %v23361_v52 = vpop.xlane.xlu0 %3895  ;;  %v23363_v18 = vpop.xlane.xlu1 %3897 }
 0x865   :  { %v4220_v46 = vrot.slane %v23361_v52, %v23380_v62 }
 0x868   :  { %v3886_v60 = vpop.xlane.xlu0 %3885  ;;  %v3884_v63 = vpop.xlane.xlu1 %3883 }
 0x869   :  { %v4196_v34 = vrot.slane %v3886_v60, %v23377_v39  ;;  %v4192_v30 = vrot.slane %v3884_v63, %v23373_v3  ;;  %v4169_v60 = vsel %vm25854_vm14, %v4168_v4, %v4164_v38 }
 0x86a   :  { %v4284_v4 = vsel %vm3639_vm7, %v4169_v60, %v4150_v57 }
 0x86b   :  { %v4197_v63 = vsel %vm25856_vm5, %v4196_v34, %v4192_v30  ;;  %v4216_v34 = vsel %vm25856_vm5, %v4215_v35, %v4211_v24  ;;  %v4285_v30 = vsel %vm3641_vm8, %v4188_v23, %v4284_v4 }
 0x86c   :  { %v3888_v55 = vpop.xlane.xlu0 %3887  ;;  %v3890_v58 = vpop.xlane.xlu1 %3889 }
 0x86d   :  { %v4201_v41 = vrot.slane %v3888_v55, %v23380_v62  ;;  %v4206_v33 = vrot.slane %v3890_v58, %v23386_v28 }
 0x86f   :  { %v4202_v27 = vsel %vm25855_vm6, %v4201_v41, %v4197_v63  ;;  %v4225_v41 = vrot.slane %v23363_v18, %v23386_v28 }
 0x870   :  { %v23367_v1 = vpop.xlane.xlu0 %3901  ;;  %v23369_v9 = vpop.xlane.xlu1 %3899 }
 0x871   :  { %v4234_v25 = vrot.slane %v23367_v1, %v23377_v39  ;;  %v4230_v2 = vrot.slane %v23369_v9, %v23373_v3  ;;  %v4221_v9 = vsel %vm25855_vm6, %v4220_v46, %v4216_v34  ;;  %v25974_v34 = vld [vmem:[#allocation13_spill] sm:$0xff] }
 0x872   :  { %v4226_v24 = vsel %vm25854_vm14, %v4225_v41, %v4221_v9  ;;  %v22315_v41 = vld [vmem:[%s25765_s8] ss:$0 sm:$0xff] }
 0x874   :  { %v23383_v40 = vpop.xlane.xlu0 %3903  ;;  %v3908_v37 = vpop.xlane.xlu1 %3907 }
 0x875   :  { %v4239_v12 = vrot.slane %v23383_v40, %v23380_v62  ;;  %v4249_v52 = vrot.slane %v3908_v37, %v23373_v3  ;;  %v4235_v37 = vsel %vm25856_vm5, %v4234_v25, %v4230_v2 }
 0x877   :  { %v4240_v16 = vsel %vm25855_vm6, %v4239_v12, %v4235_v37 }
 0x878   :  { %v3910_v49 = vpop.xlane.xlu0 %3909  ;;  %v3906_v50 = vpop.xlane.xlu1 %3905 }
 0x879   :  { %v4253_v31 = vrot.slane %v3910_v49, %v23377_v39  ;;  %v4207_v49 = vsel %vm25854_vm14, %v4206_v33, %v4202_v27  ;;  %v4244_v1 = vrot.slane %v3906_v50, %v23386_v28 }
 0x87a   :  { %v4286_v50 = vsel %vm3643_vm9, %v4207_v49, %v4285_v30  ;;  %v25975_v49 = vld [vmem:[#allocation14_spill] sm:$0xff] }
 0x87b   :  { %v4254_v22 = vsel %vm25856_vm5, %v4253_v31, %v4249_v52  ;;  %v4245_v60 = vsel %vm25854_vm14, %v4244_v1, %v4240_v16  ;;  %v25973_v52 = vld [vmem:[#allocation12_spill] sm:$0xff]  ;;  %v25976_v1 = vld [vmem:[#allocation15_spill] sm:$0xff] }
 0x87c   :  { %v3912_v55 = vpop.xlane.xlu0 %3911  ;;  %v3914_v51 = vpop.xlane.xlu1 %3913 }
 0x87d   :  { %v4258_v58 = vrot.slane %v3912_v55, %v23380_v62  ;;  %v4263_v40 = vrot.slane %v3914_v51, %v23386_v28  ;;  %v4287_v51 = vsel %vm3645_vm10, %v4226_v24, %v4286_v50 }
 0x87e   :  { %v4288_v46 = vsel %vm3647_vm11, %v4245_v60, %v4287_v51 }
 0x87f   :  { %v4259_v61 = vsel %vm25855_vm6, %v4258_v58, %v4254_v22  ;;  %v22314_v58 = vld [vmem:[%s25762_s5] sm:$0xff]  ;;  %s22329_s5 = scalar_lea.vmem %s17861_s23, 768 }
 0x880   :  { %v3918_v26 = vpop.xlane.xlu0 %3917  ;;  %v3916_v36 = vpop.xlane.xlu1 %3915  ;;  %v4264_v63 = vsel %vm25854_vm14, %v4263_v40, %v4259_v61  ;;  %p22330_p0 = scmp.ne.s32.totalorder %s17861_s23, %s22329_s5  ;;  %p22335_p2 = scmp.lt.s32.totalorder %s22329_s5, %s22329_s5 }
 0x881   :  { %v4272_v38 = vrot.slane %v3918_v26, %v23377_v39  ;;  %v4268_v45 = vrot.slane %v3916_v36, %v23373_v3  ;;  %v4289_v2 = vsel %vm3649_vm12, %v4264_v63, %v4288_v46  ;;  %v23496_v63 = vld [vmem:[%s25766_s9] sm:$0xff] }
 0x882   :  { %p22336_p3 = por %p22335_p2, %p22334_p1 }
 0x883   :  { %v4273_v23 = vsel %vm25856_vm5, %v4272_v38, %v4268_v45 }
 0x884   :  { %v3920_v35 = vpop.xlane.xlu0 %3919  ;;  %v3922_v18 = vpop.xlane.xlu1 %3921  ;;  %p22337_p4 = pnand %p22336_p3, %p22330_p0 }
 0x885   :  { %v4277_v33 = vrot.slane %v3920_v35, %v23380_v62  ;;  %v4282_v55 = vrot.slane %v3922_v18, %v23386_v28 }
 0x887   :  { %v4278_v27 = vsel %vm25855_vm6, %v4277_v33, %v4273_v23 }
 0x888   :  { %v4283_v31 = vsel %vm25854_vm14, %v4282_v55, %v4278_v27  ;;  %v4021_v57 = vpop.permute.xlu0 %4020  ;;  %v3687_v25 = vpop.xlane.xlu1 %3686 }
 0x889   :  { %v3689_v4 = vsub.f32 %v22314_v58, %v3687_v25  ;;  %19544 = vmatmul.mubr.msk.f32.vlgmr.msra.gmra.mrb[74].mxu0 %vm57_vm0, %v4021_v57  ;;  %v4290_v12 = vsel %vm3651_vm13, %v4283_v31, %v4289_v2  ;;  %v25977_v57 = vld [vmem:[#allocation24_spill] sm:$0xff]  ;;  %v25978_v58 = vld [vmem:[#allocation25_spill] sm:$0xff] }
 0x88a   :  { %21199 = vmatpush3.bf16.msra.mxu0 %v25973_v52  ;;  %19555 = vmatmul.mubr.msk.f32.vlgmr.msra.gmra.mrb[74].mxu1 %vm57_vm0, %v4290_v12 }
 0x88b   :  { %21205 = vmatpush3.bf16.msra.mxu1 %v25974_v34  ;;  %21200 = vmatprep.subr.bf16.mxu0 %v25964_v11  ;;  %v23467_v30 = vsel %vm3688_vm15, 1.0, %v3689_v4 }
 0x88c   :  { %3695 = vperm.xlu1 %21988, %v23467_v30   ;;  %21206 = vmatprep.subr.bf16.mxu1 %v25964_v11 }
 0x88d   :  { %19565 = vmatprep.mubr.msk.f32.mxu0 %vm22355_vm1, %v25963_v10  ;;  %19576 = vmatprep.mubr.msk.f32.mxu1 %vm22355_vm1, %v25963_v10 }
 0x88e   :  { %21202 = vmatpush3.bf16.msra.mxu0 %v25975_v49 }
 0x88f   :  { %21208 = vmatpush3.bf16.msra.mxu1 %v25976_v1  ;;  %21209 = vmatprep.subr.bf16.mxu0 %v25964_v11 }
 0x890   :  { %21215 = vmatprep.subr.bf16.mxu1 %v25964_v11 }
 0x90b   :  { %v23479_v6 = vpop.permute.xlu1 %3695 }
 0x90c   :  { %v4363_v22 = vmul.f32 %v22315_v41, %v23479_v6  ;;  %v25980_v41 = vld [vmem:[#allocation35_spill] sm:$0xff]  ;;  %vm3698_vm4 = vcmp.gt.f32.partialorder %v23349_v32, %v23479_v6 }
 0x95c   :  { %v23481_v26 = vpop.f32.mrb[74].mxu0 }
 0x95d   :  { %v19545_v36 = vpop.f32.mrb[75].mxu0  ;;  %v4359_v9 = vpop.f32.mrb[74].mxu1 }
 0x95e   :  { %v4360_v40 = vadd.f32 %v4359_v9, %v23481_v26  ;;  %v19556_v37 = vpop.f32.mrb[75].mxu1  ;;  %v25979_v36 = vld [vmem:[#allocation34_spill] sm:$0xff] }
 0x960   :  { %v4364_v61 = vadd.f32 %v4363_v22, %v4360_v40  ;;  %v25981_v40 = vld [vmem:[#allocation36_spill] sm:$0xff] }
 0x962   :  { %v4373_v38 = vrot.slane %v4364_v61, %v22955_v20  ;;  %v4366_v60 = vcombine.high %v4364_v61, %v4364_v61 }
 0x964   :  { %v4381_v45 = vcombine.high %v4373_v38, %v4373_v38  ;;  %v4389_v50 = vrot.slane %v4373_v38, %v22955_v20  ;;  %v4380_v55 = vrot.slane %v4366_v60, %v22955_v20  ;;  %v25982_v38 = vld [vmem:[#allocation37_spill] sm:$0xff] }
 0x966   :  { %v4403_v16 = vrot.slane %v4381_v45, %v22955_v20  ;;  %v4418_v35 = vrot.slane %v4389_v50, %v22960_v19  ;;  %v4411_v24 = vcombine.high %v4389_v50, %v4389_v50  ;;  %v4382_v27 = vcombine.high %v4380_v55, %v4380_v55 }
 0x967   :  { %v4396_v25 = vrot.slane %v4380_v55, %v22955_v20  ;;  %v25986_v55 = vld [vmem:[#allocation49_spill] sm:$0xff] }
 0x968   :  { %v4422_v18 = vrot.slane %v4403_v16, %v22960_v19  ;;  %v4455_v33 = vmul.f32 %v23496_v63, %v4418_v35  ;;  %v4413_v51 = vcombine.high %v4403_v16, %v4403_v16  ;;  %v4426_v46 = vrot.slane %v4411_v24, %v22960_v19  ;;  %v25983_v16 = vld [vmem:[#allocation46_spill] sm:$0xff]  ;;  %v25984_v35 = vld [vmem:[#allocation47_spill] sm:$0xff]  ;;  %v25985_v24 = vld [vmem:[#allocation48_spill] sm:$0xff] }
 0x969   :  { %v4410_v4 = vrot.slane %v4382_v27, %v22955_v20  ;;  %v4434_v9 = vrot.slane %v4396_v25, %v22960_v19  ;;  %v4412_v37 = vcombine.high %v4396_v25, %v4396_v25  ;;  %v25989_v27 = vld [vmem:[#allocation18_spill] sm:$0xff]  ;;  %v3691_v25 = vmax.f32 %v23231_v53, 0.0 }
 0x96a   :  { %19566 = vmatmul.mubr.msk.f32.vlgmr.msra.gmra.mrb[76].mxu0 %vm57_vm0, %v4455_v33  ;;  %v4456_v23 = vmul.f32 %v23496_v63, %v4422_v18  ;;  %v4430_v31 = vrot.slane %v4413_v51, %v22960_v19  ;;  %v4457_v2 = vmul.f32 %v23496_v63, %v4426_v46  ;;  %v25988_v46 = vld [vmem:[#allocation17_spill] sm:$0xff] }
 0x96b   :  { %21211 = vmatpush3.bf16.msra.mxu0 %v22871_v54  ;;  %19587 = vmatprep.mubr.msk.f32.mxu0 %vm22355_vm1, %v25963_v10  ;;  %v4438_v22 = vrot.slane %v4410_v4, %v22960_v19  ;;  %v4459_v61 = vmul.f32 %v23496_v63, %v4434_v9  ;;  %v4414_v45 = vcombine.high %v4410_v4, %v4410_v4  ;;  %v23577_v4 = vsel %vm25857_vm3, 0.0, %v3691_v25 }
 0x96c   :  { %19577 = vmatmul.mubr.msk.f32.vlgmr.msra.gmra.mrb[76].mxu1 %vm57_vm0, %v4456_v23  ;;  %21212 = vmatprep.subr.bf16.mxu0 %v25964_v11  ;;  %v4458_v12 = vmul.f32 %v23496_v63, %v4430_v31  ;;  %v4442_v60 = vrot.slane %v4412_v37, %v22960_v19  ;;  %v25987_v23 = vld [vmem:[#allocation16_spill] sm:$0xff]  ;;  %v25990_v31 = vld [vmem:[#allocation19_spill] sm:$0xff]  ;;  %25991 = vst [vmem:[#allocation59_spill] sm:$0xff] %v23577_v4 }
 0x96d   :  { %21217 = vmatpush3.bf16.msra.mxu1 %v22873_v56  ;;  %19598 = vmatprep.mubr.msk.f32.mxu1 %vm22355_vm1, %v25963_v10  ;;  %v4460_v50 = vmul.f32 %v23496_v63, %v4438_v22  ;;  %v4446_v18 = vrot.slane %v4414_v45, %v22960_v19 }
 0x96e   :  { %21218 = vmatprep.subr.bf16.mxu1 %v25964_v11  ;;  %v4461_v33 = vmul.f32 %v23496_v63, %v4442_v60 }
 0x96f   :  { %21214 = vmatpush3.bf16.msra.mxu0 %v25977_v57  ;;  %v4462_v51 = vmul.f32 %v23496_v63, %v4446_v18 }
 0x970   :  { %21221 = vmatprep.subr.bf16.mxu0 %v25964_v11 }
 0x971   :  { %21220 = vmatpush3.bf16.msra.mxu1 %v25978_v58 }
 0x972   :  { %19588 = vmatmul.mubr.msk.f32.vlgmr.msra.gmra.mrb[78].mxu0 %vm57_vm0, %v4457_v2  ;;  %21227 = vmatprep.subr.bf16.mxu1 %v25964_v11  ;;  %v18024_v2 = vsel %vm3698_vm4, 1.0, %v25963_v10 }
 0x973   :  { %21223 = vmatpush3.bf16.msra.mxu0 %v25979_v36  ;;  %19609 = vmatprep.mubr.msk.f32.mxu0 %vm22355_vm1, %v25963_v10 }
 0x974   :  { %19599 = vmatmul.mubr.msk.f32.vlgmr.msra.gmra.mrb[78].mxu1 %vm57_vm0, %v4458_v12  ;;  %21224 = vmatprep.subr.bf16.mxu0 %v25964_v11  ;;  %v3701_v12 = vadd.f32 %v18024_v2, %v23577_v4 }
 0x975   :  { %21229 = vmatpush3.bf16.msra.mxu1 %v25980_v41  ;;  %19620 = vmatprep.mubr.msk.f32.mxu1 %vm22355_vm1, %v25963_v10 }
 0x976   :  { %21230 = vmatprep.subr.bf16.mxu1 %v25964_v11  ;;  %v3702_v9 = vmax.f32 %v3701_v12, 0.0 }
 0x977   :  { %21226 = vmatpush3.bf16.msra.mxu0 %v25981_v40 }
 0x978   :  { %21233 = vmatprep.subr.bf16.mxu0 %v25964_v11  ;;  %v3703_v22 = vmin.f32 %v3702_v9, 1.0 }
 0x979   :  { %21232 = vmatpush3.bf16.msra.mxu1 %v25982_v38 }
 0x97a   :  { %19610 = vmatmul.mubr.msk.f32.vlgmr.msra.gmra.mrb[80].mxu0 %vm57_vm0, %v4459_v61  ;;  %21239 = vmatprep.subr.bf16.mxu1 %v25964_v11  ;;  %v23582_v37 = vsel %vm25857_vm3, 0.0, %v3703_v22 }
 0x97b   :  { %21235 = vmatpush3.bf16.msra.mxu0 %v25983_v16  ;;  %19631 = vmatprep.mubr.msk.f32.mxu0 %vm22355_vm1, %v25963_v10  ;;  %v5063_v61 = vrot.slane %v23582_v37, %v22955_v20  ;;  %v5056_v45 = vcombine.high %v23582_v37, %v23582_v37 }
 0x97c   :  { %19621 = vmatmul.mubr.msk.f32.vlgmr.msra.gmra.mrb[80].mxu1 %vm57_vm0, %v4460_v50  ;;  %21236 = vmatprep.subr.bf16.mxu0 %v25964_v11  ;;  %v25992_v50 = vmov 0  }
 0x97d   :  { %21241 = vmatpush3.bf16.msra.mxu1 %v25984_v35  ;;  %19642 = vmatprep.mubr.msk.f32.mxu1 %vm22355_vm1, %v25963_v10  ;;  %v5071_v32 = vcombine.high %v5063_v61, %v5063_v61  ;;  %v5079_v53 = vrot.slane %v5063_v61, %v22955_v20  ;;  %v5070_v25 = vrot.slane %v5056_v45, %v22955_v20 }
 0x97e   :  { %21242 = vmatprep.subr.bf16.mxu1 %v25964_v11 }
 0x97f   :  { %21238 = vmatpush3.bf16.msra.mxu0 %v25985_v24  ;;  %v5093_v6 = vrot.slane %v5071_v32, %v22955_v20  ;;  %vm5113_vm15 = vcmp.ne.f32.partialorder %v5079_v53, 0.0  ;;  %v5101_v18 = vcombine.high %v5079_v53, %v5079_v53  ;;  %v5086_v45 = vrot.slane %v5070_v25, %v22955_v20 }
 0x980   :  { %21245 = vmatprep.subr.bf16.mxu0 %v25964_v11  ;;  %v5121_v60 = vsel %vm5113_vm15, 1, %v25992_v50 }
 0x981   :  { %21244 = vmatpush3.bf16.msra.mxu1 %v25986_v55  ;;  %vm5114_vm4 = vcmp.ne.f32.partialorder %v5093_v6, 0.0  ;;  %vm5115_vm14 = vcmp.ne.f32.partialorder %v5101_v18, 0.0  ;;  %v5103_v9 = vcombine.high %v5093_v6, %v5093_v6  ;;  %vm5117_vm5 = vcmp.ne.f32.partialorder %v5086_v45, 0.0 }
 0x982   :  { %19632 = vmatmul.mubr.msk.f32.vlgmr.msra.gmra.mrb[82].mxu0 %vm57_vm0, %v4461_v33  ;;  %21251 = vmatprep.subr.bf16.mxu1 %v25964_v11  ;;  %v5122_v33 = vsel %vm5114_vm4, 1, %v25992_v50  ;;  %v5123_v53 = vsel %vm5115_vm14, 1, %v25992_v50 }
 0x983   :  { %19653 = vmatprep.mubr.msk.f32.mxu0 %vm22355_vm1, %v25963_v10  ;;  %v5136_v12 = vrot.slane %v5122_v33, %v22960_v19  ;;  %vm5116_vm4 = vcmp.ne.f32.partialorder %v5103_v9, 0.0  ;;  %v5140_v6 = vrot.slane %v5123_v53, %v22960_v19 }
 0x984   :  { %19643 = vmatmul.mubr.msk.f32.vlgmr.msra.gmra.mrb[82].mxu1 %vm57_vm0, %v4462_v51  ;;  %v5132_v51 = vrot.slane %v5121_v60, %v22960_v19  ;;  %v5124_v33 = vsel %vm5116_vm4, 1, %v25992_v50 }
 0x985   :  { %19664 = vmatprep.mubr.msk.f32.mxu1 %vm22355_vm1, %v25963_v10  ;;  %vm5162_vm15 = vcmp.eq.s32.totalorder %v5136_v12, 1 }
 0x986   :  { %vm5161_vm6 = vcmp.eq.s32.totalorder %v5132_v51, 1 }
 0x988   :  { %21247 = vmatpush3.bf16.xpose.msra.mxu0 %v25987_v23 }
 0x989   :  { %21248 = vmatprep.subr.bf16.mxu0 %v25964_v11 }
 0x98a   :  { %21253 = vmatpush3.bf16.xpose.msra.mxu1 %v25988_v46 }
 0x98b   :  { %21254 = vmatprep.subr.bf16.mxu1 %v25964_v11 }
 0x990   :  { %21250 = vmatpush3.bf16.xpose.msra.mxu0 %v25989_v27 }
 0x991   :  { %21257 = vmatprep.subr.bf16.mxu0 %v25964_v11 }
 0x992   :  { %21256 = vmatpush3.bf16.xpose.msra.mxu1 %v25990_v31  ;;  %v5072_v31 = vcombine.high %v5070_v25, %v5070_v25 }
 0x993   :  { %21263 = vmatprep.subr.bf16.mxu1 %v25964_v11 }
 0x994   :  { %v5100_v18 = vrot.slane %v5072_v31, %v22955_v20 }
 0x996   :  { %vm5118_vm14 = vcmp.ne.f32.partialorder %v5100_v18, 0.0  ;;  %v5104_v55 = vcombine.high %v5100_v18, %v5100_v18 }
 0x997   :  { %v5126_v31 = vsel %vm5118_vm14, 1, %v25992_v50 }
 0x998   :  { %vm5120_vm3 = vcmp.ne.f32.partialorder %v5104_v55, 0.0 }
 0x999   :  { %v5128_v18 = vsel %vm5120_vm3, 1, %v25992_v50  ;;  %vm6457_vm3 = vcmp.ne.f32.partialorder %v23582_v37, 0.0  ;;  %v26011_v37 = vld [vmem:[#allocation61_spill] sm:$0xff] }
 0xa3d   :  { %v4532_v2 = vpop.f32.mrb[76].mxu0 }
 0xa3e   :  { %v5047_v22 = vmul.f32 0.5, %v4532_v2  ;;  %v19567_v61 = vpop.f32.mrb[77].mxu0 }
 0xa3f   :  { %v4605_v32 = vpop.f32.mrb[76].mxu1  ;;  %v5144_v61 = vrot.slane %v5124_v33, %v22960_v19 }
 0xa40   :  { %v5048_v27 = vmul.f32 0.5, %v4605_v32  ;;  %v19578_v46 = vpop.f32.mrb[77].mxu1  ;;  %v23595_v23 = vsel %vm5161_vm6, -1e+30, %v5047_v22  ;;  %vm5163_vm6 = vcmp.eq.s32.totalorder %v5140_v6, 1  ;;  %v5102_v32 = vcombine.high %v5086_v45, %v5086_v45 }
 0xa41   :  { %5177 = vmax.xlane.f32.xlu0 %v23595_v23  ;;  %v5152_v6 = vrot.slane %v5126_v31, %v22960_v19 }
 0xa42   :  { %v5170_v60 = vsel %vm5162_vm15, -1e+30, %v5048_v27  ;;  %v5125_v27 = vsel %vm5117_vm5, 1, %v25992_v50  ;;  %vm5164_vm15 = vcmp.eq.s32.totalorder %v5144_v61, 1  ;;  %vm5119_vm4 = vcmp.ne.f32.partialorder %v5102_v32, 0.0 }
 0xa43   :  { %5179 = vmax.xlane.f32.xlu1 %v5170_v60  ;;  %v5148_v53 = vrot.slane %v5125_v27, %v22960_v19  ;;  %v5127_v35 = vsel %vm5119_vm4, 1, %v25992_v50  ;;  %vm5166_vm5 = vcmp.eq.s32.totalorder %v5152_v6, 1  ;;  %v5160_v32 = vrot.slane %v5128_v18, %v22960_v19 }
 0xa45   :  { %v4678_v51 = vpop.f32.mrb[78].mxu0 }
 0xa46   :  { %v5049_v46 = vmul.f32 0.5, %v4678_v51  ;;  %v19589_v2 = vpop.f32.mrb[79].mxu0 }
 0xa47   :  { %v4751_v22 = vpop.f32.mrb[78].mxu1 }
 0xa48   :  { %v5050_v12 = vmul.f32 0.5, %v4751_v22  ;;  %v19600_v9 = vpop.f32.mrb[79].mxu1  ;;  %v5171_v25 = vsel %vm5163_vm6, -1e+30, %v5049_v46  ;;  %vm5165_vm6 = vcmp.eq.s32.totalorder %v5148_v53, 1 }
 0xa49   :  { %5181 = vmax.xlane.f32.xlu0 %v5171_v25 }
 0xa4a   :  { %v5172_v51 = vsel %vm5164_vm15, -1e+30, %v5050_v12  ;;  %v5156_v12 = vrot.slane %v5127_v35, %v22960_v19  ;;  %vm5168_vm15 = vcmp.eq.s32.totalorder %v5160_v32, 1 }
 0xa4c   :  { %vm5167_vm14 = vcmp.eq.s32.totalorder %v5156_v12, 1 }
 0xa4d   :  { %v4824_v2 = vpop.f32.mrb[80].mxu0  ;;  %5183 = vmax.xlane.f32.xlu0 %v5172_v51 }
 0xa4e   :  { %v5051_v33 = vmul.f32 0.5, %v4824_v2  ;;  %v19611_v22 = vpop.f32.mrb[81].mxu0 }
 0xa4f   :  { %v4897_v9 = vpop.f32.mrb[80].mxu1 }
 0xa50   :  { %v5052_v46 = vmul.f32 0.5, %v4897_v9  ;;  %v19622_v24 = vpop.f32.mrb[81].mxu1  ;;  %v5173_v45 = vsel %vm5165_vm6, -1e+30, %v5051_v33 }
 0xa51   :  { %5185 = vmax.xlane.f32.xlu1 %v5173_v45 }
 0xa52   :  { %v5174_v61 = vsel %vm5166_vm5, -1e+30, %v5052_v46  ;;  %vm26012_vm5 = vcmp.eq.s32.totalorder %v23050_v13, 0 }
 0xa53   :  { %5187 = vmax.xlane.f32.xlu0 %v5174_v61 }
 0xa55   :  { %v4970_v27 = vpop.f32.mrb[82].mxu0 }
 0xa56   :  { %v5053_v31 = vmul.f32 0.5, %v4970_v27  ;;  %v19633_v2 = vpop.f32.mrb[83].mxu0 }
 0xa57   :  { %v5043_v53 = vpop.f32.mrb[82].mxu1 }
 0xa58   :  { %v5054_v55 = vmul.f32 0.5, %v5043_v53  ;;  %v19644_v24 = vpop.f32.mrb[83].mxu1  ;;  %v5175_v33 = vsel %vm5167_vm14, -1e+30, %v5053_v31  ;;  %vm26013_vm14 = vcmask 130112  }
 0xa59   :  { %5189 = vmax.xlane.f32.xlu1 %v5175_v33 }
 0xa5a   :  { %v5176_v22 = vsel %vm5168_vm15, -1e+30, %v5054_v55  ;;  %vm26014_vm15 = vmmov %vm26013_vm14 }
 0xa5b   :  { %5191 = vmax.xlane.f32.xlu0 %v5176_v22 }
 0xace   :  { %v5178_v6 = vpop.xlane.xlu0 %5177 }
 0xacf   :  { %v5193_v9 = vsub.f32 %v23595_v23, %v5178_v6 }
 0xad0   :  { %v5180_v46 = vpop.xlane.xlu1 %5179 }
 0xad1   :  { %v5201_v50 = vmul.f32 1.442695, %v5193_v9  ;;  %v5194_v35 = vsub.f32 %v5170_v60, %v5180_v46 }
 0xad3   :  { %22041 = vpow2.f32 %v5201_v50  ;;  %v5203_v16 = vmul.f32 1.442695, %v5194_v35 }
 0xad5   :  { %22043 = vpow2.f32 %v5203_v16 }
 0xad6   :  { %v5182_v18 = vpop.xlane.xlu0 %5181 }
 0xad7   :  { %v5195_v27 = vsub.f32 %v5171_v25, %v5182_v18 }
 0xad9   :  { %v5205_v2 = vmul.f32 1.442695, %v5195_v27 }
 0xada   :  { %v5184_v12 = vpop.xlane.xlu0 %5183 }
 0xadb   :  { %22045 = vpow2.f32 %v5205_v2  ;;  %v5196_v53 = vsub.f32 %v5172_v51, %v5184_v12 }
 0xadd   :  { %v22042_v31 = vpop.eup %22041  ;;  %v5207_v24 = vmul.f32 1.442695, %v5196_v53 }
 0xade   :  { %v5186_v32 = vpop.xlane.xlu1 %5185  ;;  %5217 = vadd.xlane.f32.xlu1 %v22042_v31 }
 0xadf   :  { %v22044_v55 = vpop.eup %22043  ;;  %22047 = vpow2.f32 %v5207_v24  ;;  %v5197_v38 = vsub.f32 %v5173_v45, %v5186_v32 }
 0xae0   :  { %v5188_v23 = vpop.xlane.xlu0 %5187  ;;  %5219 = vadd.xlane.f32.xlu0 %v22044_v55 }
 0xae1   :  { %v5209_v6 = vmul.f32 1.442695, %v5197_v38  ;;  %v5198_v60 = vsub.f32 %v5174_v61, %v5188_v23 }
 0xae3   :  { %22049 = vpow2.f32 %v5209_v6  ;;  %v5211_v50 = vmul.f32 1.442695, %v5198_v60 }
 0xae5   :  { %v22046_v16 = vpop.eup %22045  ;;  %22051 = vpow2.f32 %v5211_v50 }
 0xae6   :  { %5221 = vadd.xlane.f32.xlu1 %v22046_v16  ;;  %v5190_v25 = vpop.xlane.xlu1 %5189 }
 0xae7   :  { %v5199_v9 = vsub.f32 %v5175_v33, %v5190_v25 }
 0xae8   :  { %v5192_v46 = vpop.xlane.xlu0 %5191 }
 0xae9   :  { %v22048_v51 = vpop.eup %22047  ;;  %v5213_v35 = vmul.f32 1.442695, %v5199_v9  ;;  %v5200_v18 = vsub.f32 %v5176_v22, %v5192_v46 }
 0xaea   :  { %5223 = vadd.xlane.f32.xlu0 %v22048_v51 }
 0xaeb   :  { %22053 = vpow2.f32 %v5213_v35  ;;  %v5215_v27 = vmul.f32 1.442695, %v5200_v18 }
 0xaed   :  { %v22050_v2 = vpop.eup %22049  ;;  %22055 = vpow2.f32 %v5215_v27 }
 0xaee   :  { %5225 = vadd.xlane.f32.xlu1 %v22050_v2 }
 0xaef   :  { %v22052_v45 = vpop.eup %22051 }
 0xaf0   :  { %5227 = vadd.xlane.f32.xlu0 %v22052_v45 }
 0xaf5   :  { %v23613_v38 = vpop.eup %22053 }
 0xaf6   :  { %5229 = vadd.xlane.f32.xlu1 %v23613_v38 }
 0xaf7   :  { %v23616_v61 = vpop.eup %22055 }
 0xaf8   :  { %5231 = vadd.xlane.f32.xlu0 %v23616_v61 }
 0xb6b   :  { %v5218_v33 = vpop.xlane.xlu1 %5217 }
 0xb6c   :  { %22057 = vrcp.f32 %v5218_v33 }
 0xb6d   :  { %v5220_v12 = vpop.xlane.xlu0 %5219 }
 0xb6e   :  { %22059 = vrcp.f32 %v5220_v12 }
 0xb73   :  { %v5222_v53 = vpop.xlane.xlu1 %5221 }
 0xb74   :  { %22061 = vrcp.f32 %v5222_v53 }
 0xb76   :  { %v22058_v22 = vpop.eup %22057 }
 0xb77   :  { %v5234_v24 = vmul.f32 %v22058_v22, %v22042_v31  ;;  %v5224_v23 = vpop.xlane.xlu0 %5223 }
 0xb78   :  { %v22060_v32 = vpop.eup %22059  ;;  %22063 = vrcp.f32 %v5224_v23 }
 0xb79   :  { %19654 = vmatmul.mubr.f32.vlgmr.msra.gmra.mrb[84].mxu0 %v5234_v24  ;;  %v5236_v6 = vmul.f32 %v22060_v32, %v22044_v55 }
 0xb7a   :  { %21259 = vmatpush3.bf16.xpose.msra.mxu0 %v22879_v5  ;;  %19675 = vmatprep.mubr.msk.f32.mxu0 %vm22355_vm1, %v25963_v10 }
 0xb7b   :  { %19665 = vmatmul.mubr.f32.vlgmr.msra.gmra.mrb[84].mxu1 %v5236_v6  ;;  %21260 = vmatprep.subr.bf16.mxu0 %v25964_v11  ;;  %v5226_v60 = vpop.xlane.xlu1 %5225  ;;  %v25994_v6 = vld [vmem:[#allocation30_spill] sm:$0xff] }
 0xb7c   :  { %21265 = vmatpush3.bf16.xpose.msra.mxu1 %v22881_v7  ;;  %19686 = vmatprep.mubr.msk.f32.mxu1 %vm22355_vm1, %v25963_v10  ;;  %22065 = vrcp.f32 %v5226_v60  ;;  %v25997_v60 = vld [vmem:[#allocation33_spill] sm:$0xff] }
 0xb7d   :  { %21266 = vmatprep.subr.bf16.mxu1 %v25964_v11  ;;  %v5228_v25 = vpop.xlane.xlu0 %5227 }
 0xb7e   :  { %v22062_v31 = vpop.eup %22061  ;;  %22067 = vrcp.f32 %v5228_v25 }
 0xb7f   :  { %v5238_v50 = vmul.f32 %v22062_v31, %v22046_v16  ;;  %v25995_v31 = vld [vmem:[#allocation31_spill] sm:$0xff] }
 0xb82   :  { %21262 = vmatpush3.bf16.xpose.msra.mxu0 %v22883_v15  ;;  %v22064_v55 = vpop.eup %22063 }
 0xb83   :  { %21269 = vmatprep.subr.bf16.mxu0 %v25964_v11  ;;  %v5240_v9 = vmul.f32 %v22064_v55, %v22048_v51  ;;  %v5230_v51 = vpop.xlane.xlu1 %5229  ;;  %v25996_v55 = vld [vmem:[#allocation32_spill] sm:$0xff] }
 0xb84   :  { %21268 = vmatpush3.bf16.xpose.msra.mxu1 %v22885_v17  ;;  %22069 = vrcp.f32 %v5230_v51 }
 0xb85   :  { %21275 = vmatprep.subr.bf16.mxu1 %v25964_v11  ;;  %v5232_v18 = vpop.xlane.xlu0 %5231 }
 0xb86   :  { %v22066_v16 = vpop.eup %22065  ;;  %22071 = vrcp.f32 %v5232_v18  ;;  %v25999_v18 = vld [vmem:[#allocation43_spill] sm:$0xff] }
 0xb87   :  { %v5242_v35 = vmul.f32 %v22066_v16, %v22050_v2 }
 0xb88   :  { %v22068_v46 = vpop.eup %22067 }
 0xb89   :  { %19676 = vmatmul.mubr.f32.vlgmr.msra.gmra.mrb[86].mxu0 %v5238_v50  ;;  %v5244_v27 = vmul.f32 %v22068_v46, %v22052_v45 }
 0xb8a   :  { %21271 = vmatpush3.bf16.xpose.msra.mxu0 %v22903_v59  ;;  %19697 = vmatprep.mubr.msk.f32.mxu0 %vm22355_vm1, %v25963_v10 }
 0xb8b   :  { %19687 = vmatmul.mubr.f32.vlgmr.msra.gmra.mrb[86].mxu1 %v5240_v9  ;;  %21272 = vmatprep.subr.bf16.mxu0 %v25964_v11 }
 0xb8c   :  { %21277 = vmatpush3.bf16.xpose.msra.mxu1 %v22905_v0  ;;  %19708 = vmatprep.mubr.msk.f32.mxu1 %vm22355_vm1, %v25963_v10 }
 0xb8d   :  { %21278 = vmatprep.subr.bf16.mxu1 %v25964_v11 }
 0xb8e   :  { %v22070_v2 = vpop.eup %22069 }
 0xb8f   :  { %v5246_v33 = vmul.f32 %v22070_v2, %v23613_v38  ;;  %v25993_v38 = vld [vmem:[#allocation23_spill] sm:$0xff]  ;;  %v26001_v2 = vld [vmem:[#allocation45_spill] sm:$0xff] }
 0xb90   :  { %v22072_v45 = vpop.eup %22071 }
 0xb91   :  { %v5248_v12 = vmul.f32 %v22072_v45, %v23616_v61 }
 0xb92   :  { %21274 = vmatpush3.bf16.xpose.msra.mxu0 %v22907_v8 }
 0xb93   :  { %21281 = vmatprep.subr.bf16.mxu0 %v25964_v11 }
 0xb94   :  { %21280 = vmatpush3.bf16.xpose.msra.mxu1 %v22909_v14 }
 0xb95   :  { %21287 = vmatprep.subr.bf16.mxu1 %v25964_v11 }
 0xb99   :  { %19698 = vmatmul.mubr.f32.vlgmr.msra.gmra.mrb[88].mxu0 %v5242_v35  ;;  %v25998_v35 = vld [vmem:[#allocation42_spill] sm:$0xff] }
 0xb9a   :  { %21283 = vmatpush3.bf16.xpose.msra.mxu0 %v22927_v21  ;;  %19719 = vmatprep.mubr.msk.f32.mxu0 %vm22355_vm1, %v25963_v10 }
 0xb9b   :  { %19709 = vmatmul.mubr.f32.vlgmr.msra.gmra.mrb[88].mxu1 %v5244_v27  ;;  %21284 = vmatprep.subr.bf16.mxu0 %v25964_v11  ;;  %v26000_v27 = vld [vmem:[#allocation44_spill] sm:$0xff] }
 0xb9c   :  { %21289 = vmatpush3.bf16.xpose.msra.mxu1 %v22929_v29  ;;  %19730 = vmatprep.mubr.msk.f32.mxu1 %vm22355_vm1, %v25963_v10 }
 0xb9d   :  { %21290 = vmatprep.subr.bf16.mxu1 %v25964_v11 }
 0xba2   :  { %21286 = vmatpush3.bf16.xpose.msra.mxu0 %v22931_v43 }
 0xba3   :  { %21293 = vmatprep.subr.bf16.mxu0 %v25964_v11 }
 0xba4   :  { %21292 = vmatpush3.bf16.xpose.msra.mxu1 %v22933_v47 }
 0xba5   :  { %21299 = vmatprep.subr.bf16.mxu1 %v25964_v11 }
 0xba9   :  { %19720 = vmatmul.mubr.f32.vlgmr.msra.gmra.mrb[90].mxu0 %v5246_v33 }
 0xbaa   :  { %21295 = vmatpush3.bf16.msra.mxu0 %v22863_v42  ;;  %19741 = vmatprep.mubr.msk.f32.mxu0 %vm22355_vm1, %v25963_v10 }
 0xbab   :  { %19731 = vmatmul.mubr.f32.vlgmr.msra.gmra.mrb[90].mxu1 %v5248_v12  ;;  %21296 = vmatprep.subr.bf16.mxu0 %v25964_v11 }
 0xbac   :  { %21301 = vmatpush3.bf16.msra.mxu1 %v22865_v44  ;;  %19752 = vmatprep.mubr.msk.f32.mxu1 %vm22355_vm1, %v25963_v10 }
 0xbad   :  { %21302 = vmatprep.subr.bf16.mxu1 %v25964_v11 }
 0xbae   :  { %21298 = vmatpush3.bf16.msra.mxu0 %v22867_v48 }
 0xbaf   :  { %21305 = vmatprep.subr.bf16.mxu0 %v25964_v11 }
 0xbb0   :  { %21304 = vmatpush3.bf16.msra.mxu1 %v25993_v38 }
 0xbb1   :  { %21311 = vmatprep.subr.bf16.mxu1 %v25964_v11 }
 0xc4c   :  { %v5315_v61 = vpop.f32.mrb[84].mxu0 }
 0xc4d   :  { %v5809_v22 = vmul.f32 %v23496_v63, %v5315_v61  ;;  %v19655_v53 = vpop.f32.mrb[85].mxu0 }
 0xc4e   :  { %v5385_v24 = vpop.f32.mrb[84].mxu1 }
 0xc4f   :  { %v5810_v32 = vmul.f32 %v23496_v63, %v5385_v24  ;;  %v19666_v23 = vpop.f32.mrb[85].mxu1  ;;  %19742 = vmatmul.mubr.msk.f32.vlgmr.msra.gmra.mrb[92].mxu0 %vm57_vm0, %v5809_v22  ;;  %v26002_v24 = vld [vmem:[#allocation54_spill] sm:$0xff] }
 0xc50   :  { %21307 = vmatpush3.bf16.msra.mxu0 %v25994_v6  ;;  %19763 = vmatprep.mubr.msk.f32.mxu0 %vm22355_vm1, %v25963_v10  ;;  %v26004_v23 = vld [vmem:[#allocation56_spill] sm:$0xff] }
 0xc51   :  { %19753 = vmatmul.mubr.msk.f32.vlgmr.msra.gmra.mrb[92].mxu1 %vm57_vm0, %v5810_v32  ;;  %21308 = vmatprep.subr.bf16.mxu0 %v25964_v11  ;;  %v26003_v32 = vld [vmem:[#allocation55_spill] sm:$0xff] }
 0xc52   :  { %21313 = vmatpush3.bf16.msra.mxu1 %v25995_v31  ;;  %19774 = vmatprep.mubr.msk.f32.mxu1 %vm22355_vm1, %v25963_v10 }
 0xc53   :  { %21314 = vmatprep.subr.bf16.mxu1 %v25964_v11 }
 0xc54   :  { %21310 = vmatpush3.bf16.msra.mxu0 %v25996_v55 }
 0xc55   :  { %21317 = vmatprep.subr.bf16.mxu0 %v25964_v11 }
 0xc56   :  { %21316 = vmatpush3.bf16.msra.mxu1 %v25997_v60 }
 0xc57   :  { %21323 = vmatprep.subr.bf16.mxu1 %v25964_v11 }
 0xc5c   :  { %v5455_v50 = vpop.f32.mrb[86].mxu0 }
 0xc5d   :  { %v5811_v25 = vmul.f32 %v23496_v63, %v5455_v50  ;;  %v19677_v9 = vpop.f32.mrb[87].mxu0  ;;  %v26005_v50 = vld [vmem:[#allocation58_spill] sm:$0xff] }
 0xc5e   :  { %v5525_v16 = vpop.f32.mrb[86].mxu1 }
 0xc5f   :  { %v5812_v46 = vmul.f32 %v23496_v63, %v5525_v16  ;;  %v19688_v51 = vpop.f32.mrb[87].mxu1  ;;  %19764 = vmatmul.mubr.msk.f32.vlgmr.msra.gmra.mrb[94].mxu0 %vm57_vm0, %v5811_v25 }
 0xc60   :  { %21319 = vmatpush3.bf16.msra.mxu0 %v25998_v35  ;;  %19785 = vmatprep.mubr.msk.f32.mxu0 %vm22355_vm1, %v25963_v10 }
 0xc61   :  { %19775 = vmatmul.mubr.msk.f32.vlgmr.msra.gmra.mrb[94].mxu1 %vm57_vm0, %v5812_v46  ;;  %21320 = vmatprep.subr.bf16.mxu0 %v25964_v11 }
 0xc62   :  { %21325 = vmatpush3.bf16.msra.mxu1 %v25999_v18  ;;  %19796 = vmatprep.mubr.msk.f32.mxu1 %vm22355_vm1, %v25963_v10 }
 0xc63   :  { %21326 = vmatprep.subr.bf16.mxu1 %v25964_v11 }
 0xc64   :  { %21322 = vmatpush3.bf16.msra.mxu0 %v26000_v27 }
 0xc65   :  { %21329 = vmatprep.subr.bf16.mxu0 %v25964_v11 }
 0xc66   :  { %21328 = vmatpush3.bf16.msra.mxu1 %v26001_v2 }
 0xc67   :  { %21335 = vmatprep.subr.bf16.mxu1 %v25964_v11 }
 0xc6c   :  { %v5595_v45 = vpop.f32.mrb[88].mxu0 }
 0xc6d   :  { %v5813_v33 = vmul.f32 %v23496_v63, %v5595_v45  ;;  %v19699_v12 = vpop.f32.mrb[89].mxu0 }
 0xc6e   :  { %v5665_v61 = vpop.f32.mrb[88].mxu1  ;;  %v26007_v12 = vld [vmem:[#allocation9_spill] sm:$0xff] }
 0xc6f   :  { %v5814_v22 = vmul.f32 %v23496_v63, %v5665_v61  ;;  %v19710_v53 = vpop.f32.mrb[89].mxu1  ;;  %19786 = vmatmul.mubr.msk.f32.vlgmr.msra.gmra.mrb[96].mxu0 %vm57_vm0, %v5813_v33  ;;  %v26006_v33 = vld [vmem:[#allocation8_spill] sm:$0xff]  ;;  %v26009_v61 = vld [vmem:[#allocation11_spill] sm:$0xff] }
 0xc70   :  { %21331 = vmatpush3.bf16.msra.mxu0 %v26002_v24  ;;  %19807 = vmatprep.mubr.msk.f32.mxu0 %vm22355_vm1, %v25963_v10 }
 0xc71   :  { %19797 = vmatmul.mubr.msk.f32.vlgmr.msra.gmra.mrb[96].mxu1 %vm57_vm0, %v5814_v22  ;;  %21332 = vmatprep.subr.bf16.mxu0 %v25964_v11 }
 0xc72   :  { %21337 = vmatpush3.bf16.msra.mxu1 %v26003_v32  ;;  %19818 = vmatprep.mubr.msk.f32.mxu1 %vm22355_vm1, %v25963_v10 }
 0xc73   :  { %21338 = vmatprep.subr.bf16.mxu1 %v25964_v11 }
 0xc74   :  { %21334 = vmatpush3.bf16.msra.mxu0 %v26004_v23 }
 0xc75   :  { %21341 = vmatprep.subr.bf16.mxu0 %v25964_v11 }
 0xc76   :  { %21340 = vmatpush3.bf16.msra.mxu1 %v26005_v50 }
 0xc77   :  { %21347 = vmatprep.subr.bf16.mxu1 %v25964_v11 }
 0xc7c   :  { %v5735_v25 = vpop.f32.mrb[90].mxu0 }
 0xc7d   :  { %v5815_v9 = vmul.f32 %v23496_v63, %v5735_v25  ;;  %v19721_v16 = vpop.f32.mrb[91].mxu0 }
 0xc7e   :  { %v5805_v46 = vpop.f32.mrb[90].mxu1 }
 0xc7f   :  { %v5816_v51 = vmul.f32 %v23496_v63, %v5805_v46  ;;  %v19732_v45 = vpop.f32.mrb[91].mxu1  ;;  %19808 = vmatmul.mubr.msk.f32.vlgmr.msra.gmra.mrb[98].mxu0 %vm57_vm0, %v5815_v9  ;;  %v26008_v63 = vld [vmem:[#allocation10_spill] sm:$0xff] }
 0xc80   :  { %21343 = vmatpush3.bf16.msra.mxu0 %v26006_v33  ;;  %19829 = vmatprep.mubr.msk.f32.mxu0 %vm22355_vm1, %v25963_v10 }
 0xc81   :  { %19819 = vmatmul.mubr.msk.f32.vlgmr.msra.gmra.mrb[98].mxu1 %vm57_vm0, %v5816_v51  ;;  %21344 = vmatprep.subr.bf16.mxu0 %v25964_v11 }
 0xc82   :  { %21349 = vmatpush3.bf16.msra.mxu1 %v26007_v12  ;;  %19840 = vmatprep.mubr.msk.f32.mxu1 %vm22355_vm1, %v25963_v10 }
 0xc83   :  { %21350 = vmatprep.subr.bf16.mxu1 %v25964_v11 }
 0xc84   :  { %21346 = vmatpush3.bf16.msra.mxu0 %v26008_v63 }
 0xc85   :  { %21353 = vmatprep.subr.bf16.mxu0 %v25964_v11 }
 0xc86   :  { %21352 = vmatpush3.bf16.msra.mxu1 %v26009_v61 }
 0xc87   :  { %21359 = vmatprep.subr.bf16.mxu1 %v25964_v11 }
 0xd22   :  { %v5886_v22 = vpop.f32.mrb[92].mxu0 }
 0xd23   :  { %v6401_v53 = vrot.slane %v5886_v22, 4  ;;  %v19743_v25 = vpop.f32.mrb[93].mxu0 }
 0xd24   :  { %v5959_v9 = vpop.f32.mrb[92].mxu1 }
 0xd25   :  { %v6402_v16 = vadd.f32 %v6401_v53, %v5886_v22  ;;  %v6407_v46 = vrot.slane %v5959_v9, 4  ;;  %v19754_v51 = vpop.f32.mrb[93].mxu1 }
 0xd27   :  { %v6403_v45 = vrot.slane %v6402_v16, 2  ;;  %v6408_v12 = vadd.f32 %v6407_v46, %v5959_v9 }
 0xd29   :  { %v6404_v33 = vadd.f32 %v6403_v45, %v6402_v16  ;;  %v6409_v50 = vrot.slane %v6408_v12, 2 }
 0xd2b   :  { %v6405_v23 = vrot.slane %v6404_v33, 1  ;;  %v6410_v32 = vadd.f32 %v6409_v50, %v6408_v12 }
 0xd2d   :  { %v6406_v63 = vadd.f32 %v6405_v23, %v6404_v33  ;;  %v6411_v24 = vrot.slane %v6410_v32, 1 }
 0xd2f   :  { %v6449_v2 = vmul.f32 0.17677669, %v6406_v63  ;;  %v6412_v27 = vadd.f32 %v6411_v24, %v6410_v32 }
 0xd31   :  { %22073 = vtanh.f32 %v6449_v2  ;;  %v6450_v61 = vmul.f32 0.17677669, %v6412_v27 }
 0xd32   :  { %v6032_v18 = vpop.f32.mrb[94].mxu0 }
 0xd33   :  { %22075 = vtanh.f32 %v6450_v61  ;;  %v6413_v35 = vrot.slane %v6032_v18, 4  ;;  %v19765_v25 = vpop.f32.mrb[95].mxu0 }
 0xd34   :  { %v6105_v60 = vpop.f32.mrb[94].mxu1 }
 0xd35   :  { %v6414_v22 = vadd.f32 %v6413_v35, %v6032_v18  ;;  %v6419_v53 = vrot.slane %v6105_v60, 4  ;;  %v19776_v51 = vpop.f32.mrb[95].mxu1 }
 0xd37   :  { %v6415_v55 = vrot.slane %v6414_v22, 2  ;;  %v6420_v9 = vadd.f32 %v6419_v53, %v6105_v60 }
 0xd39   :  { %v6416_v16 = vadd.f32 %v6415_v55, %v6414_v22  ;;  %v6421_v46 = vrot.slane %v6420_v9, 2 }
 0xd3b   :  { %v22074_v45 = vpop.eup %22073  ;;  %v6417_v50 = vrot.slane %v6416_v16, 1  ;;  %v6422_v23 = vadd.f32 %v6421_v46, %v6420_v9 }
 0xd3c   :  { %v6466_v2 = vmul.f32 10.0, %v22074_v45 }
 0xd3d   :  { %v22076_v33 = vpop.eup %22075  ;;  %v6418_v12 = vadd.f32 %v6417_v50, %v6416_v16  ;;  %v6423_v24 = vrot.slane %v6422_v23, 1 }
 0xd3e   :  { %v6467_v27 = vmul.f32 10.0, %v22076_v33 }
 0xd3f   :  { %v6451_v32 = vmul.f32 0.17677669, %v6418_v12  ;;  %v6424_v63 = vadd.f32 %v6423_v24, %v6422_v23 }
 0xd40   :  { %v6482_v61 = vsel %vm3639_vm7, %v6467_v27, %v6466_v2 }
 0xd41   :  { %22077 = vtanh.f32 %v6451_v32  ;;  %v6452_v35 = vmul.f32 0.17677669, %v6424_v63 }
 0xd42   :  { %v6178_v18 = vpop.f32.mrb[96].mxu0 }
 0xd43   :  { %22079 = vtanh.f32 %v6452_v35  ;;  %v6425_v25 = vrot.slane %v6178_v18, 4  ;;  %v19787_v60 = vpop.f32.mrb[97].mxu0 }
 0xd44   :  { %v6251_v55 = vpop.f32.mrb[96].mxu1 }
 0xd45   :  { %v6426_v22 = vadd.f32 %v6425_v25, %v6178_v18  ;;  %v6431_v53 = vrot.slane %v6251_v55, 4  ;;  %v19798_v51 = vpop.f32.mrb[97].mxu1 }
 0xd47   :  { %v6427_v9 = vrot.slane %v6426_v22, 2  ;;  %v6432_v46 = vadd.f32 %v6431_v53, %v6251_v55 }
 0xd49   :  { %v6428_v16 = vadd.f32 %v6427_v9, %v6426_v22  ;;  %v6433_v50 = vrot.slane %v6432_v46, 2 }
 0xd4b   :  { %v22078_v45 = vpop.eup %22077  ;;  %v6429_v33 = vrot.slane %v6428_v16, 1  ;;  %v6434_v12 = vadd.f32 %v6433_v50, %v6432_v46 }
 0xd4c   :  { %v6468_v23 = vmul.f32 10.0, %v22078_v45 }
 0xd4d   :  { %v22080_v24 = vpop.eup %22079  ;;  %v6430_v2 = vadd.f32 %v6429_v33, %v6428_v16  ;;  %v6435_v27 = vrot.slane %v6434_v12, 1 }
 0xd4e   :  { %v6469_v32 = vmul.f32 10.0, %v22080_v24  ;;  %v6483_v63 = vsel %vm3641_vm8, %v6468_v23, %v6482_v61 }
 0xd4f   :  { %v6453_v35 = vmul.f32 0.17677669, %v6430_v2  ;;  %v6436_v60 = vadd.f32 %v6435_v27, %v6434_v12 }
 0xd50   :  { %v6484_v18 = vsel %vm3643_vm9, %v6469_v32, %v6483_v63 }
 0xd51   :  { %22081 = vtanh.f32 %v6453_v35  ;;  %v6454_v25 = vmul.f32 0.17677669, %v6436_v60 }
 0xd52   :  { %v6324_v51 = vpop.f32.mrb[98].mxu0 }
 0xd53   :  { %22083 = vtanh.f32 %v6454_v25  ;;  %v6437_v55 = vrot.slane %v6324_v51, 4  ;;  %v19809_v22 = vpop.f32.mrb[99].mxu0 }
 0xd54   :  { %v6397_v53 = vpop.f32.mrb[98].mxu1 }
 0xd55   :  { %v6438_v9 = vadd.f32 %v6437_v55, %v6324_v51  ;;  %v6443_v46 = vrot.slane %v6397_v53, 4  ;;  %v19820_v50 = vpop.f32.mrb[99].mxu1 }
 0xd57   :  { %v6439_v45 = vrot.slane %v6438_v9, 2  ;;  %v6444_v16 = vadd.f32 %v6443_v46, %v6397_v53 }
 0xd59   :  { %v6440_v33 = vadd.f32 %v6439_v45, %v6438_v9  ;;  %v6445_v24 = vrot.slane %v6444_v16, 2 }
 0xd5b   :  { %v22082_v31 = vpop.eup %22081  ;;  %v6441_v61 = vrot.slane %v6440_v33, 1  ;;  %v6446_v23 = vadd.f32 %v6445_v24, %v6444_v16 }
 0xd5c   :  { %v6470_v12 = vmul.f32 10.0, %v22082_v31 }
 0xd5d   :  { %v22084_v2 = vpop.eup %22083  ;;  %v6442_v27 = vadd.f32 %v6441_v61, %v6440_v33  ;;  %v6447_v32 = vrot.slane %v6446_v23, 1 }
 0xd5e   :  { %v6471_v63 = vmul.f32 10.0, %v22084_v2  ;;  %v6485_v35 = vsel %vm3645_vm10, %v6470_v12, %v6484_v18 }
 0xd5f   :  { %v6455_v60 = vmul.f32 0.17677669, %v6442_v27  ;;  %v6448_v25 = vadd.f32 %v6447_v32, %v6446_v23 }
 0xd60   :  { %v6486_v51 = vsel %vm3647_vm11, %v6471_v63, %v6485_v35 }
 0xd61   :  { %22085 = vtanh.f32 %v6455_v60  ;;  %v6456_v55 = vmul.f32 0.17677669, %v6448_v25 }
 0xd63   :  { %22087 = vtanh.f32 %v6456_v55 }
 0xd6b   :  { %v22086_v22 = vpop.eup %22085 }
 0xd6c   :  { %v6472_v53 = vmul.f32 10.0, %v22086_v22  ;;  %v6599_v22 = vld [vmem:[%s25757_s0 + $0x8] sm:$0xff] }
 0xd6d   :  { %v22088_v9 = vpop.eup %22087 }
 0xd6e   :  { %v6473_v46 = vmul.f32 10.0, %v22088_v9  ;;  %v6487_v50 = vsel %vm3649_vm12, %v6472_v53, %v6486_v51  ;;  %v6598_v53 = vld [vmem:[%s25757_s0] sm:$0xff] }
 0xd70   :  { %v6488_v31 = vsel %vm3651_vm13, %v6473_v46, %v6487_v50 }
 0xd71   :  { %v6490_v45 = vsel %vm6457_vm3, -1e+30, %v6488_v31  ;;  %vm26015_vm3 = vmmov %vm26013_vm14 }
 0xd72   :  { %6491 = vmax.xlane.f32.xlu1 %v6490_v45 }
 0xdff   :  { %v6492_v18 = vpop.xlane.xlu1 %6491 }
 0xe00   :  { %v6493_v16 = vsub.f32 %v6490_v45, %v6492_v18  ;;  %v6600_v18 = vld [vmem:[%s25757_s0 + $0x10] sm:$0xff] }
 0xe02   :  { %v6494_v33 = vmul.f32 1.442695, %v6493_v16  ;;  %v6603_v16 = vld [vmem:[%s25757_s0 + $0x28] sm:$0xff] }
 0xe04   :  { %22089 = vpow2.f32 %v6494_v33 }
 0xe0e   :  { %v22090_v24 = vpop.eup %22089 }
 0xe0f   :  { %6496 = vadd.xlane.f32.xlu0 %v22090_v24 }
 0xe9c   :  { %v6497_v61 = vpop.xlane.xlu0 %6496 }
 0xe9d   :  { %22091 = vrcp.f32 %v6497_v61 }
 0xea7   :  { %v22092_v23 = vpop.eup %22091 }
 0xea8   :  { %v6499_v12 = vmul.f32 %v22092_v23, %v22090_v24  ;;  %v6601_v23 = vld [vmem:[%s25757_s0 + $0x18] sm:$0xff] }
 0xeaa   :  { %6502 = vmax.xlane.f32.xlu1 %v6499_v12  ;;  %6501 = vst [vmem:[#allocation5 + $0x8] sm:$0xff] %v6499_v12 }
 0xf37   :  { %v23741_v2 = vpop.xlane.xlu1 %6502 }
 0xf38   :  { %26010 = vst [vmem:[#allocation57_spill] sm:$0xff] %v23741_v2  ;;  %vm6504_vm4 = vcmp.ge.f32.partialorder %v6499_v12, %v23741_v2  ;;  %v6604_v12 = vld [vmem:[%s25757_s0 + $0x30] sm:$0xff] }
 0xf39   :  { %v6505_v27 = vsel %vm6504_vm4, %v26011_v37, 128.0  ;;  %vm26016_vm4 = vcmask 195712  }
 0xf3a   :  { %6506 = vmin.xlane.f32.xlu0 %v6505_v27 }
 0xfc7   :  { %v6507_v32 = vpop.xlane.xlu0 %6506 }
 0xfc8   :  { %v21967_v63 = vtrunc.f32 %v6507_v32 }
 0xfca   :  { %v23745_v35 = vcvt.f32.s32 %v21967_v63 }
 0xfcc   :  { %vm6509_vm6 = vcmp.eq.s32.totalorder %v23050_v13, %v23745_v35  ;;  %18044 = vst.msk [vmem:[%s25768_s11 + $0x8] sm:$0xff] %vm25881_vm2, %v23745_v35 }
 0xfcd   :  { %v23755_v60 = vsel %vm6509_vm6, 1.0, %v25963_v10  ;;  %vm26017_vm6 = vmmov %vm26016_vm4 }
 0xfce   :  { %v6556_v25 = vrot.slane %v23755_v60, %v22955_v20  ;;  %v6549_v27 = vcombine.high %v23755_v60, %v23755_v60 }
 0xfd0   :  { %v6572_v51 = vrot.slane %v6556_v25, %v22955_v20  ;;  %v6564_v55 = vcombine.high %v6556_v25, %v6556_v25 }
 0xfd2   :  { %v6633_v9 = vrot.slane %v6572_v51, %v22960_v19  ;;  %v6586_v46 = vrot.slane %v6564_v55, %v22955_v20  ;;  %v6594_v61 = vcombine.high %v6572_v51, %v6572_v51  ;;  %v6607_v51 = vld [vmem:[%s25757_s0 + $0x48] sm:$0xff]  ;;  %v6602_v55 = vld [vmem:[%s25757_s0 + $0x20] sm:$0xff] }
 0xfd4   :  { %v6671_v50 = vmul.f32 %v6633_v9, %v6599_v22  ;;  %v6670_v31 = vmul.f32 %v6633_v9, %v6598_v53  ;;  %v6637_v45 = vrot.slane %v6586_v46, %v22960_v19  ;;  %v6672_v33 = vmul.f32 %v6633_v9, %v6600_v18 }
 0xfd5   :  { %v6673_v32 = vmul.f32 %v6633_v9, %v6601_v23  ;;  %v6641_v25 = vrot.slane %v6594_v61, %v22960_v19  ;;  %v6605_v9 = vld [vmem:[%s25757_s0 + $0x38] sm:$0xff]  ;;  %v6608_v61 = vld [vmem:[%s25757_s0 + $0x50] sm:$0xff] }
 0xfd6   :  { %6704 = vadd.xlane.f32.xlu0 %v6671_v50  ;;  %6702 = vadd.xlane.f32.xlu1 %v6670_v31  ;;  %v6675_v24 = vmul.f32 %v6637_v45, %v6603_v16  ;;  %v6676_v63 = vmul.f32 %v6637_v45, %v6604_v12  ;;  %v6674_v53 = vmul.f32 %v6637_v45, %v6602_v55  ;;  %v6606_v31 = vld [vmem:[%s25757_s0 + $0x40] sm:$0xff] }
 0xfd7   :  { %v6679_v22 = vmul.f32 %v6641_v25, %v6607_v51  ;;  %v6563_v50 = vrot.slane %v6549_v27, %v22955_v20  ;;  %v6677_v18 = vmul.f32 %v6637_v45, %v6605_v9  ;;  %v6678_v16 = vmul.f32 %v6641_v25, %v6606_v31  ;;  %v6615_v45 = vld [vmem:[%s25757_s0 + $0x88] sm:$0xff] }
 0xfd8   :  { %v6680_v12 = vmul.f32 %v6641_v25, %v6608_v61 }
 0xfda   :  { %6706 = vadd.xlane.f32.xlu1 %v6672_v33  ;;  %6712 = vadd.xlane.f32.xlu0 %v6675_v24  ;;  %v6579_v33 = vrot.slane %v6563_v50, %v22955_v20  ;;  %v6609_v24 = vld [vmem:[%s25757_s0 + $0x58] sm:$0xff] }
 0xfdb   :  { %v6681_v23 = vmul.f32 %v6641_v25, %v6609_v24  ;;  %v6617_v25 = vld [vmem:[%s25757_s0 + $0x98] sm:$0xff] }
 0xfdc   :  { %v6649_v27 = vrot.slane %v6579_v33, %v22960_v19 }
 0xfde   :  { %6708 = vadd.xlane.f32.xlu1 %v6673_v32  ;;  %6714 = vadd.xlane.f32.xlu0 %v6676_v63  ;;  %v6614_v32 = vld [vmem:[%s25757_s0 + $0x80] sm:$0xff]  ;;  %v6596_v63 = vcombine.high %v6586_v46, %v6586_v46  ;;  %v6687_v51 = vmul.f32 %v6649_v27, %v6615_v45  ;;  %v6689_v31 = vmul.f32 %v6649_v27, %v6617_v25  ;;  %v6611_v46 = vld [vmem:[%s25757_s0 + $0x68] sm:$0xff] }
 0xfdf   :  { %v6686_v55 = vmul.f32 %v6649_v27, %v6614_v32 }
 0xfe2   :  { %6720 = vadd.xlane.f32.xlu0 %v6679_v22  ;;  %6710 = vadd.xlane.f32.xlu1 %v6674_v53  ;;  %v6616_v22 = vld [vmem:[%s25757_s0 + $0x90] sm:$0xff]  ;;  %v6565_v53 = vcombine.high %v6563_v50, %v6563_v50 }
 0xfe3   :  { %v6688_v9 = vmul.f32 %v6649_v27, %v6616_v22  ;;  %v6612_v50 = vld [vmem:[%s25757_s0 + $0x70] sm:$0xff] }
 0xfe6   :  { %6716 = vadd.xlane.f32.xlu0 %v6677_v18  ;;  %6718 = vadd.xlane.f32.xlu1 %v6678_v16  ;;  %v6645_v18 = vrot.slane %v6596_v63, %v22960_v19  ;;  %v6610_v16 = vld [vmem:[%s25757_s0 + $0x60] sm:$0xff]  ;;  %v6595_v63 = vcombine.high %v6579_v33, %v6579_v33 }
 0xfe7   :  { %v6622_v33 = vld [vmem:[%s25757_s0 + $0xc0] sm:$0xff] }
 0xfe8   :  { %v6683_v24 = vmul.f32 %v6645_v18, %v6611_v46  ;;  %v6682_v61 = vmul.f32 %v6645_v18, %v6610_v16  ;;  %v6684_v27 = vmul.f32 %v6645_v18, %v6612_v50  ;;  %v6623_v46 = vld [vmem:[%s25757_s0 + $0xc8] sm:$0xff]  ;;  %v6621_v16 = vld [vmem:[%s25757_s0 + $0xb8] sm:$0xff] }
 0xfea   :  { %6724 = vadd.xlane.f32.xlu0 %v6681_v23  ;;  %6722 = vadd.xlane.f32.xlu1 %v6680_v12  ;;  %v6593_v23 = vrot.slane %v6565_v53, %v22955_v20  ;;  %v6613_v12 = vld [vmem:[%s25757_s0 + $0x78] sm:$0xff]  ;;  %v6657_v53 = vrot.slane %v6595_v63, %v22960_v19 }
 0xfeb   :  { %v6685_v45 = vmul.f32 %v6645_v18, %v6613_v12  ;;  %v6624_v12 = vld [vmem:[%s25757_s0 + $0xd0] sm:$0xff] }
 0xfec   :  { %v6653_v32 = vrot.slane %v6593_v23, %v22960_v19  ;;  %v6694_v18 = vmul.f32 %v6657_v53, %v6622_v33  ;;  %v6597_v50 = vcombine.high %v6593_v23, %v6593_v23  ;;  %v6626_v23 = vld [vmem:[%s25757_s0 + $0xe0] sm:$0xff] }
 0xfee   :  { %6736 = vadd.xlane.f32.xlu1 %v6687_v51  ;;  %6734 = vadd.xlane.f32.xlu0 %v6686_v55  ;;  %v6619_v51 = vld [vmem:[%s25757_s0 + $0xa8] sm:$0xff]  ;;  %v6618_v55 = vld [vmem:[%s25757_s0 + $0xa0] sm:$0xff] }
 0xfef   :  { %v6691_v22 = vmul.f32 %v6653_v32, %v6619_v51  ;;  %v6690_v25 = vmul.f32 %v6653_v32, %v6618_v55  ;;  %v6661_v51 = vrot.slane %v6597_v50, %v22960_v19  ;;  %v6627_v55 = vld [vmem:[%s25757_s0 + $0xe8] sm:$0xff] }
 0xff2   :  { %6738 = vadd.xlane.f32.xlu1 %v6688_v9  ;;  %6740 = vadd.xlane.f32.xlu0 %v6689_v31  ;;  %v6620_v9 = vld [vmem:[%s25757_s0 + $0xb0] sm:$0xff] }
 0xff3   :  { %v6692_v31 = vmul.f32 %v6653_v32, %v6620_v9 }
 0xff6   :  { %6728 = vadd.xlane.f32.xlu1 %v6683_v24  ;;  %6726 = vadd.xlane.f32.xlu0 %v6682_v61  ;;  %v6695_v24 = vmul.f32 %v6657_v53, %v6623_v46  ;;  %v6693_v61 = vmul.f32 %v6653_v32, %v6621_v16  ;;  %v6699_v32 = vmul.f32 %v6661_v51, %v6627_v55 }
 0xff7   :  { %v6528_v46 = vmax.f32 %v23577_v4, %v23755_v60 }
 0xff9   :  { %v23883_v16 = vsel %vm26012_vm5, 0.0, %v6528_v46  ;;  %vm26018_vm5 = vmmov %vm26016_vm4 }
 0xffa   :  { %6730 = vadd.xlane.f32.xlu1 %v6684_v27  ;;  %6732 = vadd.xlane.f32.xlu0 %v6685_v45  ;;  %v6625_v27 = vld [vmem:[%s25757_s0 + $0xd8] sm:$0xff]  ;;  %v6696_v45 = vmul.f32 %v6657_v53, %v6624_v12 }
 0xffb   :  { %v6697_v63 = vmul.f32 %v6657_v53, %v6625_v27  ;;  %v6629_v53 = vld [vmem:[%s25757_s0 + $0xf8] sm:$0xff] }
 0xffc   :  { %v6701_v33 = vmul.f32 %v6661_v51, %v6629_v53 }
 0xffe   :  { %6744 = vadd.xlane.f32.xlu1 %v6691_v22  ;;  %6742 = vadd.xlane.f32.xlu0 %v6690_v25  ;;  %v6698_v22 = vmul.f32 %v6661_v51, %v6626_v23  ;;  %v6628_v25 = vld [vmem:[%s25757_s0 + $0xf0] sm:$0xff] }
 0xfff   :  { %v6700_v9 = vmul.f32 %v6661_v51, %v6628_v25 }
0x1002   :  { %6746 = vadd.xlane.f32.xlu1 %v6692_v31  ;;  %6750 = vadd.xlane.f32.xlu0 %v6694_v18  ;;  %v23873_v31 = vld [vmem:[%s25759_s2] sm:$0xff] }
0x1003   :  { %v6522_v18 = vmul.f32 %v23873_v31, %v23755_v60 }
0x1006   :  { %6752 = vadd.xlane.f32.xlu1 %v6695_v24  ;;  %6748 = vadd.xlane.f32.xlu0 %v6693_v61 }
0x100a   :  { %6754 = vadd.xlane.f32.xlu1 %v6696_v45  ;;  %6756 = vadd.xlane.f32.xlu0 %v6697_v63 }
0x100e   :  { %6760 = vadd.xlane.f32.xlu1 %v6699_v32  ;;  %6758 = vadd.xlane.f32.xlu0 %v6698_v22 }
0x1012   :  { %6762 = vadd.xlane.f32.xlu1 %v6700_v9  ;;  %6764 = vadd.xlane.f32.xlu0 %v6701_v33 }
0x1016   :  { %6523 = vadd.xlane.f32.xlu0 %v6522_v18 }
0x1023   :  { %6863 = vrot.lane.b32.xlu1 %v23481_v26, %s22358_s21 }
0x1047   :  { %6541 = vadd.xlane.f32.xlu1 %v23883_v16 }
0x1063   :  { %v6705_v24 = vpop.xlane.xlu0 %6704  ;;  %v6703_v61 = vpop.xlane.xlu1 %6702 }
0x1064   :  { %v6976_v42 = vrot.slane %v6705_v24, %v23377_v39  ;;  %v6972_v47 = vrot.slane %v6703_v61, %v23373_v3 }
0x1067   :  { %v6707_v50 = vpop.xlane.xlu1 %6706  ;;  %v6713_v12 = vpop.xlane.xlu0 %6712 }
0x1068   :  { %v6995_v48 = vrot.slane %v6713_v12, %v23377_v39  ;;  %v6981_v29 = vrot.slane %v6707_v50, %v23380_v62 }
0x106b   :  { %v6709_v27 = vpop.xlane.xlu1 %6708  ;;  %v6715_v45 = vpop.xlane.xlu0 %6714 }
0x106c   :  { %v7000_v8 = vrot.slane %v6715_v45, %v23380_v62 }
0x106f   :  { %v6721_v63 = vpop.xlane.xlu0 %6720  ;;  %v6711_v51 = vpop.xlane.xlu1 %6710 }
0x1070   :  { %v6991_v37 = vrot.slane %v6711_v51, %v23373_v3  ;;  %v7014_v21 = vrot.slane %v6721_v63, %v23377_v39  ;;  %v6977_v63 = vsel %vm26015_vm3, %v6976_v42, %v6972_v47 }
0x1072   :  { %v6996_v14 = vsel %vm26013_vm14, %v6995_v48, %v6991_v37  ;;  %v6986_v48 = vrot.slane %v6709_v27, %v23386_v28  ;;  %vm26019_vm14 = vcmask 261312  }
0x1073   :  { %v6717_v55 = vpop.xlane.xlu0 %6716  ;;  %v6719_v23 = vpop.xlane.xlu1 %6718  ;;  %v7001_v37 = vsel %vm26016_vm4, %v7000_v8, %v6996_v14 }
0x1074   :  { %v7010_v44 = vrot.slane %v6719_v23, %v23373_v3  ;;  %v7005_v51 = vrot.slane %v6717_v55, %v23386_v28  ;;  %v6982_v55 = vsel %vm26018_vm5, %v6981_v29, %v6977_v63 }
0x1076   :  { %v7015_v61 = vsel %vm26014_vm15, %v7014_v21, %v7010_v44  ;;  %vm26020_vm15 = vmmov %vm26015_vm3 }
0x1077   :  { %v6725_v26 = vpop.xlane.xlu0 %6724  ;;  %v6723_v32 = vpop.xlane.xlu1 %6722  ;;  %vm26021_vm3 = vmmov %vm26019_vm14 }
0x1078   :  { %v7019_v43 = vrot.slane %v6723_v32, %v23380_v62  ;;  %v7024_v32 = vrot.slane %v6725_v26, %v23386_v28  ;;  %vm26023_vm5 = vmmov %vm26020_vm15 }
0x107a   :  { %v7020_v45 = vsel %vm26017_vm6, %v7019_v43, %v7015_v61  ;;  %vm26022_vm6 = vmmov %vm26021_vm3 }
0x107b   :  { %v6737_v22 = vpop.xlane.xlu1 %6736  ;;  %v6735_v60 = vpop.xlane.xlu0 %6734  ;;  %v7025_v47 = vsel %vm26021_vm3, %v7024_v32, %v7020_v45  ;;  %v6987_v43 = vsel %vm26022_vm6, %v6986_v48, %v6982_v55 }
0x107c   :  { %v7048_v44 = vrot.slane %v6735_v60, %v23373_v3 }
0x107f   :  { %v6739_v25 = vpop.xlane.xlu1 %6738  ;;  %v23886_v53 = vpop.xlane.xlu0 %6740 }
0x1080   :  { %v7057_v8 = vrot.slane %v6739_v25, %v23380_v62 }
0x1083   :  { %v6729_v9 = vpop.xlane.xlu1 %6728  ;;  %v6727_v33 = vpop.xlane.xlu0 %6726 }
0x1084   :  { %v7033_v12 = vrot.slane %v6729_v9, %v23377_v39  ;;  %v7029_v23 = vrot.slane %v6727_v33, %v23373_v3  ;;  %v7006_v9 = vsel %vm26019_vm14, %v7005_v51, %v7001_v37  ;;  %v7052_v33 = vrot.slane %v6737_v22, %v23377_v39  ;;  %vm26024_vm14 = vmmov %vm26021_vm3 }
0x1085   :  { %vm26026_vm3 = vmmov %vm26023_vm5 }
0x1086   :  { %v7034_v21 = vsel %vm26020_vm15, %v7033_v12, %v7029_v23  ;;  %v7053_v25 = vsel %vm26023_vm5, %v7052_v33, %v7048_v44  ;;  %vm26025_vm15 = vmmov %vm26016_vm4 }
0x1087   :  { %v6731_v18 = vpop.xlane.xlu1 %6730  ;;  %v6733_v46 = vpop.xlane.xlu0 %6732  ;;  %vm26028_vm6 = vmmov %vm26025_vm15 }
0x1088   :  { %v7038_v50 = vrot.slane %v6731_v18, %v23380_v62  ;;  %v7043_v26 = vrot.slane %v6733_v46, %v23386_v28  ;;  %v7121_v46 = vsel %vm3639_vm7, %v7006_v9, %v6987_v43  ;;  %vm26029_vm5 = vmmov %vm26028_vm6 }
0x1089   :  { %v7122_v23 = vsel %vm3641_vm8, %v7025_v47, %v7121_v46 }
0x108a   :  { %v7039_v14 = vsel %vm26016_vm4, %v7038_v50, %v7034_v21  ;;  %v7062_v50 = vrot.slane %v23886_v53, %v23386_v28  ;;  %vm26027_vm4 = vmmov %vm26026_vm3 }
0x108b   :  { %v6745_v2 = vpop.xlane.xlu1 %6744  ;;  %v6743_v4 = vpop.xlane.xlu0 %6742 }
0x108c   :  { %v7071_v27 = vrot.slane %v6745_v2, %v23377_v39  ;;  %v7067_v22 = vrot.slane %v6743_v4, %v23373_v3  ;;  %v7058_v4 = vsel %vm26025_vm15, %v7057_v8, %v7053_v25  ;;  %vm26030_vm15 = vmmov %vm26024_vm14 }
0x108d   :  { %v7063_v44 = vsel %vm26030_vm15, %v7062_v50, %v7058_v4 }
0x108f   :  { %v6747_v6 = vpop.xlane.xlu1 %6746  ;;  %v6751_v38 = vpop.xlane.xlu0 %6750 }
0x1090   :  { %v7076_v51 = vrot.slane %v6747_v6, %v23380_v62  ;;  %v7086_v12 = vrot.slane %v6751_v38, %v23373_v3  ;;  %v7072_v38 = vsel %vm26027_vm4, %v7071_v27, %v7067_v22 }
0x1092   :  { %v7077_v55 = vsel %vm26029_vm5, %v7076_v51, %v7072_v38 }
0x1093   :  { %v6753_v0 = vpop.xlane.xlu1 %6752  ;;  %v6749_v24 = vpop.xlane.xlu0 %6748 }
0x1094   :  { %v7090_v29 = vrot.slane %v6753_v0, %v23377_v39  ;;  %v7044_v0 = vsel %vm26024_vm14, %v7043_v26, %v7039_v14  ;;  %v7081_v61 = vrot.slane %v6749_v24, %v23386_v28 }
0x1095   :  { %v7123_v24 = vsel %vm3643_vm9, %v7044_v0, %v7122_v23  ;;  %v22318_v0 = vld [vmem:[%s25765_s8] ss:$0 sm:$0xff] }
0x1096   :  { %v7091_v63 = vsel %vm26026_vm3, %v7090_v29, %v7086_v12  ;;  %v7082_v9 = vsel %vm26024_vm14, %v7081_v61, %v7077_v55  ;;  %vm26031_vm3 = vmmov %vm26024_vm14  ;;  %vm6525_vm14 = vcmp.eq.s32.totalorder %v23745_v35, 0  ;;  %v23990_v55 = vld [vmem:[%s25766_s9] sm:$0xff] }
0x1097   :  { %v6755_v18 = vpop.xlane.xlu1 %6754  ;;  %v6757_v42 = vpop.xlane.xlu0 %6756 }
0x1098   :  { %v7095_v60 = vrot.slane %v6755_v18, %v23380_v62  ;;  %v7100_v6 = vrot.slane %v6757_v42, %v23386_v28  ;;  %v7124_v42 = vsel %vm3645_vm10, %v7063_v44, %v7123_v24 }
0x1099   :  { %v7125_v8 = vsel %vm3647_vm11, %v7082_v9, %v7124_v42 }
0x109a   :  { %v7096_v48 = vsel %vm26028_vm6, %v7095_v60, %v7091_v63  ;;  %vm26032_vm6 = vmmov %vm26029_vm5 }
0x109b   :  { %v6761_v32 = vpop.xlane.xlu1 %6760  ;;  %v6759_v2 = vpop.xlane.xlu0 %6758  ;;  %v7101_v21 = vsel %vm26031_vm3, %v7100_v6, %v7096_v48  ;;  %vm26033_vm5 = vmmov %vm26031_vm3 }
0x109c   :  { %v7109_v37 = vrot.slane %v6761_v32, %v23377_v39  ;;  %v7105_v45 = vrot.slane %v6759_v2, %v23373_v3  ;;  %v7126_v22 = vsel %vm3649_vm12, %v7101_v21, %v7125_v8 }
0x109e   :  { %v7110_v47 = vsel %vm26027_vm4, %v7109_v37, %v7105_v45  ;;  %vm25882_vm4 = vmmov 1  }
0x109f   :  { %v6763_v33 = vpop.xlane.xlu1 %6762  ;;  %v6765_v53 = vpop.xlane.xlu0 %6764 }
0x10a0   :  { %v7114_v26 = vrot.slane %v6763_v33, %v23380_v62  ;;  %v7119_v18 = vrot.slane %v6765_v53, %v23386_v28 }
0x10a2   :  { %v7115_v14 = vsel %vm26032_vm6, %v7114_v26, %v7110_v47 }
0x10a3   :  { %v7120_v29 = vsel %vm26033_vm5, %v7119_v18, %v7115_v14  ;;  %v6864_v43 = vpop.permute.xlu1 %6863  ;;  %v6524_v27 = vpop.xlane.xlu0 %6523 }
0x10a4   :  { %v6526_v60 = vsub.f32 %v23467_v30, %v6524_v27  ;;  %19830 = vmatmul.mubr.msk.f32.vlgmr.msra.gmra.mrb[100].mxu0 %vm57_vm0, %v6864_v43  ;;  %v7127_v46 = vsel %vm3651_vm13, %v7120_v29, %v7126_v22 }
0x10a5   :  { %21355 = vmatpush3.bf16.msra.mxu0 %v25973_v52  ;;  %19841 = vmatmul.mubr.msk.f32.vlgmr.msra.gmra.mrb[100].mxu1 %vm57_vm0, %v7127_v46 }
0x10a6   :  { %21361 = vmatpush3.bf16.msra.mxu1 %v25974_v34  ;;  %21356 = vmatprep.subr.bf16.mxu0 %v25964_v11  ;;  %v23961_v51 = vsel %vm6525_vm14, 1.0, %v6526_v60  ;;  %v26034_v60 = vld [vmem:[#allocation37_spill] sm:$0xff] }
0x10a7   :  { %6532 = vperm.xlu0 %21987, %v23961_v51   ;;  %21362 = vmatprep.subr.bf16.mxu1 %v25964_v11 }
0x10a8   :  { %19851 = vmatprep.mubr.msk.f32.mxu0 %vm22355_vm1, %v25963_v10  ;;  %19862 = vmatprep.mubr.msk.f32.mxu1 %vm22355_vm1, %v25963_v10 }
0x10a9   :  { %21358 = vmatpush3.bf16.msra.mxu0 %v25975_v49 }
0x10aa   :  { %21364 = vmatpush3.bf16.msra.mxu1 %v25976_v1  ;;  %21365 = vmatprep.subr.bf16.mxu0 %v25964_v11 }
0x10ab   :  { %21371 = vmatprep.subr.bf16.mxu1 %v25964_v11 }
0x1126   :  { %v23973_v30 = vpop.permute.xlu0 %6532 }
0x1127   :  { %v7200_v61 = vmul.f32 %v22318_v0, %v23973_v30  ;;  %vm6535_vm15 = vcmp.gt.f32.partialorder %v23873_v31, %v23973_v30 }
0x1177   :  { %v23975_v12 = vpop.f32.mrb[100].mxu0 }
0x1178   :  { %v19831_v25 = vpop.f32.mrb[101].mxu0  ;;  %v7196_v23 = vpop.f32.mrb[100].mxu1 }
0x1179   :  { %v7197_v32 = vadd.f32 %v7196_v23, %v23975_v12  ;;  %v19842_v2 = vpop.f32.mrb[101].mxu1  ;;  %v26035_v23 = vld [vmem:[#allocation46_spill] sm:$0xff] }
0x117a   :  { %v26037_v2 = vld [vmem:[#allocation48_spill] sm:$0xff] }
0x117b   :  { %v7201_v4 = vadd.f32 %v7200_v61, %v7197_v32  ;;  %v26036_v61 = vld [vmem:[#allocation47_spill] sm:$0xff] }
0x117d   :  { %v7210_v50 = vrot.slane %v7201_v4, %v22955_v20  ;;  %v7203_v48 = vcombine.high %v7201_v4, %v7201_v4 }
0x117f   :  { %v7218_v63 = vcombine.high %v7210_v50, %v7210_v50  ;;  %v7226_v6 = vrot.slane %v7210_v50, %v22955_v20  ;;  %v7217_v33 = vrot.slane %v7203_v48, %v22955_v20  ;;  %v26038_v50 = vld [vmem:[#allocation49_spill] sm:$0xff]  ;;  %v26041_v48 = vld [vmem:[#allocation18_spill] sm:$0xff] }
0x1181   :  { %v7240_v38 = vrot.slane %v7218_v63, %v22955_v20  ;;  %v7255_v37 = vrot.slane %v7226_v6, %v22960_v19  ;;  %v7248_v24 = vcombine.high %v7226_v6, %v7226_v6  ;;  %v7219_v26 = vcombine.high %v7217_v33, %v7217_v33  ;;  %v26039_v6 = vld [vmem:[#allocation16_spill] sm:$0xff] }
0x1182   :  { %v7233_v42 = vrot.slane %v7217_v33, %v22955_v20 }
0x1183   :  { %v7259_v45 = vrot.slane %v7240_v38, %v22960_v19  ;;  %v7292_v9 = vmul.f32 %v23990_v55, %v7255_v37  ;;  %v7250_v53 = vcombine.high %v7240_v38, %v7240_v38  ;;  %v7263_v21 = vrot.slane %v7248_v24, %v22960_v19  ;;  %v26040_v38 = vld [vmem:[#allocation17_spill] sm:$0xff]  ;;  %v26042_v37 = vld [vmem:[#allocation19_spill] sm:$0xff]  ;;  %v24068_v24 = vpop.xlane.xlu1 %6541 }
0x1184   :  { %v7247_v8 = vrot.slane %v7219_v26, %v22955_v20  ;;  %v7271_v29 = vrot.slane %v7233_v42, %v22960_v19  ;;  %v7249_v27 = vcombine.high %v7233_v42, %v7233_v42  ;;  %vm6543_vm3 = vcmp.ge.f32.partialorder %v24068_v24, 20.0 }
0x1185   :  { %19852 = vmatmul.mubr.msk.f32.vlgmr.msra.gmra.mrb[102].mxu0 %vm57_vm0, %v7292_v9  ;;  %v7293_v44 = vmul.f32 %v23990_v55, %v7259_v45  ;;  %v7267_v18 = vrot.slane %v7250_v53, %v22960_v19  ;;  %v7294_v47 = vmul.f32 %v23990_v55, %v7263_v21  ;;  %v18046_v45 = vsel %vm6535_vm15, 1.0, %v25963_v10  ;;  %vm6544_vm6 = vmxor %vm6543_vm3, %vm25882_vm4 }
0x1186   :  { %21367 = vmatpush3.bf16.msra.mxu0 %v22871_v54  ;;  %19873 = vmatprep.mubr.msk.f32.mxu0 %vm22355_vm1, %v25963_v10  ;;  %v7275_v43 = vrot.slane %v7247_v8, %v22960_v19  ;;  %v7296_v22 = vmul.f32 %v23990_v55, %v7271_v29  ;;  %v7251_v46 = vcombine.high %v7247_v8, %v7247_v8  ;;  %vm6545_vm5 = vmand %vm6525_vm14, %vm6544_vm6  ;;  %vm26043_vm15 = vcmp.eq.s32.totalorder %v23050_v13, 0 }
0x1187   :  { %19863 = vmatmul.mubr.msk.f32.vlgmr.msra.gmra.mrb[102].mxu1 %vm57_vm0, %v7293_v44  ;;  %21368 = vmatprep.subr.bf16.mxu0 %v25964_v11  ;;  %v7295_v14 = vmul.f32 %v23990_v55, %v7267_v18  ;;  %v7279_v0 = vrot.slane %v7249_v27, %v22960_v19  ;;  %v6538_v9 = vadd.f32 %v18046_v45, %v23883_v16  ;;  %v6546_v31 = vsel %vm6545_vm5, 1.0, %v25963_v10 }
0x1188   :  { %21373 = vmatpush3.bf16.msra.mxu1 %v22873_v56  ;;  %19884 = vmatprep.mubr.msk.f32.mxu1 %vm22355_vm1, %v25963_v10  ;;  %v7297_v25 = vmul.f32 %v23990_v55, %v7275_v43  ;;  %v7283_v32 = vrot.slane %v7251_v46, %v22960_v19  ;;  %v26044_v42 = vmov 0  }
0x1189   :  { %21374 = vmatprep.subr.bf16.mxu1 %v25964_v11  ;;  %v7298_v4 = vmul.f32 %v23990_v55, %v7279_v0  ;;  %v6539_v33 = vmax.f32 %v6538_v9, 0.0 }
0x118a   :  { %21370 = vmatpush3.bf16.msra.mxu0 %v25977_v57  ;;  %v7299_v63 = vmul.f32 %v23990_v55, %v7283_v32 }
0x118b   :  { %21377 = vmatprep.subr.bf16.mxu0 %v25964_v11  ;;  %v6540_v53 = vmin.f32 %v6539_v33, 1.0 }
0x118c   :  { %21376 = vmatpush3.bf16.msra.mxu1 %v25978_v58 }
0x118d   :  { %19874 = vmatmul.mubr.msk.f32.vlgmr.msra.gmra.mrb[104].mxu0 %vm57_vm0, %v7294_v47  ;;  %21383 = vmatprep.subr.bf16.mxu1 %v25964_v11  ;;  %v24080_v30 = vsel %vm26043_vm15, %v6546_v31, %v6540_v53 }
0x118e   :  { %21379 = vmatpush3.bf16.msra.mxu0 %v25979_v36  ;;  %19895 = vmatprep.mubr.msk.f32.mxu0 %vm22355_vm1, %v25963_v10  ;;  %v7900_v44 = vrot.slane %v24080_v30, %v22955_v20  ;;  %v7893_v35 = vcombine.high %v24080_v30, %v24080_v30 }
0x118f   :  { %19885 = vmatmul.mubr.msk.f32.vlgmr.msra.gmra.mrb[104].mxu1 %vm57_vm0, %v7295_v14  ;;  %21380 = vmatprep.subr.bf16.mxu0 %v25964_v11 }
0x1190   :  { %21385 = vmatpush3.bf16.msra.mxu1 %v25980_v41  ;;  %19906 = vmatprep.mubr.msk.f32.mxu1 %vm22355_vm1, %v25963_v10  ;;  %v7908_v21 = vcombine.high %v7900_v44, %v7900_v44  ;;  %v7916_v26 = vrot.slane %v7900_v44, %v22955_v20  ;;  %v7907_v27 = vrot.slane %v7893_v35, %v22955_v20 }
0x1191   :  { %21386 = vmatprep.subr.bf16.mxu1 %v25964_v11 }
0x1192   :  { %21382 = vmatpush3.bf16.msra.mxu0 %v25981_v40  ;;  %v7930_v18 = vrot.slane %v7908_v21, %v22955_v20  ;;  %vm7950_vm2 = vcmp.ne.f32.partialorder %v7916_v26, 0.0  ;;  %v7938_v8 = vcombine.high %v7916_v26, %v7916_v26  ;;  %v7923_v53 = vrot.slane %v7907_v27, %v22955_v20 }
0x1193   :  { %21389 = vmatprep.subr.bf16.mxu0 %v25964_v11  ;;  %v7958_v47 = vsel %vm7950_vm2, 1, %v26044_v42 }
0x1194   :  { %21388 = vmatpush3.bf16.msra.mxu1 %v26034_v60  ;;  %vm7951_vm4 = vcmp.ne.f32.partialorder %v7930_v18, 0.0  ;;  %v7969_v29 = vrot.slane %v7958_v47, %v22960_v19  ;;  %v7940_v43 = vcombine.high %v7930_v18, %v7930_v18  ;;  %vm7952_vm14 = vcmp.ne.f32.partialorder %v7938_v8, 0.0 }
0x1195   :  { %19896 = vmatmul.mubr.msk.f32.vlgmr.msra.gmra.mrb[106].mxu0 %vm57_vm0, %v7296_v22  ;;  %21395 = vmatprep.subr.bf16.mxu1 %v25964_v11  ;;  %v7959_v14 = vsel %vm7951_vm4, 1, %v26044_v42  ;;  %v7960_v33 = vsel %vm7952_vm14, 1, %v26044_v42  ;;  %vm7954_vm4 = vcmp.ne.f32.partialorder %v7923_v53, 0.0 }
0x1196   :  { %21391 = vmatpush3.bf16.msra.mxu0 %v26035_v23  ;;  %19917 = vmatprep.mubr.msk.f32.mxu0 %vm22355_vm1, %v25963_v10  ;;  %v7973_v46 = vrot.slane %v7959_v14, %v22960_v19  ;;  %vm7998_vm6 = vcmp.eq.s32.totalorder %v7969_v29, 1  ;;  %vm7953_vm5 = vcmp.ne.f32.partialorder %v7940_v43, 0.0  ;;  %v7977_v21 = vrot.slane %v7960_v33, %v22960_v19 }
0x1197   :  { %19907 = vmatmul.mubr.msk.f32.vlgmr.msra.gmra.mrb[106].mxu1 %vm57_vm0, %v7297_v25  ;;  %21392 = vmatprep.subr.bf16.mxu0 %v25964_v11  ;;  %v7961_v44 = vsel %vm7953_vm5, 1, %v26044_v42 }
0x1198   :  { %21397 = vmatpush3.bf16.msra.mxu1 %v26036_v61  ;;  %19928 = vmatprep.mubr.msk.f32.mxu1 %vm22355_vm1, %v25963_v10  ;;  %vm7999_vm2 = vcmp.eq.s32.totalorder %v7973_v46, 1  ;;  %v7981_v35 = vrot.slane %v7961_v44, %v22960_v19  ;;  %vm8000_vm15 = vcmp.eq.s32.totalorder %v7977_v21, 1  ;;  %v7939_v46 = vcombine.high %v7923_v53, %v7923_v53 }
0x1199   :  { %21398 = vmatprep.subr.bf16.mxu1 %v25964_v11 }
0x119a   :  { %21394 = vmatpush3.bf16.msra.mxu0 %v26037_v2  ;;  %vm7956_vm5 = vcmp.ne.f32.partialorder %v7939_v46, 0.0 }
0x119b   :  { %21401 = vmatprep.subr.bf16.mxu0 %v25964_v11  ;;  %v7964_v53 = vsel %vm7956_vm5, 1, %v26044_v42  ;;  %vm9294_vm5 = vcmp.ne.f32.partialorder %v24080_v30, 0.0  ;;  %v26072_v30 = vld [vmem:[#allocation61_spill] sm:$0xff] }
0x119c   :  { %21400 = vmatpush3.bf16.msra.mxu1 %v26038_v50 }
0x119d   :  { %19918 = vmatmul.mubr.msk.f32.vlgmr.msra.gmra.mrb[108].mxu0 %vm57_vm0, %v7298_v4  ;;  %21407 = vmatprep.subr.bf16.mxu1 %v25964_v11  ;;  %v7909_v4 = vcombine.high %v7907_v27, %v7907_v27 }
0x119e   :  { %19939 = vmatprep.mubr.msk.f32.mxu0 %vm22355_vm1, %v25963_v10 }
0x119f   :  { %19929 = vmatmul.mubr.msk.f32.vlgmr.msra.gmra.mrb[108].mxu1 %vm57_vm0, %v7299_v63  ;;  %v7937_v26 = vrot.slane %v7909_v4, %v22955_v20 }
0x11a0   :  { %19950 = vmatprep.mubr.msk.f32.mxu1 %vm22355_vm1, %v25963_v10 }
0x11a1   :  { %vm7955_vm14 = vcmp.ne.f32.partialorder %v7937_v26, 0.0  ;;  %v7941_v4 = vcombine.high %v7937_v26, %v7937_v26  ;;  %v7993_v26 = vrot.slane %v7964_v53, %v22960_v19 }
0x11a3   :  { %21403 = vmatpush3.bf16.xpose.msra.mxu0 %v26039_v6 }
0x11a4   :  { %21404 = vmatprep.subr.bf16.mxu0 %v25964_v11 }
0x11a5   :  { %21409 = vmatpush3.bf16.xpose.msra.mxu1 %v26040_v38 }
0x11a6   :  { %21410 = vmatprep.subr.bf16.mxu1 %v25964_v11 }
0x11ab   :  { %21406 = vmatpush3.bf16.xpose.msra.mxu0 %v26041_v48 }
0x11ac   :  { %21413 = vmatprep.subr.bf16.mxu0 %v25964_v11 }
0x11ad   :  { %21412 = vmatpush3.bf16.xpose.msra.mxu1 %v26042_v37 }
0x11ae   :  { %21419 = vmatprep.subr.bf16.mxu1 %v25964_v11 }
0x1258   :  { %v7369_v22 = vpop.f32.mrb[102].mxu0 }
0x1259   :  { %v7884_v25 = vmul.f32 0.5, %v7369_v22  ;;  %v19853_v0 = vpop.f32.mrb[103].mxu0  ;;  %v7962_v22 = vsel %vm7954_vm4, 1, %v26044_v42 }
0x125a   :  { %v7442_v32 = vpop.f32.mrb[102].mxu1  ;;  %v7963_v0 = vsel %vm7955_vm14, 1, %v26044_v42  ;;  %vm8004_vm14 = vcmp.eq.s32.totalorder %v7993_v26, 1 }
0x125b   :  { %v7885_v63 = vmul.f32 0.5, %v7442_v32  ;;  %v19864_v45 = vpop.f32.mrb[103].mxu1  ;;  %v24093_v9 = vsel %vm7998_vm6, -1e+30, %v7884_v25  ;;  %vm8001_vm6 = vcmp.eq.s32.totalorder %v7981_v35, 1  ;;  %v7985_v32 = vrot.slane %v7962_v22, %v22960_v19 }
0x125c   :  { %8014 = vmax.xlane.f32.xlu0 %v24093_v9  ;;  %v7989_v45 = vrot.slane %v7963_v0, %v22960_v19 }
0x125d   :  { %v8007_v31 = vsel %vm7999_vm2, -1e+30, %v7885_v63  ;;  %vm8002_vm2 = vcmp.eq.s32.totalorder %v7985_v32, 1 }
0x125e   :  { %8016 = vmax.xlane.f32.xlu1 %v8007_v31  ;;  %vm8003_vm4 = vcmp.eq.s32.totalorder %v7989_v45, 1 }
0x1260   :  { %v7515_v18 = vpop.f32.mrb[104].mxu0 }
0x1261   :  { %v7886_v47 = vmul.f32 0.5, %v7515_v18  ;;  %v19875_v8 = vpop.f32.mrb[105].mxu0 }
0x1262   :  { %v7588_v14 = vpop.f32.mrb[104].mxu1 }
0x1263   :  { %v7887_v29 = vmul.f32 0.5, %v7588_v14  ;;  %v19886_v43 = vpop.f32.mrb[105].mxu1  ;;  %v8008_v27 = vsel %vm8000_vm15, -1e+30, %v7886_v47  ;;  %vm7957_vm15 = vcmp.ne.f32.partialorder %v7941_v4, 0.0 }
0x1264   :  { %8018 = vmax.xlane.f32.xlu1 %v8008_v27  ;;  %v7965_v14 = vsel %vm7957_vm15, 1, %v26044_v42  ;;  %vm26073_vm15 = vcmask 7168  }
0x1265   :  { %v8009_v25 = vsel %vm8001_vm6, -1e+30, %v7887_v29  ;;  %v7997_v43 = vrot.slane %v7965_v14, %v22960_v19 }
0x1266   :  { %8020 = vmax.xlane.f32.xlu0 %v8009_v25 }
0x1267   :  { %vm8005_vm6 = vcmp.eq.s32.totalorder %v7997_v43, 1 }
0x1268   :  { %v7661_v63 = vpop.f32.mrb[106].mxu0 }
0x1269   :  { %v7888_v33 = vmul.f32 0.5, %v7661_v63  ;;  %v19897_v44 = vpop.f32.mrb[107].mxu0 }
0x126a   :  { %v7734_v21 = vpop.f32.mrb[106].mxu1 }
0x126b   :  { %v7889_v18 = vmul.f32 0.5, %v7734_v21  ;;  %v19908_v47 = vpop.f32.mrb[107].mxu1  ;;  %v8010_v35 = vsel %vm8002_vm2, -1e+30, %v7888_v33 }
0x126c   :  { %8022 = vmax.xlane.f32.xlu1 %v8010_v35 }
0x126d   :  { %v8011_v8 = vsel %vm8003_vm4, -1e+30, %v7889_v18 }
0x126e   :  { %8024 = vmax.xlane.f32.xlu0 %v8011_v8 }
0x1270   :  { %v7807_v29 = vpop.f32.mrb[108].mxu0 }
0x1271   :  { %v7890_v22 = vmul.f32 0.5, %v7807_v29  ;;  %v19919_v46 = vpop.f32.mrb[109].mxu0 }
0x1272   :  { %v7880_v0 = vpop.f32.mrb[108].mxu1 }
0x1273   :  { %v7891_v32 = vmul.f32 0.5, %v7880_v0  ;;  %v19930_v4 = vpop.f32.mrb[109].mxu1  ;;  %v8012_v63 = vsel %vm8004_vm14, -1e+30, %v7890_v22  ;;  %vm26074_vm14 = vmmov %vm26073_vm15 }
0x1274   :  { %8026 = vmax.xlane.f32.xlu1 %v8012_v63 }
0x1275   :  { %v8013_v33 = vsel %vm8005_vm6, -1e+30, %v7891_v32  ;;  %vm26078_vm6 = vcmask 130112  }
0x1276   :  { %8028 = vmax.xlane.f32.xlu0 %v8013_v33 }
0x12e9   :  { %v8015_v45 = vpop.xlane.xlu0 %8014 }
0x12ea   :  { %v8030_v44 = vsub.f32 %v24093_v9, %v8015_v45 }
0x12eb   :  { %v8017_v21 = vpop.xlane.xlu1 %8016 }
0x12ec   :  { %v8038_v18 = vmul.f32 1.442695, %v8030_v44  ;;  %v8031_v47 = vsub.f32 %v8007_v31, %v8017_v21 }
0x12ee   :  { %22093 = vpow2.f32 %v8038_v18  ;;  %v8040_v53 = vmul.f32 1.442695, %v8031_v47 }
0x12f0   :  { %22095 = vpow2.f32 %v8040_v53 }
0x12f1   :  { %v8019_v14 = vpop.xlane.xlu1 %8018 }
0x12f2   :  { %v8032_v29 = vsub.f32 %v8008_v27, %v8019_v14 }
0x12f3   :  { %v8021_v46 = vpop.xlane.xlu0 %8020 }
0x12f4   :  { %v8042_v26 = vmul.f32 1.442695, %v8032_v29  ;;  %v8033_v0 = vsub.f32 %v8009_v25, %v8021_v46 }
0x12f6   :  { %22097 = vpow2.f32 %v8042_v26  ;;  %v8044_v22 = vmul.f32 1.442695, %v8033_v0 }
0x12f8   :  { %v22094_v4 = vpop.eup %22093  ;;  %22099 = vpow2.f32 %v8044_v22 }
0x12f9   :  { %v8023_v43 = vpop.xlane.xlu1 %8022  ;;  %8054 = vadd.xlane.f32.xlu1 %v22094_v4 }
0x12fa   :  { %v22096_v32 = vpop.eup %22095  ;;  %v8034_v42 = vsub.f32 %v8010_v35, %v8023_v43 }
0x12fb   :  { %v8025_v9 = vpop.xlane.xlu0 %8024  ;;  %8056 = vadd.xlane.f32.xlu0 %v22096_v32 }
0x12fc   :  { %v8046_v45 = vmul.f32 1.442695, %v8034_v42  ;;  %v8035_v31 = vsub.f32 %v8011_v8, %v8025_v9 }
0x12fe   :  { %22101 = vpow2.f32 %v8046_v45  ;;  %v8048_v44 = vmul.f32 1.442695, %v8035_v31 }
0x1300   :  { %v22098_v21 = vpop.eup %22097  ;;  %22103 = vpow2.f32 %v8048_v44 }
0x1301   :  { %8058 = vadd.xlane.f32.xlu1 %v22098_v21  ;;  %v8027_v27 = vpop.xlane.xlu1 %8026 }
0x1302   :  { %v22100_v18 = vpop.eup %22099  ;;  %v8036_v25 = vsub.f32 %v8012_v63, %v8027_v27 }
0x1303   :  { %8060 = vadd.xlane.f32.xlu0 %v22100_v18  ;;  %v8029_v47 = vpop.xlane.xlu0 %8028 }
0x1304   :  { %v8050_v53 = vmul.f32 1.442695, %v8036_v25  ;;  %v8037_v14 = vsub.f32 %v8013_v33, %v8029_v47  ;;  %v26045_v47 = vld [vmem:[#allocation39_spill] sm:$0xff] }
0x1306   :  { %22105 = vpow2.f32 %v8050_v53  ;;  %v8052_v29 = vmul.f32 1.442695, %v8037_v14  ;;  %v26047_v53 = vld [vmem:[#allocation41_spill] sm:$0xff] }
0x1308   :  { %v22102_v46 = vpop.eup %22101  ;;  %22107 = vpow2.f32 %v8052_v29 }
0x1309   :  { %8062 = vadd.xlane.f32.xlu1 %v22102_v46 }
0x130a   :  { %v22104_v35 = vpop.eup %22103 }
0x130b   :  { %8064 = vadd.xlane.f32.xlu0 %v22104_v35 }
0x1310   :  { %v24111_v42 = vpop.eup %22105 }
0x1311   :  { %8066 = vadd.xlane.f32.xlu1 %v24111_v42 }
0x1312   :  { %v24114_v8 = vpop.eup %22107 }
0x1313   :  { %8068 = vadd.xlane.f32.xlu0 %v24114_v8 }
0x1386   :  { %v8055_v63 = vpop.xlane.xlu1 %8054 }
0x1387   :  { %22109 = vrcp.f32 %v8055_v63 }
0x1388   :  { %v8057_v26 = vpop.xlane.xlu0 %8056 }
0x1389   :  { %22111 = vrcp.f32 %v8057_v26 }
0x138e   :  { %v8059_v0 = vpop.xlane.xlu1 %8058 }
0x138f   :  { %22113 = vrcp.f32 %v8059_v0  ;;  %v26048_v0 = vld [vmem:[#allocation50_spill] sm:$0xff] }
0x1390   :  { %v8061_v9 = vpop.xlane.xlu0 %8060 }
0x1391   :  { %v22110_v33 = vpop.eup %22109  ;;  %22115 = vrcp.f32 %v8061_v9 }
0x1392   :  { %v8071_v22 = vmul.f32 %v22110_v33, %v22094_v4 }
0x1393   :  { %v22112_v43 = vpop.eup %22111 }
0x1394   :  { %19940 = vmatmul.mubr.f32.vlgmr.msra.gmra.mrb[110].mxu0 %v8071_v22  ;;  %v8073_v45 = vmul.f32 %v22112_v43, %v22096_v32  ;;  %v26049_v22 = vld [vmem:[#allocation51_spill] sm:$0xff]  ;;  %v26051_v43 = vld [vmem:[#allocation53_spill] sm:$0xff] }
0x1395   :  { %21415 = vmatpush3.bf16.xpose.msra.mxu0 %v22879_v5  ;;  %19961 = vmatprep.mubr.msk.f32.mxu0 %vm22355_vm1, %v25963_v10 }
0x1396   :  { %19951 = vmatmul.mubr.f32.vlgmr.msra.gmra.mrb[110].mxu1 %v8073_v45  ;;  %21416 = vmatprep.subr.bf16.mxu0 %v25964_v11  ;;  %v8063_v31 = vpop.xlane.xlu1 %8062 }
0x1397   :  { %21421 = vmatpush3.bf16.xpose.msra.mxu1 %v22881_v7  ;;  %19972 = vmatprep.mubr.msk.f32.mxu1 %vm22355_vm1, %v25963_v10  ;;  %22117 = vrcp.f32 %v8063_v31  ;;  %v26053_v31 = vld [vmem:[#allocation21_spill] sm:$0xff] }
0x1398   :  { %21422 = vmatprep.subr.bf16.mxu1 %v25964_v11  ;;  %v8065_v27 = vpop.xlane.xlu0 %8064 }
0x1399   :  { %v22114_v4 = vpop.eup %22113  ;;  %22119 = vrcp.f32 %v8065_v27 }
0x139a   :  { %v8075_v44 = vmul.f32 %v22114_v4, %v22098_v21  ;;  %v26046_v21 = vld [vmem:[#allocation40_spill] sm:$0xff] }
0x139b   :  { %v22116_v32 = vpop.eup %22115 }
0x139c   :  { %v8077_v25 = vmul.f32 %v22116_v32, %v22100_v18  ;;  %v26052_v32 = vld [vmem:[#allocation20_spill] sm:$0xff] }
0x139d   :  { %21418 = vmatpush3.bf16.xpose.msra.mxu0 %v22883_v15 }
0x139e   :  { %21425 = vmatprep.subr.bf16.mxu0 %v25964_v11  ;;  %v8067_v29 = vpop.xlane.xlu1 %8066 }
0x139f   :  { %21424 = vmatpush3.bf16.xpose.msra.mxu1 %v22885_v17  ;;  %22121 = vrcp.f32 %v8067_v29 }
0x13a0   :  { %21431 = vmatprep.subr.bf16.mxu1 %v25964_v11  ;;  %v8069_v26 = vpop.xlane.xlu0 %8068 }
0x13a1   :  { %v22118_v18 = vpop.eup %22117  ;;  %22123 = vrcp.f32 %v8069_v26  ;;  %v26057_v26 = vld [vmem:[#allocation31_spill] sm:$0xff] }
0x13a2   :  { %v8079_v63 = vmul.f32 %v22118_v18, %v22102_v46  ;;  %v26050_v46 = vld [vmem:[#allocation52_spill] sm:$0xff] }
0x13a3   :  { %v22120_v14 = vpop.eup %22119 }
0x13a4   :  { %19962 = vmatmul.mubr.f32.vlgmr.msra.gmra.mrb[112].mxu0 %v8075_v44  ;;  %v8081_v33 = vmul.f32 %v22120_v14, %v22104_v35  ;;  %v26054_v44 = vld [vmem:[#allocation22_spill] sm:$0xff] }
0x13a5   :  { %21427 = vmatpush3.bf16.xpose.msra.mxu0 %v22903_v59  ;;  %19983 = vmatprep.mubr.msk.f32.mxu0 %vm22355_vm1, %v25963_v10 }
0x13a6   :  { %19973 = vmatmul.mubr.f32.vlgmr.msra.gmra.mrb[112].mxu1 %v8077_v25  ;;  %21428 = vmatprep.subr.bf16.mxu0 %v25964_v11 }
0x13a7   :  { %21433 = vmatpush3.bf16.xpose.msra.mxu1 %v26045_v47  ;;  %19994 = vmatprep.mubr.msk.f32.mxu1 %vm22355_vm1, %v25963_v10 }
0x13a8   :  { %21434 = vmatprep.subr.bf16.mxu1 %v25964_v11 }
0x13a9   :  { %v22122_v35 = vpop.eup %22121 }
0x13aa   :  { %v8083_v45 = vmul.f32 %v22122_v35, %v24111_v42  ;;  %v26055_v42 = vld [vmem:[#allocation23_spill] sm:$0xff]  ;;  %v26059_v35 = vld [vmem:[#allocation33_spill] sm:$0xff] }
0x13ab   :  { %v22124_v9 = vpop.eup %22123 }
0x13ac   :  { %v8085_v4 = vmul.f32 %v22124_v9, %v24114_v8 }
0x13ad   :  { %21430 = vmatpush3.bf16.xpose.msra.mxu0 %v26046_v21 }
0x13ae   :  { %21437 = vmatprep.subr.bf16.mxu0 %v25964_v11 }
0x13af   :  { %21436 = vmatpush3.bf16.xpose.msra.mxu1 %v26047_v53 }
0x13b0   :  { %21443 = vmatprep.subr.bf16.mxu1 %v25964_v11 }
0x13b4   :  { %19984 = vmatmul.mubr.f32.vlgmr.msra.gmra.mrb[114].mxu0 %v8079_v63  ;;  %v26056_v63 = vld [vmem:[#allocation30_spill] sm:$0xff] }
0x13b5   :  { %21439 = vmatpush3.bf16.xpose.msra.mxu0 %v26048_v0  ;;  %20005 = vmatprep.mubr.msk.f32.mxu0 %vm22355_vm1, %v25963_v10 }
0x13b6   :  { %19995 = vmatmul.mubr.f32.vlgmr.msra.gmra.mrb[114].mxu1 %v8081_v33  ;;  %21440 = vmatprep.subr.bf16.mxu0 %v25964_v11  ;;  %v26058_v33 = vld [vmem:[#allocation32_spill] sm:$0xff] }
0x13b7   :  { %21445 = vmatpush3.bf16.xpose.msra.mxu1 %v26049_v22  ;;  %20016 = vmatprep.mubr.msk.f32.mxu1 %vm22355_vm1, %v25963_v10 }
0x13b8   :  { %21446 = vmatprep.subr.bf16.mxu1 %v25964_v11 }
0x13bd   :  { %21442 = vmatpush3.bf16.xpose.msra.mxu0 %v26050_v46 }
0x13be   :  { %21449 = vmatprep.subr.bf16.mxu0 %v25964_v11 }
0x13bf   :  { %21448 = vmatpush3.bf16.xpose.msra.mxu1 %v26051_v43 }
0x13c0   :  { %21455 = vmatprep.subr.bf16.mxu1 %v25964_v11 }
0x13c4   :  { %20006 = vmatmul.mubr.f32.vlgmr.msra.gmra.mrb[116].mxu0 %v8083_v45 }
0x13c5   :  { %21451 = vmatpush3.bf16.msra.mxu0 %v26052_v32  ;;  %20027 = vmatprep.mubr.msk.f32.mxu0 %vm22355_vm1, %v25963_v10 }
0x13c6   :  { %20017 = vmatmul.mubr.f32.vlgmr.msra.gmra.mrb[116].mxu1 %v8085_v4  ;;  %21452 = vmatprep.subr.bf16.mxu0 %v25964_v11 }
0x13c7   :  { %21457 = vmatpush3.bf16.msra.mxu1 %v26053_v31  ;;  %20038 = vmatprep.mubr.msk.f32.mxu1 %vm22355_vm1, %v25963_v10 }
0x13c8   :  { %21458 = vmatprep.subr.bf16.mxu1 %v25964_v11 }
0x13c9   :  { %21454 = vmatpush3.bf16.msra.mxu0 %v26054_v44 }
0x13ca   :  { %21461 = vmatprep.subr.bf16.mxu0 %v25964_v11 }
0x13cb   :  { %21460 = vmatpush3.bf16.msra.mxu1 %v26055_v42 }
0x13cc   :  { %21467 = vmatprep.subr.bf16.mxu1 %v25964_v11 }
0x1467   :  { %v8152_v8 = vpop.f32.mrb[110].mxu0 }
0x1468   :  { %v8646_v27 = vmul.f32 %v23990_v55, %v8152_v8  ;;  %v19941_v25 = vpop.f32.mrb[111].mxu0 }
0x1469   :  { %v8222_v18 = vpop.f32.mrb[110].mxu1 }
0x146a   :  { %v8647_v14 = vmul.f32 %v23990_v55, %v8222_v18  ;;  %v19952_v29 = vpop.f32.mrb[111].mxu1  ;;  %20028 = vmatmul.mubr.msk.f32.vlgmr.msra.gmra.mrb[118].mxu0 %vm57_vm0, %v8646_v27  ;;  %v26060_v18 = vld [vmem:[#allocation42_spill] sm:$0xff] }
0x146b   :  { %21463 = vmatpush3.bf16.msra.mxu0 %v26056_v63  ;;  %20049 = vmatprep.mubr.msk.f32.mxu0 %vm22355_vm1, %v25963_v10  ;;  %v26062_v29 = vld [vmem:[#allocation44_spill] sm:$0xff] }
0x146c   :  { %20039 = vmatmul.mubr.msk.f32.vlgmr.msra.gmra.mrb[118].mxu1 %vm57_vm0, %v8647_v14  ;;  %21464 = vmatprep.subr.bf16.mxu0 %v25964_v11  ;;  %v26061_v14 = vld [vmem:[#allocation43_spill] sm:$0xff] }
0x146d   :  { %21469 = vmatpush3.bf16.msra.mxu1 %v26057_v26  ;;  %20060 = vmatprep.mubr.msk.f32.mxu1 %vm22355_vm1, %v25963_v10 }
0x146e   :  { %21470 = vmatprep.subr.bf16.mxu1 %v25964_v11 }
0x146f   :  { %21466 = vmatpush3.bf16.msra.mxu0 %v26058_v33 }
0x1470   :  { %21473 = vmatprep.subr.bf16.mxu0 %v25964_v11 }
0x1471   :  { %21472 = vmatpush3.bf16.msra.mxu1 %v26059_v35 }
0x1472   :  { %21479 = vmatprep.subr.bf16.mxu1 %v25964_v11 }
0x1477   :  { %v8292_v9 = vpop.f32.mrb[112].mxu0 }
0x1478   :  { %v8648_v45 = vmul.f32 %v23990_v55, %v8292_v9  ;;  %v19963_v4 = vpop.f32.mrb[113].mxu0  ;;  %v26063_v9 = vld [vmem:[#allocation45_spill] sm:$0xff] }
0x1479   :  { %v8362_v8 = vpop.f32.mrb[112].mxu1 }
0x147a   :  { %v8649_v27 = vmul.f32 %v23990_v55, %v8362_v8  ;;  %v19974_v25 = vpop.f32.mrb[113].mxu1  ;;  %20050 = vmatmul.mubr.msk.f32.vlgmr.msra.gmra.mrb[120].mxu0 %vm57_vm0, %v8648_v45 }
0x147b   :  { %21475 = vmatpush3.bf16.msra.mxu0 %v26060_v18  ;;  %20071 = vmatprep.mubr.msk.f32.mxu0 %vm22355_vm1, %v25963_v10  ;;  %v26064_v18 = vld [vmem:[#allocation54_spill] sm:$0xff] }
0x147c   :  { %20061 = vmatmul.mubr.msk.f32.vlgmr.msra.gmra.mrb[120].mxu1 %vm57_vm0, %v8649_v27  ;;  %21476 = vmatprep.subr.bf16.mxu0 %v25964_v11 }
0x147d   :  { %21481 = vmatpush3.bf16.msra.mxu1 %v26061_v14  ;;  %20082 = vmatprep.mubr.msk.f32.mxu1 %vm22355_vm1, %v25963_v10 }
0x147e   :  { %21482 = vmatprep.subr.bf16.mxu1 %v25964_v11 }
0x147f   :  { %21478 = vmatpush3.bf16.msra.mxu0 %v26062_v29  ;;  %v26068_v29 = vld [vmem:[#allocation8_spill] sm:$0xff] }
0x1480   :  { %21485 = vmatprep.subr.bf16.mxu0 %v25964_v11 }
0x1481   :  { %21484 = vmatpush3.bf16.msra.mxu1 %v26063_v9  ;;  %v26065_v9 = vld [vmem:[#allocation55_spill] sm:$0xff] }
0x1482   :  { %21491 = vmatprep.subr.bf16.mxu1 %v25964_v11 }
0x1487   :  { %v8432_v45 = vpop.f32.mrb[114].mxu0 }
0x1488   :  { %v8650_v4 = vmul.f32 %v23990_v55, %v8432_v45  ;;  %v19985_v8 = vpop.f32.mrb[115].mxu0  ;;  %v26066_v45 = vld [vmem:[#allocation56_spill] sm:$0xff] }
0x1489   :  { %v8502_v27 = vpop.f32.mrb[114].mxu1 }
0x148a   :  { %v8651_v25 = vmul.f32 %v23990_v55, %v8502_v27  ;;  %v19996_v14 = vpop.f32.mrb[115].mxu1  ;;  %20072 = vmatmul.mubr.msk.f32.vlgmr.msra.gmra.mrb[122].mxu0 %vm57_vm0, %v8650_v4 }
0x148b   :  { %21487 = vmatpush3.bf16.msra.mxu0 %v26064_v18  ;;  %20093 = vmatprep.mubr.msk.f32.mxu0 %vm22355_vm1, %v25963_v10  ;;  %v26067_v14 = vld [vmem:[#allocation58_spill] sm:$0xff] }
0x148c   :  { %20083 = vmatmul.mubr.msk.f32.vlgmr.msra.gmra.mrb[122].mxu1 %vm57_vm0, %v8651_v25  ;;  %21488 = vmatprep.subr.bf16.mxu0 %v25964_v11 }
0x148d   :  { %21493 = vmatpush3.bf16.msra.mxu1 %v26065_v9  ;;  %20104 = vmatprep.mubr.msk.f32.mxu1 %vm22355_vm1, %v25963_v10 }
0x148e   :  { %21494 = vmatprep.subr.bf16.mxu1 %v25964_v11 }
0x148f   :  { %21490 = vmatpush3.bf16.msra.mxu0 %v26066_v45 }
0x1490   :  { %21497 = vmatprep.subr.bf16.mxu0 %v25964_v11 }
0x1491   :  { %21496 = vmatpush3.bf16.msra.mxu1 %v26067_v14  ;;  %v26069_v14 = vld [vmem:[#allocation9_spill] sm:$0xff] }
0x1492   :  { %21503 = vmatprep.subr.bf16.mxu1 %v25964_v11 }
0x1497   :  { %v8572_v4 = vpop.f32.mrb[116].mxu0 }
0x1498   :  { %v8652_v8 = vmul.f32 %v23990_v55, %v8572_v4  ;;  %v20007_v27 = vpop.f32.mrb[117].mxu0 }
0x1499   :  { %v8642_v25 = vpop.f32.mrb[116].mxu1 }
0x149a   :  { %v8653_v9 = vmul.f32 %v23990_v55, %v8642_v25  ;;  %v20018_v18 = vpop.f32.mrb[117].mxu1  ;;  %20094 = vmatmul.mubr.msk.f32.vlgmr.msra.gmra.mrb[124].mxu0 %vm57_vm0, %v8652_v8  ;;  %v26070_v55 = vld [vmem:[#allocation10_spill] sm:$0xff] }
0x149b   :  { %21499 = vmatpush3.bf16.msra.mxu0 %v26068_v29  ;;  %20115 = vmatprep.mubr.msk.f32.mxu0 %vm22355_vm1, %v25963_v10  ;;  %v26071_v18 = vld [vmem:[#allocation11_spill] sm:$0xff] }
0x149c   :  { %20105 = vmatmul.mubr.msk.f32.vlgmr.msra.gmra.mrb[124].mxu1 %vm57_vm0, %v8653_v9  ;;  %21500 = vmatprep.subr.bf16.mxu0 %v25964_v11 }
0x149d   :  { %21505 = vmatpush3.bf16.msra.mxu1 %v26069_v14  ;;  %20126 = vmatprep.mubr.msk.f32.mxu1 %vm22355_vm1, %v25963_v10 }
0x149e   :  { %21506 = vmatprep.subr.bf16.mxu1 %v25964_v11 }
0x149f   :  { %21502 = vmatpush3.bf16.msra.mxu0 %v26070_v55 }
0x14a0   :  { %21509 = vmatprep.subr.bf16.mxu0 %v25964_v11 }
0x14a1   :  { %21508 = vmatpush3.bf16.msra.mxu1 %v26071_v18 }
0x14a2   :  { %21515 = vmatprep.subr.bf16.mxu1 %v25964_v11 }
0x153d   :  { %v8723_v4 = vpop.f32.mrb[118].mxu0 }
0x153e   :  { %v9238_v8 = vrot.slane %v8723_v4, 4  ;;  %v20029_v9 = vpop.f32.mrb[119].mxu0 }
0x153f   :  { %v8796_v27 = vpop.f32.mrb[118].mxu1 }
0x1540   :  { %v9239_v25 = vadd.f32 %v9238_v8, %v8723_v4  ;;  %v9244_v29 = vrot.slane %v8796_v27, 4  ;;  %v20040_v14 = vpop.f32.mrb[119].mxu1 }
0x1542   :  { %v9240_v45 = vrot.slane %v9239_v25, 2  ;;  %v9245_v35 = vadd.f32 %v9244_v29, %v8796_v27 }
0x1544   :  { %v9241_v33 = vadd.f32 %v9240_v45, %v9239_v25  ;;  %v9246_v26 = vrot.slane %v9245_v35, 2 }
0x1546   :  { %v9242_v63 = vrot.slane %v9241_v33, 1  ;;  %v9247_v42 = vadd.f32 %v9246_v26, %v9245_v35 }
0x1548   :  { %v9243_v55 = vadd.f32 %v9242_v63, %v9241_v33  ;;  %v9248_v44 = vrot.slane %v9247_v42, 1 }
0x154a   :  { %v9286_v31 = vmul.f32 0.17677669, %v9243_v55  ;;  %v9249_v32 = vadd.f32 %v9248_v44, %v9247_v42 }
0x154c   :  { %22125 = vtanh.f32 %v9286_v31  ;;  %v9287_v18 = vmul.f32 0.17677669, %v9249_v32 }
0x154d   :  { %v8869_v43 = vpop.f32.mrb[120].mxu0 }
0x154e   :  { %22127 = vtanh.f32 %v9287_v18  ;;  %v9250_v46 = vrot.slane %v8869_v43, 4  ;;  %v20051_v9 = vpop.f32.mrb[121].mxu0 }
0x154f   :  { %v8942_v22 = vpop.f32.mrb[120].mxu1 }
0x1550   :  { %v9251_v4 = vadd.f32 %v9250_v46, %v8869_v43  ;;  %v9256_v8 = vrot.slane %v8942_v22, 4  ;;  %v20062_v14 = vpop.f32.mrb[121].mxu1 }
0x1552   :  { %v9252_v0 = vrot.slane %v9251_v4, 2  ;;  %v9257_v29 = vadd.f32 %v9256_v8, %v8942_v22 }
0x1554   :  { %v9253_v45 = vadd.f32 %v9252_v0, %v9251_v4  ;;  %v9258_v27 = vrot.slane %v9257_v29, 2 }
0x1556   :  { %v22126_v25 = vpop.eup %22125  ;;  %v9254_v26 = vrot.slane %v9253_v45, 1  ;;  %v9259_v63 = vadd.f32 %v9258_v27, %v9257_v29 }
0x1557   :  { %v9303_v31 = vmul.f32 10.0, %v22126_v25 }
0x1558   :  { %v22128_v33 = vpop.eup %22127  ;;  %v9255_v35 = vadd.f32 %v9254_v26, %v9253_v45  ;;  %v9260_v44 = vrot.slane %v9259_v63, 1 }
0x1559   :  { %v9304_v32 = vmul.f32 10.0, %v22128_v33 }
0x155a   :  { %v9288_v42 = vmul.f32 0.17677669, %v9255_v35  ;;  %v9261_v55 = vadd.f32 %v9260_v44, %v9259_v63 }
0x155b   :  { %v9319_v18 = vsel %vm3639_vm7, %v9304_v32, %v9303_v31 }
0x155c   :  { %22129 = vtanh.f32 %v9288_v42  ;;  %v9289_v46 = vmul.f32 0.17677669, %v9261_v55 }
0x155d   :  { %v9015_v43 = vpop.f32.mrb[122].mxu0 }
0x155e   :  { %22131 = vtanh.f32 %v9289_v46  ;;  %v9262_v9 = vrot.slane %v9015_v43, 4  ;;  %v20073_v22 = vpop.f32.mrb[123].mxu0 }
0x155f   :  { %v9088_v0 = vpop.f32.mrb[122].mxu1 }
0x1560   :  { %v9263_v4 = vadd.f32 %v9262_v9, %v9015_v43  ;;  %v9268_v8 = vrot.slane %v9088_v0, 4  ;;  %v20084_v14 = vpop.f32.mrb[123].mxu1 }
0x1562   :  { %v9264_v29 = vrot.slane %v9263_v4, 2  ;;  %v9269_v27 = vadd.f32 %v9268_v8, %v9088_v0 }
0x1564   :  { %v9265_v45 = vadd.f32 %v9264_v29, %v9263_v4  ;;  %v9270_v26 = vrot.slane %v9269_v27, 2 }
0x1566   :  { %v22130_v25 = vpop.eup %22129  ;;  %v9266_v33 = vrot.slane %v9265_v45, 1  ;;  %v9271_v35 = vadd.f32 %v9270_v26, %v9269_v27 }
0x1567   :  { %v9305_v63 = vmul.f32 10.0, %v22130_v25 }
0x1568   :  { %v22132_v44 = vpop.eup %22131  ;;  %v9267_v31 = vadd.f32 %v9266_v33, %v9265_v45  ;;  %v9272_v32 = vrot.slane %v9271_v35, 1 }
0x1569   :  { %v9306_v42 = vmul.f32 10.0, %v22132_v44  ;;  %v9320_v55 = vsel %vm3641_vm8, %v9305_v63, %v9319_v18 }
0x156a   :  { %v9290_v46 = vmul.f32 0.17677669, %v9267_v31  ;;  %v9273_v22 = vadd.f32 %v9272_v32, %v9271_v35 }
0x156b   :  { %v9321_v43 = vsel %vm3643_vm9, %v9306_v42, %v9320_v55 }
0x156c   :  { %22133 = vtanh.f32 %v9290_v46  ;;  %v9291_v9 = vmul.f32 0.17677669, %v9273_v22 }
0x156d   :  { %v9161_v14 = vpop.f32.mrb[124].mxu0 }
0x156e   :  { %22135 = vtanh.f32 %v9291_v9  ;;  %v9274_v0 = vrot.slane %v9161_v14, 4  ;;  %v20095_v4 = vpop.f32.mrb[125].mxu0 }
0x156f   :  { %v9234_v8 = vpop.f32.mrb[124].mxu1 }
0x1570   :  { %v9275_v29 = vadd.f32 %v9274_v0, %v9161_v14  ;;  %v9280_v27 = vrot.slane %v9234_v8, 4  ;;  %v20106_v26 = vpop.f32.mrb[125].mxu1 }
0x1572   :  { %v9276_v25 = vrot.slane %v9275_v29, 2  ;;  %v9281_v45 = vadd.f32 %v9280_v27, %v9234_v8 }
0x1574   :  { %v9277_v33 = vadd.f32 %v9276_v25, %v9275_v29  ;;  %v9282_v44 = vrot.slane %v9281_v45, 2 }
0x1576   :  { %v22134_v53 = vpop.eup %22133  ;;  %v9278_v18 = vrot.slane %v9277_v33, 1  ;;  %v9283_v63 = vadd.f32 %v9282_v44, %v9281_v45 }
0x1577   :  { %v9307_v35 = vmul.f32 10.0, %v22134_v53 }
0x1578   :  { %v22136_v31 = vpop.eup %22135  ;;  %v9279_v32 = vadd.f32 %v9278_v18, %v9277_v33  ;;  %v9284_v42 = vrot.slane %v9283_v63, 1 }
0x1579   :  { %v9308_v55 = vmul.f32 10.0, %v22136_v31  ;;  %v9322_v46 = vsel %vm3645_vm10, %v9307_v35, %v9321_v43 }
0x157a   :  { %v9292_v22 = vmul.f32 0.17677669, %v9279_v32  ;;  %v9285_v9 = vadd.f32 %v9284_v42, %v9283_v63 }
0x157b   :  { %v9323_v14 = vsel %vm3647_vm11, %v9308_v55, %v9322_v46 }
0x157c   :  { %22137 = vtanh.f32 %v9292_v22  ;;  %v9293_v0 = vmul.f32 0.17677669, %v9285_v9 }
0x157e   :  { %22139 = vtanh.f32 %v9293_v0 }
0x1586   :  { %v22138_v4 = vpop.eup %22137 }
0x1587   :  { %v9309_v8 = vmul.f32 10.0, %v22138_v4 }
0x1588   :  { %v22140_v29 = vpop.eup %22139 }
0x1589   :  { %v9310_v27 = vmul.f32 10.0, %v22140_v29  ;;  %v9324_v26 = vsel %vm3649_vm12, %v9309_v8, %v9323_v14  ;;  %v9433_v29 = vld [vmem:[%s25757_s0 + $0x8] sm:$0xff] }
0x158b   :  { %v9325_v53 = vsel %vm3651_vm13, %v9310_v27, %v9324_v26  ;;  %v9432_v27 = vld [vmem:[%s25757_s0] sm:$0xff] }
0x158c   :  { %v9327_v25 = vsel %vm9294_vm5, -1e+30, %v9325_v53  ;;  %vm26079_vm5 = vmmov %vm26078_vm6 }
0x158d   :  { %9328 = vmax.xlane.f32.xlu1 %v9327_v25 }
0x161a   :  { %v9329_v43 = vpop.xlane.xlu1 %9328 }
0x161b   :  { %v9330_v45 = vsub.f32 %v9327_v25, %v9329_v43 }
0x161d   :  { %v9331_v33 = vmul.f32 1.442695, %v9330_v45 }
0x161f   :  { %22141 = vpow2.f32 %v9331_v33  ;;  %v9434_v33 = vld [vmem:[%s25757_s0 + $0x10] sm:$0xff] }
0x1629   :  { %v22142_v44 = vpop.eup %22141 }
0x162a   :  { %9333 = vadd.xlane.f32.xlu0 %v22142_v44 }
0x16b7   :  { %v9334_v18 = vpop.xlane.xlu0 %9333 }
0x16b8   :  { %22143 = vrcp.f32 %v9334_v18 }
0x16c2   :  { %v22144_v63 = vpop.eup %22143 }
0x16c3   :  { %v9336_v35 = vmul.f32 %v22144_v63, %v22142_v44  ;;  %v9437_v44 = vld [vmem:[%s25757_s0 + $0x28] sm:$0xff] }
0x16c5   :  { %9339 = vmax.xlane.f32.xlu1 %v9336_v35  ;;  %9338 = vst [vmem:[#allocation5 + $0x10] sm:$0xff] %v9336_v35 }
0x1752   :  { %v9340_v31 = vpop.xlane.xlu1 %9339 }
0x1753   :  { %22145 = vlog2.f32 %v9340_v31  ;;  %vm9341_vm2 = vcmp.ge.f32.partialorder %v9336_v35, %v9340_v31  ;;  %v9435_v31 = vld [vmem:[%s25757_s0 + $0x18] sm:$0xff] }
0x1754   :  { %v9342_v32 = vsel %vm9341_vm2, %v26072_v30, 128.0  ;;  %vm26080_vm2 = vmmov %vm26079_vm5 }
0x1755   :  { %9343 = vmin.xlane.f32.xlu0 %v9342_v32  ;;  %v9438_v32 = vld [vmem:[%s25757_s0 + $0x30] sm:$0xff] }
0x175d   :  { %v22146_v42 = vpop.eup %22145 }
0x175e   :  { %v9350_v55 = vmul.f32 0.6931472, %v22146_v42 }
0x1760   :  { %v9351_v46 = vsel %vm6543_vm3, 0.0, %v9350_v55  ;;  %vm26076_vm3 = vcmp.eq.s32.totalorder %v23050_v13, 0 }
0x1761   :  { %18067 = vst.msk [vmem:[%s25769_s12 + $0x10] sm:$0xff] %vm26073_vm15, %v9351_v46  ;;  %vm26081_vm15 = vcmask 195712  }
0x17e2   :  { %v9344_v22 = vpop.xlane.xlu0 %9343 }
0x17e3   :  { %v21969_v9 = vtrunc.f32 %v9344_v22 }
0x17e5   :  { %v24246_v14 = vcvt.f32.s32 %v21969_v9  ;;  %v9441_v9 = vld [vmem:[%s25757_s0 + $0x48] sm:$0xff] }
0x17e7   :  { %vm9346_vm4 = vcmp.eq.s32.totalorder %v23050_v13, %v24246_v14  ;;  %18066 = vst.msk [vmem:[%s25768_s11 + $0x10] sm:$0xff] %vm26074_vm14, %v24246_v14 }
0x17e8   :  { %v24256_v24 = vsel %vm9346_vm4, 1.0, %v25963_v10  ;;  %vm26082_vm4 = vmmov %vm26081_vm15 }
0x17e9   :  { %v9390_v0 = vrot.slane %v24256_v24, %v22955_v20  ;;  %v9383_v42 = vcombine.high %v24256_v24, %v24256_v24  ;;  %vm26083_vm14 = vmmov %vm26082_vm4 }
0x17eb   :  { %v9398_v4 = vcombine.high %v9390_v0, %v9390_v0  ;;  %v9406_v8 = vrot.slane %v9390_v0, %v22955_v20  ;;  %v9436_v0 = vld [vmem:[%s25757_s0 + $0x20] sm:$0xff] }
0x17ed   :  { %v9467_v26 = vrot.slane %v9406_v8, %v22960_v19  ;;  %v9420_v53 = vrot.slane %v9398_v4, %v22955_v20  ;;  %v9428_v35 = vcombine.high %v9406_v8, %v9406_v8  ;;  %v9397_v4 = vrot.slane %v9383_v42, %v22955_v20 }
0x17ef   :  { %v9505_v25 = vmul.f32 %v9467_v26, %v9433_v29  ;;  %v9504_v43 = vmul.f32 %v9467_v26, %v9432_v27  ;;  %v9471_v45 = vrot.slane %v9420_v53, %v22960_v19  ;;  %v9506_v18 = vmul.f32 %v9467_v26, %v9434_v33  ;;  %v9439_v27 = vld [vmem:[%s25757_s0 + $0x38] sm:$0xff] }
0x17f0   :  { %v9507_v55 = vmul.f32 %v9467_v26, %v9435_v31  ;;  %v9475_v22 = vrot.slane %v9428_v35, %v22960_v19  ;;  %v9440_v26 = vld [vmem:[%s25757_s0 + $0x40] sm:$0xff]  ;;  %v9413_v33 = vrot.slane %v9397_v4, %v22955_v20 }
0x17f1   :  { %9538 = vadd.xlane.f32.xlu0 %v9505_v25  ;;  %9536 = vadd.xlane.f32.xlu1 %v9504_v43  ;;  %v9509_v63 = vmul.f32 %v9471_v45, %v9437_v44  ;;  %v9510_v46 = vmul.f32 %v9471_v45, %v9438_v32  ;;  %v9508_v29 = vmul.f32 %v9471_v45, %v9436_v0  ;;  %v9443_v44 = vld [vmem:[%s25757_s0 + $0x58] sm:$0xff]  ;;  %v9448_v32 = vld [vmem:[%s25757_s0 + $0x80] sm:$0xff] }
0x17f2   :  { %v9513_v8 = vmul.f32 %v9475_v22, %v9441_v9  ;;  %v9511_v25 = vmul.f32 %v9471_v45, %v9439_v27  ;;  %v9512_v43 = vmul.f32 %v9475_v22, %v9440_v26  ;;  %v9483_v31 = vrot.slane %v9413_v33, %v22960_v19  ;;  %v9449_v45 = vld [vmem:[%s25757_s0 + $0x88] sm:$0xff]  ;;  %v9450_v9 = vld [vmem:[%s25757_s0 + $0x90] sm:$0xff] }
0x17f3   :  { %v9399_v0 = vcombine.high %v9397_v4, %v9397_v4  ;;  %v9445_v26 = vld [vmem:[%s25757_s0 + $0x68] sm:$0xff]  ;;  %v9446_v4 = vld [vmem:[%s25757_s0 + $0x70] sm:$0xff] }
0x17f4   :  { %v9521_v42 = vmul.f32 %v9483_v31, %v9449_v45  ;;  %v9429_v45 = vcombine.high %v9413_v33, %v9413_v33  ;;  %v9456_v33 = vld [vmem:[%s25757_s0 + $0xc0] sm:$0xff] }
0x17f5   :  { %9540 = vadd.xlane.f32.xlu1 %v9506_v18  ;;  %9546 = vadd.xlane.f32.xlu0 %v9509_v63  ;;  %v9442_v18 = vld [vmem:[%s25757_s0 + $0x50] sm:$0xff]  ;;  %v9515_v63 = vmul.f32 %v9475_v22, %v9443_v44  ;;  %v9427_v44 = vrot.slane %v9399_v0, %v22955_v20 }
0x17f6   :  { %v9514_v35 = vmul.f32 %v9475_v22, %v9442_v18  ;;  %v9451_v22 = vld [vmem:[%s25757_s0 + $0x98] sm:$0xff] }
0x17f7   :  { %v9447_v18 = vld [vmem:[%s25757_s0 + $0x78] sm:$0xff] }
0x17f9   :  { %9542 = vadd.xlane.f32.xlu1 %v9507_v55  ;;  %9548 = vadd.xlane.f32.xlu0 %v9510_v46  ;;  %v9520_v55 = vmul.f32 %v9483_v31, %v9448_v32  ;;  %v9430_v46 = vcombine.high %v9420_v53, %v9420_v53  ;;  %v9444_v53 = vld [vmem:[%s25757_s0 + $0x60] sm:$0xff]  ;;  %v9453_v32 = vld [vmem:[%s25757_s0 + $0xa8] sm:$0xff] }
0x17fb   :  { %v9479_v27 = vrot.slane %v9430_v46, %v22960_v19 }
0x17fd   :  { %9554 = vadd.xlane.f32.xlu0 %v9513_v8  ;;  %9544 = vadd.xlane.f32.xlu1 %v9508_v29  ;;  %v9522_v8 = vmul.f32 %v9483_v31, %v9450_v9  ;;  %v9523_v29 = vmul.f32 %v9483_v31, %v9451_v22  ;;  %v9487_v31 = vrot.slane %v9427_v44, %v22960_v19  ;;  %v9454_v22 = vld [vmem:[%s25757_s0 + $0xb0] sm:$0xff] }
0x17fe   :  { %v9491_v9 = vrot.slane %v9429_v45, %v22960_v19  ;;  %v9461_v45 = vld [vmem:[%s25757_s0 + $0xe8] sm:$0xff] }
0x17ff   :  { %v9526_v0 = vmul.f32 %v9487_v31, %v9454_v22  ;;  %v24374_v22 = vld [vmem:[%s25759_s2] sm:$0xff] }
0x1800   :  { %26075 = vst [vmem:[#allocation12_spill] sm:$0xff] %v24374_v22 }
0x1801   :  { %9550 = vadd.xlane.f32.xlu0 %v9511_v25  ;;  %9552 = vadd.xlane.f32.xlu1 %v9512_v43  ;;  %v9517_v25 = vmul.f32 %v9479_v27, %v9445_v26  ;;  %v9516_v43 = vmul.f32 %v9479_v27, %v9444_v53 }
0x1805   :  { %9558 = vadd.xlane.f32.xlu0 %v9515_v63  ;;  %9556 = vadd.xlane.f32.xlu1 %v9514_v35  ;;  %v9518_v63 = vmul.f32 %v9479_v27, %v9446_v4  ;;  %v9519_v35 = vmul.f32 %v9479_v27, %v9447_v18  ;;  %v9455_v27 = vld [vmem:[%s25757_s0 + $0xb8] sm:$0xff] }
0x1806   :  { %v9527_v53 = vmul.f32 %v9487_v31, %v9455_v27  ;;  %v9459_v4 = vld [vmem:[%s25757_s0 + $0xd8] sm:$0xff] }
0x1809   :  { %9570 = vadd.xlane.f32.xlu1 %v9521_v42  ;;  %9568 = vadd.xlane.f32.xlu0 %v9520_v55  ;;  %v9452_v42 = vld [vmem:[%s25757_s0 + $0xa0] sm:$0xff]  ;;  %v9525_v55 = vmul.f32 %v9487_v31, %v9453_v32 }
0x180a   :  { %v9524_v46 = vmul.f32 %v9487_v31, %v9452_v42  ;;  %v9462_v42 = vld [vmem:[%s25757_s0 + $0xf0] sm:$0xff] }
0x180d   :  { %9572 = vadd.xlane.f32.xlu1 %v9522_v8  ;;  %9574 = vadd.xlane.f32.xlu0 %v9523_v29  ;;  %v9528_v8 = vmul.f32 %v9491_v9, %v9456_v33  ;;  %v9457_v29 = vld [vmem:[%s25757_s0 + $0xc8] sm:$0xff]  ;;  %v9356_v33 = vmul.f32 %v24374_v22, %v24256_v24 }
0x180e   :  { %v9529_v26 = vmul.f32 %v9491_v9, %v9457_v29 }
0x1811   :  { %9562 = vadd.xlane.f32.xlu1 %v9517_v25  ;;  %9560 = vadd.xlane.f32.xlu0 %v9516_v43  ;;  %v9431_v25 = vcombine.high %v9427_v44, %v9427_v44  ;;  %v9458_v43 = vld [vmem:[%s25757_s0 + $0xd0] sm:$0xff]  ;;  %v9460_v44 = vld [vmem:[%s25757_s0 + $0xe0] sm:$0xff] }
0x1812   :  { %v9530_v18 = vmul.f32 %v9491_v9, %v9458_v43 }
0x1815   :  { %9564 = vadd.xlane.f32.xlu1 %v9518_v63  ;;  %9566 = vadd.xlane.f32.xlu0 %v9519_v35  ;;  %v9531_v63 = vmul.f32 %v9491_v9, %v9459_v4  ;;  %v9495_v35 = vrot.slane %v9431_v25, %v22960_v19 }
0x1817   :  { %v9533_v31 = vmul.f32 %v9495_v35, %v9461_v45  ;;  %v9532_v32 = vmul.f32 %v9495_v35, %v9460_v44 }
0x1819   :  { %9578 = vadd.xlane.f32.xlu1 %v9525_v55  ;;  %9576 = vadd.xlane.f32.xlu0 %v9524_v46  ;;  %v9463_v55 = vld [vmem:[%s25757_s0 + $0xf8] sm:$0xff]  ;;  %v9534_v46 = vmul.f32 %v9495_v35, %v9462_v42 }
0x181a   :  { %v9535_v9 = vmul.f32 %v9495_v35, %v9463_v55 }
0x181d   :  { %9580 = vadd.xlane.f32.xlu1 %v9526_v0  ;;  %9584 = vadd.xlane.f32.xlu0 %v9528_v8  ;;  %v9362_v0 = vmax.f32 %v23883_v16, %v24256_v24 }
0x181f   :  { %v24384_v8 = vsel %vm26076_vm3, 0.0, %v9362_v0  ;;  %vm26084_vm3 = vcmask 261312  }
0x1820   :  { %26077 = vst [vmem:[#allocation13_spill] sm:$0xff] %v24384_v8 }
0x1821   :  { %9586 = vadd.xlane.f32.xlu1 %v9529_v26  ;;  %9582 = vadd.xlane.f32.xlu0 %v9527_v53 }
0x1825   :  { %9588 = vadd.xlane.f32.xlu1 %v9530_v18  ;;  %9590 = vadd.xlane.f32.xlu0 %v9531_v63 }
0x1829   :  { %9594 = vadd.xlane.f32.xlu1 %v9533_v31  ;;  %9592 = vadd.xlane.f32.xlu0 %v9532_v32 }
0x182d   :  { %9596 = vadd.xlane.f32.xlu1 %v9534_v46  ;;  %9598 = vadd.xlane.f32.xlu0 %v9535_v9 }
0x1831   :  { %9357 = vadd.xlane.f32.xlu0 %v9356_v33 }
0x183e   :  { %9697 = vrot.lane.b32.xlu1 %v23975_v12, %s22358_s21 }
0x1862   :  { %9375 = vadd.xlane.f32.xlu1 %v24384_v8 }
0x187e   :  { %v9539_v29 = vpop.xlane.xlu0 %9538  ;;  %v9537_v27 = vpop.xlane.xlu1 %9536 }
0x187f   :  { %v9810_v17 = vrot.slane %v9539_v29, %v23377_v39  ;;  %v9806_v15 = vrot.slane %v9537_v27, %v23373_v3 }
0x1882   :  { %v9541_v26 = vpop.xlane.xlu1 %9540  ;;  %v9547_v53 = vpop.xlane.xlu0 %9546 }
0x1883   :  { %v9829_v47 = vrot.slane %v9547_v53, %v23377_v39  ;;  %v9815_v5 = vrot.slane %v9541_v26, %v23380_v62 }
0x1886   :  { %v9543_v25 = vpop.xlane.xlu1 %9542  ;;  %v9549_v43 = vpop.xlane.xlu0 %9548 }
0x1887   :  { %v9834_v22 = vrot.slane %v9549_v43, %v23380_v62 }
0x188a   :  { %v9555_v4 = vpop.xlane.xlu0 %9554  ;;  %v9545_v18 = vpop.xlane.xlu1 %9544 }
0x188b   :  { %v9825_v0 = vrot.slane %v9545_v18, %v23373_v3  ;;  %v9848_v13 = vrot.slane %v9555_v4, %v23377_v39  ;;  %v9811_v4 = vsel %vm26080_vm2, %v9810_v17, %v9806_v15 }
0x188d   :  { %v9830_v8 = vsel %vm26078_vm6, %v9829_v47, %v9825_v0  ;;  %v9820_v47 = vrot.slane %v9543_v25, %v23386_v28  ;;  %vm26085_vm6 = vmmov %vm26080_vm2 }
0x188e   :  { %v9551_v63 = vpop.xlane.xlu0 %9550  ;;  %v9553_v35 = vpop.xlane.xlu1 %9552  ;;  %vm26087_vm2 = vmmov %vm26082_vm4 }
0x188f   :  { %v9844_v59 = vrot.slane %v9553_v35, %v23373_v3  ;;  %v9839_v18 = vrot.slane %v9551_v63, %v23386_v28  ;;  %v9835_v63 = vsel %vm26081_vm15, %v9834_v22, %v9830_v8  ;;  %vm26088_vm15 = vmmov %vm26084_vm3 }
0x1891   :  { %v9849_v27 = vsel %vm26079_vm5, %v9848_v13, %v9844_v59  ;;  %vm26086_vm5 = vmmov %vm26084_vm3 }
0x1892   :  { %v9559_v12 = vpop.xlane.xlu0 %9558  ;;  %v9557_v45 = vpop.xlane.xlu1 %9556 }
0x1893   :  { %v9853_v7 = vrot.slane %v9557_v45, %v23380_v62  ;;  %v9858_v45 = vrot.slane %v9559_v12, %v23386_v28 }
0x1895   :  { %v9854_v43 = vsel %vm26082_vm4, %v9853_v7, %v9849_v27  ;;  %vm26089_vm4 = vmmov %vm26085_vm6 }
0x1896   :  { %v9571_v44 = vpop.xlane.xlu1 %9570  ;;  %v9569_v16 = vpop.xlane.xlu0 %9568  ;;  %v9859_v17 = vsel %vm26086_vm5, %v9858_v45, %v9854_v43  ;;  %vm26093_vm5 = vmmov %vm26089_vm4 }
0x1897   :  { %v9886_v0 = vrot.slane %v9571_v44, %v23377_v39  ;;  %v9882_v59 = vrot.slane %v9569_v16, %v23373_v3 }
0x189a   :  { %v9573_v24 = vpop.xlane.xlu1 %9572  ;;  %v24387_v31 = vpop.xlane.xlu0 %9574 }
0x189b   :  { %v9891_v22 = vrot.slane %v9573_v24, %v23380_v62  ;;  %v9887_v24 = vsel %vm26089_vm4, %v9886_v0, %v9882_v59 }
0x189e   :  { %v9563_v32 = vpop.xlane.xlu1 %9562  ;;  %v9561_v42 = vpop.xlane.xlu0 %9560 }
0x189f   :  { %v9867_v53 = vrot.slane %v9563_v32, %v23377_v39  ;;  %v9863_v35 = vrot.slane %v9561_v42, %v23373_v3  ;;  %v9816_v32 = vsel %vm26083_vm14, %v9815_v5, %v9811_v4  ;;  %v9840_v42 = vsel %vm26084_vm3, %v9839_v18, %v9835_v63  ;;  %vm26090_vm14 = vmmov %vm26084_vm3 }
0x18a0   :  { %v9821_v8 = vsel %vm26088_vm15, %v9820_v47, %v9816_v32  ;;  %vm26091_vm3 = vmmov %vm26087_vm2 }
0x18a1   :  { %v9868_v13 = vsel %vm26085_vm6, %v9867_v53, %v9863_v35  ;;  %vm26092_vm6 = vmmov %vm26089_vm4 }
0x18a2   :  { %v9565_v55 = vpop.xlane.xlu1 %9564  ;;  %v9567_v46 = vpop.xlane.xlu0 %9566  ;;  %vm26094_vm15 = vmmov %vm26087_vm2 }
0x18a3   :  { %v9872_v26 = vrot.slane %v9565_v55, %v23380_v62  ;;  %v9877_v12 = vrot.slane %v9567_v46, %v23386_v28  ;;  %v9955_v46 = vsel %vm3639_vm7, %v9840_v42, %v9821_v8  ;;  %vm26095_vm4 = vmmov %vm26090_vm14 }
0x18a4   :  { %v9956_v35 = vsel %vm3641_vm8, %v9859_v17, %v9955_v46 }
0x18a5   :  { %v9873_v7 = vsel %vm26087_vm2, %v9872_v26, %v9868_v13  ;;  %v9896_v26 = vrot.slane %v24387_v31, %v23386_v28 }
0x18a6   :  { %v9579_v9 = vpop.xlane.xlu1 %9578  ;;  %v9577_v33 = vpop.xlane.xlu0 %9576 }
0x18a7   :  { %v9905_v25 = vrot.slane %v9579_v9, %v23377_v39  ;;  %v9901_v44 = vrot.slane %v9577_v33, %v23373_v3  ;;  %v9892_v33 = vsel %vm26091_vm3, %v9891_v22, %v9887_v24  ;;  %vm26097_vm3 = vmmov %vm26095_vm4 }
0x18aa   :  { %v9581_v30 = vpop.xlane.xlu1 %9580  ;;  %v9585_v21 = vpop.xlane.xlu0 %9584 }
0x18ab   :  { %v9910_v18 = vrot.slane %v9581_v30, %v23380_v62  ;;  %v9920_v53 = vrot.slane %v9585_v21, %v23373_v3  ;;  %v9906_v21 = vsel %vm26093_vm5, %v9905_v25, %v9901_v44 }
0x18ad   :  { %v9911_v32 = vsel %vm26094_vm15, %v9910_v18, %v9906_v21  ;;  %vm9359_vm15 = vcmp.eq.s32.totalorder %v24246_v14, 0 }
0x18ae   :  { %v9587_v37 = vpop.xlane.xlu1 %9586  ;;  %v9583_v29 = vpop.xlane.xlu0 %9582 }
0x18af   :  { %v9924_v5 = vrot.slane %v9587_v37, %v23377_v39  ;;  %v9878_v37 = vsel %vm26090_vm14, %v9877_v12, %v9873_v7  ;;  %v9915_v27 = vrot.slane %v9583_v29, %v23386_v28  ;;  %vm26096_vm14 = vmmov %vm26095_vm4 }
0x18b0   :  { %v9957_v29 = vsel %vm3643_vm9, %v9878_v37, %v9956_v35  ;;  %v9897_v59 = vsel %vm26096_vm14, %v9896_v26, %v9892_v33  ;;  %v22321_v37 = vld [vmem:[%s25765_s8] ss:$0 sm:$0xff] }
0x18b1   :  { %v9925_v4 = vsel %vm26092_vm6, %v9924_v5, %v9920_v53  ;;  %v9916_v42 = vsel %vm26095_vm4, %v9915_v27, %v9911_v32  ;;  %vm26098_vm6 = vmmov %vm26093_vm5  ;;  %v24491_v32 = vld [vmem:[%s25766_s9] sm:$0xff] }
0x18b2   :  { %v9589_v55 = vpop.xlane.xlu1 %9588  ;;  %v9591_v15 = vpop.xlane.xlu0 %9590  ;;  %vm26099_vm5 = vmmov %vm26087_vm2 }
0x18b3   :  { %v9929_v16 = vrot.slane %v9589_v55, %v23380_v62  ;;  %v9934_v30 = vrot.slane %v9591_v15, %v23386_v28  ;;  %v9958_v15 = vsel %vm3645_vm10, %v9897_v59, %v9957_v29 }
0x18b4   :  { %v9959_v22 = vsel %vm3647_vm11, %v9916_v42, %v9958_v15 }
0x18b5   :  { %v9930_v47 = vsel %vm26087_vm2, %v9929_v16, %v9925_v4  ;;  %vm26100_vm2 = vmmov %vm26097_vm3 }
0x18b6   :  { %v9595_v45 = vpop.xlane.xlu1 %9594  ;;  %v9593_v9 = vpop.xlane.xlu0 %9592  ;;  %v9935_v13 = vsel %vm26097_vm3, %v9934_v30, %v9930_v47  ;;  %vm26104_vm3 = vmmov 1  }
0x18b7   :  { %v9943_v63 = vrot.slane %v9595_v45, %v23377_v39  ;;  %v9939_v43 = vrot.slane %v9593_v9, %v23373_v3  ;;  %v9960_v44 = vsel %vm3649_vm12, %v9935_v13, %v9959_v22 }
0x18b9   :  { %v9944_v17 = vsel %vm26098_vm6, %v9943_v63, %v9939_v43 }
0x18ba   :  { %v9597_v0 = vpop.xlane.xlu1 %9596  ;;  %v9599_v31 = vpop.xlane.xlu0 %9598 }
0x18bb   :  { %v9948_v12 = vrot.slane %v9597_v0, %v23380_v62  ;;  %v9953_v55 = vrot.slane %v9599_v31, %v23386_v28 }
0x18bd   :  { %v9949_v7 = vsel %vm26099_vm5, %v9948_v12, %v9944_v17 }
0x18be   :  { %v9954_v5 = vsel %vm26100_vm2, %v9953_v55, %v9949_v7  ;;  %v9698_v8 = vpop.permute.xlu1 %9697  ;;  %v9358_v25 = vpop.xlane.xlu0 %9357 }
0x18bf   :  { %v9360_v16 = vsub.f32 %v23961_v51, %v9358_v25  ;;  %20116 = vmatmul.mubr.msk.f32.vlgmr.msra.gmra.mrb[126].mxu0 %vm57_vm0, %v9698_v8  ;;  %v9961_v46 = vsel %vm3651_vm13, %v9954_v5, %v9960_v44 }
0x18c0   :  { %21511 = vmatpush3.bf16.msra.mxu0 %v25973_v52  ;;  %20127 = vmatmul.mubr.msk.f32.vlgmr.msra.gmra.mrb[126].mxu1 %vm57_vm0, %v9961_v46 }
0x18c1   :  { %21517 = vmatpush3.bf16.msra.mxu1 %v25974_v34  ;;  %21512 = vmatprep.subr.bf16.mxu0 %v25964_v11  ;;  %v24462_v18 = vsel %vm9359_vm15, 1.0, %v9360_v16 }
0x18c2   :  { %9366 = vperm.xlu0 %21987, %v24462_v18   ;;  %21518 = vmatprep.subr.bf16.mxu1 %v25964_v11 }
0x18c3   :  { %20137 = vmatprep.mubr.msk.f32.mxu0 %vm22355_vm1, %v25963_v10  ;;  %20148 = vmatprep.mubr.msk.f32.mxu1 %vm22355_vm1, %v25963_v10 }
0x18c4   :  { %21514 = vmatpush3.bf16.msra.mxu0 %v25975_v49 }
0x18c5   :  { %21520 = vmatpush3.bf16.msra.mxu1 %v25976_v1  ;;  %21521 = vmatprep.subr.bf16.mxu0 %v25964_v11 }
0x18c6   :  { %21527 = vmatprep.subr.bf16.mxu1 %v25964_v11 }
0x1941   :  { %v24474_v51 = vpop.permute.xlu0 %9366 }
0x1942   :  { %v10034_v27 = vmul.f32 %v22321_v37, %v24474_v51 }
0x1992   :  { %v24476_v53 = vpop.f32.mrb[126].mxu0 }
0x1993   :  { %v20117_v24 = vpop.f32.mrb[127].mxu0  ;;  %v10030_v35 = vpop.f32.mrb[126].mxu1 }
0x1994   :  { %v10031_v45 = vadd.f32 %v10030_v35, %v24476_v53  ;;  %v20128_v9 = vpop.f32.mrb[127].mxu1 }
0x1995   :  { %v26102_v9 = vld [vmem:[#allocation12_spill] sm:$0xff] }
0x1996   :  { %v10035_v33 = vadd.f32 %v10034_v27, %v10031_v45  ;;  %v26101_v45 = vld [vmem:[#allocation19_spill] sm:$0xff]  ;;  %vm9369_vm4 = vcmp.gt.f32.partialorder %v26102_v9, %v24474_v51  ;;  %v26105_v51 = vld [vmem:[#allocation60_spill] sm:$0xff] }
0x1997   :  { %vm26106_vm2 = vcmp.eq.s32.totalorder %v26105_v51, 0 }
0x1998   :  { %v10044_v26 = vrot.slane %v10035_v33, %v22955_v20  ;;  %v10037_v47 = vcombine.high %v10035_v33, %v10035_v33  ;;  %v18068_v33 = vsel %vm9369_vm4, 1.0, %v25963_v10 }
0x199a   :  { %v10052_v4 = vcombine.high %v10044_v26, %v10044_v26  ;;  %v10060_v30 = vrot.slane %v10044_v26, %v22955_v20  ;;  %v10051_v0 = vrot.slane %v10037_v47, %v22955_v20  ;;  %v24569_v26 = vpop.xlane.xlu1 %9375 }
0x199b   :  { %vm25900_vm14 = vcmp.ge.f32.partialorder %v24569_v26, 20.0 }
0x199c   :  { %v10074_v21 = vrot.slane %v10052_v4, %v22955_v20  ;;  %v10089_v63 = vrot.slane %v10060_v30, %v22960_v19  ;;  %v10082_v29 = vcombine.high %v10060_v30, %v10060_v30  ;;  %v10053_v12 = vcombine.high %v10051_v0, %v10051_v0  ;;  %v26103_v4 = vld [vmem:[#allocation13_spill] sm:$0xff]  ;;  %vm9378_vm6 = vmxor %vm25900_vm14, %vm26104_vm3 }
0x199d   :  { %v10067_v15 = vrot.slane %v10051_v0, %v22955_v20  ;;  %v9372_v30 = vadd.f32 %v18068_v33, %v26103_v4  ;;  %vm9379_vm5 = vmand %vm9359_vm15, %vm9378_vm6 }
0x199e   :  { %v10093_v43 = vrot.slane %v10074_v21, %v22960_v19  ;;  %v10126_v42 = vmul.f32 %v24491_v32, %v10089_v63  ;;  %v10084_v31 = vcombine.high %v10074_v21, %v10074_v21  ;;  %v10097_v13 = vrot.slane %v10082_v29, %v22960_v19 }
0x199f   :  { %v10081_v22 = vrot.slane %v10053_v12, %v22955_v20  ;;  %v10105_v5 = vrot.slane %v10067_v15, %v22960_v19  ;;  %v10083_v25 = vcombine.high %v10067_v15, %v10067_v15  ;;  %v9373_v21 = vmax.f32 %v9372_v30, 0.0 }
0x19a0   :  { %20138 = vmatmul.mubr.msk.f32.vlgmr.msra.gmra.mrb[128].mxu0 %vm57_vm0, %v10126_v42  ;;  %v10127_v59 = vmul.f32 %v24491_v32, %v10093_v43  ;;  %v10101_v55 = vrot.slane %v10084_v31, %v22960_v19  ;;  %v10128_v17 = vmul.f32 %v24491_v32, %v10097_v13  ;;  %v9380_v63 = vsel %vm9379_vm5, 1.0, %v25963_v10 }
0x19a1   :  { %21523 = vmatpush3.bf16.msra.mxu0 %v22871_v54  ;;  %20159 = vmatprep.mubr.msk.f32.mxu0 %vm22355_vm1, %v25963_v10  ;;  %v10109_v8 = vrot.slane %v10081_v22, %v22960_v19  ;;  %v10130_v44 = vmul.f32 %v24491_v32, %v10105_v5  ;;  %v10085_v16 = vcombine.high %v10081_v22, %v10081_v22  ;;  %v9374_v47 = vmin.f32 %v9373_v21, 1.0 }
0x19a2   :  { %20149 = vmatmul.mubr.msk.f32.vlgmr.msra.gmra.mrb[128].mxu1 %vm57_vm0, %v10127_v59  ;;  %21524 = vmatprep.subr.bf16.mxu0 %v25964_v11  ;;  %v10129_v7 = vmul.f32 %v24491_v32, %v10101_v55  ;;  %v10113_v24 = vrot.slane %v10083_v25, %v22960_v19  ;;  %v26107_v59 = vmov 0  }
0x19a3   :  { %21529 = vmatpush3.bf16.msra.mxu1 %v22873_v56  ;;  %20170 = vmatprep.mubr.msk.f32.mxu1 %vm22355_vm1, %v25963_v10  ;;  %v10131_v46 = vmul.f32 %v24491_v32, %v10109_v8  ;;  %v10117_v35 = vrot.slane %v10085_v16, %v22960_v19  ;;  %v24581_v43 = vsel %vm26106_vm2, %v9380_v63, %v9374_v47 }
0x19a4   :  { %21530 = vmatprep.subr.bf16.mxu1 %v25964_v11  ;;  %v10132_v37 = vmul.f32 %v24491_v32, %v10113_v24  ;;  %v10734_v29 = vrot.slane %v24581_v43, %v22955_v20  ;;  %v10727_v14 = vcombine.high %v24581_v43, %v24581_v43 }
0x19a5   :  { %21526 = vmatpush3.bf16.msra.mxu0 %v25977_v57  ;;  %v10133_v27 = vmul.f32 %v24491_v32, %v10117_v35 }
0x19a6   :  { %21533 = vmatprep.subr.bf16.mxu0 %v25964_v11  ;;  %v10742_v42 = vcombine.high %v10734_v29, %v10734_v29  ;;  %v10750_v0 = vrot.slane %v10734_v29, %v22955_v20  ;;  %v10741_v22 = vrot.slane %v10727_v14, %v22955_v20 }
0x19a7   :  { %21532 = vmatpush3.bf16.msra.mxu1 %v25978_v58 }
0x19a8   :  { %20160 = vmatmul.mubr.msk.f32.vlgmr.msra.gmra.mrb[130].mxu0 %vm57_vm0, %v10128_v17  ;;  %21539 = vmatprep.subr.bf16.mxu1 %v25964_v11  ;;  %v10764_v31 = vrot.slane %v10742_v42, %v22955_v20  ;;  %vm10784_vm4 = vcmp.ne.f32.partialorder %v10750_v0, 0.0  ;;  %v10772_v12 = vcombine.high %v10750_v0, %v10750_v0  ;;  %v10743_v16 = vcombine.high %v10741_v22, %v10741_v22 }
0x19a9   :  { %21535 = vmatpush3.bf16.msra.mxu0 %v25979_v36  ;;  %20181 = vmatprep.mubr.msk.f32.mxu0 %vm22355_vm1, %v25963_v10  ;;  %v10792_v13 = vsel %vm10784_vm4, 1, %v26107_v59 }
0x19aa   :  { %20171 = vmatmul.mubr.msk.f32.vlgmr.msra.gmra.mrb[130].mxu1 %vm57_vm0, %v10129_v7  ;;  %21536 = vmatprep.subr.bf16.mxu0 %v25964_v11  ;;  %vm10785_vm14 = vcmp.ne.f32.partialorder %v10764_v31, 0.0  ;;  %v10803_v15 = vrot.slane %v10792_v13, %v22960_v19  ;;  %v10774_v17 = vcombine.high %v10764_v31, %v10764_v31  ;;  %vm10786_vm15 = vcmp.ne.f32.partialorder %v10772_v12, 0.0 }
0x19ab   :  { %21541 = vmatpush3.bf16.msra.mxu1 %v25980_v41  ;;  %20192 = vmatprep.mubr.msk.f32.mxu1 %vm22355_vm1, %v25963_v10  ;;  %v10793_v55 = vsel %vm10785_vm14, 1, %v26107_v59  ;;  %v10771_v21 = vrot.slane %v10743_v16, %v22955_v20 }
0x19ac   :  { %21542 = vmatprep.subr.bf16.mxu1 %v25964_v11  ;;  %v10807_v5 = vrot.slane %v10793_v55, %v22960_v19  ;;  %vm10832_vm6 = vcmp.eq.s32.totalorder %v10803_v15, 1  ;;  %vm10787_vm5 = vcmp.ne.f32.partialorder %v10774_v17, 0.0 }
0x19ad   :  { %21538 = vmatpush3.bf16.msra.mxu0 %v25981_v40  ;;  %v10795_v33 = vsel %vm10787_vm5, 1, %v26107_v59 }
0x19ae   :  { %21545 = vmatprep.subr.bf16.mxu0 %v25964_v11  ;;  %vm10833_vm14 = vcmp.eq.s32.totalorder %v10807_v5, 1  ;;  %v10815_v63 = vrot.slane %v10795_v33, %v22960_v19 }
0x19af   :  { %21544 = vmatpush3.bf16.msra.mxu1 %v26034_v60 }
0x19b0   :  { %20182 = vmatmul.mubr.msk.f32.vlgmr.msra.gmra.mrb[132].mxu0 %vm57_vm0, %v10130_v44  ;;  %21551 = vmatprep.subr.bf16.mxu1 %v25964_v11 }
0x19b1   :  { %21547 = vmatpush3.bf16.msra.mxu0 %v26035_v23  ;;  %20203 = vmatprep.mubr.msk.f32.mxu0 %vm22355_vm1, %v25963_v10 }
0x19b2   :  { %20193 = vmatmul.mubr.msk.f32.vlgmr.msra.gmra.mrb[132].mxu1 %vm57_vm0, %v10131_v46  ;;  %21548 = vmatprep.subr.bf16.mxu0 %v25964_v11 }
0x19b3   :  { %21553 = vmatpush3.bf16.msra.mxu1 %v26036_v61  ;;  %20214 = vmatprep.mubr.msk.f32.mxu1 %vm22355_vm1, %v25963_v10 }
0x19b4   :  { %21554 = vmatprep.subr.bf16.mxu1 %v25964_v11 }
0x19b5   :  { %21550 = vmatpush3.bf16.msra.mxu0 %v26037_v2 }
0x19b6   :  { %21557 = vmatprep.subr.bf16.mxu0 %v25964_v11 }
0x19b7   :  { %21556 = vmatpush3.bf16.msra.mxu1 %v26038_v50 }
0x19b8   :  { %20204 = vmatmul.mubr.msk.f32.vlgmr.msra.gmra.mrb[134].mxu0 %vm57_vm0, %v10132_v37  ;;  %21563 = vmatprep.subr.bf16.mxu1 %v25964_v11  ;;  %v10794_v37 = vsel %vm10786_vm15, 1, %v26107_v59  ;;  %vm10789_vm15 = vcmp.ne.f32.partialorder %v10771_v21, 0.0 }
0x19b9   :  { %20225 = vmatprep.mubr.msk.f32.mxu0 %vm22355_vm1, %v25963_v10  ;;  %v10811_v30 = vrot.slane %v10794_v37, %v22960_v19  ;;  %v10797_v17 = vsel %vm10789_vm15, 1, %v26107_v59 }
0x19ba   :  { %20215 = vmatmul.mubr.msk.f32.vlgmr.msra.gmra.mrb[134].mxu1 %vm57_vm0, %v10133_v27  ;;  %v10757_v27 = vrot.slane %v10741_v22, %v22955_v20 }
0x19bb   :  { %20236 = vmatprep.mubr.msk.f32.mxu1 %vm22355_vm1, %v25963_v10  ;;  %vm10834_vm4 = vcmp.eq.s32.totalorder %v10811_v30, 1 }
0x19bc   :  { %vm10788_vm2 = vcmp.ne.f32.partialorder %v10757_v27, 0.0  ;;  %v10773_v55 = vcombine.high %v10757_v27, %v10757_v27 }
0x19bd   :  { %v10796_v12 = vsel %vm10788_vm2, 1, %v26107_v59 }
0x19be   :  { %21559 = vmatpush3.bf16.xpose.msra.mxu0 %v26039_v6  ;;  %v10819_v22 = vrot.slane %v10796_v12, %v22960_v19  ;;  %vm10790_vm5 = vcmp.ne.f32.partialorder %v10773_v55, 0.0 }
0x19bf   :  { %21560 = vmatprep.subr.bf16.mxu0 %v25964_v11  ;;  %v10798_v27 = vsel %vm10790_vm5, 1, %v26107_v59  ;;  %vm12128_vm5 = vcmp.ne.f32.partialorder %v24581_v43, 0.0  ;;  %v26140_v43 = vld [vmem:[#allocation61_spill] sm:$0xff] }
0x19c0   :  { %21565 = vmatpush3.bf16.xpose.msra.mxu1 %v26040_v38 }
0x19c1   :  { %21566 = vmatprep.subr.bf16.mxu1 %v25964_v11 }
0x19c6   :  { %21562 = vmatpush3.bf16.xpose.msra.mxu0 %v26041_v48 }
0x19c7   :  { %21569 = vmatprep.subr.bf16.mxu0 %v25964_v11 }
0x19c8   :  { %21568 = vmatpush3.bf16.xpose.msra.mxu1 %v26101_v45 }
0x19c9   :  { %21575 = vmatprep.subr.bf16.mxu1 %v25964_v11 }
0x1a73   :  { %v10203_v7 = vpop.f32.mrb[128].mxu0 }
0x1a74   :  { %v10718_v8 = vmul.f32 0.5, %v10203_v7  ;;  %v20139_v25 = vpop.f32.mrb[129].mxu0  ;;  %v10775_v7 = vcombine.high %v10771_v21, %v10771_v21  ;;  %v10827_v21 = vrot.slane %v10798_v27, %v22960_v19 }
0x1a75   :  { %v10276_v44 = vpop.f32.mrb[128].mxu1 }
0x1a76   :  { %v10719_v46 = vmul.f32 0.5, %v10276_v44  ;;  %v20150_v24 = vpop.f32.mrb[129].mxu1  ;;  %v24594_v35 = vsel %vm10832_vm6, -1e+30, %v10718_v8  ;;  %vm10835_vm6 = vcmp.eq.s32.totalorder %v10815_v63, 1  ;;  %v10823_v8 = vrot.slane %v10797_v17, %v22960_v19 }
0x1a77   :  { %10848 = vmax.xlane.f32.xlu0 %v24594_v35  ;;  %vm10838_vm15 = vcmp.eq.s32.totalorder %v10827_v21, 1 }
0x1a78   :  { %v10841_v9 = vsel %vm10833_vm14, -1e+30, %v10719_v46  ;;  %vm10836_vm14 = vcmp.eq.s32.totalorder %v10819_v22, 1  ;;  %vm10837_vm2 = vcmp.eq.s32.totalorder %v10823_v8, 1 }
0x1a79   :  { %10850 = vmax.xlane.f32.xlu1 %v10841_v9 }
0x1a7b   :  { %v10349_v47 = vpop.f32.mrb[130].mxu0 }
0x1a7c   :  { %v10720_v29 = vmul.f32 0.5, %v10349_v47  ;;  %v20161_v42 = vpop.f32.mrb[131].mxu0 }
0x1a7d   :  { %v10422_v0 = vpop.f32.mrb[130].mxu1 }
0x1a7e   :  { %v10721_v31 = vmul.f32 0.5, %v10422_v0  ;;  %v20172_v14 = vpop.f32.mrb[131].mxu1  ;;  %v10842_v13 = vsel %vm10834_vm4, -1e+30, %v10720_v29  ;;  %vm10791_vm4 = vcmp.ne.f32.partialorder %v10775_v7, 0.0 }
0x1a7f   :  { %10852 = vmax.xlane.f32.xlu1 %v10842_v13  ;;  %v10799_v30 = vsel %vm10791_vm4, 1, %v26107_v59  ;;  %vm26141_vm4 = vcmp.ge.f32.partialorder %v24569_v26, 20.0 }
0x1a80   :  { %v10843_v15 = vsel %vm10835_vm6, -1e+30, %v10721_v31  ;;  %v10831_v63 = vrot.slane %v10799_v30, %v22960_v19 }
0x1a81   :  { %10854 = vmax.xlane.f32.xlu0 %v10843_v15 }
0x1a82   :  { %vm10839_vm6 = vcmp.eq.s32.totalorder %v10831_v63, 1 }
0x1a83   :  { %v10495_v5 = vpop.f32.mrb[132].mxu0 }
0x1a84   :  { %v10722_v25 = vmul.f32 0.5, %v10495_v5  ;;  %v20183_v44 = vpop.f32.mrb[133].mxu0 }
0x1a85   :  { %v10568_v16 = vpop.f32.mrb[132].mxu1 }
0x1a86   :  { %v10723_v46 = vmul.f32 0.5, %v10568_v16  ;;  %v20194_v24 = vpop.f32.mrb[133].mxu1  ;;  %v10844_v37 = vsel %vm10836_vm14, -1e+30, %v10722_v25 }
0x1a87   :  { %10856 = vmax.xlane.f32.xlu1 %v10844_v37 }
0x1a88   :  { %v10845_v33 = vsel %vm10837_vm2, -1e+30, %v10723_v46  ;;  %vm26142_vm2 = vcmask 7168  }
0x1a89   :  { %10858 = vmax.xlane.f32.xlu0 %v10845_v33 }
0x1a8b   :  { %v10641_v47 = vpop.f32.mrb[134].mxu0 }
0x1a8c   :  { %v10724_v29 = vmul.f32 0.5, %v10641_v47  ;;  %v20205_v42 = vpop.f32.mrb[135].mxu0 }
0x1a8d   :  { %v10714_v0 = vpop.f32.mrb[134].mxu1 }
0x1a8e   :  { %v10725_v31 = vmul.f32 0.5, %v10714_v0  ;;  %v20216_v14 = vpop.f32.mrb[135].mxu1  ;;  %v10846_v12 = vsel %vm10838_vm15, -1e+30, %v10724_v29 }
0x1a8f   :  { %10860 = vmax.xlane.f32.xlu1 %v10846_v12 }
0x1a90   :  { %v10847_v55 = vsel %vm10839_vm6, -1e+30, %v10725_v31  ;;  %vm26143_vm6 = vmmov %vm26142_vm2 }
0x1a91   :  { %10862 = vmax.xlane.f32.xlu0 %v10847_v55 }
0x1b04   :  { %v10849_v17 = vpop.xlane.xlu0 %10848 }
0x1b05   :  { %v10864_v22 = vsub.f32 %v24594_v35, %v10849_v17 }
0x1b06   :  { %v10851_v7 = vpop.xlane.xlu1 %10850 }
0x1b07   :  { %v10872_v5 = vmul.f32 1.442695, %v10864_v22  ;;  %v10865_v8 = vsub.f32 %v10841_v9, %v10851_v7 }
0x1b09   :  { %22147 = vpow2.f32 %v10872_v5  ;;  %v10874_v25 = vmul.f32 1.442695, %v10865_v8 }
0x1b0b   :  { %22149 = vpow2.f32 %v10874_v25 }
0x1b0c   :  { %v10853_v44 = vpop.xlane.xlu1 %10852 }
0x1b0d   :  { %v10866_v16 = vsub.f32 %v10842_v13, %v10853_v44 }
0x1b0e   :  { %v10855_v46 = vpop.xlane.xlu0 %10854 }
0x1b0f   :  { %v10876_v24 = vmul.f32 1.442695, %v10866_v16  ;;  %v10867_v27 = vsub.f32 %v10843_v15, %v10855_v46 }
0x1b11   :  { %22151 = vpow2.f32 %v10876_v24  ;;  %v10878_v30 = vmul.f32 1.442695, %v10867_v27 }
0x1b13   :  { %v22148_v21 = vpop.eup %22147  ;;  %22153 = vpow2.f32 %v10878_v30 }
0x1b14   :  { %v10857_v47 = vpop.xlane.xlu1 %10856  ;;  %10888 = vadd.xlane.f32.xlu1 %v22148_v21 }
0x1b15   :  { %v22150_v63 = vpop.eup %22149  ;;  %v10868_v29 = vsub.f32 %v10844_v37, %v10857_v47  ;;  %v26108_v47 = vld [vmem:[#allocation26_spill] sm:$0xff] }
0x1b16   :  { %v10859_v35 = vpop.xlane.xlu0 %10858  ;;  %10890 = vadd.xlane.f32.xlu0 %v22150_v63 }
0x1b17   :  { %v10880_v42 = vmul.f32 1.442695, %v10868_v29  ;;  %v10869_v9 = vsub.f32 %v10845_v33, %v10859_v35  ;;  %v26109_v29 = vld [vmem:[#allocation27_spill] sm:$0xff]  ;;  %v26111_v35 = vld [vmem:[#allocation29_spill] sm:$0xff] }
0x1b19   :  { %22155 = vpow2.f32 %v10880_v42  ;;  %v10882_v0 = vmul.f32 1.442695, %v10869_v9 }
0x1b1b   :  { %v22152_v31 = vpop.eup %22151  ;;  %22157 = vpow2.f32 %v10882_v0 }
0x1b1c   :  { %10892 = vadd.xlane.f32.xlu1 %v22152_v31  ;;  %v10861_v13 = vpop.xlane.xlu1 %10860 }
0x1b1d   :  { %v22154_v14 = vpop.eup %22153  ;;  %v10870_v15 = vsub.f32 %v10846_v12, %v10861_v13 }
0x1b1e   :  { %10894 = vadd.xlane.f32.xlu0 %v22154_v14  ;;  %v10863_v17 = vpop.xlane.xlu0 %10862 }
0x1b1f   :  { %v10884_v22 = vmul.f32 1.442695, %v10870_v15  ;;  %v10871_v7 = vsub.f32 %v10847_v55, %v10863_v17  ;;  %v26112_v17 = vld [vmem:[#allocation38_spill] sm:$0xff] }
0x1b21   :  { %22159 = vpow2.f32 %v10884_v22  ;;  %v10886_v5 = vmul.f32 1.442695, %v10871_v7  ;;  %v26113_v22 = vld [vmem:[#allocation39_spill] sm:$0xff]  ;;  %v26115_v7 = vld [vmem:[#allocation41_spill] sm:$0xff] }
0x1b23   :  { %v22156_v8 = vpop.eup %22155  ;;  %22161 = vpow2.f32 %v10886_v5 }
0x1b24   :  { %10896 = vadd.xlane.f32.xlu1 %v22156_v8 }
0x1b25   :  { %v22158_v37 = vpop.eup %22157 }
0x1b26   :  { %10898 = vadd.xlane.f32.xlu0 %v22158_v37 }
0x1b2b   :  { %v24612_v33 = vpop.eup %22159 }
0x1b2c   :  { %10900 = vadd.xlane.f32.xlu1 %v24612_v33 }
0x1b2d   :  { %v24615_v25 = vpop.eup %22161 }
0x1b2e   :  { %10902 = vadd.xlane.f32.xlu0 %v24615_v25 }
0x1ba1   :  { %v10889_v12 = vpop.xlane.xlu1 %10888 }
0x1ba2   :  { %22163 = vrcp.f32 %v10889_v12 }
0x1ba3   :  { %v10891_v44 = vpop.xlane.xlu0 %10890 }
0x1ba4   :  { %22165 = vrcp.f32 %v10891_v44 }
0x1ba9   :  { %v10893_v16 = vpop.xlane.xlu1 %10892 }
0x1baa   :  { %22167 = vrcp.f32 %v10893_v16 }
0x1bab   :  { %v10895_v27 = vpop.xlane.xlu0 %10894 }
0x1bac   :  { %v22164_v55 = vpop.eup %22163  ;;  %22169 = vrcp.f32 %v10895_v27  ;;  %v26119_v27 = vld [vmem:[#allocation53_spill] sm:$0xff] }
0x1bad   :  { %v10905_v46 = vmul.f32 %v22164_v55, %v22148_v21  ;;  %v26110_v21 = vld [vmem:[#allocation28_spill] sm:$0xff] }
0x1bae   :  { %v22166_v24 = vpop.eup %22165 }
0x1baf   :  { %20226 = vmatmul.mubr.f32.vlgmr.msra.gmra.mrb[136].mxu0 %v10905_v46  ;;  %v10907_v30 = vmul.f32 %v22166_v24, %v22150_v63  ;;  %v26116_v46 = vld [vmem:[#allocation50_spill] sm:$0xff]  ;;  %v26117_v24 = vld [vmem:[#allocation51_spill] sm:$0xff] }
0x1bb0   :  { %21571 = vmatpush3.bf16.xpose.msra.mxu0 %v26108_v47  ;;  %20247 = vmatprep.mubr.msk.f32.mxu0 %vm22355_vm1, %v25963_v10 }
0x1bb1   :  { %20237 = vmatmul.mubr.f32.vlgmr.msra.gmra.mrb[136].mxu1 %v10907_v30  ;;  %21572 = vmatprep.subr.bf16.mxu0 %v25964_v11  ;;  %v10897_v9 = vpop.xlane.xlu1 %10896 }
0x1bb2   :  { %21577 = vmatpush3.bf16.xpose.msra.mxu1 %v26109_v29  ;;  %20258 = vmatprep.mubr.msk.f32.mxu1 %vm22355_vm1, %v25963_v10  ;;  %22171 = vrcp.f32 %v10897_v9  ;;  %v26120_v9 = vld [vmem:[#allocation20_spill] sm:$0xff] }
0x1bb3   :  { %21578 = vmatprep.subr.bf16.mxu1 %v25964_v11  ;;  %v10899_v13 = vpop.xlane.xlu0 %10898 }
0x1bb4   :  { %v22168_v63 = vpop.eup %22167  ;;  %22173 = vrcp.f32 %v10899_v13  ;;  %v26122_v13 = vld [vmem:[#allocation22_spill] sm:$0xff] }
0x1bb5   :  { %v10909_v0 = vmul.f32 %v22168_v63, %v22152_v31  ;;  %v26114_v31 = vld [vmem:[#allocation40_spill] sm:$0xff] }
0x1bb6   :  { %v22170_v42 = vpop.eup %22169 }
0x1bb7   :  { %v10911_v15 = vmul.f32 %v22170_v42, %v22154_v14 }
0x1bb8   :  { %21574 = vmatpush3.bf16.xpose.msra.mxu0 %v26110_v21 }
0x1bb9   :  { %21581 = vmatprep.subr.bf16.mxu0 %v25964_v11  ;;  %v10901_v12 = vpop.xlane.xlu1 %10900 }
0x1bba   :  { %21580 = vmatpush3.bf16.xpose.msra.mxu1 %v26111_v35  ;;  %22175 = vrcp.f32 %v10901_v12 }
0x1bbb   :  { %21587 = vmatprep.subr.bf16.mxu1 %v25964_v11  ;;  %v10903_v55 = vpop.xlane.xlu0 %10902 }
0x1bbc   :  { %v22172_v14 = vpop.eup %22171  ;;  %22177 = vrcp.f32 %v10903_v55  ;;  %v26124_v55 = vld [vmem:[#allocation30_spill] sm:$0xff] }
0x1bbd   :  { %v10913_v44 = vmul.f32 %v22172_v14, %v22156_v8  ;;  %v26118_v8 = vld [vmem:[#allocation52_spill] sm:$0xff] }
0x1bbe   :  { %v22174_v5 = vpop.eup %22173 }
0x1bbf   :  { %20248 = vmatmul.mubr.f32.vlgmr.msra.gmra.mrb[138].mxu0 %v10909_v0  ;;  %v10915_v16 = vmul.f32 %v22174_v5, %v22158_v37  ;;  %v26121_v0 = vld [vmem:[#allocation21_spill] sm:$0xff] }
0x1bc0   :  { %21583 = vmatpush3.bf16.xpose.msra.mxu0 %v26112_v17  ;;  %20269 = vmatprep.mubr.msk.f32.mxu0 %vm22355_vm1, %v25963_v10 }
0x1bc1   :  { %20259 = vmatmul.mubr.f32.vlgmr.msra.gmra.mrb[138].mxu1 %v10911_v15  ;;  %21584 = vmatprep.subr.bf16.mxu0 %v25964_v11 }
0x1bc2   :  { %21589 = vmatpush3.bf16.xpose.msra.mxu1 %v26113_v22  ;;  %20280 = vmatprep.mubr.msk.f32.mxu1 %vm22355_vm1, %v25963_v10 }
0x1bc3   :  { %21590 = vmatprep.subr.bf16.mxu1 %v25964_v11 }
0x1bc4   :  { %v22176_v37 = vpop.eup %22175 }
0x1bc5   :  { %v10917_v63 = vmul.f32 %v22176_v37, %v24612_v33  ;;  %v26123_v33 = vld [vmem:[#allocation23_spill] sm:$0xff]  ;;  %v26126_v37 = vld [vmem:[#allocation32_spill] sm:$0xff] }
0x1bc6   :  { %v22178_v30 = vpop.eup %22177 }
0x1bc7   :  { %v10919_v42 = vmul.f32 %v22178_v30, %v24615_v25  ;;  %v26127_v30 = vld [vmem:[#allocation33_spill] sm:$0xff] }
0x1bc8   :  { %21586 = vmatpush3.bf16.xpose.msra.mxu0 %v26114_v31 }
0x1bc9   :  { %21593 = vmatprep.subr.bf16.mxu0 %v25964_v11 }
0x1bca   :  { %21592 = vmatpush3.bf16.xpose.msra.mxu1 %v26115_v7 }
0x1bcb   :  { %21599 = vmatprep.subr.bf16.mxu1 %v25964_v11 }
0x1bcf   :  { %20270 = vmatmul.mubr.f32.vlgmr.msra.gmra.mrb[140].mxu0 %v10913_v44 }
0x1bd0   :  { %21595 = vmatpush3.bf16.xpose.msra.mxu0 %v26116_v46  ;;  %20291 = vmatprep.mubr.msk.f32.mxu0 %vm22355_vm1, %v25963_v10 }
0x1bd1   :  { %20281 = vmatmul.mubr.f32.vlgmr.msra.gmra.mrb[140].mxu1 %v10915_v16  ;;  %21596 = vmatprep.subr.bf16.mxu0 %v25964_v11  ;;  %v26125_v16 = vld [vmem:[#allocation31_spill] sm:$0xff] }
0x1bd2   :  { %21601 = vmatpush3.bf16.xpose.msra.mxu1 %v26117_v24  ;;  %20302 = vmatprep.mubr.msk.f32.mxu1 %vm22355_vm1, %v25963_v10 }
0x1bd3   :  { %21602 = vmatprep.subr.bf16.mxu1 %v25964_v11 }
0x1bd8   :  { %21598 = vmatpush3.bf16.xpose.msra.mxu0 %v26118_v8 }
0x1bd9   :  { %21605 = vmatprep.subr.bf16.mxu0 %v25964_v11 }
0x1bda   :  { %21604 = vmatpush3.bf16.xpose.msra.mxu1 %v26119_v27 }
0x1bdb   :  { %21611 = vmatprep.subr.bf16.mxu1 %v25964_v11 }
0x1bdf   :  { %20292 = vmatmul.mubr.f32.vlgmr.msra.gmra.mrb[142].mxu0 %v10917_v63 }
0x1be0   :  { %21607 = vmatpush3.bf16.msra.mxu0 %v26120_v9  ;;  %20313 = vmatprep.mubr.msk.f32.mxu0 %vm22355_vm1, %v25963_v10 }
0x1be1   :  { %20303 = vmatmul.mubr.f32.vlgmr.msra.gmra.mrb[142].mxu1 %v10919_v42  ;;  %21608 = vmatprep.subr.bf16.mxu0 %v25964_v11 }
0x1be2   :  { %21613 = vmatpush3.bf16.msra.mxu1 %v26121_v0  ;;  %20324 = vmatprep.mubr.msk.f32.mxu1 %vm22355_vm1, %v25963_v10 }
0x1be3   :  { %21614 = vmatprep.subr.bf16.mxu1 %v25964_v11 }
0x1be4   :  { %21610 = vmatpush3.bf16.msra.mxu0 %v26122_v13 }
0x1be5   :  { %21617 = vmatprep.subr.bf16.mxu0 %v25964_v11 }
0x1be6   :  { %21616 = vmatpush3.bf16.msra.mxu1 %v26123_v33 }
0x1be7   :  { %21623 = vmatprep.subr.bf16.mxu1 %v25964_v11 }
0x1c82   :  { %v10986_v25 = vpop.f32.mrb[136].mxu0 }
0x1c83   :  { %v11480_v15 = vmul.f32 %v24491_v32, %v10986_v25  ;;  %v20227_v14 = vpop.f32.mrb[137].mxu0 }
0x1c84   :  { %v11056_v5 = vpop.f32.mrb[136].mxu1 }
0x1c85   :  { %v11481_v12 = vmul.f32 %v24491_v32, %v11056_v5  ;;  %v20238_v44 = vpop.f32.mrb[137].mxu1  ;;  %20314 = vmatmul.mubr.msk.f32.vlgmr.msra.gmra.mrb[144].mxu0 %vm57_vm0, %v11480_v15 }
0x1c86   :  { %21619 = vmatpush3.bf16.msra.mxu0 %v26124_v55  ;;  %20335 = vmatprep.mubr.msk.f32.mxu0 %vm22355_vm1, %v25963_v10  ;;  %v26129_v44 = vld [vmem:[#allocation43_spill] sm:$0xff] }
0x1c87   :  { %20325 = vmatmul.mubr.msk.f32.vlgmr.msra.gmra.mrb[144].mxu1 %vm57_vm0, %v11481_v12  ;;  %21620 = vmatprep.subr.bf16.mxu0 %v25964_v11  ;;  %v26128_v12 = vld [vmem:[#allocation42_spill] sm:$0xff] }
0x1c88   :  { %21625 = vmatpush3.bf16.msra.mxu1 %v26125_v16  ;;  %20346 = vmatprep.mubr.msk.f32.mxu1 %vm22355_vm1, %v25963_v10 }
0x1c89   :  { %21626 = vmatprep.subr.bf16.mxu1 %v25964_v11 }
0x1c8a   :  { %21622 = vmatpush3.bf16.msra.mxu0 %v26126_v37 }
0x1c8b   :  { %21629 = vmatprep.subr.bf16.mxu0 %v25964_v11 }
0x1c8c   :  { %21628 = vmatpush3.bf16.msra.mxu1 %v26127_v30  ;;  %v26132_v30 = vld [vmem:[#allocation54_spill] sm:$0xff] }
0x1c8d   :  { %21635 = vmatprep.subr.bf16.mxu1 %v25964_v11 }
0x1c92   :  { %v11126_v63 = vpop.f32.mrb[138].mxu0 }
0x1c93   :  { %v11482_v42 = vmul.f32 %v24491_v32, %v11126_v63  ;;  %v20249_v25 = vpop.f32.mrb[139].mxu0  ;;  %v26130_v63 = vld [vmem:[#allocation44_spill] sm:$0xff] }
0x1c94   :  { %v11196_v15 = vpop.f32.mrb[138].mxu1 }
0x1c95   :  { %v11483_v14 = vmul.f32 %v24491_v32, %v11196_v15  ;;  %v20260_v5 = vpop.f32.mrb[139].mxu1  ;;  %20336 = vmatmul.mubr.msk.f32.vlgmr.msra.gmra.mrb[146].mxu0 %vm57_vm0, %v11482_v42  ;;  %v26131_v42 = vld [vmem:[#allocation45_spill] sm:$0xff] }
0x1c96   :  { %21631 = vmatpush3.bf16.msra.mxu0 %v26128_v12  ;;  %20357 = vmatprep.mubr.msk.f32.mxu0 %vm22355_vm1, %v25963_v10 }
0x1c97   :  { %20347 = vmatmul.mubr.msk.f32.vlgmr.msra.gmra.mrb[146].mxu1 %vm57_vm0, %v11483_v14  ;;  %21632 = vmatprep.subr.bf16.mxu0 %v25964_v11 }
0x1c98   :  { %21637 = vmatpush3.bf16.msra.mxu1 %v26129_v44  ;;  %20368 = vmatprep.mubr.msk.f32.mxu1 %vm22355_vm1, %v25963_v10 }
0x1c99   :  { %21638 = vmatprep.subr.bf16.mxu1 %v25964_v11 }
0x1c9a   :  { %21634 = vmatpush3.bf16.msra.mxu0 %v26130_v63  ;;  %v26136_v63 = vld [vmem:[#allocation8_spill] sm:$0xff] }
0x1c9b   :  { %21641 = vmatprep.subr.bf16.mxu0 %v25964_v11 }
0x1c9c   :  { %21640 = vmatpush3.bf16.msra.mxu1 %v26131_v42  ;;  %v26133_v42 = vld [vmem:[#allocation55_spill] sm:$0xff] }
0x1c9d   :  { %21647 = vmatprep.subr.bf16.mxu1 %v25964_v11 }
0x1ca2   :  { %v11266_v25 = vpop.f32.mrb[140].mxu0 }
0x1ca3   :  { %v11484_v15 = vmul.f32 %v24491_v32, %v11266_v25  ;;  %v20271_v14 = vpop.f32.mrb[141].mxu0  ;;  %v26134_v25 = vld [vmem:[#allocation56_spill] sm:$0xff] }
0x1ca4   :  { %v11336_v5 = vpop.f32.mrb[140].mxu1 }
0x1ca5   :  { %v11485_v44 = vmul.f32 %v24491_v32, %v11336_v5  ;;  %v20282_v12 = vpop.f32.mrb[141].mxu1  ;;  %20358 = vmatmul.mubr.msk.f32.vlgmr.msra.gmra.mrb[148].mxu0 %vm57_vm0, %v11484_v15 }
0x1ca6   :  { %21643 = vmatpush3.bf16.msra.mxu0 %v26132_v30  ;;  %20379 = vmatprep.mubr.msk.f32.mxu0 %vm22355_vm1, %v25963_v10  ;;  %v26135_v12 = vld [vmem:[#allocation58_spill] sm:$0xff] }
0x1ca7   :  { %20369 = vmatmul.mubr.msk.f32.vlgmr.msra.gmra.mrb[148].mxu1 %vm57_vm0, %v11485_v44  ;;  %21644 = vmatprep.subr.bf16.mxu0 %v25964_v11 }
0x1ca8   :  { %21649 = vmatpush3.bf16.msra.mxu1 %v26133_v42  ;;  %20390 = vmatprep.mubr.msk.f32.mxu1 %vm22355_vm1, %v25963_v10 }
0x1ca9   :  { %21650 = vmatprep.subr.bf16.mxu1 %v25964_v11 }
0x1caa   :  { %21646 = vmatpush3.bf16.msra.mxu0 %v26134_v25 }
0x1cab   :  { %21653 = vmatprep.subr.bf16.mxu0 %v25964_v11 }
0x1cac   :  { %21652 = vmatpush3.bf16.msra.mxu1 %v26135_v12  ;;  %v26137_v12 = vld [vmem:[#allocation9_spill] sm:$0xff] }
0x1cad   :  { %21659 = vmatprep.subr.bf16.mxu1 %v25964_v11 }
0x1cb2   :  { %v11406_v15 = vpop.f32.mrb[142].mxu0 }
0x1cb3   :  { %v11486_v44 = vmul.f32 %v24491_v32, %v11406_v15  ;;  %v20293_v14 = vpop.f32.mrb[143].mxu0 }
0x1cb4   :  { %v11476_v5 = vpop.f32.mrb[142].mxu1 }
0x1cb5   :  { %v11487_v42 = vmul.f32 %v24491_v32, %v11476_v5  ;;  %v20304_v30 = vpop.f32.mrb[143].mxu1  ;;  %20380 = vmatmul.mubr.msk.f32.vlgmr.msra.gmra.mrb[150].mxu0 %vm57_vm0, %v11486_v44  ;;  %v26138_v32 = vld [vmem:[#allocation10_spill] sm:$0xff] }
0x1cb6   :  { %21655 = vmatpush3.bf16.msra.mxu0 %v26136_v63  ;;  %20401 = vmatprep.mubr.msk.f32.mxu0 %vm22355_vm1, %v25963_v10  ;;  %v26139_v30 = vld [vmem:[#allocation11_spill] sm:$0xff] }
0x1cb7   :  { %20391 = vmatmul.mubr.msk.f32.vlgmr.msra.gmra.mrb[150].mxu1 %vm57_vm0, %v11487_v42  ;;  %21656 = vmatprep.subr.bf16.mxu0 %v25964_v11 }
0x1cb8   :  { %21661 = vmatpush3.bf16.msra.mxu1 %v26137_v12  ;;  %20412 = vmatprep.mubr.msk.f32.mxu1 %vm22355_vm1, %v25963_v10 }
0x1cb9   :  { %21662 = vmatprep.subr.bf16.mxu1 %v25964_v11 }
0x1cba   :  { %21658 = vmatpush3.bf16.msra.mxu0 %v26138_v32 }
0x1cbb   :  { %21665 = vmatprep.subr.bf16.mxu0 %v25964_v11 }
0x1cbc   :  { %21664 = vmatpush3.bf16.msra.mxu1 %v26139_v30 }
0x1cbd   :  { %21671 = vmatprep.subr.bf16.mxu1 %v25964_v11 }
0x1d58   :  { %v11557_v15 = vpop.f32.mrb[144].mxu0 }
0x1d59   :  { %v12072_v44 = vrot.slane %v11557_v15, 4  ;;  %v20315_v42 = vpop.f32.mrb[145].mxu0 }
0x1d5a   :  { %v11630_v14 = vpop.f32.mrb[144].mxu1 }
0x1d5b   :  { %v12073_v5 = vadd.f32 %v12072_v44, %v11557_v15  ;;  %v12078_v63 = vrot.slane %v11630_v14, 4  ;;  %v20326_v12 = vpop.f32.mrb[145].mxu1 }
0x1d5d   :  { %v12074_v25 = vrot.slane %v12073_v5, 2  ;;  %v12079_v37 = vadd.f32 %v12078_v63, %v11630_v14 }
0x1d5f   :  { %v12075_v16 = vadd.f32 %v12074_v25, %v12073_v5  ;;  %v12080_v55 = vrot.slane %v12079_v37, 2 }
0x1d61   :  { %v12076_v33 = vrot.slane %v12075_v16, 1  ;;  %v12081_v13 = vadd.f32 %v12080_v55, %v12079_v37 }
0x1d63   :  { %v12077_v32 = vadd.f32 %v12076_v33, %v12075_v16  ;;  %v12082_v0 = vrot.slane %v12081_v13, 1 }
0x1d65   :  { %v12120_v9 = vmul.f32 0.17677669, %v12077_v32  ;;  %v12083_v27 = vadd.f32 %v12082_v0, %v12081_v13 }
0x1d67   :  { %22179 = vtanh.f32 %v12120_v9  ;;  %v12121_v30 = vmul.f32 0.17677669, %v12083_v27 }
0x1d68   :  { %v11703_v8 = vpop.f32.mrb[146].mxu0 }
0x1d69   :  { %22181 = vtanh.f32 %v12121_v30  ;;  %v12084_v24 = vrot.slane %v11703_v8, 4  ;;  %v20337_v42 = vpop.f32.mrb[147].mxu0 }
0x1d6a   :  { %v11776_v46 = vpop.f32.mrb[146].mxu1 }
0x1d6b   :  { %v12085_v15 = vadd.f32 %v12084_v24, %v11703_v8  ;;  %v12090_v44 = vrot.slane %v11776_v46, 4  ;;  %v20348_v12 = vpop.f32.mrb[147].mxu1 }
0x1d6d   :  { %v12086_v7 = vrot.slane %v12085_v15, 2  ;;  %v12091_v63 = vadd.f32 %v12090_v44, %v11776_v46 }
0x1d6f   :  { %v12087_v25 = vadd.f32 %v12086_v7, %v12085_v15  ;;  %v12092_v14 = vrot.slane %v12091_v63, 2 }
0x1d71   :  { %v22180_v5 = vpop.eup %22179  ;;  %v12088_v55 = vrot.slane %v12087_v25, 1  ;;  %v12093_v33 = vadd.f32 %v12092_v14, %v12091_v63 }
0x1d72   :  { %v12137_v9 = vmul.f32 10.0, %v22180_v5 }
0x1d73   :  { %v22182_v16 = vpop.eup %22181  ;;  %v12089_v37 = vadd.f32 %v12088_v55, %v12087_v25  ;;  %v12094_v0 = vrot.slane %v12093_v33, 1 }
0x1d74   :  { %v12138_v27 = vmul.f32 10.0, %v22182_v16 }
0x1d75   :  { %v12122_v13 = vmul.f32 0.17677669, %v12089_v37  ;;  %v12095_v32 = vadd.f32 %v12094_v0, %v12093_v33 }
0x1d76   :  { %v12153_v30 = vsel %vm3639_vm7, %v12138_v27, %v12137_v9 }
0x1d77   :  { %22183 = vtanh.f32 %v12122_v13  ;;  %v12123_v24 = vmul.f32 0.17677669, %v12095_v32 }
0x1d78   :  { %v11849_v8 = vpop.f32.mrb[148].mxu0 }
0x1d79   :  { %22185 = vtanh.f32 %v12123_v24  ;;  %v12096_v42 = vrot.slane %v11849_v8, 4  ;;  %v20359_v46 = vpop.f32.mrb[149].mxu0 }
0x1d7a   :  { %v11922_v7 = vpop.f32.mrb[148].mxu1 }
0x1d7b   :  { %v12097_v15 = vadd.f32 %v12096_v42, %v11849_v8  ;;  %v12102_v44 = vrot.slane %v11922_v7, 4  ;;  %v20370_v12 = vpop.f32.mrb[149].mxu1 }
0x1d7d   :  { %v12098_v63 = vrot.slane %v12097_v15, 2  ;;  %v12103_v14 = vadd.f32 %v12102_v44, %v11922_v7 }
0x1d7f   :  { %v12099_v25 = vadd.f32 %v12098_v63, %v12097_v15  ;;  %v12104_v55 = vrot.slane %v12103_v14, 2 }
0x1d81   :  { %v22184_v5 = vpop.eup %22183  ;;  %v12100_v16 = vrot.slane %v12099_v25, 1  ;;  %v12105_v37 = vadd.f32 %v12104_v55, %v12103_v14 }
0x1d82   :  { %v12139_v33 = vmul.f32 10.0, %v22184_v5 }
0x1d83   :  { %v22186_v0 = vpop.eup %22185  ;;  %v12101_v9 = vadd.f32 %v12100_v16, %v12099_v25  ;;  %v12106_v27 = vrot.slane %v12105_v37, 1 }
0x1d84   :  { %v12140_v13 = vmul.f32 10.0, %v22186_v0  ;;  %v12154_v32 = vsel %vm3641_vm8, %v12139_v33, %v12153_v30 }
0x1d85   :  { %v12124_v24 = vmul.f32 0.17677669, %v12101_v9  ;;  %v12107_v46 = vadd.f32 %v12106_v27, %v12105_v37 }
0x1d86   :  { %v12155_v8 = vsel %vm3643_vm9, %v12140_v13, %v12154_v32 }
0x1d87   :  { %22187 = vtanh.f32 %v12124_v24  ;;  %v12125_v42 = vmul.f32 0.17677669, %v12107_v46 }
0x1d88   :  { %v11995_v12 = vpop.f32.mrb[150].mxu0 }
0x1d89   :  { %22189 = vtanh.f32 %v12125_v42  ;;  %v12108_v7 = vrot.slane %v11995_v12, 4  ;;  %v20381_v15 = vpop.f32.mrb[151].mxu0 }
0x1d8a   :  { %v12068_v44 = vpop.f32.mrb[150].mxu1 }
0x1d8b   :  { %v12109_v63 = vadd.f32 %v12108_v7, %v11995_v12  ;;  %v12114_v14 = vrot.slane %v12068_v44, 4  ;;  %v20392_v55 = vpop.f32.mrb[151].mxu1 }
0x1d8d   :  { %v12110_v5 = vrot.slane %v12109_v63, 2  ;;  %v12115_v25 = vadd.f32 %v12114_v14, %v12068_v44 }
0x1d8f   :  { %v12111_v16 = vadd.f32 %v12110_v5, %v12109_v63  ;;  %v12116_v0 = vrot.slane %v12115_v25, 2 }
0x1d91   :  { %v22188_v31 = vpop.eup %22187  ;;  %v12112_v30 = vrot.slane %v12111_v16, 1  ;;  %v12117_v33 = vadd.f32 %v12116_v0, %v12115_v25 }
0x1d92   :  { %v12141_v37 = vmul.f32 10.0, %v22188_v31 }
0x1d93   :  { %v22190_v9 = vpop.eup %22189  ;;  %v12113_v27 = vadd.f32 %v12112_v30, %v12111_v16  ;;  %v12118_v13 = vrot.slane %v12117_v33, 1 }
0x1d94   :  { %v12142_v32 = vmul.f32 10.0, %v22190_v9  ;;  %v12156_v24 = vsel %vm3645_vm10, %v12141_v37, %v12155_v8 }
0x1d95   :  { %v12126_v46 = vmul.f32 0.17677669, %v12113_v27  ;;  %v12119_v42 = vadd.f32 %v12118_v13, %v12117_v33 }
0x1d96   :  { %v12157_v12 = vsel %vm3647_vm11, %v12142_v32, %v12156_v24 }
0x1d97   :  { %22191 = vtanh.f32 %v12126_v46  ;;  %v12127_v7 = vmul.f32 0.17677669, %v12119_v42 }
0x1d99   :  { %22193 = vtanh.f32 %v12127_v7 }
0x1da1   :  { %v22192_v15 = vpop.eup %22191 }
0x1da2   :  { %v12143_v44 = vmul.f32 10.0, %v22192_v15 }
0x1da3   :  { %v22194_v63 = vpop.eup %22193 }
0x1da4   :  { %v12144_v14 = vmul.f32 10.0, %v22194_v63  ;;  %v12158_v55 = vsel %vm3649_vm12, %v12143_v44, %v12157_v12  ;;  %v12267_v63 = vld [vmem:[%s25757_s0 + $0x8] sm:$0xff] }
0x1da6   :  { %v12159_v31 = vsel %vm3651_vm13, %v12144_v14, %v12158_v55  ;;  %v12266_v14 = vld [vmem:[%s25757_s0] sm:$0xff] }
0x1da7   :  { %v12161_v5 = vsel %vm12128_vm5, -1e+30, %v12159_v31  ;;  %vm26145_vm5 = vcmp.eq.s32.totalorder %v26105_v51, 0 }
0x1da8   :  { %12162 = vmax.xlane.f32.xlu1 %v12161_v5 }
0x1e35   :  { %v12163_v8 = vpop.xlane.xlu1 %12162 }
0x1e36   :  { %v12164_v25 = vsub.f32 %v12161_v5, %v12163_v8 }
0x1e38   :  { %v12165_v16 = vmul.f32 1.442695, %v12164_v25 }
0x1e3a   :  { %22195 = vpow2.f32 %v12165_v16  ;;  %v12268_v16 = vld [vmem:[%s25757_s0 + $0x10] sm:$0xff] }
0x1e44   :  { %v22196_v0 = vpop.eup %22195 }
0x1e45   :  { %12167 = vadd.xlane.f32.xlu0 %v22196_v0 }
0x1ed2   :  { %v12168_v30 = vpop.xlane.xlu0 %12167 }
0x1ed3   :  { %22197 = vrcp.f32 %v12168_v30 }
0x1edd   :  { %v22198_v33 = vpop.eup %22197 }
0x1ede   :  { %v12170_v37 = vmul.f32 %v22198_v33, %v22196_v0  ;;  %v12271_v0 = vld [vmem:[%s25757_s0 + $0x28] sm:$0xff] }
0x1ee0   :  { %12173 = vmax.xlane.f32.xlu1 %v12170_v37  ;;  %12172 = vst [vmem:[#allocation5 + $0x18] sm:$0xff] %v12170_v37 }
0x1f6d   :  { %v12174_v9 = vpop.xlane.xlu1 %12173 }
0x1f6e   :  { %22199 = vlog2.f32 %v12174_v9  ;;  %vm12175_vm14 = vcmp.ge.f32.partialorder %v12170_v37, %v12174_v9  ;;  %v12269_v9 = vld [vmem:[%s25757_s0 + $0x18] sm:$0xff] }
0x1f6f   :  { %v12176_v27 = vsel %vm12175_vm14, %v26140_v43, 128.0  ;;  %vm26147_vm14 = vcmask 130112  }
0x1f70   :  { %12177 = vmin.xlane.f32.xlu0 %v12176_v27  ;;  %v12272_v27 = vld [vmem:[%s25757_s0 + $0x30] sm:$0xff] }
0x1f78   :  { %v22200_v13 = vpop.eup %22199 }
0x1f79   :  { %v12184_v32 = vmul.f32 0.6931472, %v22200_v13 }
0x1f7b   :  { %v12185_v24 = vsel %vm26141_vm4, 0.0, %v12184_v32  ;;  %vm26148_vm4 = vmmov %vm26147_vm14 }
0x1f7c   :  { %18089 = vst.msk [vmem:[%s25769_s12 + $0x18] sm:$0xff] %vm26142_vm2, %v12185_v24  ;;  %vm26149_vm2 = vmmov %vm26148_vm4 }
0x1ffd   :  { %v12178_v46 = vpop.xlane.xlu0 %12177 }
0x1ffe   :  { %v21971_v42 = vtrunc.f32 %v12178_v46 }
0x2000   :  { %v24747_v12 = vcvt.f32.s32 %v21971_v42  ;;  %v12275_v42 = vld [vmem:[%s25757_s0 + $0x48] sm:$0xff] }
0x2002   :  { %vm12180_vm15 = vcmp.eq.s32.totalorder %v26105_v51, %v24747_v12  ;;  %18088 = vst.msk [vmem:[%s25768_s11 + $0x18] sm:$0xff] %vm26143_vm6, %v24747_v12 }
0x2003   :  { %v24757_v26 = vsel %vm12180_vm15, 1.0, %v25963_v10  ;;  %vm26150_vm15 = vcmask 195712  }
0x2004   :  { %v12224_v7 = vrot.slane %v24757_v26, %v22955_v20  ;;  %v12217_v13 = vcombine.high %v24757_v26, %v24757_v26  ;;  %vm26151_vm6 = vmmov %vm26150_vm15 }
0x2006   :  { %v12232_v15 = vcombine.high %v12224_v7, %v12224_v7  ;;  %v12240_v44 = vrot.slane %v12224_v7, %v22955_v20  ;;  %v12270_v7 = vld [vmem:[%s25757_s0 + $0x20] sm:$0xff] }
0x2008   :  { %v12301_v55 = vrot.slane %v12240_v44, %v22960_v19  ;;  %v12254_v31 = vrot.slane %v12232_v15, %v22955_v20  ;;  %v12262_v37 = vcombine.high %v12240_v44, %v12240_v44  ;;  %v12231_v15 = vrot.slane %v12217_v13, %v22955_v20 }
0x200a   :  { %v12339_v5 = vmul.f32 %v12301_v55, %v12267_v63  ;;  %v12338_v8 = vmul.f32 %v12301_v55, %v12266_v14  ;;  %v12305_v25 = vrot.slane %v12254_v31, %v22960_v19  ;;  %v12340_v30 = vmul.f32 %v12301_v55, %v12268_v16  ;;  %v12273_v14 = vld [vmem:[%s25757_s0 + $0x38] sm:$0xff] }
0x200b   :  { %v12341_v32 = vmul.f32 %v12301_v55, %v12269_v9  ;;  %v12309_v46 = vrot.slane %v12262_v37, %v22960_v19  ;;  %v12274_v55 = vld [vmem:[%s25757_s0 + $0x40] sm:$0xff]  ;;  %v12247_v16 = vrot.slane %v12231_v15, %v22955_v20 }
0x200c   :  { %12372 = vadd.xlane.f32.xlu0 %v12339_v5  ;;  %12370 = vadd.xlane.f32.xlu1 %v12338_v8  ;;  %v12343_v33 = vmul.f32 %v12305_v25, %v12271_v0  ;;  %v12344_v24 = vmul.f32 %v12305_v25, %v12272_v27  ;;  %v12342_v63 = vmul.f32 %v12305_v25, %v12270_v7  ;;  %v12277_v0 = vld [vmem:[%s25757_s0 + $0x58] sm:$0xff]  ;;  %v12282_v27 = vld [vmem:[%s25757_s0 + $0x80] sm:$0xff] }
0x200d   :  { %v12347_v44 = vmul.f32 %v12309_v46, %v12275_v42  ;;  %v12345_v5 = vmul.f32 %v12305_v25, %v12273_v14  ;;  %v12346_v8 = vmul.f32 %v12309_v46, %v12274_v55  ;;  %v12317_v9 = vrot.slane %v12247_v16, %v22960_v19  ;;  %v12283_v25 = vld [vmem:[%s25757_s0 + $0x88] sm:$0xff]  ;;  %v12284_v42 = vld [vmem:[%s25757_s0 + $0x90] sm:$0xff] }
0x200e   :  { %v12233_v7 = vcombine.high %v12231_v15, %v12231_v15  ;;  %v12279_v55 = vld [vmem:[%s25757_s0 + $0x68] sm:$0xff]  ;;  %v12280_v15 = vld [vmem:[%s25757_s0 + $0x70] sm:$0xff] }
0x200f   :  { %v12355_v13 = vmul.f32 %v12317_v9, %v12283_v25  ;;  %v12263_v25 = vcombine.high %v12247_v16, %v12247_v16  ;;  %v12290_v16 = vld [vmem:[%s25757_s0 + $0xc0] sm:$0xff] }
0x2010   :  { %12374 = vadd.xlane.f32.xlu1 %v12340_v30  ;;  %12380 = vadd.xlane.f32.xlu0 %v12343_v33  ;;  %v12276_v30 = vld [vmem:[%s25757_s0 + $0x50] sm:$0xff]  ;;  %v12349_v33 = vmul.f32 %v12309_v46, %v12277_v0  ;;  %v12261_v0 = vrot.slane %v12233_v7, %v22955_v20 }
0x2011   :  { %v12348_v37 = vmul.f32 %v12309_v46, %v12276_v30  ;;  %v12285_v46 = vld [vmem:[%s25757_s0 + $0x98] sm:$0xff] }
0x2012   :  { %v12281_v30 = vld [vmem:[%s25757_s0 + $0x78] sm:$0xff] }
0x2014   :  { %12376 = vadd.xlane.f32.xlu1 %v12341_v32  ;;  %12382 = vadd.xlane.f32.xlu0 %v12344_v24  ;;  %v12354_v32 = vmul.f32 %v12317_v9, %v12282_v27  ;;  %v12264_v24 = vcombine.high %v12254_v31, %v12254_v31  ;;  %v12278_v31 = vld [vmem:[%s25757_s0 + $0x60] sm:$0xff]  ;;  %v12287_v27 = vld [vmem:[%s25757_s0 + $0xa8] sm:$0xff] }
0x2016   :  { %v12313_v14 = vrot.slane %v12264_v24, %v22960_v19 }
0x2018   :  { %12388 = vadd.xlane.f32.xlu0 %v12347_v44  ;;  %12378 = vadd.xlane.f32.xlu1 %v12342_v63  ;;  %v12356_v44 = vmul.f32 %v12317_v9, %v12284_v42  ;;  %v12357_v63 = vmul.f32 %v12317_v9, %v12285_v46  ;;  %v12321_v9 = vrot.slane %v12261_v0, %v22960_v19  ;;  %v12288_v46 = vld [vmem:[%s25757_s0 + $0xb0] sm:$0xff] }
0x2019   :  { %v12325_v42 = vrot.slane %v12263_v25, %v22960_v19  ;;  %v12295_v25 = vld [vmem:[%s25757_s0 + $0xe8] sm:$0xff] }
0x201a   :  { %v12360_v7 = vmul.f32 %v12321_v9, %v12288_v46  ;;  %v24875_v46 = vld [vmem:[%s25759_s2] sm:$0xff] }
0x201b   :  { %26144 = vst [vmem:[#allocation14_spill] sm:$0xff] %v24875_v46 }
0x201c   :  { %12384 = vadd.xlane.f32.xlu0 %v12345_v5  ;;  %12386 = vadd.xlane.f32.xlu1 %v12346_v8  ;;  %v12351_v5 = vmul.f32 %v12313_v14, %v12279_v55  ;;  %v12350_v8 = vmul.f32 %v12313_v14, %v12278_v31 }
0x2020   :  { %12392 = vadd.xlane.f32.xlu0 %v12349_v33  ;;  %12390 = vadd.xlane.f32.xlu1 %v12348_v37  ;;  %v12352_v33 = vmul.f32 %v12313_v14, %v12280_v15  ;;  %v12353_v37 = vmul.f32 %v12313_v14, %v12281_v30  ;;  %v12289_v14 = vld [vmem:[%s25757_s0 + $0xb8] sm:$0xff] }
0x2021   :  { %v12361_v31 = vmul.f32 %v12321_v9, %v12289_v14  ;;  %v12293_v15 = vld [vmem:[%s25757_s0 + $0xd8] sm:$0xff] }
0x2024   :  { %12404 = vadd.xlane.f32.xlu1 %v12355_v13  ;;  %12402 = vadd.xlane.f32.xlu0 %v12354_v32  ;;  %v12286_v13 = vld [vmem:[%s25757_s0 + $0xa0] sm:$0xff]  ;;  %v12359_v32 = vmul.f32 %v12321_v9, %v12287_v27 }
0x2025   :  { %v12358_v24 = vmul.f32 %v12321_v9, %v12286_v13  ;;  %v12296_v13 = vld [vmem:[%s25757_s0 + $0xf0] sm:$0xff] }
0x2028   :  { %12406 = vadd.xlane.f32.xlu1 %v12356_v44  ;;  %12408 = vadd.xlane.f32.xlu0 %v12357_v63  ;;  %v12362_v44 = vmul.f32 %v12325_v42, %v12290_v16  ;;  %v12291_v63 = vld [vmem:[%s25757_s0 + $0xc8] sm:$0xff]  ;;  %v12190_v16 = vmul.f32 %v24875_v46, %v24757_v26 }
0x2029   :  { %v12363_v55 = vmul.f32 %v12325_v42, %v12291_v63 }
0x202c   :  { %12396 = vadd.xlane.f32.xlu1 %v12351_v5  ;;  %12394 = vadd.xlane.f32.xlu0 %v12350_v8  ;;  %v12265_v5 = vcombine.high %v12261_v0, %v12261_v0  ;;  %v12292_v8 = vld [vmem:[%s25757_s0 + $0xd0] sm:$0xff]  ;;  %v12294_v0 = vld [vmem:[%s25757_s0 + $0xe0] sm:$0xff] }
0x202d   :  { %v12364_v30 = vmul.f32 %v12325_v42, %v12292_v8 }
0x2030   :  { %12398 = vadd.xlane.f32.xlu1 %v12352_v33  ;;  %12400 = vadd.xlane.f32.xlu0 %v12353_v37  ;;  %v12365_v33 = vmul.f32 %v12325_v42, %v12293_v15  ;;  %v12329_v37 = vrot.slane %v12265_v5, %v22960_v19 }
0x2032   :  { %v12367_v9 = vmul.f32 %v12329_v37, %v12295_v25  ;;  %v12366_v27 = vmul.f32 %v12329_v37, %v12294_v0 }
0x2034   :  { %12412 = vadd.xlane.f32.xlu1 %v12359_v32  ;;  %12410 = vadd.xlane.f32.xlu0 %v12358_v24  ;;  %v12297_v32 = vld [vmem:[%s25757_s0 + $0xf8] sm:$0xff]  ;;  %v12368_v24 = vmul.f32 %v12329_v37, %v12296_v13 }
0x2035   :  { %v12369_v42 = vmul.f32 %v12329_v37, %v12297_v32 }
0x2038   :  { %12414 = vadd.xlane.f32.xlu1 %v12360_v7  ;;  %12418 = vadd.xlane.f32.xlu0 %v12362_v44  ;;  %v12196_v7 = vmax.f32 %v26103_v4, %v24757_v26 }
0x203a   :  { %v24885_v44 = vsel %vm26145_vm5, 0.0, %v12196_v7  ;;  %vm26152_vm5 = vmmov %vm26151_vm6 }
0x203b   :  { %26146 = vst [vmem:[#allocation15_spill] sm:$0xff] %v24885_v44 }
0x203c   :  { %12420 = vadd.xlane.f32.xlu1 %v12363_v55  ;;  %12416 = vadd.xlane.f32.xlu0 %v12361_v31 }
0x2040   :  { %12422 = vadd.xlane.f32.xlu1 %v12364_v30  ;;  %12424 = vadd.xlane.f32.xlu0 %v12365_v33 }
0x2044   :  { %12428 = vadd.xlane.f32.xlu1 %v12367_v9  ;;  %12426 = vadd.xlane.f32.xlu0 %v12366_v27 }
0x2048   :  { %12430 = vadd.xlane.f32.xlu1 %v12368_v24  ;;  %12432 = vadd.xlane.f32.xlu0 %v12369_v42 }
0x204c   :  { %12191 = vadd.xlane.f32.xlu0 %v12190_v16 }
0x2059   :  { %12531 = vrot.lane.b32.xlu1 %v24476_v53, %s22358_s21 }
0x207d   :  { %12209 = vadd.xlane.f32.xlu1 %v24885_v44 }
0x2099   :  { %v12373_v63 = vpop.xlane.xlu0 %12372  ;;  %v12371_v14 = vpop.xlane.xlu1 %12370 }
0x209a   :  { %v12644_v21 = vrot.slane %v12373_v63, %v23377_v39  ;;  %v12640_v29 = vrot.slane %v12371_v14, %v23373_v3 }
0x209d   :  { %v12375_v55 = vpop.xlane.xlu1 %12374  ;;  %v12381_v31 = vpop.xlane.xlu0 %12380 }
0x209e   :  { %v12663_v17 = vrot.slane %v12381_v31, %v23377_v39  ;;  %v12649_v59 = vrot.slane %v12375_v55, %v23380_v62 }
0x20a1   :  { %v12377_v5 = vpop.xlane.xlu1 %12376  ;;  %v12383_v8 = vpop.xlane.xlu0 %12382 }
0x20a2   :  { %v12668_v46 = vrot.slane %v12383_v8, %v23380_v62 }
0x20a5   :  { %v12389_v15 = vpop.xlane.xlu0 %12388  ;;  %v12379_v30 = vpop.xlane.xlu1 %12378 }
0x20a6   :  { %v12659_v7 = vrot.slane %v12379_v30, %v23373_v3  ;;  %v12682_v51 = vrot.slane %v12389_v15, %v23377_v39  ;;  %v12645_v15 = vsel %vm26149_vm2, %v12644_v21, %v12640_v29 }
0x20a8   :  { %v12664_v44 = vsel %vm26147_vm14, %v12663_v17, %v12659_v7  ;;  %v12654_v17 = vrot.slane %v12377_v5, %v23386_v28  ;;  %vm26153_vm14 = vcmask 261312  }
0x20a9   :  { %v12385_v33 = vpop.xlane.xlu0 %12384  ;;  %v12387_v37 = vpop.xlane.xlu1 %12386 }
0x20aa   :  { %v12678_v35 = vrot.slane %v12387_v37, %v23373_v3  ;;  %v12673_v30 = vrot.slane %v12385_v33, %v23386_v28  ;;  %v12669_v33 = vsel %vm26150_vm15, %v12668_v46, %v12664_v44  ;;  %vm26156_vm15 = vmmov %vm26152_vm5 }
0x20ac   :  { %v12683_v14 = vsel %vm26148_vm4, %v12682_v51, %v12678_v35  ;;  %vm26154_vm4 = vmmov %vm26149_vm2 }
0x20ad   :  { %v12393_v53 = vpop.xlane.xlu0 %12392  ;;  %v12391_v25 = vpop.xlane.xlu1 %12390  ;;  %vm26155_vm2 = vmmov %vm26153_vm14 }
0x20ae   :  { %v12687_v47 = vrot.slane %v12391_v25, %v23380_v62  ;;  %v12692_v25 = vrot.slane %v12393_v53, %v23386_v28 }
0x20b0   :  { %v12688_v8 = vsel %vm26151_vm6, %v12687_v47, %v12683_v14  ;;  %vm26157_vm6 = vmmov %vm26155_vm2 }
0x20b1   :  { %v12405_v0 = vpop.xlane.xlu1 %12404  ;;  %v12403_v4 = vpop.xlane.xlu0 %12402  ;;  %v12693_v21 = vsel %vm26155_vm2, %v12692_v25, %v12688_v8 }
0x20b2   :  { %v12720_v7 = vrot.slane %v12405_v0, %v23377_v39  ;;  %v12716_v51 = vrot.slane %v12403_v4, %v23373_v3 }
0x20b5   :  { %v12407_v26 = vpop.xlane.xlu1 %12406  ;;  %v24888_v9 = vpop.xlane.xlu0 %12408 }
0x20b6   :  { %v12725_v46 = vrot.slane %v12407_v26, %v23380_v62 }
0x20b9   :  { %v12397_v27 = vpop.xlane.xlu1 %12396  ;;  %v12395_v13 = vpop.xlane.xlu0 %12394 }
0x20ba   :  { %v12701_v31 = vrot.slane %v12397_v27, %v23377_v39  ;;  %v12697_v37 = vrot.slane %v12395_v13, %v23373_v3  ;;  %v12650_v27 = vsel %vm26152_vm5, %v12649_v59, %v12645_v15  ;;  %v12674_v13 = vsel %vm26153_vm14, %v12673_v30, %v12669_v33  ;;  %vm26158_vm5 = vmmov %vm26154_vm4 }
0x20bb   :  { %v12655_v44 = vsel %vm26157_vm6, %v12654_v17, %v12650_v27  ;;  %v12721_v26 = vsel %vm26158_vm5, %v12720_v7, %v12716_v51  ;;  %vm26159_vm14 = vmmov %vm26155_vm2 }
0x20bc   :  { %v12702_v35 = vsel %vm26154_vm4, %v12701_v31, %v12697_v37  ;;  %vm26160_vm4 = vmmov %vm26156_vm15 }
0x20bd   :  { %v12399_v32 = vpop.xlane.xlu1 %12398  ;;  %v12401_v24 = vpop.xlane.xlu0 %12400  ;;  %vm26161_vm2 = vmmov %vm26158_vm5 }
0x20be   :  { %v12706_v55 = vrot.slane %v12399_v32, %v23380_v62  ;;  %v12711_v53 = vrot.slane %v12401_v24, %v23386_v28  ;;  %v12789_v24 = vsel %vm3639_vm7, %v12674_v13, %v12655_v44  ;;  %vm26163_vm6 = vmmov %vm26160_vm4 }
0x20bf   :  { %v12790_v37 = vsel %vm3641_vm8, %v12693_v21, %v12789_v24  ;;  %vm26164_vm5 = vmmov %vm26160_vm4 }
0x20c0   :  { %v12707_v47 = vsel %vm26156_vm15, %v12706_v55, %v12702_v35  ;;  %v12730_v55 = vrot.slane %v24888_v9, %v23386_v28  ;;  %vm26162_vm15 = vmmov %vm26161_vm2 }
0x20c1   :  { %v12413_v42 = vpop.xlane.xlu1 %12412  ;;  %v12411_v16 = vpop.xlane.xlu0 %12410 }
0x20c2   :  { %v12739_v5 = vrot.slane %v12413_v42, %v23377_v39  ;;  %v12735_v0 = vrot.slane %v12411_v16, %v23373_v3  ;;  %v12726_v16 = vsel %vm26160_vm4, %v12725_v46, %v12721_v26  ;;  %vm26165_vm4 = vmmov %vm26159_vm14 }
0x20c3   :  { %v12731_v51 = vsel %vm26165_vm4, %v12730_v55, %v12726_v16 }
0x20c5   :  { %v12415_v43 = vpop.xlane.xlu1 %12414  ;;  %v12419_v22 = vpop.xlane.xlu0 %12418 }
0x20c6   :  { %v12744_v30 = vrot.slane %v12415_v43, %v23380_v62  ;;  %v12754_v31 = vrot.slane %v12419_v22, %v23373_v3  ;;  %v12740_v22 = vsel %vm26162_vm15, %v12739_v5, %v12735_v0 }
0x20c8   :  { %v12745_v27 = vsel %vm26164_vm5, %v12744_v30, %v12740_v22 }
0x20c9   :  { %v12421_v45 = vpop.xlane.xlu1 %12420  ;;  %v12417_v63 = vpop.xlane.xlu0 %12416 }
0x20ca   :  { %v12758_v59 = vrot.slane %v12421_v45, %v23377_v39  ;;  %v12712_v45 = vsel %vm26159_vm14, %v12711_v53, %v12707_v47  ;;  %v12749_v14 = vrot.slane %v12417_v63, %v23386_v28 }
0x20cb   :  { %v12791_v63 = vsel %vm3643_vm9, %v12712_v45, %v12790_v37  ;;  %v22324_v45 = vld [vmem:[%s25765_s8] ss:$0 sm:$0xff] }
0x20cc   :  { %v12759_v15 = vsel %vm26161_vm2, %v12758_v59, %v12754_v31  ;;  %v12750_v13 = vsel %vm26159_vm14, %v12749_v14, %v12745_v27  ;;  %vm26166_vm2 = vmmov %vm26165_vm4  ;;  %vm12193_vm14 = vcmp.eq.s32.totalorder %v24747_v12, 0  ;;  %v24992_v27 = vld [vmem:[%s25766_s9] sm:$0xff] }
0x20cd   :  { %v12423_v32 = vpop.xlane.xlu1 %12422  ;;  %v12425_v29 = vpop.xlane.xlu0 %12424 }
0x20ce   :  { %v12763_v4 = vrot.slane %v12423_v32, %v23380_v62  ;;  %v12768_v43 = vrot.slane %v12425_v29, %v23386_v28  ;;  %v12792_v29 = vsel %vm3645_vm10, %v12731_v51, %v12791_v63 }
0x20cf   :  { %v12793_v46 = vsel %vm3647_vm11, %v12750_v13, %v12792_v29 }
0x20d0   :  { %v12764_v17 = vsel %vm26163_vm6, %v12763_v4, %v12759_v15  ;;  %vm26167_vm6 = vmmov %vm26164_vm5 }
0x20d1   :  { %v12429_v25 = vpop.xlane.xlu1 %12428  ;;  %v12427_v42 = vpop.xlane.xlu0 %12426  ;;  %v12769_v35 = vsel %vm26166_vm2, %v12768_v43, %v12764_v17  ;;  %vm26168_vm5 = vmmov %vm26166_vm2 }
0x20d2   :  { %v12777_v33 = vrot.slane %v12429_v25, %v23377_v39  ;;  %v12773_v8 = vrot.slane %v12427_v42, %v23373_v3  ;;  %v12794_v59 = vsel %vm3649_vm12, %v12769_v35, %v12793_v46 }
0x20d4   :  { %v12778_v21 = vsel %vm26162_vm15, %v12777_v33, %v12773_v8 }
0x20d5   :  { %v12431_v7 = vpop.xlane.xlu1 %12430  ;;  %v12433_v9 = vpop.xlane.xlu0 %12432 }
0x20d6   :  { %v12782_v53 = vrot.slane %v12431_v7, %v23380_v62  ;;  %v12787_v32 = vrot.slane %v12433_v9, %v23386_v28 }
0x20d8   :  { %v12783_v47 = vsel %vm26167_vm6, %v12782_v53, %v12778_v21 }
0x20d9   :  { %v12788_v44 = vsel %vm26168_vm5, %v12787_v32, %v12783_v47  ;;  %v12532_v5 = vpop.permute.xlu1 %12531  ;;  %v12192_v0 = vpop.xlane.xlu0 %12191 }
0x20da   :  { %v12194_v4 = vsub.f32 %v24462_v18, %v12192_v0  ;;  %20402 = vmatmul.mubr.msk.f32.vlgmr.msra.gmra.mrb[152].mxu0 %vm57_vm0, %v12532_v5  ;;  %v12795_v24 = vsel %vm3651_vm13, %v12788_v44, %v12794_v59 }
0x20db   :  { %21667 = vmatpush3.bf16.msra.mxu0 %v25973_v52  ;;  %20413 = vmatmul.mubr.msk.f32.vlgmr.msra.gmra.mrb[152].mxu1 %vm57_vm0, %v12795_v24 }
0x20dc   :  { %v24961_v30 = vsel %vm12193_vm14, 1.0, %v12194_v4  ;;  %21673 = vmatpush3.bf16.msra.mxu1 %v25974_v34  ;;  %21668 = vmatprep.subr.bf16.mxu0 %v25964_v11 }
0x20dd   :  { %12200 = vperm.xlu0 %21987, %v24961_v30   ;;  %21674 = vmatprep.subr.bf16.mxu1 %v25964_v11 }
0x20de   :  { %20423 = vmatprep.mubr.msk.f32.mxu0 %vm22355_vm1, %v25963_v10  ;;  %20434 = vmatprep.mubr.msk.f32.mxu1 %vm22355_vm1, %v25963_v10 }
0x20df   :  { %21670 = vmatpush3.bf16.msra.mxu0 %v25975_v49 }
0x20e0   :  { %21676 = vmatpush3.bf16.msra.mxu1 %v25976_v1  ;;  %21677 = vmatprep.subr.bf16.mxu0 %v25964_v11 }
0x20e1   :  { %21683 = vmatprep.subr.bf16.mxu1 %v25964_v11 }
0x215c   :  { %v24975_v18 = vpop.permute.xlu0 %12200 }
0x215d   :  { %v12868_v14 = vmul.f32 %v22324_v45, %v24975_v18 }
0x21ad   :  { %v24977_v31 = vpop.f32.mrb[152].mxu0 }
0x21ae   :  { %v20403_v26 = vpop.f32.mrb[153].mxu0  ;;  %v12864_v37 = vpop.f32.mrb[152].mxu1 }
0x21af   :  { %v12865_v25 = vadd.f32 %v12864_v37, %v24977_v31  ;;  %v20414_v42 = vpop.f32.mrb[153].mxu1 }
0x21b0   :  { %v26170_v42 = vld [vmem:[#allocation14_spill] sm:$0xff] }
0x21b1   :  { %v12869_v16 = vadd.f32 %v12868_v14, %v12865_v25  ;;  %v26169_v25 = vld [vmem:[#allocation19_spill] sm:$0xff]  ;;  %vm12203_vm4 = vcmp.gt.f32.partialorder %v26170_v42, %v24975_v18  ;;  %v26172_v18 = vld [vmem:[#allocation60_spill] sm:$0xff] }
0x21b2   :  { %vm26173_vm5 = vcmp.eq.s32.totalorder %v26172_v18, 0 }
0x21b3   :  { %v12878_v55 = vrot.slane %v12869_v16, %v22955_v20  ;;  %v12871_v17 = vcombine.high %v12869_v16, %v12869_v16  ;;  %v18090_v16 = vsel %vm12203_vm4, 1.0, %v25963_v10 }
0x21b5   :  { %v12886_v15 = vcombine.high %v12878_v55, %v12878_v55  ;;  %v12894_v43 = vrot.slane %v12878_v55, %v22955_v20  ;;  %v12885_v7 = vrot.slane %v12871_v17, %v22955_v20  ;;  %v25070_v55 = vpop.xlane.xlu1 %12209 }
0x21b6   :  { %vm25906_vm2 = vcmp.ge.f32.partialorder %v25070_v55, 20.0 }
0x21b7   :  { %v12908_v22 = vrot.slane %v12886_v15, %v22955_v20  ;;  %v12923_v33 = vrot.slane %v12894_v43, %v22960_v19  ;;  %v12916_v63 = vcombine.high %v12894_v43, %v12894_v43  ;;  %v12887_v53 = vcombine.high %v12885_v7, %v12885_v7  ;;  %v26171_v15 = vld [vmem:[#allocation15_spill] sm:$0xff]  ;;  %vm12212_vm15 = vmxor %vm25906_vm2, %vm26104_vm3 }
0x21b8   :  { %v12901_v29 = vrot.slane %v12885_v7, %v22955_v20  ;;  %v12206_v43 = vadd.f32 %v18090_v16, %v26171_v15  ;;  %vm12213_vm6 = vmand %vm12193_vm14, %vm12212_vm15 }
0x21b9   :  { %v12927_v8 = vrot.slane %v12908_v22, %v22960_v19  ;;  %v12960_v13 = vmul.f32 %v24992_v27, %v12923_v33  ;;  %v12918_v9 = vcombine.high %v12908_v22, %v12908_v22  ;;  %v12931_v35 = vrot.slane %v12916_v63, %v22960_v19 }
0x21ba   :  { %v12915_v46 = vrot.slane %v12887_v53, %v22955_v20  ;;  %v12939_v59 = vrot.slane %v12901_v29, %v22960_v19  ;;  %v12917_v5 = vcombine.high %v12901_v29, %v12901_v29  ;;  %v12207_v22 = vmax.f32 %v12206_v43, 0.0 }
0x21bb   :  { %20424 = vmatmul.mubr.msk.f32.vlgmr.msra.gmra.mrb[154].mxu0 %vm57_vm0, %v12960_v13  ;;  %v12961_v51 = vmul.f32 %v24992_v27, %v12927_v8  ;;  %v12935_v32 = vrot.slane %v12918_v9, %v22960_v19  ;;  %v12962_v21 = vmul.f32 %v24992_v27, %v12931_v35  ;;  %v12214_v33 = vsel %vm12213_vm6, 1.0, %v25963_v10 }
0x21bc   :  { %21679 = vmatpush3.bf16.msra.mxu0 %v22871_v54  ;;  %20445 = vmatprep.mubr.msk.f32.mxu0 %vm22355_vm1, %v25963_v10  ;;  %v12943_v44 = vrot.slane %v12915_v46, %v22960_v19  ;;  %v12964_v0 = vmul.f32 %v24992_v27, %v12939_v59  ;;  %v12919_v4 = vcombine.high %v12915_v46, %v12915_v46  ;;  %v12208_v17 = vmin.f32 %v12207_v22, 1.0 }
0x21bd   :  { %20435 = vmatmul.mubr.msk.f32.vlgmr.msra.gmra.mrb[154].mxu1 %vm57_vm0, %v12961_v51  ;;  %21680 = vmatprep.subr.bf16.mxu0 %v25964_v11  ;;  %v12963_v47 = vmul.f32 %v24992_v27, %v12935_v32  ;;  %v12947_v26 = vrot.slane %v12917_v5, %v22960_v19  ;;  %v26174_v51 = vmov 0  }
0x21be   :  { %21685 = vmatpush3.bf16.msra.mxu1 %v22873_v56  ;;  %20456 = vmatprep.mubr.msk.f32.mxu1 %vm22355_vm1, %v25963_v10  ;;  %v12965_v24 = vmul.f32 %v24992_v27, %v12943_v44  ;;  %v12951_v37 = vrot.slane %v12919_v4, %v22960_v19  ;;  %v25082_v8 = vsel %vm26173_vm5, %v12214_v33, %v12208_v17 }
0x21bf   :  { %21686 = vmatprep.subr.bf16.mxu1 %v25964_v11  ;;  %v12966_v45 = vmul.f32 %v24992_v27, %v12947_v26  ;;  %v13568_v63 = vrot.slane %v25082_v8, %v22955_v20  ;;  %v13561_v12 = vcombine.high %v25082_v8, %v25082_v8 }
0x21c0   :  { %21682 = vmatpush3.bf16.msra.mxu0 %v25977_v57  ;;  %v12967_v14 = vmul.f32 %v24992_v27, %v12951_v37 }
0x21c1   :  { %21689 = vmatprep.subr.bf16.mxu0 %v25964_v11  ;;  %v13576_v13 = vcombine.high %v13568_v63, %v13568_v63  ;;  %v13584_v7 = vrot.slane %v13568_v63, %v22955_v20  ;;  %v13575_v46 = vrot.slane %v13561_v12, %v22955_v20 }
0x21c2   :  { %21688 = vmatpush3.bf16.msra.mxu1 %v25978_v58 }
0x21c3   :  { %20446 = vmatmul.mubr.msk.f32.vlgmr.msra.gmra.mrb[156].mxu0 %vm57_vm0, %v12962_v21  ;;  %21695 = vmatprep.subr.bf16.mxu1 %v25964_v11  ;;  %v13598_v9 = vrot.slane %v13576_v13, %v22955_v20  ;;  %vm13618_vm4 = vcmp.ne.f32.partialorder %v13584_v7, 0.0  ;;  %v13606_v53 = vcombine.high %v13584_v7, %v13584_v7  ;;  %v13577_v4 = vcombine.high %v13575_v46, %v13575_v46 }
0x21c4   :  { %21691 = vmatpush3.bf16.msra.mxu0 %v25979_v36  ;;  %20467 = vmatprep.mubr.msk.f32.mxu0 %vm22355_vm1, %v25963_v10  ;;  %v13626_v35 = vsel %vm13618_vm4, 1, %v26174_v51 }
0x21c5   :  { %20457 = vmatmul.mubr.msk.f32.vlgmr.msra.gmra.mrb[156].mxu1 %vm57_vm0, %v12963_v47  ;;  %21692 = vmatprep.subr.bf16.mxu0 %v25964_v11  ;;  %vm13619_vm2 = vcmp.ne.f32.partialorder %v13598_v9, 0.0  ;;  %v13637_v29 = vrot.slane %v13626_v35, %v22960_v19  ;;  %v13608_v21 = vcombine.high %v13598_v9, %v13598_v9  ;;  %vm13620_vm14 = vcmp.ne.f32.partialorder %v13606_v53, 0.0 }
0x21c6   :  { %21697 = vmatpush3.bf16.msra.mxu1 %v25980_v41  ;;  %20478 = vmatprep.mubr.msk.f32.mxu1 %vm22355_vm1, %v25963_v10  ;;  %v13627_v32 = vsel %vm13619_vm2, 1, %v26174_v51  ;;  %v13605_v22 = vrot.slane %v13577_v4, %v22955_v20 }
0x21c7   :  { %21698 = vmatprep.subr.bf16.mxu1 %v25964_v11  ;;  %v13641_v59 = vrot.slane %v13627_v32, %v22960_v19  ;;  %vm13666_vm15 = vcmp.eq.s32.totalorder %v13637_v29, 1  ;;  %vm13621_vm6 = vcmp.ne.f32.partialorder %v13608_v21, 0.0 }
0x21c8   :  { %21694 = vmatpush3.bf16.msra.mxu0 %v25981_v40  ;;  %v13629_v16 = vsel %vm13621_vm6, 1, %v26174_v51 }
0x21c9   :  { %21701 = vmatprep.subr.bf16.mxu0 %v25964_v11  ;;  %vm13667_vm2 = vcmp.eq.s32.totalorder %v13641_v59, 1  ;;  %v13649_v33 = vrot.slane %v13629_v16, %v22960_v19 }
0x21ca   :  { %21700 = vmatpush3.bf16.msra.mxu1 %v26034_v60 }
0x21cb   :  { %20468 = vmatmul.mubr.msk.f32.vlgmr.msra.gmra.mrb[158].mxu0 %vm57_vm0, %v12964_v0  ;;  %21707 = vmatprep.subr.bf16.mxu1 %v25964_v11 }
0x21cc   :  { %21703 = vmatpush3.bf16.msra.mxu0 %v26035_v23  ;;  %20489 = vmatprep.mubr.msk.f32.mxu0 %vm22355_vm1, %v25963_v10 }
0x21cd   :  { %20479 = vmatmul.mubr.msk.f32.vlgmr.msra.gmra.mrb[158].mxu1 %vm57_vm0, %v12965_v24  ;;  %21704 = vmatprep.subr.bf16.mxu0 %v25964_v11 }
0x21ce   :  { %21709 = vmatpush3.bf16.msra.mxu1 %v26036_v61  ;;  %20500 = vmatprep.mubr.msk.f32.mxu1 %vm22355_vm1, %v25963_v10 }
0x21cf   :  { %21710 = vmatprep.subr.bf16.mxu1 %v25964_v11 }
0x21d0   :  { %21706 = vmatpush3.bf16.msra.mxu0 %v26037_v2 }
0x21d1   :  { %21713 = vmatprep.subr.bf16.mxu0 %v25964_v11 }
0x21d2   :  { %21712 = vmatpush3.bf16.msra.mxu1 %v26038_v50 }
0x21d3   :  { %20490 = vmatmul.mubr.msk.f32.vlgmr.msra.gmra.mrb[160].mxu0 %vm57_vm0, %v12966_v45  ;;  %21719 = vmatprep.subr.bf16.mxu1 %v25964_v11  ;;  %v13628_v45 = vsel %vm13620_vm14, 1, %v26174_v51  ;;  %vm13623_vm14 = vcmp.ne.f32.partialorder %v13605_v22, 0.0 }
0x21d4   :  { %20511 = vmatprep.mubr.msk.f32.mxu0 %vm22355_vm1, %v25963_v10  ;;  %v13645_v43 = vrot.slane %v13628_v45, %v22960_v19  ;;  %v13631_v21 = vsel %vm13623_vm14, 1, %v26174_v51 }
0x21d5   :  { %20501 = vmatmul.mubr.msk.f32.vlgmr.msra.gmra.mrb[160].mxu1 %vm57_vm0, %v12967_v14  ;;  %v13591_v14 = vrot.slane %v13575_v46, %v22955_v20 }
0x21d6   :  { %20522 = vmatprep.mubr.msk.f32.mxu1 %vm22355_vm1, %v25963_v10  ;;  %vm13668_vm4 = vcmp.eq.s32.totalorder %v13645_v43, 1 }
0x21d7   :  { %vm13622_vm5 = vcmp.ne.f32.partialorder %v13591_v14, 0.0  ;;  %v13607_v32 = vcombine.high %v13591_v14, %v13591_v14 }
0x21d8   :  { %v13630_v53 = vsel %vm13622_vm5, 1, %v26174_v51 }
0x21d9   :  { %21715 = vmatpush3.bf16.xpose.msra.mxu0 %v26039_v6  ;;  %v13653_v46 = vrot.slane %v13630_v53, %v22960_v19  ;;  %vm13624_vm6 = vcmp.ne.f32.partialorder %v13607_v32, 0.0 }
0x21da   :  { %21716 = vmatprep.subr.bf16.mxu0 %v25964_v11  ;;  %v13632_v14 = vsel %vm13624_vm6, 1, %v26174_v51  ;;  %vm14962_vm6 = vcmp.ne.f32.partialorder %v25082_v8, 0.0  ;;  %v26207_v8 = vld [vmem:[#allocation61_spill] sm:$0xff] }
0x21db   :  { %21721 = vmatpush3.bf16.xpose.msra.mxu1 %v26040_v38 }
0x21dc   :  { %21722 = vmatprep.subr.bf16.mxu1 %v25964_v11 }
0x21e1   :  { %21718 = vmatpush3.bf16.xpose.msra.mxu0 %v26041_v48 }
0x21e2   :  { %21725 = vmatprep.subr.bf16.mxu0 %v25964_v11 }
0x21e3   :  { %21724 = vmatpush3.bf16.xpose.msra.mxu1 %v26169_v25 }
0x21e4   :  { %21731 = vmatprep.subr.bf16.mxu1 %v25964_v11 }
0x228e   :  { %v13037_v47 = vpop.f32.mrb[154].mxu0 }
0x228f   :  { %v13552_v44 = vmul.f32 0.5, %v13037_v47  ;;  %v20425_v5 = vpop.f32.mrb[155].mxu0  ;;  %v13609_v47 = vcombine.high %v13605_v22, %v13605_v22  ;;  %v13661_v22 = vrot.slane %v13632_v14, %v22960_v19 }
0x2290   :  { %v13110_v0 = vpop.f32.mrb[154].mxu1 }
0x2291   :  { %v13553_v24 = vmul.f32 0.5, %v13110_v0  ;;  %v20436_v26 = vpop.f32.mrb[155].mxu1  ;;  %v25095_v37 = vsel %vm13666_vm15, -1e+30, %v13552_v44  ;;  %vm13669_vm15 = vcmp.eq.s32.totalorder %v13649_v33, 1  ;;  %v13657_v44 = vrot.slane %v13631_v21, %v22960_v19 }
0x2292   :  { %13682 = vmax.xlane.f32.xlu0 %v25095_v37  ;;  %vm13672_vm14 = vcmp.eq.s32.totalorder %v13661_v22, 1 }
0x2293   :  { %v13675_v42 = vsel %vm13667_vm2, -1e+30, %v13553_v24  ;;  %vm13670_vm2 = vcmp.eq.s32.totalorder %v13653_v46, 1  ;;  %vm13671_vm5 = vcmp.eq.s32.totalorder %v13657_v44, 1 }
0x2294   :  { %13684 = vmax.xlane.f32.xlu1 %v13675_v42 }
0x2296   :  { %v13183_v17 = vpop.f32.mrb[156].mxu0 }
0x2297   :  { %v13554_v63 = vmul.f32 0.5, %v13183_v17  ;;  %v20447_v13 = vpop.f32.mrb[157].mxu0 }
0x2298   :  { %v13256_v7 = vpop.f32.mrb[156].mxu1 }
0x2299   :  { %v13555_v9 = vmul.f32 0.5, %v13256_v7  ;;  %v20458_v12 = vpop.f32.mrb[157].mxu1  ;;  %v13676_v35 = vsel %vm13668_vm4, -1e+30, %v13554_v63  ;;  %vm13625_vm4 = vcmp.ne.f32.partialorder %v13609_v47, 0.0 }
0x229a   :  { %13686 = vmax.xlane.f32.xlu1 %v13676_v35  ;;  %v13633_v43 = vsel %vm13625_vm4, 1, %v26174_v51  ;;  %vm26208_vm4 = vcmp.ge.f32.partialorder %v25070_v55, 20.0 }
0x229b   :  { %v13677_v29 = vsel %vm13669_vm15, -1e+30, %v13555_v9  ;;  %v13665_v33 = vrot.slane %v13633_v43, %v22960_v19 }
0x229c   :  { %13688 = vmax.xlane.f32.xlu0 %v13677_v29 }
0x229d   :  { %vm13673_vm15 = vcmp.eq.s32.totalorder %v13665_v33, 1 }
0x229e   :  { %v13329_v59 = vpop.f32.mrb[158].mxu0 }
0x229f   :  { %v13556_v5 = vmul.f32 0.5, %v13329_v59  ;;  %v20469_v0 = vpop.f32.mrb[159].mxu0 }
0x22a0   :  { %v13402_v4 = vpop.f32.mrb[158].mxu1 }
0x22a1   :  { %v13557_v24 = vmul.f32 0.5, %v13402_v4  ;;  %v20480_v26 = vpop.f32.mrb[159].mxu1  ;;  %v13678_v45 = vsel %vm13670_vm2, -1e+30, %v13556_v5 }
0x22a2   :  { %13690 = vmax.xlane.f32.xlu1 %v13678_v45 }
0x22a3   :  { %v13679_v16 = vsel %vm13671_vm5, -1e+30, %v13557_v24  ;;  %vm26209_vm5 = vcmask 7168  }
0x22a4   :  { %13692 = vmax.xlane.f32.xlu0 %v13679_v16 }
0x22a6   :  { %v13475_v17 = vpop.f32.mrb[160].mxu0 }
0x22a7   :  { %v13558_v63 = vmul.f32 0.5, %v13475_v17  ;;  %v20491_v13 = vpop.f32.mrb[161].mxu0 }
0x22a8   :  { %v13548_v7 = vpop.f32.mrb[160].mxu1 }
0x22a9   :  { %v13559_v9 = vmul.f32 0.5, %v13548_v7  ;;  %v20502_v12 = vpop.f32.mrb[161].mxu1  ;;  %v13680_v53 = vsel %vm13672_vm14, -1e+30, %v13558_v63 }
0x22aa   :  { %13694 = vmax.xlane.f32.xlu1 %v13680_v53 }
0x22ab   :  { %v13681_v32 = vsel %vm13673_vm15, -1e+30, %v13559_v9  ;;  %vm26210_vm15 = vmmov %vm26209_vm5 }
0x22ac   :  { %13696 = vmax.xlane.f32.xlu0 %v13681_v32 }
0x231f   :  { %v13683_v21 = vpop.xlane.xlu0 %13682 }
0x2320   :  { %v13698_v46 = vsub.f32 %v25095_v37, %v13683_v21 }
0x2321   :  { %v13685_v47 = vpop.xlane.xlu1 %13684 }
0x2322   :  { %v13706_v59 = vmul.f32 1.442695, %v13698_v46  ;;  %v13699_v44 = vsub.f32 %v13675_v42, %v13685_v47 }
0x2324   :  { %22201 = vpow2.f32 %v13706_v59  ;;  %v13708_v5 = vmul.f32 1.442695, %v13699_v44 }
0x2326   :  { %22203 = vpow2.f32 %v13708_v5 }
0x2327   :  { %v13687_v0 = vpop.xlane.xlu1 %13686 }
0x2328   :  { %v13700_v4 = vsub.f32 %v13676_v35, %v13687_v0 }
0x2329   :  { %v13689_v24 = vpop.xlane.xlu0 %13688 }
0x232a   :  { %v13710_v26 = vmul.f32 1.442695, %v13700_v4  ;;  %v13701_v14 = vsub.f32 %v13677_v29, %v13689_v24 }
0x232c   :  { %22205 = vpow2.f32 %v13710_v26  ;;  %v13712_v43 = vmul.f32 1.442695, %v13701_v14 }
0x232e   :  { %v22202_v22 = vpop.eup %22201  ;;  %22207 = vpow2.f32 %v13712_v43 }
0x232f   :  { %v13691_v17 = vpop.xlane.xlu1 %13690  ;;  %13722 = vadd.xlane.f32.xlu1 %v22202_v22 }
0x2330   :  { %v22204_v33 = vpop.eup %22203  ;;  %v13702_v63 = vsub.f32 %v13678_v45, %v13691_v17  ;;  %v26175_v17 = vld [vmem:[#allocation26_spill] sm:$0xff] }
0x2331   :  { %v13693_v37 = vpop.xlane.xlu0 %13692  ;;  %13724 = vadd.xlane.f32.xlu0 %v22204_v33 }
0x2332   :  { %v13714_v13 = vmul.f32 1.442695, %v13702_v63  ;;  %v13703_v42 = vsub.f32 %v13679_v16, %v13693_v37  ;;  %v26176_v63 = vld [vmem:[#allocation27_spill] sm:$0xff]  ;;  %v26178_v37 = vld [vmem:[#allocation29_spill] sm:$0xff] }
0x2334   :  { %22209 = vpow2.f32 %v13714_v13  ;;  %v13716_v7 = vmul.f32 1.442695, %v13703_v42 }
0x2336   :  { %v22206_v9 = vpop.eup %22205  ;;  %22211 = vpow2.f32 %v13716_v7 }
0x2337   :  { %13726 = vadd.xlane.f32.xlu1 %v22206_v9  ;;  %v13695_v35 = vpop.xlane.xlu1 %13694 }
0x2338   :  { %v22208_v12 = vpop.eup %22207  ;;  %v13704_v29 = vsub.f32 %v13680_v53, %v13695_v35 }
0x2339   :  { %13728 = vadd.xlane.f32.xlu0 %v22208_v12  ;;  %v13697_v21 = vpop.xlane.xlu0 %13696 }
0x233a   :  { %v13718_v46 = vmul.f32 1.442695, %v13704_v29  ;;  %v13705_v47 = vsub.f32 %v13681_v32, %v13697_v21  ;;  %v26179_v21 = vld [vmem:[#allocation38_spill] sm:$0xff] }
0x233c   :  { %22213 = vpow2.f32 %v13718_v46  ;;  %v13720_v59 = vmul.f32 1.442695, %v13705_v47  ;;  %v26180_v46 = vld [vmem:[#allocation39_spill] sm:$0xff]  ;;  %v26182_v47 = vld [vmem:[#allocation41_spill] sm:$0xff] }
0x233e   :  { %v22210_v44 = vpop.eup %22209  ;;  %22215 = vpow2.f32 %v13720_v59 }
0x233f   :  { %13730 = vadd.xlane.f32.xlu1 %v22210_v44 }
0x2340   :  { %v22212_v45 = vpop.eup %22211 }
0x2341   :  { %13732 = vadd.xlane.f32.xlu0 %v22212_v45 }
0x2346   :  { %v25113_v16 = vpop.eup %22213 }
0x2347   :  { %13734 = vadd.xlane.f32.xlu1 %v25113_v16 }
0x2348   :  { %v25116_v5 = vpop.eup %22215 }
0x2349   :  { %13736 = vadd.xlane.f32.xlu0 %v25116_v5 }
0x23bc   :  { %v13723_v53 = vpop.xlane.xlu1 %13722 }
0x23bd   :  { %22217 = vrcp.f32 %v13723_v53 }
0x23be   :  { %v13725_v0 = vpop.xlane.xlu0 %13724 }
0x23bf   :  { %22219 = vrcp.f32 %v13725_v0 }
0x23c4   :  { %v13727_v4 = vpop.xlane.xlu1 %13726 }
0x23c5   :  { %22221 = vrcp.f32 %v13727_v4 }
0x23c6   :  { %v13729_v14 = vpop.xlane.xlu0 %13728 }
0x23c7   :  { %v22218_v32 = vpop.eup %22217  ;;  %22223 = vrcp.f32 %v13729_v14  ;;  %v26186_v14 = vld [vmem:[#allocation53_spill] sm:$0xff] }
0x23c8   :  { %v13739_v24 = vmul.f32 %v22218_v32, %v22202_v22  ;;  %v26177_v22 = vld [vmem:[#allocation28_spill] sm:$0xff] }
0x23c9   :  { %v22220_v26 = vpop.eup %22219 }
0x23ca   :  { %20512 = vmatmul.mubr.f32.vlgmr.msra.gmra.mrb[162].mxu0 %v13739_v24  ;;  %v13741_v43 = vmul.f32 %v22220_v26, %v22204_v33  ;;  %v26183_v24 = vld [vmem:[#allocation50_spill] sm:$0xff]  ;;  %v26184_v26 = vld [vmem:[#allocation51_spill] sm:$0xff] }
0x23cb   :  { %21727 = vmatpush3.bf16.xpose.msra.mxu0 %v26175_v17  ;;  %20533 = vmatprep.mubr.msk.f32.mxu0 %vm22355_vm1, %v25963_v10 }
0x23cc   :  { %20523 = vmatmul.mubr.f32.vlgmr.msra.gmra.mrb[162].mxu1 %v13741_v43  ;;  %21728 = vmatprep.subr.bf16.mxu0 %v25964_v11  ;;  %v13731_v42 = vpop.xlane.xlu1 %13730 }
0x23cd   :  { %21733 = vmatpush3.bf16.xpose.msra.mxu1 %v26176_v63  ;;  %20544 = vmatprep.mubr.msk.f32.mxu1 %vm22355_vm1, %v25963_v10  ;;  %22225 = vrcp.f32 %v13731_v42  ;;  %v26187_v42 = vld [vmem:[#allocation20_spill] sm:$0xff] }
0x23ce   :  { %21734 = vmatprep.subr.bf16.mxu1 %v25964_v11  ;;  %v13733_v35 = vpop.xlane.xlu0 %13732 }
0x23cf   :  { %v22222_v33 = vpop.eup %22221  ;;  %22227 = vrcp.f32 %v13733_v35  ;;  %v26189_v35 = vld [vmem:[#allocation22_spill] sm:$0xff] }
0x23d0   :  { %v13743_v7 = vmul.f32 %v22222_v33, %v22206_v9  ;;  %v26181_v9 = vld [vmem:[#allocation40_spill] sm:$0xff] }
0x23d1   :  { %v22224_v13 = vpop.eup %22223 }
0x23d2   :  { %v13745_v29 = vmul.f32 %v22224_v13, %v22208_v12 }
0x23d3   :  { %21730 = vmatpush3.bf16.xpose.msra.mxu0 %v26177_v22 }
0x23d4   :  { %21737 = vmatprep.subr.bf16.mxu0 %v25964_v11  ;;  %v13735_v53 = vpop.xlane.xlu1 %13734 }
0x23d5   :  { %21736 = vmatpush3.bf16.xpose.msra.mxu1 %v26178_v37  ;;  %22229 = vrcp.f32 %v13735_v53 }
0x23d6   :  { %21743 = vmatprep.subr.bf16.mxu1 %v25964_v11  ;;  %v13737_v32 = vpop.xlane.xlu0 %13736 }
0x23d7   :  { %v22226_v12 = vpop.eup %22225  ;;  %22231 = vrcp.f32 %v13737_v32  ;;  %v26191_v32 = vld [vmem:[#allocation30_spill] sm:$0xff] }
0x23d8   :  { %v13747_v0 = vmul.f32 %v22226_v12, %v22210_v44  ;;  %v26185_v44 = vld [vmem:[#allocation52_spill] sm:$0xff] }
0x23d9   :  { %v22228_v59 = vpop.eup %22227 }
0x23da   :  { %20534 = vmatmul.mubr.f32.vlgmr.msra.gmra.mrb[164].mxu0 %v13743_v7  ;;  %v13749_v4 = vmul.f32 %v22228_v59, %v22212_v45  ;;  %v26188_v7 = vld [vmem:[#allocation21_spill] sm:$0xff] }
0x23db   :  { %21739 = vmatpush3.bf16.xpose.msra.mxu0 %v26179_v21  ;;  %20555 = vmatprep.mubr.msk.f32.mxu0 %vm22355_vm1, %v25963_v10 }
0x23dc   :  { %20545 = vmatmul.mubr.f32.vlgmr.msra.gmra.mrb[164].mxu1 %v13745_v29  ;;  %21740 = vmatprep.subr.bf16.mxu0 %v25964_v11 }
0x23dd   :  { %21745 = vmatpush3.bf16.xpose.msra.mxu1 %v26180_v46  ;;  %20566 = vmatprep.mubr.msk.f32.mxu1 %vm22355_vm1, %v25963_v10 }
0x23de   :  { %21746 = vmatprep.subr.bf16.mxu1 %v25964_v11 }
0x23df   :  { %v22230_v45 = vpop.eup %22229 }
0x23e0   :  { %v13751_v33 = vmul.f32 %v22230_v45, %v25113_v16  ;;  %v26190_v16 = vld [vmem:[#allocation23_spill] sm:$0xff]  ;;  %v26193_v45 = vld [vmem:[#allocation32_spill] sm:$0xff] }
0x23e1   :  { %v22232_v43 = vpop.eup %22231 }
0x23e2   :  { %v13753_v13 = vmul.f32 %v22232_v43, %v25116_v5  ;;  %v26194_v43 = vld [vmem:[#allocation33_spill] sm:$0xff] }
0x23e3   :  { %21742 = vmatpush3.bf16.xpose.msra.mxu0 %v26181_v9 }
0x23e4   :  { %21749 = vmatprep.subr.bf16.mxu0 %v25964_v11 }
0x23e5   :  { %21748 = vmatpush3.bf16.xpose.msra.mxu1 %v26182_v47 }
0x23e6   :  { %21755 = vmatprep.subr.bf16.mxu1 %v25964_v11 }
0x23ea   :  { %20556 = vmatmul.mubr.f32.vlgmr.msra.gmra.mrb[166].mxu0 %v13747_v0 }
0x23eb   :  { %21751 = vmatpush3.bf16.xpose.msra.mxu0 %v26183_v24  ;;  %20577 = vmatprep.mubr.msk.f32.mxu0 %vm22355_vm1, %v25963_v10 }
0x23ec   :  { %20567 = vmatmul.mubr.f32.vlgmr.msra.gmra.mrb[166].mxu1 %v13749_v4  ;;  %21752 = vmatprep.subr.bf16.mxu0 %v25964_v11  ;;  %v26192_v4 = vld [vmem:[#allocation31_spill] sm:$0xff] }
0x23ed   :  { %21757 = vmatpush3.bf16.xpose.msra.mxu1 %v26184_v26  ;;  %20588 = vmatprep.mubr.msk.f32.mxu1 %vm22355_vm1, %v25963_v10 }
0x23ee   :  { %21758 = vmatprep.subr.bf16.mxu1 %v25964_v11 }
0x23f3   :  { %21754 = vmatpush3.bf16.xpose.msra.mxu0 %v26185_v44 }
0x23f4   :  { %21761 = vmatprep.subr.bf16.mxu0 %v25964_v11 }
0x23f5   :  { %21760 = vmatpush3.bf16.xpose.msra.mxu1 %v26186_v14 }
0x23f6   :  { %21767 = vmatprep.subr.bf16.mxu1 %v25964_v11 }
0x23fa   :  { %20578 = vmatmul.mubr.f32.vlgmr.msra.gmra.mrb[168].mxu0 %v13751_v33 }
0x23fb   :  { %21763 = vmatpush3.bf16.msra.mxu0 %v26187_v42  ;;  %20599 = vmatprep.mubr.msk.f32.mxu0 %vm22355_vm1, %v25963_v10 }
0x23fc   :  { %20589 = vmatmul.mubr.f32.vlgmr.msra.gmra.mrb[168].mxu1 %v13753_v13  ;;  %21764 = vmatprep.subr.bf16.mxu0 %v25964_v11 }
0x23fd   :  { %21769 = vmatpush3.bf16.msra.mxu1 %v26188_v7  ;;  %20610 = vmatprep.mubr.msk.f32.mxu1 %vm22355_vm1, %v25963_v10 }
0x23fe   :  { %21770 = vmatprep.subr.bf16.mxu1 %v25964_v11 }
0x23ff   :  { %21766 = vmatpush3.bf16.msra.mxu0 %v26189_v35 }
0x2400   :  { %21773 = vmatprep.subr.bf16.mxu0 %v25964_v11 }
0x2401   :  { %21772 = vmatpush3.bf16.msra.mxu1 %v26190_v16 }
0x2402   :  { %21779 = vmatprep.subr.bf16.mxu1 %v25964_v11 }
0x249d   :  { %v13820_v5 = vpop.f32.mrb[162].mxu0 }
0x249e   :  { %v14314_v29 = vmul.f32 %v24992_v27, %v13820_v5  ;;  %v20513_v12 = vpop.f32.mrb[163].mxu0 }
0x249f   :  { %v13890_v59 = vpop.f32.mrb[162].mxu1 }
0x24a0   :  { %v14315_v53 = vmul.f32 %v24992_v27, %v13890_v59  ;;  %v20524_v0 = vpop.f32.mrb[163].mxu1  ;;  %20600 = vmatmul.mubr.msk.f32.vlgmr.msra.gmra.mrb[170].mxu0 %vm57_vm0, %v14314_v29 }
0x24a1   :  { %21775 = vmatpush3.bf16.msra.mxu0 %v26191_v32  ;;  %20621 = vmatprep.mubr.msk.f32.mxu0 %vm22355_vm1, %v25963_v10  ;;  %v26196_v0 = vld [vmem:[#allocation43_spill] sm:$0xff] }
0x24a2   :  { %20611 = vmatmul.mubr.msk.f32.vlgmr.msra.gmra.mrb[170].mxu1 %vm57_vm0, %v14315_v53  ;;  %21776 = vmatprep.subr.bf16.mxu0 %v25964_v11  ;;  %v26195_v53 = vld [vmem:[#allocation42_spill] sm:$0xff] }
0x24a3   :  { %21781 = vmatpush3.bf16.msra.mxu1 %v26192_v4  ;;  %20632 = vmatprep.mubr.msk.f32.mxu1 %vm22355_vm1, %v25963_v10 }
0x24a4   :  { %21782 = vmatprep.subr.bf16.mxu1 %v25964_v11 }
0x24a5   :  { %21778 = vmatpush3.bf16.msra.mxu0 %v26193_v45 }
0x24a6   :  { %21785 = vmatprep.subr.bf16.mxu0 %v25964_v11 }
0x24a7   :  { %21784 = vmatpush3.bf16.msra.mxu1 %v26194_v43  ;;  %v26199_v43 = vld [vmem:[#allocation54_spill] sm:$0xff] }
0x24a8   :  { %21791 = vmatprep.subr.bf16.mxu1 %v25964_v11 }
0x24ad   :  { %v13960_v33 = vpop.f32.mrb[164].mxu0 }
0x24ae   :  { %v14316_v13 = vmul.f32 %v24992_v27, %v13960_v33  ;;  %v20535_v5 = vpop.f32.mrb[165].mxu0  ;;  %v26197_v33 = vld [vmem:[#allocation44_spill] sm:$0xff] }
0x24af   :  { %v14030_v29 = vpop.f32.mrb[164].mxu1 }
0x24b0   :  { %v14317_v12 = vmul.f32 %v24992_v27, %v14030_v29  ;;  %v20546_v59 = vpop.f32.mrb[165].mxu1  ;;  %20622 = vmatmul.mubr.msk.f32.vlgmr.msra.gmra.mrb[172].mxu0 %vm57_vm0, %v14316_v13  ;;  %v26198_v13 = vld [vmem:[#allocation45_spill] sm:$0xff] }
0x24b1   :  { %21787 = vmatpush3.bf16.msra.mxu0 %v26195_v53  ;;  %20643 = vmatprep.mubr.msk.f32.mxu0 %vm22355_vm1, %v25963_v10 }
0x24b2   :  { %20633 = vmatmul.mubr.msk.f32.vlgmr.msra.gmra.mrb[172].mxu1 %vm57_vm0, %v14317_v12  ;;  %21788 = vmatprep.subr.bf16.mxu0 %v25964_v11 }
0x24b3   :  { %21793 = vmatpush3.bf16.msra.mxu1 %v26196_v0  ;;  %20654 = vmatprep.mubr.msk.f32.mxu1 %vm22355_vm1, %v25963_v10 }
0x24b4   :  { %21794 = vmatprep.subr.bf16.mxu1 %v25964_v11 }
0x24b5   :  { %21790 = vmatpush3.bf16.msra.mxu0 %v26197_v33  ;;  %v26203_v33 = vld [vmem:[#allocation8_spill] sm:$0xff] }
0x24b6   :  { %21797 = vmatprep.subr.bf16.mxu0 %v25964_v11 }
0x24b7   :  { %21796 = vmatpush3.bf16.msra.mxu1 %v26198_v13  ;;  %v26200_v13 = vld [vmem:[#allocation55_spill] sm:$0xff] }
0x24b8   :  { %21803 = vmatprep.subr.bf16.mxu1 %v25964_v11 }
0x24bd   :  { %v14100_v5 = vpop.f32.mrb[166].mxu0 }
0x24be   :  { %v14318_v29 = vmul.f32 %v24992_v27, %v14100_v5  ;;  %v20557_v12 = vpop.f32.mrb[167].mxu0  ;;  %v26201_v5 = vld [vmem:[#allocation56_spill] sm:$0xff] }
0x24bf   :  { %v14170_v59 = vpop.f32.mrb[166].mxu1 }
0x24c0   :  { %v14319_v0 = vmul.f32 %v24992_v27, %v14170_v59  ;;  %v20568_v53 = vpop.f32.mrb[167].mxu1  ;;  %20644 = vmatmul.mubr.msk.f32.vlgmr.msra.gmra.mrb[174].mxu0 %vm57_vm0, %v14318_v29 }
0x24c1   :  { %21799 = vmatpush3.bf16.msra.mxu0 %v26199_v43  ;;  %20665 = vmatprep.mubr.msk.f32.mxu0 %vm22355_vm1, %v25963_v10  ;;  %v26202_v53 = vld [vmem:[#allocation58_spill] sm:$0xff] }
0x24c2   :  { %20655 = vmatmul.mubr.msk.f32.vlgmr.msra.gmra.mrb[174].mxu1 %vm57_vm0, %v14319_v0  ;;  %21800 = vmatprep.subr.bf16.mxu0 %v25964_v11 }
0x24c3   :  { %21805 = vmatpush3.bf16.msra.mxu1 %v26200_v13  ;;  %20676 = vmatprep.mubr.msk.f32.mxu1 %vm22355_vm1, %v25963_v10 }
0x24c4   :  { %21806 = vmatprep.subr.bf16.mxu1 %v25964_v11 }
0x24c5   :  { %21802 = vmatpush3.bf16.msra.mxu0 %v26201_v5 }
0x24c6   :  { %21809 = vmatprep.subr.bf16.mxu0 %v25964_v11 }
0x24c7   :  { %21808 = vmatpush3.bf16.msra.mxu1 %v26202_v53  ;;  %v26204_v53 = vld [vmem:[#allocation9_spill] sm:$0xff] }
0x24c8   :  { %21815 = vmatprep.subr.bf16.mxu1 %v25964_v11 }
0x24cd   :  { %v14240_v29 = vpop.f32.mrb[168].mxu0 }
0x24ce   :  { %v14320_v0 = vmul.f32 %v24992_v27, %v14240_v29  ;;  %v20579_v12 = vpop.f32.mrb[169].mxu0 }
0x24cf   :  { %v14310_v59 = vpop.f32.mrb[168].mxu1 }
0x24d0   :  { %v14321_v13 = vmul.f32 %v24992_v27, %v14310_v59  ;;  %v20590_v43 = vpop.f32.mrb[169].mxu1  ;;  %20666 = vmatmul.mubr.msk.f32.vlgmr.msra.gmra.mrb[176].mxu0 %vm57_vm0, %v14320_v0  ;;  %v26205_v27 = vld [vmem:[#allocation10_spill] sm:$0xff] }
0x24d1   :  { %21811 = vmatpush3.bf16.msra.mxu0 %v26203_v33  ;;  %20687 = vmatprep.mubr.msk.f32.mxu0 %vm22355_vm1, %v25963_v10  ;;  %v26206_v43 = vld [vmem:[#allocation11_spill] sm:$0xff] }
0x24d2   :  { %20677 = vmatmul.mubr.msk.f32.vlgmr.msra.gmra.mrb[176].mxu1 %vm57_vm0, %v14321_v13  ;;  %21812 = vmatprep.subr.bf16.mxu0 %v25964_v11 }
0x24d3   :  { %21817 = vmatpush3.bf16.msra.mxu1 %v26204_v53  ;;  %20698 = vmatprep.mubr.msk.f32.mxu1 %vm22355_vm1, %v25963_v10 }
0x24d4   :  { %21818 = vmatprep.subr.bf16.mxu1 %v25964_v11 }
0x24d5   :  { %21814 = vmatpush3.bf16.msra.mxu0 %v26205_v27 }
0x24d6   :  { %21821 = vmatprep.subr.bf16.mxu0 %v25964_v11 }
0x24d7   :  { %21820 = vmatpush3.bf16.msra.mxu1 %v26206_v43 }
0x24d8   :  { %21827 = vmatprep.subr.bf16.mxu1 %v25964_v11 }
0x2573   :  { %v14391_v33 = vpop.f32.mrb[170].mxu0 }
0x2574   :  { %v14906_v29 = vrot.slane %v14391_v33, 4  ;;  %v20601_v13 = vpop.f32.mrb[171].mxu0 }
0x2575   :  { %v14464_v0 = vpop.f32.mrb[170].mxu1 }
0x2576   :  { %v14907_v12 = vadd.f32 %v14906_v29, %v14391_v33  ;;  %v14912_v59 = vrot.slane %v14464_v0, 4  ;;  %v20612_v53 = vpop.f32.mrb[171].mxu1 }
0x2578   :  { %v14908_v5 = vrot.slane %v14907_v12, 2  ;;  %v14913_v45 = vadd.f32 %v14912_v59, %v14464_v0 }
0x257a   :  { %v14909_v4 = vadd.f32 %v14908_v5, %v14907_v12  ;;  %v14914_v32 = vrot.slane %v14913_v45, 2 }
0x257c   :  { %v14910_v16 = vrot.slane %v14909_v4, 1  ;;  %v14915_v35 = vadd.f32 %v14914_v32, %v14913_v45 }
0x257e   :  { %v14911_v27 = vadd.f32 %v14910_v16, %v14909_v4  ;;  %v14916_v7 = vrot.slane %v14915_v35, 1 }
0x2580   :  { %v14954_v42 = vmul.f32 0.17677669, %v14911_v27  ;;  %v14917_v14 = vadd.f32 %v14916_v7, %v14915_v35 }
0x2582   :  { %22233 = vtanh.f32 %v14954_v42  ;;  %v14955_v43 = vmul.f32 0.17677669, %v14917_v14 }
0x2583   :  { %v14537_v44 = vpop.f32.mrb[172].mxu0 }
0x2584   :  { %22235 = vtanh.f32 %v14955_v43  ;;  %v14918_v26 = vrot.slane %v14537_v44, 4  ;;  %v20623_v13 = vpop.f32.mrb[173].mxu0 }
0x2585   :  { %v14610_v24 = vpop.f32.mrb[172].mxu1 }
0x2586   :  { %v14919_v33 = vadd.f32 %v14918_v26, %v14537_v44  ;;  %v14924_v29 = vrot.slane %v14610_v24, 4  ;;  %v20634_v53 = vpop.f32.mrb[173].mxu1 }
0x2588   :  { %v14920_v47 = vrot.slane %v14919_v33, 2  ;;  %v14925_v0 = vadd.f32 %v14924_v29, %v14610_v24 }
0x258a   :  { %v14921_v5 = vadd.f32 %v14920_v47, %v14919_v33  ;;  %v14926_v12 = vrot.slane %v14925_v0, 2 }
0x258c   :  { %v22234_v59 = vpop.eup %22233  ;;  %v14922_v32 = vrot.slane %v14921_v5, 1  ;;  %v14927_v16 = vadd.f32 %v14926_v12, %v14925_v0 }
0x258d   :  { %v14971_v42 = vmul.f32 10.0, %v22234_v59 }
0x258e   :  { %v22236_v4 = vpop.eup %22235  ;;  %v14923_v45 = vadd.f32 %v14922_v32, %v14921_v5  ;;  %v14928_v7 = vrot.slane %v14927_v16, 1 }
0x258f   :  { %v14972_v14 = vmul.f32 10.0, %v22236_v4 }
0x2590   :  { %v14956_v35 = vmul.f32 0.17677669, %v14923_v45  ;;  %v14929_v27 = vadd.f32 %v14928_v7, %v14927_v16 }
0x2591   :  { %v14987_v43 = vsel %vm3639_vm7, %v14972_v14, %v14971_v42 }
0x2592   :  { %22237 = vtanh.f32 %v14956_v35  ;;  %v14957_v26 = vmul.f32 0.17677669, %v14929_v27 }
0x2593   :  { %v14683_v44 = vpop.f32.mrb[174].mxu0 }
0x2594   :  { %22239 = vtanh.f32 %v14957_v26  ;;  %v14930_v13 = vrot.slane %v14683_v44, 4  ;;  %v20645_v24 = vpop.f32.mrb[175].mxu0 }
0x2595   :  { %v14756_v47 = vpop.f32.mrb[174].mxu1 }
0x2596   :  { %v14931_v33 = vadd.f32 %v14930_v13, %v14683_v44  ;;  %v14936_v29 = vrot.slane %v14756_v47, 4  ;;  %v20656_v53 = vpop.f32.mrb[175].mxu1 }
0x2598   :  { %v14932_v0 = vrot.slane %v14931_v33, 2  ;;  %v14937_v12 = vadd.f32 %v14936_v29, %v14756_v47 }
0x259a   :  { %v14933_v5 = vadd.f32 %v14932_v0, %v14931_v33  ;;  %v14938_v32 = vrot.slane %v14937_v12, 2 }
0x259c   :  { %v22238_v59 = vpop.eup %22237  ;;  %v14934_v4 = vrot.slane %v14933_v5, 1  ;;  %v14939_v45 = vadd.f32 %v14938_v32, %v14937_v12 }
0x259d   :  { %v14973_v16 = vmul.f32 10.0, %v22238_v59 }
0x259e   :  { %v22240_v7 = vpop.eup %22239  ;;  %v14935_v42 = vadd.f32 %v14934_v4, %v14933_v5  ;;  %v14940_v14 = vrot.slane %v14939_v45, 1 }
0x259f   :  { %v14974_v35 = vmul.f32 10.0, %v22240_v7  ;;  %v14988_v27 = vsel %vm3641_vm8, %v14973_v16, %v14987_v43 }
0x25a0   :  { %v14958_v26 = vmul.f32 0.17677669, %v14935_v42  ;;  %v14941_v24 = vadd.f32 %v14940_v14, %v14939_v45 }
0x25a1   :  { %v14989_v44 = vsel %vm3643_vm9, %v14974_v35, %v14988_v27 }
0x25a2   :  { %22241 = vtanh.f32 %v14958_v26  ;;  %v14959_v13 = vmul.f32 0.17677669, %v14941_v24 }
0x25a3   :  { %v14829_v53 = vpop.f32.mrb[176].mxu0 }
0x25a4   :  { %22243 = vtanh.f32 %v14959_v13  ;;  %v14942_v47 = vrot.slane %v14829_v53, 4  ;;  %v20667_v33 = vpop.f32.mrb[177].mxu0 }
0x25a5   :  { %v14902_v29 = vpop.f32.mrb[176].mxu1 }
0x25a6   :  { %v14943_v0 = vadd.f32 %v14942_v47, %v14829_v53  ;;  %v14948_v12 = vrot.slane %v14902_v29, 4  ;;  %v20678_v32 = vpop.f32.mrb[177].mxu1 }
0x25a8   :  { %v14944_v59 = vrot.slane %v14943_v0, 2  ;;  %v14949_v5 = vadd.f32 %v14948_v12, %v14902_v29 }
0x25aa   :  { %v14945_v4 = vadd.f32 %v14944_v59, %v14943_v0  ;;  %v14950_v7 = vrot.slane %v14949_v5, 2 }
0x25ac   :  { %v22242_v9 = vpop.eup %22241  ;;  %v14946_v43 = vrot.slane %v14945_v4, 1  ;;  %v14951_v16 = vadd.f32 %v14950_v7, %v14949_v5 }
0x25ad   :  { %v14975_v45 = vmul.f32 10.0, %v22242_v9 }
0x25ae   :  { %v22244_v42 = vpop.eup %22243  ;;  %v14947_v14 = vadd.f32 %v14946_v43, %v14945_v4  ;;  %v14952_v35 = vrot.slane %v14951_v16, 1 }
0x25af   :  { %v14976_v27 = vmul.f32 10.0, %v22244_v42  ;;  %v14990_v26 = vsel %vm3645_vm10, %v14975_v45, %v14989_v44 }
0x25b0   :  { %v14960_v24 = vmul.f32 0.17677669, %v14947_v14  ;;  %v14953_v13 = vadd.f32 %v14952_v35, %v14951_v16 }
0x25b1   :  { %v14991_v53 = vsel %vm3647_vm11, %v14976_v27, %v14990_v26 }
0x25b2   :  { %22245 = vtanh.f32 %v14960_v24  ;;  %v14961_v47 = vmul.f32 0.17677669, %v14953_v13 }
0x25b4   :  { %22247 = vtanh.f32 %v14961_v47 }
0x25bc   :  { %v22246_v33 = vpop.eup %22245 }
0x25bd   :  { %v14977_v29 = vmul.f32 10.0, %v22246_v33 }
0x25be   :  { %v22248_v0 = vpop.eup %22247 }
0x25bf   :  { %v14978_v12 = vmul.f32 10.0, %v22248_v0  ;;  %v14992_v32 = vsel %vm3649_vm12, %v14977_v29, %v14991_v53  ;;  %v15101_v0 = vld [vmem:[%s25757_s0 + $0x8] sm:$0xff] }
0x25c1   :  { %v14993_v9 = vsel %vm3651_vm13, %v14978_v12, %v14992_v32  ;;  %v15100_v12 = vld [vmem:[%s25757_s0] sm:$0xff] }
0x25c2   :  { %v14995_v59 = vsel %vm14962_vm6, -1e+30, %v14993_v9  ;;  %vm26212_vm6 = vcmp.eq.s32.totalorder %v26172_v18, 0 }
0x25c3   :  { %14996 = vmax.xlane.f32.xlu1 %v14995_v59 }
0x2650   :  { %v14997_v44 = vpop.xlane.xlu1 %14996 }
0x2651   :  { %v14998_v5 = vsub.f32 %v14995_v59, %v14997_v44 }
0x2653   :  { %v14999_v4 = vmul.f32 1.442695, %v14998_v5 }
0x2655   :  { %22249 = vpow2.f32 %v14999_v4  ;;  %v15102_v4 = vld [vmem:[%s25757_s0 + $0x10] sm:$0xff] }
0x265f   :  { %v22250_v7 = vpop.eup %22249 }
0x2660   :  { %15001 = vadd.xlane.f32.xlu0 %v22250_v7 }
0x26ed   :  { %v15002_v43 = vpop.xlane.xlu0 %15001 }
0x26ee   :  { %22251 = vrcp.f32 %v15002_v43 }
0x26f8   :  { %v22252_v16 = vpop.eup %22251 }
0x26f9   :  { %v15004_v45 = vmul.f32 %v22252_v16, %v22250_v7  ;;  %v15105_v7 = vld [vmem:[%s25757_s0 + $0x28] sm:$0xff] }
0x26fb   :  { %15007 = vmax.xlane.f32.xlu1 %v15004_v45  ;;  %15006 = vst [vmem:[#allocation5 + $0x20] sm:$0xff] %v15004_v45 }
0x2788   :  { %v15008_v42 = vpop.xlane.xlu1 %15007 }
0x2789   :  { %vm15009_vm2 = vcmp.ge.f32.partialorder %v15004_v45, %v15008_v42  ;;  %22253 = vlog2.f32 %v15008_v42  ;;  %v15103_v42 = vld [vmem:[%s25757_s0 + $0x18] sm:$0xff] }
0x278a   :  { %v15010_v14 = vsel %vm15009_vm2, %v26207_v8, 128.0  ;;  %vm26214_vm2 = vcmask 130112  }
0x278b   :  { %15011 = vmin.xlane.f32.xlu0 %v15010_v14  ;;  %v15106_v14 = vld [vmem:[%s25757_s0 + $0x30] sm:$0xff] }
0x2793   :  { %v22254_v35 = vpop.eup %22253 }
0x2794   :  { %v15018_v27 = vmul.f32 0.6931472, %v22254_v35 }
0x2796   :  { %v15019_v26 = vsel %vm26208_vm4, 0.0, %v15018_v27  ;;  %vm26215_vm4 = vmmov %vm26214_vm2 }
0x2797   :  { %18111 = vst.msk [vmem:[%s25769_s12 + $0x20] sm:$0xff] %vm26209_vm5, %v15019_v26  ;;  %vm26216_vm5 = vmmov %vm26214_vm2 }
0x2818   :  { %v15012_v24 = vpop.xlane.xlu0 %15011 }
0x2819   :  { %v21973_v13 = vtrunc.f32 %v15012_v24 }
0x281b   :  { %v25248_v53 = vcvt.f32.s32 %v21973_v13  ;;  %v15109_v13 = vld [vmem:[%s25757_s0 + $0x48] sm:$0xff] }
0x281d   :  { %vm15014_vm14 = vcmp.eq.s32.totalorder %v26172_v18, %v25248_v53  ;;  %18110 = vst.msk [vmem:[%s25768_s11 + $0x20] sm:$0xff] %vm26210_vm15, %v25248_v53 }
0x281e   :  { %v25258_v55 = vsel %vm15014_vm14, 1.0, %v25963_v10  ;;  %vm26217_vm14 = vcmask 195712  }
0x281f   :  { %v15058_v47 = vrot.slane %v25258_v55, %v22955_v20  ;;  %v15051_v35 = vcombine.high %v25258_v55, %v25258_v55  ;;  %vm26218_vm15 = vmmov %vm26217_vm14 }
0x2821   :  { %v15066_v33 = vcombine.high %v15058_v47, %v15058_v47  ;;  %v15074_v29 = vrot.slane %v15058_v47, %v22955_v20  ;;  %v15104_v47 = vld [vmem:[%s25757_s0 + $0x20] sm:$0xff] }
0x2823   :  { %v15135_v32 = vrot.slane %v15074_v29, %v22960_v19  ;;  %v15088_v9 = vrot.slane %v15066_v33, %v22955_v20  ;;  %v15096_v45 = vcombine.high %v15074_v29, %v15074_v29  ;;  %v15065_v33 = vrot.slane %v15051_v35, %v22955_v20 }
0x2825   :  { %v15173_v59 = vmul.f32 %v15135_v32, %v15101_v0  ;;  %v15172_v44 = vmul.f32 %v15135_v32, %v15100_v12  ;;  %v15139_v5 = vrot.slane %v15088_v9, %v22960_v19  ;;  %v15174_v43 = vmul.f32 %v15135_v32, %v15102_v4  ;;  %v15107_v12 = vld [vmem:[%s25757_s0 + $0x38] sm:$0xff] }
0x2826   :  { %v15175_v27 = vmul.f32 %v15135_v32, %v15103_v42  ;;  %v15143_v24 = vrot.slane %v15096_v45, %v22960_v19  ;;  %v15108_v32 = vld [vmem:[%s25757_s0 + $0x40] sm:$0xff]  ;;  %v15081_v4 = vrot.slane %v15065_v33, %v22955_v20 }
0x2827   :  { %15206 = vadd.xlane.f32.xlu0 %v15173_v59  ;;  %15204 = vadd.xlane.f32.xlu1 %v15172_v44  ;;  %v15177_v16 = vmul.f32 %v15139_v5, %v15105_v7  ;;  %v15178_v26 = vmul.f32 %v15139_v5, %v15106_v14  ;;  %v15176_v0 = vmul.f32 %v15139_v5, %v15104_v47  ;;  %v15111_v7 = vld [vmem:[%s25757_s0 + $0x58] sm:$0xff]  ;;  %v15116_v14 = vld [vmem:[%s25757_s0 + $0x80] sm:$0xff] }
0x2828   :  { %v15181_v29 = vmul.f32 %v15143_v24, %v15109_v13  ;;  %v15179_v59 = vmul.f32 %v15139_v5, %v15107_v12  ;;  %v15180_v44 = vmul.f32 %v15143_v24, %v15108_v32  ;;  %v15151_v42 = vrot.slane %v15081_v4, %v22960_v19  ;;  %v15117_v5 = vld [vmem:[%s25757_s0 + $0x88] sm:$0xff]  ;;  %v15118_v13 = vld [vmem:[%s25757_s0 + $0x90] sm:$0xff] }
0x2829   :  { %v15067_v47 = vcombine.high %v15065_v33, %v15065_v33  ;;  %v15113_v32 = vld [vmem:[%s25757_s0 + $0x68] sm:$0xff]  ;;  %v15114_v33 = vld [vmem:[%s25757_s0 + $0x70] sm:$0xff] }
0x282a   :  { %v15189_v35 = vmul.f32 %v15151_v42, %v15117_v5  ;;  %v15097_v5 = vcombine.high %v15081_v4, %v15081_v4  ;;  %v15124_v4 = vld [vmem:[%s25757_s0 + $0xc0] sm:$0xff] }
0x282b   :  { %15208 = vadd.xlane.f32.xlu1 %v15174_v43  ;;  %15214 = vadd.xlane.f32.xlu0 %v15177_v16  ;;  %v15110_v43 = vld [vmem:[%s25757_s0 + $0x50] sm:$0xff]  ;;  %v15183_v16 = vmul.f32 %v15143_v24, %v15111_v7  ;;  %v15095_v7 = vrot.slane %v15067_v47, %v22955_v20 }
0x282c   :  { %v15182_v45 = vmul.f32 %v15143_v24, %v15110_v43  ;;  %v15119_v24 = vld [vmem:[%s25757_s0 + $0x98] sm:$0xff] }
0x282d   :  { %v15115_v43 = vld [vmem:[%s25757_s0 + $0x78] sm:$0xff] }
0x282f   :  { %15210 = vadd.xlane.f32.xlu1 %v15175_v27  ;;  %15216 = vadd.xlane.f32.xlu0 %v15178_v26  ;;  %v15188_v27 = vmul.f32 %v15151_v42, %v15116_v14  ;;  %v15098_v26 = vcombine.high %v15088_v9, %v15088_v9  ;;  %v15112_v9 = vld [vmem:[%s25757_s0 + $0x60] sm:$0xff]  ;;  %v15121_v14 = vld [vmem:[%s25757_s0 + $0xa8] sm:$0xff] }
0x2831   :  { %v15147_v12 = vrot.slane %v15098_v26, %v22960_v19 }
0x2833   :  { %15222 = vadd.xlane.f32.xlu0 %v15181_v29  ;;  %15212 = vadd.xlane.f32.xlu1 %v15176_v0  ;;  %v15190_v29 = vmul.f32 %v15151_v42, %v15118_v13  ;;  %v15191_v0 = vmul.f32 %v15151_v42, %v15119_v24  ;;  %v15155_v42 = vrot.slane %v15095_v7, %v22960_v19  ;;  %v15122_v24 = vld [vmem:[%s25757_s0 + $0xb0] sm:$0xff] }
0x2834   :  { %v15159_v13 = vrot.slane %v15097_v5, %v22960_v19  ;;  %v15129_v5 = vld [vmem:[%s25757_s0 + $0xe8] sm:$0xff] }
0x2835   :  { %v15194_v47 = vmul.f32 %v15155_v42, %v15122_v24  ;;  %v25376_v24 = vld [vmem:[%s25759_s2] sm:$0xff] }
0x2836   :  { %26211 = vst [vmem:[#allocation24_spill] sm:$0xff] %v25376_v24 }
0x2837   :  { %15218 = vadd.xlane.f32.xlu0 %v15179_v59  ;;  %15220 = vadd.xlane.f32.xlu1 %v15180_v44  ;;  %v15185_v59 = vmul.f32 %v15147_v12, %v15113_v32  ;;  %v15184_v44 = vmul.f32 %v15147_v12, %v15112_v9 }
0x283b   :  { %15226 = vadd.xlane.f32.xlu0 %v15183_v16  ;;  %15224 = vadd.xlane.f32.xlu1 %v15182_v45  ;;  %v15186_v16 = vmul.f32 %v15147_v12, %v15114_v33  ;;  %v15187_v45 = vmul.f32 %v15147_v12, %v15115_v43  ;;  %v15123_v12 = vld [vmem:[%s25757_s0 + $0xb8] sm:$0xff] }
0x283c   :  { %v15195_v9 = vmul.f32 %v15155_v42, %v15123_v12  ;;  %v15127_v33 = vld [vmem:[%s25757_s0 + $0xd8] sm:$0xff] }
0x283f   :  { %15238 = vadd.xlane.f32.xlu1 %v15189_v35  ;;  %15236 = vadd.xlane.f32.xlu0 %v15188_v27  ;;  %v15120_v35 = vld [vmem:[%s25757_s0 + $0xa0] sm:$0xff]  ;;  %v15193_v27 = vmul.f32 %v15155_v42, %v15121_v14 }
0x2840   :  { %v15192_v26 = vmul.f32 %v15155_v42, %v15120_v35  ;;  %v15130_v35 = vld [vmem:[%s25757_s0 + $0xf0] sm:$0xff] }
0x2843   :  { %15240 = vadd.xlane.f32.xlu1 %v15190_v29  ;;  %15242 = vadd.xlane.f32.xlu0 %v15191_v0  ;;  %v15196_v29 = vmul.f32 %v15159_v13, %v15124_v4  ;;  %v15125_v0 = vld [vmem:[%s25757_s0 + $0xc8] sm:$0xff]  ;;  %v15024_v4 = vmul.f32 %v25376_v24, %v25258_v55 }
0x2844   :  { %v15197_v32 = vmul.f32 %v15159_v13, %v15125_v0 }
0x2847   :  { %15230 = vadd.xlane.f32.xlu1 %v15185_v59  ;;  %15228 = vadd.xlane.f32.xlu0 %v15184_v44  ;;  %v15099_v59 = vcombine.high %v15095_v7, %v15095_v7  ;;  %v15126_v44 = vld [vmem:[%s25757_s0 + $0xd0] sm:$0xff]  ;;  %v15128_v7 = vld [vmem:[%s25757_s0 + $0xe0] sm:$0xff] }
0x2848   :  { %v15198_v43 = vmul.f32 %v15159_v13, %v15126_v44 }
0x284b   :  { %15232 = vadd.xlane.f32.xlu1 %v15186_v16  ;;  %15234 = vadd.xlane.f32.xlu0 %v15187_v45  ;;  %v15199_v16 = vmul.f32 %v15159_v13, %v15127_v33  ;;  %v15163_v45 = vrot.slane %v15099_v59, %v22960_v19 }
0x284d   :  { %v15201_v42 = vmul.f32 %v15163_v45, %v15129_v5  ;;  %v15200_v14 = vmul.f32 %v15163_v45, %v15128_v7 }
0x284f   :  { %15246 = vadd.xlane.f32.xlu1 %v15193_v27  ;;  %15244 = vadd.xlane.f32.xlu0 %v15192_v26  ;;  %v15131_v27 = vld [vmem:[%s25757_s0 + $0xf8] sm:$0xff]  ;;  %v15202_v26 = vmul.f32 %v15163_v45, %v15130_v35 }
0x2850   :  { %v15203_v13 = vmul.f32 %v15163_v45, %v15131_v27 }
0x2853   :  { %15248 = vadd.xlane.f32.xlu1 %v15194_v47  ;;  %15252 = vadd.xlane.f32.xlu0 %v15196_v29  ;;  %v15030_v47 = vmax.f32 %v26171_v15, %v25258_v55 }
0x2855   :  { %v25386_v29 = vsel %vm26212_vm6, 0.0, %v15030_v47  ;;  %vm26219_vm6 = vmmov %vm26217_vm14 }
0x2856   :  { %26213 = vst [vmem:[#allocation25_spill] sm:$0xff] %v25386_v29 }
0x2857   :  { %15254 = vadd.xlane.f32.xlu1 %v15197_v32  ;;  %15250 = vadd.xlane.f32.xlu0 %v15195_v9 }
0x285b   :  { %15256 = vadd.xlane.f32.xlu1 %v15198_v43  ;;  %15258 = vadd.xlane.f32.xlu0 %v15199_v16 }
0x285f   :  { %15262 = vadd.xlane.f32.xlu1 %v15201_v42  ;;  %15260 = vadd.xlane.f32.xlu0 %v15200_v14 }
0x2863   :  { %15264 = vadd.xlane.f32.xlu1 %v15202_v26  ;;  %15266 = vadd.xlane.f32.xlu0 %v15203_v13 }
0x2867   :  { %15025 = vadd.xlane.f32.xlu0 %v15024_v4 }
0x2874   :  { %15365 = vrot.lane.b32.xlu1 %v24977_v31, %s22358_s21 }
0x2898   :  { %15043 = vadd.xlane.f32.xlu1 %v25386_v29 }
0x28b4   :  { %v15207_v0 = vpop.xlane.xlu0 %15206  ;;  %v15205_v12 = vpop.xlane.xlu1 %15204 }
0x28b5   :  { %v15478_v22 = vrot.slane %v15207_v0, %v23377_v39  ;;  %v15474_v63 = vrot.slane %v15205_v12, %v23373_v3 }
0x28b8   :  { %v15209_v32 = vpop.xlane.xlu1 %15208  ;;  %v15215_v9 = vpop.xlane.xlu0 %15214 }
0x28b9   :  { %v15497_v21 = vrot.slane %v15215_v9, %v23377_v39  ;;  %v15483_v51 = vrot.slane %v15209_v32, %v23380_v62 }
0x28bc   :  { %v15211_v59 = vpop.xlane.xlu1 %15210  ;;  %v15217_v44 = vpop.xlane.xlu0 %15216 }
0x28bd   :  { %v15502_v24 = vrot.slane %v15217_v44, %v23380_v62 }
0x28c0   :  { %v15223_v33 = vpop.xlane.xlu0 %15222  ;;  %v15213_v43 = vpop.xlane.xlu1 %15212 }
0x28c1   :  { %v15493_v47 = vrot.slane %v15213_v43, %v23373_v3  ;;  %v15516_v18 = vrot.slane %v15223_v33, %v23377_v39  ;;  %v15479_v33 = vsel %vm26216_vm5, %v15478_v22, %v15474_v63 }
0x28c3   :  { %v15498_v29 = vsel %vm26214_vm2, %v15497_v21, %v15493_v47  ;;  %v15488_v21 = vrot.slane %v15211_v59, %v23386_v28  ;;  %vm26220_vm2 = vcmask 261312  }
0x28c4   :  { %v15219_v16 = vpop.xlane.xlu0 %15218  ;;  %v15221_v45 = vpop.xlane.xlu1 %15220  ;;  %vm26221_vm5 = vmmov %vm26220_vm2 }
0x28c5   :  { %v15512_v37 = vrot.slane %v15221_v45, %v23373_v3  ;;  %v15507_v43 = vrot.slane %v15219_v16, %v23386_v28  ;;  %v15503_v16 = vsel %vm26217_vm14, %v15502_v24, %v15498_v29  ;;  %vm26222_vm14 = vmmov %vm26219_vm6 }
0x28c7   :  { %v15517_v12 = vsel %vm26215_vm4, %v15516_v18, %v15512_v37 }
0x28c8   :  { %v15227_v31 = vpop.xlane.xlu0 %15226  ;;  %v15225_v5 = vpop.xlane.xlu1 %15224 }
0x28c9   :  { %v15521_v17 = vrot.slane %v15225_v5, %v23380_v62  ;;  %v15526_v5 = vrot.slane %v15227_v31, %v23386_v28 }
0x28cb   :  { %v15522_v44 = vsel %vm26218_vm15, %v15521_v17, %v15517_v12  ;;  %vm26223_vm15 = vmmov %vm26220_vm2 }
0x28cc   :  { %v15239_v7 = vpop.xlane.xlu1 %15238  ;;  %v15237_v15 = vpop.xlane.xlu0 %15236  ;;  %v15527_v22 = vsel %vm26221_vm5, %v15526_v5, %v15522_v44 }
0x28cd   :  { %v15554_v47 = vrot.slane %v15239_v7, %v23377_v39  ;;  %v15550_v18 = vrot.slane %v15237_v15, %v23373_v3 }
0x28d0   :  { %v15241_v55 = vpop.xlane.xlu1 %15240  ;;  %v25389_v42 = vpop.xlane.xlu0 %15242 }
0x28d1   :  { %v15559_v24 = vrot.slane %v15241_v55, %v23380_v62 }
0x28d4   :  { %v15231_v14 = vpop.xlane.xlu1 %15230  ;;  %v15229_v35 = vpop.xlane.xlu0 %15228 }
0x28d5   :  { %v15535_v9 = vrot.slane %v15231_v14, %v23377_v39  ;;  %v15531_v45 = vrot.slane %v15229_v35, %v23373_v3  ;;  %v15484_v14 = vsel %vm26219_vm6, %v15483_v51, %v15479_v33  ;;  %v15508_v35 = vsel %vm26220_vm2, %v15507_v43, %v15503_v16  ;;  %vm26224_vm6 = vmmov %vm26215_vm4 }
0x28d6   :  { %v15489_v29 = vsel %vm26223_vm15, %v15488_v21, %v15484_v14  ;;  %v15555_v55 = vsel %vm26224_vm6, %v15554_v47, %v15550_v18  ;;  %vm26226_vm5 = vmmov %vm26224_vm6 }
0x28d7   :  { %v15536_v37 = vsel %vm26215_vm4, %v15535_v9, %v15531_v45  ;;  %vm26225_vm4 = vmmov %vm26222_vm14 }
0x28d8   :  { %v15233_v27 = vpop.xlane.xlu1 %15232  ;;  %v15235_v26 = vpop.xlane.xlu0 %15234  ;;  %vm26228_vm15 = vmmov %vm26225_vm4 }
0x28d9   :  { %v15540_v32 = vrot.slane %v15233_v27, %v23380_v62  ;;  %v15545_v31 = vrot.slane %v15235_v26, %v23386_v28  ;;  %v15623_v26 = vsel %vm3639_vm7, %v15508_v35, %v15489_v29  ;;  %vm26229_vm6 = vmmov %vm26225_vm4 }
0x28da   :  { %v15624_v45 = vsel %vm3641_vm8, %v15527_v22, %v15623_v26 }
0x28db   :  { %v15541_v17 = vsel %vm26222_vm14, %v15540_v32, %v15536_v37  ;;  %v15564_v32 = vrot.slane %v25389_v42, %v23386_v28  ;;  %vm26227_vm14 = vmmov %vm26226_vm5 }
0x28dc   :  { %v15247_v13 = vpop.xlane.xlu1 %15246  ;;  %v15245_v4 = vpop.xlane.xlu0 %15244 }
0x28dd   :  { %v15573_v59 = vrot.slane %v15247_v13, %v23377_v39  ;;  %v15569_v7 = vrot.slane %v15245_v4, %v23373_v3  ;;  %v15560_v4 = vsel %vm26225_vm4, %v15559_v24, %v15555_v55  ;;  %vm26230_vm4 = vmmov %vm26220_vm2 }
0x28de   :  { %v15565_v18 = vsel %vm26230_vm4, %v15564_v32, %v15560_v4  ;;  %v25487_v32 = vld [vmem:[%s25766_s9] sm:$0xff] }
0x28e0   :  { %v15249_v8 = vpop.xlane.xlu1 %15248  ;;  %v15253_v46 = vpop.xlane.xlu0 %15252 }
0x28e1   :  { %v15578_v43 = vrot.slane %v15249_v8, %v23380_v62  ;;  %v15588_v9 = vrot.slane %v15253_v46, %v23373_v3  ;;  %v15574_v46 = vsel %vm26227_vm14, %v15573_v59, %v15569_v7 }
0x28e3   :  { %v15579_v14 = vsel %vm26229_vm6, %v15578_v43, %v15574_v46 }
0x28e4   :  { %v15255_v25 = vpop.xlane.xlu1 %15254  ;;  %v15251_v0 = vpop.xlane.xlu0 %15250 }
0x28e5   :  { %v15592_v51 = vrot.slane %v15255_v25, %v23377_v39  ;;  %v15546_v25 = vsel %vm26220_vm2, %v15545_v31, %v15541_v17  ;;  %v15583_v12 = vrot.slane %v15251_v0, %v23386_v28 }
0x28e6   :  { %v15625_v0 = vsel %vm3643_vm9, %v15546_v25, %v15624_v45 }
0x28e7   :  { %v15593_v33 = vsel %vm26226_vm5, %v15592_v51, %v15588_v9  ;;  %v15584_v35 = vsel %vm26220_vm2, %v15583_v12, %v15579_v14  ;;  %vm26231_vm5 = vmmov %vm26220_vm2 }
0x28e8   :  { %v15257_v27 = vpop.xlane.xlu1 %15256  ;;  %v15259_v63 = vpop.xlane.xlu0 %15258 }
0x28e9   :  { %v15597_v15 = vrot.slane %v15257_v27, %v23380_v62  ;;  %v15602_v8 = vrot.slane %v15259_v63, %v23386_v28 }
0x28eb   :  { %v15598_v21 = vsel %vm26228_vm15, %v15597_v15, %v15593_v33  ;;  %vm26232_vm15 = vmmov %vm26229_vm6  ;;  %v22327_v15 = vld [vmem:[%s25765_s8] ss:$0 sm:$0xff] }
0x28ec   :  { %v15263_v5 = vpop.xlane.xlu1 %15262  ;;  %v15261_v13 = vpop.xlane.xlu0 %15260  ;;  %v15603_v37 = vsel %vm26231_vm5, %v15602_v8, %v15598_v21  ;;  %vm26233_vm6 = vmmov %vm26220_vm2  ;;  %vm15027_vm2 = vcmp.eq.s32.totalorder %v25248_v53, 0 }
0x28ed   :  { %v15611_v16 = vrot.slane %v15263_v5, %v23377_v39  ;;  %v15607_v44 = vrot.slane %v15261_v13, %v23373_v3  ;;  %v15626_v39 = vsel %vm3645_vm10, %v15565_v18, %v15625_v0 }
0x28ee   :  { %v15627_v63 = vsel %vm3647_vm11, %v15584_v35, %v15626_v39  ;;  %v26237_v39 = vld [vmem:[#allocation60_spill] sm:$0xff] }
0x28ef   :  { %v15612_v3 = vsel %vm26227_vm14, %v15611_v16, %v15607_v44  ;;  %v15628_v24 = vsel %vm3649_vm12, %v15603_v37, %v15627_v63  ;;  %v26236_v37 = vld [vmem:[#allocation25_spill] sm:$0xff] }
0x28f0   :  { %v15265_v47 = vpop.xlane.xlu1 %15264  ;;  %v15267_v42 = vpop.xlane.xlu0 %15266 }
0x28f1   :  { %v15616_v31 = vrot.slane %v15265_v47, %v23380_v62  ;;  %v15621_v27 = vrot.slane %v15267_v42, %v23386_v28 }
0x28f3   :  { %v15617_v22 = vsel %vm26232_vm15, %v15616_v31, %v15612_v3 }
0x28f4   :  { %v15622_v17 = vsel %vm26233_vm6, %v15621_v27, %v15617_v22  ;;  %v15366_v51 = vpop.permute.xlu1 %15365  ;;  %v15026_v29 = vpop.xlane.xlu0 %15025  ;;  %vm26238_vm6 = vcmp.eq.s32.totalorder %v26237_v39, 0 }
0x28f5   :  { %v15028_v59 = vsub.f32 %v24961_v30, %v15026_v29  ;;  %20688 = vmatmul.mubr.msk.f32.vlgmr.msra.gmra.mrb[178].mxu0 %vm57_vm0, %v15366_v51  ;;  %v15629_v62 = vsel %vm3651_vm13, %v15622_v17, %v15628_v24  ;;  %v26239_v51 = vmov 0  }
0x28f6   :  { %21823 = vmatpush3.bf16.msra.mxu0 %v25973_v52  ;;  %20699 = vmatmul.mubr.msk.f32.vlgmr.msra.gmra.mrb[178].mxu1 %vm57_vm0, %v15629_v62 }
0x28f7   :  { %v15029_v28 = vsel %vm15027_vm2, 1.0, %v15028_v59  ;;  %21829 = vmatpush3.bf16.msra.mxu1 %v25974_v34  ;;  %21824 = vmatprep.subr.bf16.mxu0 %v25964_v11 }
0x28f8   :  { %15034 = vperm.xlu0 %21987, %v15029_v28   ;;  %21830 = vmatprep.subr.bf16.mxu1 %v25964_v11 }
0x28f9   :  { %20709 = vmatprep.mubr.msk.f32.mxu0 %vm22355_vm1, %v25963_v10  ;;  %20720 = vmatprep.mubr.msk.f32.mxu1 %vm22355_vm1, %v25963_v10 }
0x28fa   :  { %21826 = vmatpush3.bf16.msra.mxu0 %v25975_v49 }
0x28fb   :  { %21832 = vmatpush3.bf16.msra.mxu1 %v25976_v1  ;;  %21833 = vmatprep.subr.bf16.mxu0 %v25964_v11 }
0x28fc   :  { %21839 = vmatprep.subr.bf16.mxu1 %v25964_v11 }
0x2977   :  { %v25473_v52 = vpop.permute.xlu0 %15034 }
0x2978   :  { %v15702_v26 = vmul.f32 %v22327_v15, %v25473_v52 }
0x29c8   :  { %v15435_v34 = vpop.f32.mrb[178].mxu0 }
0x29c9   :  { %v20689_v30 = vpop.f32.mrb[179].mxu0  ;;  %v15698_v7 = vpop.f32.mrb[178].mxu1 }
0x29ca   :  { %v15699_v43 = vadd.f32 %v15698_v7, %v15435_v34  ;;  %v20700_v9 = vpop.f32.mrb[179].mxu1 }
0x29cc   :  { %v15703_v49 = vadd.f32 %v15702_v26, %v15699_v43 }
0x29ce   :  { %v15712_v1 = vrot.slane %v15703_v49, %v22955_v20  ;;  %v15705_v12 = vcombine.high %v15703_v49, %v15703_v49 }
0x29d0   :  { %v15720_v55 = vcombine.high %v15712_v1, %v15712_v1  ;;  %v15728_v45 = vrot.slane %v15712_v1, %v22955_v20  ;;  %v15719_v8 = vrot.slane %v15705_v12, %v22955_v20 }
0x29d2   :  { %v15742_v25 = vrot.slane %v15720_v55, %v22955_v20  ;;  %v15757_v5 = vrot.slane %v15728_v45, %v22960_v19  ;;  %v15750_v4 = vcombine.high %v15728_v45, %v15728_v45  ;;  %v15721_v44 = vcombine.high %v15719_v8, %v15719_v8 }
0x29d4   :  { %v15761_v13 = vrot.slane %v15742_v25, %v22960_v19  ;;  %v15794_v33 = vmul.f32 %v25487_v32, %v15757_v5  ;;  %v15752_v46 = vcombine.high %v15742_v25, %v15742_v25  ;;  %v15765_v16 = vrot.slane %v15750_v4, %v22960_v19 }
0x29d6   :  { %20710 = vmatmul.mubr.msk.f32.vlgmr.msra.gmra.mrb[180].mxu0 %vm57_vm0, %v15794_v33  ;;  %v15795_v21 = vmul.f32 %v25487_v32, %v15761_v13  ;;  %v15769_v0 = vrot.slane %v15752_v46, %v22960_v19  ;;  %v15796_v14 = vmul.f32 %v25487_v32, %v15765_v16 }
0x29d7   :  { %21835 = vmatpush3.bf16.msra.mxu0 %v22871_v54  ;;  %20731 = vmatprep.mubr.msk.f32.mxu0 %vm22355_vm1, %v25963_v10  ;;  %v15735_v54 = vrot.slane %v15719_v8, %v22955_v20 }
0x29d8   :  { %20721 = vmatmul.mubr.msk.f32.vlgmr.msra.gmra.mrb[180].mxu1 %vm57_vm0, %v15795_v21  ;;  %21836 = vmatprep.subr.bf16.mxu0 %v25964_v11  ;;  %v15797_v35 = vmul.f32 %v25487_v32, %v15769_v0 }
0x29d9   :  { %21841 = vmatpush3.bf16.msra.mxu1 %v22873_v56  ;;  %20742 = vmatprep.mubr.msk.f32.mxu1 %vm22355_vm1, %v25963_v10  ;;  %v15749_v56 = vrot.slane %v15721_v44, %v22955_v20 }
0x29da   :  { %21842 = vmatprep.subr.bf16.mxu1 %v25964_v11 }
0x29db   :  { %21838 = vmatpush3.bf16.msra.mxu0 %v25977_v57  ;;  %v15773_v57 = vrot.slane %v15735_v54, %v22960_v19  ;;  %v15753_v42 = vcombine.high %v15749_v56, %v15749_v56 }
0x29dc   :  { %21845 = vmatprep.subr.bf16.mxu0 %v25964_v11 }
0x29dd   :  { %21844 = vmatpush3.bf16.msra.mxu1 %v25978_v58  ;;  %v15777_v58 = vrot.slane %v15749_v56, %v22960_v19  ;;  %v15798_v47 = vmul.f32 %v25487_v32, %v15773_v57 }
0x29de   :  { %20732 = vmatmul.mubr.msk.f32.vlgmr.msra.gmra.mrb[182].mxu0 %vm57_vm0, %v15796_v14  ;;  %21851 = vmatprep.subr.bf16.mxu1 %v25964_v11 }
0x29df   :  { %21847 = vmatpush3.bf16.msra.mxu0 %v25979_v36  ;;  %20753 = vmatprep.mubr.msk.f32.mxu0 %vm22355_vm1, %v25963_v10  ;;  %v15751_v36 = vcombine.high %v15735_v54, %v15735_v54 }
0x29e0   :  { %20743 = vmatmul.mubr.msk.f32.vlgmr.msra.gmra.mrb[182].mxu1 %vm57_vm0, %v15797_v35  ;;  %21848 = vmatprep.subr.bf16.mxu0 %v25964_v11 }
0x29e1   :  { %21853 = vmatpush3.bf16.msra.mxu1 %v25980_v41  ;;  %20764 = vmatprep.mubr.msk.f32.mxu1 %vm22355_vm1, %v25963_v10  ;;  %v15799_v41 = vmul.f32 %v25487_v32, %v15777_v58 }
0x29e2   :  { %21854 = vmatprep.subr.bf16.mxu1 %v25964_v11 }
0x29e3   :  { %21850 = vmatpush3.bf16.msra.mxu0 %v25981_v40  ;;  %v15781_v40 = vrot.slane %v15751_v36, %v22960_v19 }
0x29e4   :  { %21857 = vmatprep.subr.bf16.mxu0 %v25964_v11 }
0x29e5   :  { %21856 = vmatpush3.bf16.msra.mxu1 %v26034_v60  ;;  %v15785_v60 = vrot.slane %v15753_v42, %v22960_v19 }
0x29e6   :  { %20754 = vmatmul.mubr.msk.f32.vlgmr.msra.gmra.mrb[184].mxu0 %vm57_vm0, %v15798_v47  ;;  %21863 = vmatprep.subr.bf16.mxu1 %v25964_v11 }
0x29e7   :  { %21859 = vmatpush3.bf16.msra.mxu0 %v26035_v23  ;;  %20775 = vmatprep.mubr.msk.f32.mxu0 %vm22355_vm1, %v25963_v10  ;;  %v15800_v23 = vmul.f32 %v25487_v32, %v15781_v40  ;;  %v15801_v18 = vmul.f32 %v25487_v32, %v15785_v60 }
0x29e8   :  { %20765 = vmatmul.mubr.msk.f32.vlgmr.msra.gmra.mrb[184].mxu1 %vm57_vm0, %v15799_v41  ;;  %21860 = vmatprep.subr.bf16.mxu0 %v25964_v11 }
0x29e9   :  { %21865 = vmatpush3.bf16.msra.mxu1 %v26036_v61  ;;  %20786 = vmatprep.mubr.msk.f32.mxu1 %vm22355_vm1, %v25963_v10  ;;  %v26234_v61 = vld [vmem:[#allocation19_spill] sm:$0xff] }
0x29ea   :  { %21866 = vmatprep.subr.bf16.mxu1 %v25964_v11 }
0x29eb   :  { %21862 = vmatpush3.bf16.msra.mxu0 %v26037_v2  ;;  %v26235_v2 = vld [vmem:[#allocation24_spill] sm:$0xff] }
0x29ec   :  { %21869 = vmatprep.subr.bf16.mxu0 %v25964_v11  ;;  %vm15037_vm4 = vcmp.gt.f32.partialorder %v26235_v2, %v25473_v52 }
0x29ed   :  { %21868 = vmatpush3.bf16.msra.mxu1 %v26038_v50  ;;  %v18112_v50 = vsel %vm15037_vm4, 1.0, %v25963_v10 }
0x29ee   :  { %20776 = vmatmul.mubr.msk.f32.vlgmr.msra.gmra.mrb[186].mxu0 %vm57_vm0, %v15800_v23  ;;  %21875 = vmatprep.subr.bf16.mxu1 %v25964_v11  ;;  %v15040_v31 = vadd.f32 %v18112_v50, %v26236_v37 }
0x29ef   :  { %20797 = vmatprep.mubr.msk.f32.mxu0 %vm22355_vm1, %v25963_v10 }
0x29f0   :  { %20787 = vmatmul.mubr.msk.f32.vlgmr.msra.gmra.mrb[186].mxu1 %vm57_vm0, %v15801_v18 }
0x29f1   :  { %20808 = vmatprep.mubr.msk.f32.mxu1 %vm22355_vm1, %v25963_v10 }
0x29f4   :  { %21871 = vmatpush3.bf16.xpose.msra.mxu0 %v26039_v6  ;;  %v25565_v6 = vpop.xlane.xlu1 %15043 }
0x29f5   :  { %21872 = vmatprep.subr.bf16.mxu0 %v25964_v11  ;;  %vm15045_vm5 = vcmp.ge.f32.partialorder %v25565_v6, 20.0 }
0x29f6   :  { %21877 = vmatpush3.bf16.xpose.msra.mxu1 %v26040_v38  ;;  %v15041_v38 = vmax.f32 %v15040_v31, 0.0  ;;  %vm15046_vm14 = vmxor %vm15045_vm5, %vm26104_vm3 }
0x29f7   :  { %21878 = vmatprep.subr.bf16.mxu1 %v25964_v11  ;;  %vm15047_vm15 = vmand %vm15027_vm2, %vm15046_vm14 }
0x29f8   :  { %v15048_v27 = vsel %vm15047_vm15, 1.0, %v25963_v10 }
0x29fc   :  { %21874 = vmatpush3.bf16.xpose.msra.mxu0 %v26041_v48  ;;  %v15042_v48 = vmin.f32 %v15041_v38, 1.0 }
0x29fd   :  { %21881 = vmatprep.subr.bf16.mxu0 %v25964_v11 }
0x29fe   :  { %21880 = vmatpush3.bf16.xpose.msra.mxu1 %v26234_v61  ;;  %v25577_v3 = vsel %vm26238_vm6, %v15048_v27, %v15042_v48 }
0x29ff   :  { %21887 = vmatprep.subr.bf16.mxu1 %v25964_v11  ;;  %v16402_v63 = vrot.slane %v25577_v3, %v22955_v20  ;;  %v16395_v53 = vcombine.high %v25577_v3, %v25577_v3 }
0x2a01   :  { %v16410_v22 = vcombine.high %v16402_v63, %v16402_v63  ;;  %v16418_v24 = vrot.slane %v16402_v63, %v22955_v20  ;;  %v16409_v34 = vrot.slane %v16395_v53, %v22955_v20 }
0x2a03   :  { %v16432_v17 = vrot.slane %v16410_v22, %v22955_v20  ;;  %vm16452_vm4 = vcmp.ne.f32.partialorder %v16418_v24, 0.0  ;;  %v16440_v59 = vcombine.high %v16418_v24, %v16418_v24  ;;  %v16411_v9 = vcombine.high %v16409_v34, %v16409_v34 }
0x2a04   :  { %v16460_v29 = vsel %vm16452_vm4, 1, %v26239_v51  ;;  %v16425_v25 = vrot.slane %v16409_v34, %v22955_v20 }
0x2a05   :  { %vm16453_vm3 = vcmp.ne.f32.partialorder %v16432_v17, 0.0  ;;  %v16471_v28 = vrot.slane %v16460_v29, %v22960_v19  ;;  %v16442_v52 = vcombine.high %v16432_v17, %v16432_v17  ;;  %vm16454_vm2 = vcmp.ne.f32.partialorder %v16440_v59, 0.0 }
0x2a06   :  { %v16461_v62 = vsel %vm16453_vm3, 1, %v26239_v51  ;;  %v16462_v45 = vsel %vm16454_vm2, 1, %v26239_v51  ;;  %v16439_v4 = vrot.slane %v16411_v9, %v22955_v20  ;;  %vm16456_vm4 = vcmp.ne.f32.partialorder %v16425_v25, 0.0 }
0x2a07   :  { %v16475_v7 = vrot.slane %v16461_v62, %v22960_v19  ;;  %vm16500_vm14 = vcmp.eq.s32.totalorder %v16471_v28, 1  ;;  %vm16455_vm15 = vcmp.ne.f32.partialorder %v16442_v52, 0.0  ;;  %v16479_v13 = vrot.slane %v16462_v45, %v22960_v19 }
0x2a08   :  { %v16463_v5 = vsel %vm16455_vm15, 1, %v26239_v51  ;;  %vm16457_vm2 = vcmp.ne.f32.partialorder %v16439_v4, 0.0  ;;  %v16464_v14 = vsel %vm16456_vm4, 1, %v26239_v51  ;;  %v16441_v56 = vcombine.high %v16425_v25, %v16425_v25 }
0x2a09   :  { %vm16501_vm6 = vcmp.eq.s32.totalorder %v16475_v7, 1  ;;  %v16483_v8 = vrot.slane %v16463_v5, %v22960_v19  ;;  %vm16502_vm3 = vcmp.eq.s32.totalorder %v16479_v13, 1  ;;  %v16465_v20 = vsel %vm16457_vm2, 1, %v26239_v51 }
0x2a0a   :  { %v16487_v57 = vrot.slane %v16464_v14, %v22960_v19  ;;  %v16443_v58 = vcombine.high %v16439_v4, %v16439_v4  ;;  %v16491_v47 = vrot.slane %v16465_v20, %v22960_v19  ;;  %vm16458_vm15 = vcmp.ne.f32.partialorder %v16441_v56, 0.0 }
0x2a0b   :  { %v16466_v61 = vsel %vm16458_vm15, 1, %v26239_v51 }
0x2a0c   :  { %vm16505_vm4 = vcmp.eq.s32.totalorder %v16491_v47, 1  ;;  %v16495_v37 = vrot.slane %v16466_v61, %v22960_v19 }
0x2a0e   :  { %vm16506_vm2 = vcmp.eq.s32.totalorder %v16495_v37, 1 }
0x2aa9   :  { %v15871_v30 = vpop.f32.mrb[180].mxu0 }
0x2aaa   :  { %v16386_v15 = vmul.f32 0.5, %v15871_v30  ;;  %v20711_v26 = vpop.f32.mrb[181].mxu0 }
0x2aab   :  { %v15944_v43 = vpop.f32.mrb[180].mxu1 }
0x2aac   :  { %v16387_v49 = vmul.f32 0.5, %v15944_v43  ;;  %v20722_v1 = vpop.f32.mrb[181].mxu1  ;;  %v25590_v55 = vsel %vm16500_vm14, -1e+30, %v16386_v15  ;;  %vm16503_vm14 = vcmp.eq.s32.totalorder %v16483_v8, 1 }
0x2aad   :  { %16516 = vmax.xlane.f32.xlu0 %v25590_v55 }
0x2aae   :  { %v16509_v12 = vsel %vm16501_vm6, -1e+30, %v16387_v49  ;;  %vm16504_vm6 = vcmp.eq.s32.totalorder %v16487_v57, 1 }
0x2aaf   :  { %16518 = vmax.xlane.f32.xlu1 %v16509_v12 }
0x2ab1   :  { %v16017_v33 = vpop.f32.mrb[182].mxu0 }
0x2ab2   :  { %v16388_v46 = vmul.f32 0.5, %v16017_v33  ;;  %v20733_v21 = vpop.f32.mrb[183].mxu0 }
0x2ab3   :  { %v16090_v16 = vpop.f32.mrb[182].mxu1 }
0x2ab4   :  { %v16389_v44 = vmul.f32 0.5, %v16090_v16  ;;  %v20744_v0 = vpop.f32.mrb[183].mxu1  ;;  %v16510_v54 = vsel %vm16502_vm3, -1e+30, %v16388_v46  ;;  %vm16459_vm3 = vcmp.ne.f32.partialorder %v16443_v58, 0.0 }
0x2ab5   :  { %16520 = vmax.xlane.f32.xlu1 %v16510_v54  ;;  %v16467_v50 = vsel %vm16459_vm3, 1, %v26239_v51 }
0x2ab6   :  { %v16511_v35 = vsel %vm16503_vm14, -1e+30, %v16389_v44  ;;  %v16499_v38 = vrot.slane %v16467_v50, %v22960_v19 }
0x2ab7   :  { %16522 = vmax.xlane.f32.xlu0 %v16511_v35 }
0x2ab8   :  { %vm16507_vm14 = vcmp.eq.s32.totalorder %v16499_v38, 1  ;;  %v26245_v38 = vld [vmem:[#allocation39_spill] sm:$0xff] }
0x2ab9   :  { %v16163_v36 = vpop.f32.mrb[184].mxu0 }
0x2aba   :  { %v16390_v42 = vmul.f32 0.5, %v16163_v36  ;;  %v20755_v41 = vpop.f32.mrb[185].mxu0 }
0x2abb   :  { %v16236_v40 = vpop.f32.mrb[184].mxu1  ;;  %v26241_v41 = vld [vmem:[#allocation27_spill] sm:$0xff] }
0x2abc   :  { %v16391_v60 = vmul.f32 0.5, %v16236_v40  ;;  %v20766_v23 = vpop.f32.mrb[185].mxu1  ;;  %v16512_v18 = vsel %vm16504_vm6, -1e+30, %v16390_v42  ;;  %v26240_v42 = vld [vmem:[#allocation26_spill] sm:$0xff]  ;;  %v26242_v40 = vld [vmem:[#allocation28_spill] sm:$0xff] }
0x2abd   :  { %16524 = vmax.xlane.f32.xlu1 %v16512_v18  ;;  %v26243_v23 = vld [vmem:[#allocation29_spill] sm:$0xff] }
0x2abe   :  { %v16513_v2 = vsel %vm16505_vm4, -1e+30, %v16391_v60 }
0x2abf   :  { %16526 = vmax.xlane.f32.xlu0 %v16513_v2 }
0x2ac1   :  { %v16309_v31 = vpop.f32.mrb[186].mxu0 }
0x2ac2   :  { %v16392_v48 = vmul.f32 0.5, %v16309_v31  ;;  %v20777_v27 = vpop.f32.mrb[187].mxu0  ;;  %v26244_v31 = vld [vmem:[#allocation38_spill] sm:$0xff] }
0x2ac3   :  { %v16382_v39 = vpop.f32.mrb[186].mxu1 }
0x2ac4   :  { %v16393_v63 = vmul.f32 0.5, %v16382_v39  ;;  %v20788_v22 = vpop.f32.mrb[187].mxu1  ;;  %v16514_v24 = vsel %vm16506_vm2, -1e+30, %v16392_v48  ;;  %v26246_v48 = vld [vmem:[#allocation40_spill] sm:$0xff]  ;;  %v26247_v39 = vld [vmem:[#allocation41_spill] sm:$0xff] }
0x2ac5   :  { %16528 = vmax.xlane.f32.xlu1 %v16514_v24 }
0x2ac6   :  { %v16515_v17 = vsel %vm16507_vm14, -1e+30, %v16393_v63 }
0x2ac7   :  { %16530 = vmax.xlane.f32.xlu0 %v16515_v17 }
0x2b3a   :  { %v16517_v53 = vpop.xlane.xlu0 %16516 }
0x2b3b   :  { %v16532_v51 = vsub.f32 %v25590_v55, %v16517_v53 }
0x2b3c   :  { %v16519_v29 = vpop.xlane.xlu1 %16518 }
0x2b3d   :  { %v16540_v59 = vmul.f32 1.442695, %v16532_v51  ;;  %v16533_v62 = vsub.f32 %v16509_v12, %v16519_v29  ;;  %v26248_v51 = vld [vmem:[#allocation50_spill] sm:$0xff]  ;;  %v26249_v29 = vld [vmem:[#allocation51_spill] sm:$0xff] }
0x2b3f   :  { %22255 = vpow2.f32 %v16540_v59  ;;  %v16542_v28 = vmul.f32 1.442695, %v16533_v62  ;;  %v26250_v59 = vld [vmem:[#allocation52_spill] sm:$0xff] }
0x2b41   :  { %22257 = vpow2.f32 %v16542_v28  ;;  %v26251_v28 = vld [vmem:[#allocation53_spill] sm:$0xff] }
0x2b42   :  { %v16521_v19 = vpop.xlane.xlu1 %16520 }
0x2b43   :  { %v16534_v52 = vsub.f32 %v16510_v54, %v16521_v19 }
0x2b44   :  { %v16523_v34 = vpop.xlane.xlu0 %16522 }
0x2b45   :  { %v16544_v30 = vmul.f32 1.442695, %v16534_v52  ;;  %v16535_v7 = vsub.f32 %v16511_v35, %v16523_v34 }
0x2b47   :  { %22259 = vpow2.f32 %v16544_v30  ;;  %v16546_v15 = vmul.f32 1.442695, %v16535_v7  ;;  %v26252_v30 = vld [vmem:[#allocation20_spill] sm:$0xff]  ;;  %v26253_v7 = vld [vmem:[#allocation21_spill] sm:$0xff] }
0x2b49   :  { %v22256_v26 = vpop.eup %22255  ;;  %22261 = vpow2.f32 %v16546_v15  ;;  %v26254_v15 = vld [vmem:[#allocation22_spill] sm:$0xff] }
0x2b4a   :  { %v16525_v43 = vpop.xlane.xlu1 %16524  ;;  %16556 = vadd.xlane.f32.xlu1 %v22256_v26 }
0x2b4b   :  { %v22258_v9 = vpop.eup %22257  ;;  %v16536_v49 = vsub.f32 %v16512_v18, %v16525_v43 }
0x2b4c   :  { %v16527_v1 = vpop.xlane.xlu0 %16526  ;;  %16558 = vadd.xlane.f32.xlu0 %v22258_v9 }
0x2b4d   :  { %v16548_v55 = vmul.f32 1.442695, %v16536_v49  ;;  %v16537_v45 = vsub.f32 %v16513_v2, %v16527_v1 }
0x2b4f   :  { %22263 = vpow2.f32 %v16548_v55  ;;  %v16550_v25 = vmul.f32 1.442695, %v16537_v45 }
0x2b51   :  { %v22260_v12 = vpop.eup %22259  ;;  %22265 = vpow2.f32 %v16550_v25  ;;  %v26256_v25 = vld [vmem:[#allocation30_spill] sm:$0xff] }
0x2b52   :  { %16560 = vadd.xlane.f32.xlu1 %v22260_v12  ;;  %v16529_v5 = vpop.xlane.xlu1 %16528 }
0x2b53   :  { %v22262_v13 = vpop.eup %22261  ;;  %v16538_v4 = vsub.f32 %v16514_v24, %v16529_v5  ;;  %v26258_v5 = vld [vmem:[#allocation32_spill] sm:$0xff] }
0x2b54   :  { %16562 = vadd.xlane.f32.xlu0 %v22262_v13  ;;  %v16531_v33 = vpop.xlane.xlu0 %16530 }
0x2b55   :  { %v16552_v8 = vmul.f32 1.442695, %v16538_v4  ;;  %v16539_v46 = vsub.f32 %v16515_v17, %v16531_v33 }
0x2b57   :  { %22267 = vpow2.f32 %v16552_v8  ;;  %v16554_v21 = vmul.f32 1.442695, %v16539_v46 }
0x2b59   :  { %v22264_v16 = vpop.eup %22263  ;;  %22269 = vpow2.f32 %v16554_v21 }
0x2b5a   :  { %16564 = vadd.xlane.f32.xlu1 %v22264_v16 }
0x2b5b   :  { %v22266_v44 = vpop.eup %22265 }
0x2b5c   :  { %16566 = vadd.xlane.f32.xlu0 %v22266_v44 }
0x2b61   :  { %v25608_v0 = vpop.eup %22267 }
0x2b62   :  { %16568 = vadd.xlane.f32.xlu1 %v25608_v0 }
0x2b63   :  { %v25611_v54 = vpop.eup %22269 }
0x2b64   :  { %16570 = vadd.xlane.f32.xlu0 %v25611_v54 }
0x2bd7   :  { %v16557_v14 = vpop.xlane.xlu1 %16556 }
0x2bd8   :  { %22271 = vrcp.f32 %v16557_v14  ;;  %v26263_v14 = vld [vmem:[#allocation45_spill] sm:$0xff] }
0x2bd9   :  { %v16559_v56 = vpop.xlane.xlu0 %16558 }
0x2bda   :  { %22273 = vrcp.f32 %v16559_v56 }
0x2bdf   :  { %v16561_v20 = vpop.xlane.xlu1 %16560 }
0x2be0   :  { %22275 = vrcp.f32 %v16561_v20 }
0x2be1   :  { %v16563_v36 = vpop.xlane.xlu0 %16562 }
0x2be2   :  { %v22272_v35 = vpop.eup %22271  ;;  %22277 = vrcp.f32 %v16563_v36 }
0x2be3   :  { %v16573_v57 = vmul.f32 %v22272_v35, %v22256_v26  ;;  %v26255_v26 = vld [vmem:[#allocation23_spill] sm:$0xff] }
0x2be4   :  { %v22274_v58 = vpop.eup %22273 }
0x2be5   :  { %20798 = vmatmul.mubr.f32.vlgmr.msra.gmra.mrb[188].mxu0 %v16573_v57  ;;  %v16575_v47 = vmul.f32 %v22274_v58, %v22258_v9 }
0x2be6   :  { %21883 = vmatpush3.bf16.xpose.msra.mxu0 %v26240_v42  ;;  %20819 = vmatprep.mubr.msk.f32.mxu0 %vm22355_vm1, %v25963_v10  ;;  %v26265_v42 = vld [vmem:[#allocation55_spill] sm:$0xff] }
0x2be7   :  { %20809 = vmatmul.mubr.f32.vlgmr.msra.gmra.mrb[188].mxu1 %v16575_v47  ;;  %21884 = vmatprep.subr.bf16.mxu0 %v25964_v11  ;;  %v16565_v61 = vpop.xlane.xlu1 %16564  ;;  %v26264_v47 = vld [vmem:[#allocation54_spill] sm:$0xff] }
0x2be8   :  { %21889 = vmatpush3.bf16.xpose.msra.mxu1 %v26241_v41  ;;  %20830 = vmatprep.mubr.msk.f32.mxu1 %vm22355_vm1, %v25963_v10  ;;  %22279 = vrcp.f32 %v16565_v61  ;;  %v26266_v41 = vld [vmem:[#allocation56_spill] sm:$0xff] }
0x2be9   :  { %21890 = vmatprep.subr.bf16.mxu1 %v25964_v11  ;;  %v16567_v50 = vpop.xlane.xlu0 %16566 }
0x2bea   :  { %v22276_v60 = vpop.eup %22275  ;;  %22281 = vrcp.f32 %v16567_v50 }
0x2beb   :  { %v16577_v2 = vmul.f32 %v22276_v60, %v22260_v12  ;;  %v26257_v12 = vld [vmem:[#allocation31_spill] sm:$0xff] }
0x2bec   :  { %v22278_v18 = vpop.eup %22277 }
0x2bed   :  { %v16579_v37 = vmul.f32 %v22278_v18, %v22262_v13  ;;  %v26259_v13 = vld [vmem:[#allocation33_spill] sm:$0xff] }
0x2bee   :  { %21886 = vmatpush3.bf16.xpose.msra.mxu0 %v26242_v40  ;;  %v26267_v40 = vld [vmem:[#allocation58_spill] sm:$0xff] }
0x2bef   :  { %21893 = vmatprep.subr.bf16.mxu0 %v25964_v11  ;;  %v16569_v22 = vpop.xlane.xlu1 %16568 }
0x2bf0   :  { %21892 = vmatpush3.bf16.xpose.msra.mxu1 %v26243_v23  ;;  %22283 = vrcp.f32 %v16569_v22 }
0x2bf1   :  { %21899 = vmatprep.subr.bf16.mxu1 %v25964_v11  ;;  %v16571_v17 = vpop.xlane.xlu0 %16570 }
0x2bf2   :  { %v22280_v27 = vpop.eup %22279  ;;  %22285 = vrcp.f32 %v16571_v17 }
0x2bf3   :  { %v16581_v24 = vmul.f32 %v22280_v27, %v22264_v16 }
0x2bf4   :  { %v22282_v63 = vpop.eup %22281 }
0x2bf5   :  { %20820 = vmatmul.mubr.f32.vlgmr.msra.gmra.mrb[190].mxu0 %v16577_v2  ;;  %v16583_v53 = vmul.f32 %v22282_v63, %v22266_v44  ;;  %v26260_v44 = vld [vmem:[#allocation42_spill] sm:$0xff] }
0x2bf6   :  { %21895 = vmatpush3.bf16.xpose.msra.mxu0 %v26244_v31  ;;  %20841 = vmatprep.mubr.msk.f32.mxu0 %vm22355_vm1, %v25963_v10 }
0x2bf7   :  { %20831 = vmatmul.mubr.f32.vlgmr.msra.gmra.mrb[190].mxu1 %v16579_v37  ;;  %21896 = vmatprep.subr.bf16.mxu0 %v25964_v11 }
0x2bf8   :  { %21901 = vmatpush3.bf16.xpose.msra.mxu1 %v26245_v38  ;;  %20852 = vmatprep.mubr.msk.f32.mxu1 %vm22355_vm1, %v25963_v10 }
0x2bf9   :  { %21902 = vmatprep.subr.bf16.mxu1 %v25964_v11 }
0x2bfa   :  { %v22284_v62 = vpop.eup %22283 }
0x2bfb   :  { %v16585_v52 = vmul.f32 %v22284_v62, %v25608_v0  ;;  %v26261_v0 = vld [vmem:[#allocation43_spill] sm:$0xff] }
0x2bfc   :  { %v22286_v19 = vpop.eup %22285 }
0x2bfd   :  { %v16587_v34 = vmul.f32 %v22286_v19, %v25611_v54  ;;  %v26262_v54 = vld [vmem:[#allocation44_spill] sm:$0xff] }
0x2bfe   :  { %21898 = vmatpush3.bf16.xpose.msra.mxu0 %v26246_v48 }
0x2bff   :  { %21905 = vmatprep.subr.bf16.mxu0 %v25964_v11 }
0x2c00   :  { %21904 = vmatpush3.bf16.xpose.msra.mxu1 %v26247_v39 }
0x2c01   :  { %21911 = vmatprep.subr.bf16.mxu1 %v25964_v11 }
0x2c05   :  { %20842 = vmatmul.mubr.f32.vlgmr.msra.gmra.mrb[192].mxu0 %v16581_v24 }
0x2c06   :  { %21907 = vmatpush3.bf16.xpose.msra.mxu0 %v26248_v51  ;;  %20863 = vmatprep.mubr.msk.f32.mxu0 %vm22355_vm1, %v25963_v10 }
0x2c07   :  { %20853 = vmatmul.mubr.f32.vlgmr.msra.gmra.mrb[192].mxu1 %v16583_v53  ;;  %21908 = vmatprep.subr.bf16.mxu0 %v25964_v11 }
0x2c08   :  { %21913 = vmatpush3.bf16.xpose.msra.mxu1 %v26249_v29  ;;  %20874 = vmatprep.mubr.msk.f32.mxu1 %vm22355_vm1, %v25963_v10 }
0x2c09   :  { %21914 = vmatprep.subr.bf16.mxu1 %v25964_v11 }
0x2c0e   :  { %21910 = vmatpush3.bf16.xpose.msra.mxu0 %v26250_v59 }
0x2c0f   :  { %21917 = vmatprep.subr.bf16.mxu0 %v25964_v11 }
0x2c10   :  { %21916 = vmatpush3.bf16.xpose.msra.mxu1 %v26251_v28 }
0x2c11   :  { %21923 = vmatprep.subr.bf16.mxu1 %v25964_v11 }
0x2c15   :  { %20864 = vmatmul.mubr.f32.vlgmr.msra.gmra.mrb[194].mxu0 %v16585_v52 }
0x2c16   :  { %21919 = vmatpush3.bf16.msra.mxu0 %v26252_v30  ;;  %20885 = vmatprep.mubr.msk.f32.mxu0 %vm22355_vm1, %v25963_v10 }
0x2c17   :  { %20875 = vmatmul.mubr.f32.vlgmr.msra.gmra.mrb[194].mxu1 %v16587_v34  ;;  %21920 = vmatprep.subr.bf16.mxu0 %v25964_v11 }
0x2c18   :  { %21925 = vmatpush3.bf16.msra.mxu1 %v26253_v7  ;;  %20896 = vmatprep.mubr.msk.f32.mxu1 %vm22355_vm1, %v25963_v10 }
0x2c19   :  { %21926 = vmatprep.subr.bf16.mxu1 %v25964_v11 }
0x2c1a   :  { %21922 = vmatpush3.bf16.msra.mxu0 %v26254_v15 }
0x2c1b   :  { %21929 = vmatprep.subr.bf16.mxu0 %v25964_v11 }
0x2c1c   :  { %21928 = vmatpush3.bf16.msra.mxu1 %v26255_v26 }
0x2c1d   :  { %21935 = vmatprep.subr.bf16.mxu1 %v25964_v11 }
0x2cb8   :  { %v16654_v43 = vpop.f32.mrb[188].mxu0 }
0x2cb9   :  { %v17148_v9 = vmul.f32 %v25487_v32, %v16654_v43  ;;  %v20799_v49 = vpop.f32.mrb[189].mxu0 }
0x2cba   :  { %v16724_v1 = vpop.f32.mrb[188].mxu1 }
0x2cbb   :  { %v17149_v55 = vmul.f32 %v25487_v32, %v16724_v1  ;;  %v20810_v45 = vpop.f32.mrb[189].mxu1  ;;  %20886 = vmatmul.mubr.msk.f32.vlgmr.msra.gmra.mrb[196].mxu0 %vm57_vm0, %v17148_v9 }
0x2cbc   :  { %21931 = vmatpush3.bf16.msra.mxu0 %v26256_v25  ;;  %20907 = vmatprep.mubr.msk.f32.mxu0 %vm22355_vm1, %v25963_v10 }
0x2cbd   :  { %20897 = vmatmul.mubr.msk.f32.vlgmr.msra.gmra.mrb[196].mxu1 %vm57_vm0, %v17149_v55  ;;  %21932 = vmatprep.subr.bf16.mxu0 %v25964_v11 }
0x2cbe   :  { %21937 = vmatpush3.bf16.msra.mxu1 %v26257_v12  ;;  %20918 = vmatprep.mubr.msk.f32.mxu1 %vm22355_vm1, %v25963_v10 }
0x2cbf   :  { %21938 = vmatprep.subr.bf16.mxu1 %v25964_v11 }
0x2cc0   :  { %21934 = vmatpush3.bf16.msra.mxu0 %v26258_v5 }
0x2cc1   :  { %21941 = vmatprep.subr.bf16.mxu0 %v25964_v11 }
0x2cc2   :  { %21940 = vmatpush3.bf16.msra.mxu1 %v26259_v13 }
0x2cc3   :  { %21947 = vmatprep.subr.bf16.mxu1 %v25964_v11 }
0x2cc8   :  { %v16794_v4 = vpop.f32.mrb[190].mxu0 }
0x2cc9   :  { %v17150_v33 = vmul.f32 %v25487_v32, %v16794_v4  ;;  %v20821_v8 = vpop.f32.mrb[191].mxu0 }
0x2cca   :  { %v16864_v46 = vpop.f32.mrb[190].mxu1 }
0x2ccb   :  { %v17151_v21 = vmul.f32 %v25487_v32, %v16864_v46  ;;  %v20832_v16 = vpop.f32.mrb[191].mxu1  ;;  %20908 = vmatmul.mubr.msk.f32.vlgmr.msra.gmra.mrb[198].mxu0 %vm57_vm0, %v17150_v33 }
0x2ccc   :  { %21943 = vmatpush3.bf16.msra.mxu0 %v26260_v44  ;;  %20929 = vmatprep.mubr.msk.f32.mxu0 %vm22355_vm1, %v25963_v10 }
0x2ccd   :  { %20919 = vmatmul.mubr.msk.f32.vlgmr.msra.gmra.mrb[198].mxu1 %vm57_vm0, %v17151_v21  ;;  %21944 = vmatprep.subr.bf16.mxu0 %v25964_v11 }
0x2cce   :  { %21949 = vmatpush3.bf16.msra.mxu1 %v26261_v0  ;;  %20940 = vmatprep.mubr.msk.f32.mxu1 %vm22355_vm1, %v25963_v10 }
0x2ccf   :  { %21950 = vmatprep.subr.bf16.mxu1 %v25964_v11 }
0x2cd0   :  { %21946 = vmatpush3.bf16.msra.mxu0 %v26262_v54 }
0x2cd1   :  { %21953 = vmatprep.subr.bf16.mxu0 %v25964_v11 }
0x2cd2   :  { %21952 = vmatpush3.bf16.msra.mxu1 %v26263_v14 }
0x2cd3   :  { %21959 = vmatprep.subr.bf16.mxu1 %v25964_v11 }
0x2cd8   :  { %v16934_v56 = vpop.f32.mrb[192].mxu0 }
0x2cd9   :  { %v17152_v35 = vmul.f32 %v25487_v32, %v16934_v56  ;;  %v20843_v20 = vpop.f32.mrb[193].mxu0 }
0x2cda   :  { %v17004_v57 = vpop.f32.mrb[192].mxu1 }
0x2cdb   :  { %v17153_v58 = vmul.f32 %v25487_v32, %v17004_v57  ;;  %v20854_v36 = vpop.f32.mrb[193].mxu1  ;;  %20930 = vmatmul.mubr.msk.f32.vlgmr.msra.gmra.mrb[200].mxu0 %vm57_vm0, %v17152_v35 }
0x2cdc   :  { %21955 = vmatpush3.bf16.msra.mxu0 %v26264_v47  ;;  %20951 = vmatprep.mubr.msk.f32.mxu0 %vm22355_vm1, %v25963_v10 }
0x2cdd   :  { %20941 = vmatmul.mubr.msk.f32.vlgmr.msra.gmra.mrb[200].mxu1 %vm57_vm0, %v17153_v58  ;;  %21956 = vmatprep.subr.bf16.mxu0 %v25964_v11 }
0x2cde   :  { %21961 = vmatpush3.bf16.msra.mxu1 %v26265_v42  ;;  %20962 = vmatprep.mubr.msk.f32.mxu1 %vm22355_vm1, %v25963_v10 }
0x2cdf   :  { %21962 = vmatprep.subr.bf16.mxu1 %v25964_v11 }
0x2ce0   :  { %21958 = vmatpush3.bf16.msra.mxu0 %v26266_v41 }
0x2ce2   :  { %21964 = vmatpush3.bf16.msra.mxu1 %v26267_v40 }
0x2ce8   :  { %v17074_v60 = vpop.f32.mrb[194].mxu0 }
0x2ce9   :  { %v17154_v23 = vmul.f32 %v25487_v32, %v17074_v60  ;;  %v20865_v18 = vpop.f32.mrb[195].mxu0 }
0x2cea   :  { %v17144_v61 = vpop.f32.mrb[194].mxu1 }
0x2ceb   :  { %v17155_v2 = vmul.f32 %v25487_v32, %v17144_v61  ;;  %v20876_v50 = vpop.f32.mrb[195].mxu1  ;;  %20952 = vmatmul.mubr.msk.f32.vlgmr.msra.gmra.mrb[202].mxu0 %vm57_vm0, %v17154_v23 }
0x2ced   :  { %20963 = vmatmul.mubr.msk.f32.vlgmr.msra.gmra.mrb[202].mxu1 %vm57_vm0, %v17155_v2  ;;  %vm17796_vm0 = vcmp.ne.f32.partialorder %v25577_v3, 0.0 }
0x2d8e   :  { %v17225_v37 = vpop.f32.mrb[196].mxu0 }
0x2d8f   :  { %v17740_v31 = vrot.slane %v17225_v37, 4  ;;  %v20887_v38 = vpop.f32.mrb[197].mxu0 }
0x2d90   :  { %v17298_v11 = vpop.f32.mrb[196].mxu1 }
0x2d91   :  { %v17741_v48 = vadd.f32 %v17740_v31, %v17225_v37  ;;  %v17746_v27 = vrot.slane %v17298_v11, 4  ;;  %v20898_v39 = vpop.f32.mrb[197].mxu1 }
0x2d93   :  { %v17742_v63 = vrot.slane %v17741_v48, 2  ;;  %v17747_v22 = vadd.f32 %v17746_v27, %v17298_v11 }
0x2d95   :  { %v17743_v24 = vadd.f32 %v17742_v63, %v17741_v48  ;;  %v17748_v17 = vrot.slane %v17747_v22, 2 }
0x2d97   :  { %v17744_v53 = vrot.slane %v17743_v24, 1  ;;  %v17749_v51 = vadd.f32 %v17748_v17, %v17747_v22 }
0x2d99   :  { %v17745_v29 = vadd.f32 %v17744_v53, %v17743_v24  ;;  %v17750_v32 = vrot.slane %v17749_v51, 1 }
0x2d9b   :  { %v17788_v59 = vmul.f32 0.17677669, %v17745_v29  ;;  %v17751_v62 = vadd.f32 %v17750_v32, %v17749_v51 }
0x2d9d   :  { %22287 = vtanh.f32 %v17788_v59  ;;  %v17789_v28 = vmul.f32 0.17677669, %v17751_v62 }
0x2d9e   :  { %v17371_v19 = vpop.f32.mrb[198].mxu0 }
0x2d9f   :  { %22289 = vtanh.f32 %v17789_v28  ;;  %v17752_v52 = vrot.slane %v17371_v19, 4  ;;  %v20909_v34 = vpop.f32.mrb[199].mxu0 }
0x2da0   :  { %v17444_v30 = vpop.f32.mrb[198].mxu1 }
0x2da1   :  { %v17753_v7 = vadd.f32 %v17752_v52, %v17371_v19  ;;  %v17758_v15 = vrot.slane %v17444_v30, 4  ;;  %v20920_v26 = vpop.f32.mrb[199].mxu1 }
0x2da3   :  { %v17754_v43 = vrot.slane %v17753_v7, 2  ;;  %v17759_v9 = vadd.f32 %v17758_v15, %v17444_v30 }
0x2da5   :  { %v17755_v49 = vadd.f32 %v17754_v43, %v17753_v7  ;;  %v17760_v1 = vrot.slane %v17759_v9, 2 }
0x2da7   :  { %v22288_v55 = vpop.eup %22287  ;;  %v17756_v45 = vrot.slane %v17755_v49, 1  ;;  %v17761_v25 = vadd.f32 %v17760_v1, %v17759_v9 }
0x2da8   :  { %v17805_v4 = vmul.f32 10.0, %v22288_v55 }
0x2da9   :  { %v22290_v12 = vpop.eup %22289  ;;  %v17757_v5 = vadd.f32 %v17756_v45, %v17755_v49  ;;  %v17762_v13 = vrot.slane %v17761_v25, 1 }
0x2daa   :  { %v17806_v33 = vmul.f32 10.0, %v22290_v12 }
0x2dab   :  { %v17790_v8 = vmul.f32 0.17677669, %v17757_v5  ;;  %v17763_v46 = vadd.f32 %v17762_v13, %v17761_v25 }
0x2dac   :  { %v17821_v21 = vsel %vm3639_vm7, %v17806_v33, %v17805_v4 }
0x2dad   :  { %22291 = vtanh.f32 %v17790_v8  ;;  %v17791_v16 = vmul.f32 0.17677669, %v17763_v46 }
0x2dae   :  { %v17517_v44 = vpop.f32.mrb[200].mxu0 }
0x2daf   :  { %22293 = vtanh.f32 %v17791_v16  ;;  %v17764_v0 = vrot.slane %v17517_v44, 4  ;;  %v20931_v54 = vpop.f32.mrb[201].mxu0 }
0x2db0   :  { %v17590_v14 = vpop.f32.mrb[200].mxu1 }
0x2db1   :  { %v17765_v56 = vadd.f32 %v17764_v0, %v17517_v44  ;;  %v17770_v35 = vrot.slane %v17590_v14, 4  ;;  %v20942_v20 = vpop.f32.mrb[201].mxu1  ;;  %v26268_v0 = vld [vmem:[#allocation62_spill] sm:$0xff] }
0x2db3   :  { %v17766_v57 = vrot.slane %v17765_v56, 2  ;;  %v17771_v58 = vadd.f32 %v17770_v35, %v17590_v14  ;;  %v26269_v14 = vld [vmem:[#allocation61_spill] sm:$0xff] }
0x2db5   :  { %v17767_v36 = vadd.f32 %v17766_v57, %v17765_v56  ;;  %v17772_v47 = vrot.slane %v17771_v58, 2 }
0x2db7   :  { %v22292_v42 = vpop.eup %22291  ;;  %v17768_v41 = vrot.slane %v17767_v36, 1  ;;  %v17773_v40 = vadd.f32 %v17772_v47, %v17771_v58  ;;  %v26271_v58 = vld [vmem:[#allocation59_spill] sm:$0xff] }
0x2db8   :  { %v17807_v60 = vmul.f32 10.0, %v22292_v42 }
0x2db9   :  { %v22294_v23 = vpop.eup %22293  ;;  %v17769_v18 = vadd.f32 %v17768_v41, %v17767_v36  ;;  %v17774_v61 = vrot.slane %v17773_v40, 1 }
0x2dba   :  { %v17808_v2 = vmul.f32 10.0, %v22294_v23  ;;  %v17822_v50 = vsel %vm3641_vm8, %v17807_v60, %v17821_v21  ;;  %vm26270_vm8 = vcmask 7168  }
0x2dbb   :  { %v17792_v37 = vmul.f32 0.17677669, %v17769_v18  ;;  %v17775_v31 = vadd.f32 %v17774_v61, %v17773_v40 }
0x2dbc   :  { %v17823_v38 = vsel %vm3643_vm9, %v17808_v2, %v17822_v50  ;;  %vm26272_vm9 = vmmov %vm26270_vm8 }
0x2dbd   :  { %22295 = vtanh.f32 %v17792_v37  ;;  %v17793_v11 = vmul.f32 0.17677669, %v17775_v31 }
0x2dbe   :  { %v17663_v48 = vpop.f32.mrb[202].mxu0 }
0x2dbf   :  { %22297 = vtanh.f32 %v17793_v11  ;;  %v17776_v27 = vrot.slane %v17663_v48, 4  ;;  %v20953_v39 = vpop.f32.mrb[203].mxu0 }
0x2dc0   :  { %v17736_v63 = vpop.f32.mrb[202].mxu1 }
0x2dc1   :  { %v17777_v22 = vadd.f32 %v17776_v27, %v17663_v48  ;;  %v17782_v24 = vrot.slane %v17736_v63, 4  ;;  %v20964_v17 = vpop.f32.mrb[203].mxu1 }
0x2dc3   :  { %v17778_v53 = vrot.slane %v17777_v22, 2  ;;  %v17783_v51 = vadd.f32 %v17782_v24, %v17736_v63 }
0x2dc5   :  { %v17779_v29 = vadd.f32 %v17778_v53, %v17777_v22  ;;  %v17784_v32 = vrot.slane %v17783_v51, 2 }
0x2dc7   :  { %v22296_v59 = vpop.eup %22295  ;;  %v17780_v62 = vrot.slane %v17779_v29, 1  ;;  %v17785_v28 = vadd.f32 %v17784_v32, %v17783_v51 }
0x2dc8   :  { %v17809_v19 = vmul.f32 10.0, %v22296_v59 }
0x2dc9   :  { %v22298_v52 = vpop.eup %22297  ;;  %v17781_v34 = vadd.f32 %v17780_v62, %v17779_v29  ;;  %v17786_v30 = vrot.slane %v17785_v28, 1 }
0x2dca   :  { %v17810_v7 = vmul.f32 10.0, %v22298_v52  ;;  %v17824_v15 = vsel %vm3645_vm10, %v17809_v19, %v17823_v38 }
0x2dcb   :  { %v17794_v26 = vmul.f32 0.17677669, %v17781_v34  ;;  %v17787_v43 = vadd.f32 %v17786_v30, %v17785_v28 }
0x2dcc   :  { %v17825_v9 = vsel %vm3647_vm11, %v17810_v7, %v17824_v15 }
0x2dcd   :  { %22299 = vtanh.f32 %v17794_v26  ;;  %v17795_v49 = vmul.f32 0.17677669, %v17787_v43 }
0x2dcf   :  { %22301 = vtanh.f32 %v17795_v49 }
0x2dd7   :  { %v22300_v1 = vpop.eup %22299 }
0x2dd8   :  { %v17811_v55 = vmul.f32 10.0, %v22300_v1 }
0x2dd9   :  { %v22302_v45 = vpop.eup %22301 }
0x2dda   :  { %v17812_v25 = vmul.f32 10.0, %v22302_v45  ;;  %v17826_v12 = vsel %vm3649_vm12, %v17811_v55, %v17825_v9 }
0x2ddc   :  { %v17827_v5 = vsel %vm3651_vm13, %v17812_v25, %v17826_v12 }
0x2ddd   :  { %v17829_v13 = vsel %vm17796_vm0, -1e+30, %v17827_v5 }
0x2dde   :  { %17830 = vmax.xlane.f32.xlu1 %v17829_v13 }
0x2e6b   :  { %v17831_v4 = vpop.xlane.xlu1 %17830 }
0x2e6c   :  { %v17832_v33 = vsub.f32 %v17829_v13, %v17831_v4 }
0x2e6e   :  { %v17833_v8 = vmul.f32 1.442695, %v17832_v33 }
0x2e70   :  { %22303 = vpow2.f32 %v17833_v8 }
0x2e7a   :  { %v22304_v46 = vpop.eup %22303 }
0x2e7b   :  { %17835 = vadd.xlane.f32.xlu0 %v22304_v46 }
0x2f08   :  { %v17836_v21 = vpop.xlane.xlu0 %17835 }
0x2f09   :  { %22305 = vrcp.f32 %v17836_v21 }
0x2f0a   :  { %22307 = vlog2.f32 %v26268_v0 }
0x2f13   :  { %v22306_v16 = vpop.eup %22305 }
0x2f14   :  { %v17838_v44 = vmul.f32 %v22306_v16, %v22304_v46  ;;  %v22308_v54 = vpop.eup %22307 }
0x2f15   :  { %v3680_v35 = vmul.f32 0.6931472, %v22308_v54 }
0x2f16   :  { %17841 = vmax.xlane.f32.xlu1 %v17838_v44  ;;  %17840 = vst [vmem:[#allocation5 + $0x28] sm:$0xff] %v17838_v44 }
0x2f1a   :  { %3676 = vadd.xlane.f32.xlu1 %v25963_v10 }
0x2fa3   :  { %v17842_v3 = vpop.xlane.xlu1 %17841 }
0x2fa4   :  { %vm17843_vm1 = vcmp.ge.f32.partialorder %v17838_v44, %v17842_v3  ;;  %22309 = vlog2.f32 %v17842_v3 }
0x2fa5   :  { %v17844_v56 = vsel %vm17843_vm1, %v26269_v14, 128.0 }
0x2fa6   :  { %17845 = vmin.xlane.f32.xlu0 %v17844_v56 }
0x2fa7   :  { %v3677_v20 = vpop.xlane.xlu1 %3676 }
0x2fa8   :  { %vm3678_vm7 = vcmp.ge.f32.partialorder %v3677_v20, 20.0 }
0x2fa9   :  { %v3681_v57 = vsel %vm3678_vm7, 0.0, %v3680_v35 }
0x2faa   :  { %3684 = vst.msk [vmem:[%s25769_s12] sm:$0xff] %vm26270_vm8, %v3681_v57  ;;  %6512 = vadd.xlane.f32.xlu0 %v26271_v58 }
0x2fae   :  { %v22310_v10 = vpop.eup %22309 }
0x2faf   :  { %v17849_v36 = vmul.f32 0.6931472, %v22310_v10 }
0x2fb1   :  { %v17850_v47 = vsel %vm15045_vm5, 0.0, %v17849_v36 }
0x2fb2   :  { %18132 = vst.msk [vmem:[%s25769_s12 + $0x28] sm:$0xff] %vm26272_vm9, %v17850_v47 }
0x2fb3   :  { %22340 = shalt.err (!%p22337_p4)
}
0x2fb4   :  { %s22341_s26 = scalar_lea.hbm %s25767_s10, 768 }
0x2fb5   :  { %p22342_p5 = scmp.ne.s32.totalorder %s25767_s10, %s22341_s26  ;;  %p22345_p6 = scmp.lt.u32.totalorder %s22341_s26, %s25767_s10 }
0x2fb7   :  { %p22347_p7 = pnand %p22345_p6, %p22342_p5 }
0x2fb9   :  { %22350 = shalt.err (!%p22347_p7)
}
0x2fba   :  { %s22361_s13 = smov 128   ;;  %s22362_s14 = smov 8   ;;  %v26273_v6 = vld [vmem:[#allocation57_spill] sm:$0xff]  ;;  %vm26274_vm10 = vmmov %vm26270_vm8 }
0x2fbb   :  { %17866 = dma.vmem_to_hbm [thread:$0]  %s17861_s23, 768, %s25767_s10, [#allocation6], %s22361_s13, %s22361_s13, %s22362_s14   ;;  %22311 = vlog2.f32 %v26273_v6  ;;  %vm26275_vm12 = vmmov %vm26270_vm8 }
0x2fc5   :  { %v22312_v41 = vpop.eup %22311 }
0x2fc6   :  { %v6516_v23 = vmul.f32 0.6931472, %v22312_v41 }
0x3033   :  { %v17846_v42 = vpop.xlane.xlu0 %17845 }
0x3034   :  { %v21975_v40 = vtrunc.f32 %v17846_v42 }
0x3036   :  { %v21976_v60 = vcvt.f32.s32 %v21975_v40 }
0x3037   :  { %v6513_v18 = vpop.xlane.xlu0 %6512 }
0x3038   :  { %18131 = vst.msk [vmem:[%s25768_s11 + $0x28] sm:$0xff] %vm26274_vm10, %v21976_v60  ;;  %vm6514_vm11 = vcmp.ge.f32.partialorder %v6513_v18, 20.0 }
0x3039   :  { %v6517_v61 = vsel %vm6514_vm11, 0.0, %v6516_v23 }
0x303a   :  { %18045 = vst.msk [vmem:[%s25769_s12 + $0x8] sm:$0xff] %vm26275_vm12, %v6517_v61 }
0x303b   :  { %22351 = dma.done.wait [#allocation6], 768  }
0x303c   :  { %22352 = vsyncadd [#allocation6], 4294966528 }
0x303d   :  { %17878 = vsyncpa [#allocation6], 1 }

</bundles_post_ra>
